<compile_context>
chip_gen: v5e
topology: v5e:2x2
jax: 0.10.0
libtpu: 0.0.40
codegen_flags: <defaults>
</compile_context>

<pallas_src>
import functools
import math

import jax
import jax.numpy as jnp
from jax.experimental import pallas as pl
from jax.experimental.pallas import tpu as pltpu

NS = 0.2                       # leaky_relu negative slope (module default ns=0.2)
EPS = 1e-5                     # InstanceNorm1d eps
MXU_DTYPE = jnp.bfloat16       # MXU operand dtype (accumulation is always f32)
ACT_DTYPE = jnp.bfloat16       # inter-kernel activation dtype (halves HBM traffic)
VMEM_LIMIT = 64 * 1024 * 1024  # explicit scoped-VMEM budget (>= default on v5e/v6e/v7x)


def _leaky(x, ns):
    return jnp.where(x >= 0.0, x, ns * x)


def _cparams(sem):
    return pltpu.CompilerParams(dimension_semantics=sem, vmem_limit_bytes=VMEM_LIMIT)


def _pick_divisor(n, target, multiple):
    """Largest divisor of n that is a multiple of `multiple` and <= target (fallback n)."""
    best = None
    d = multiple
    lim = min(n, target)
    while d <= lim:
        if n % d == 0:
            best = d
        d += multiple
    return best if best is not None else n


# --------------------------------------------------------------------------- kernels
def _conv_leaky_kernel(xp_ref, w_ref, eb_ref, o_ref, *, ns):
    # One batch element.  xp_ref: (L+2, Cx) reflect-padded NWC input (bf16)
    # w_ref: (3, Cx, Cout) per-tap weights (bf16); eb_ref: (1, Cout) bias + emb term
    L = o_ref.shape[0]
    acc = jnp.dot(xp_ref[0:L, :], w_ref[0], preferred_element_type=jnp.float32)
    acc = acc + jnp.dot(xp_ref[1:L + 1, :], w_ref[1], preferred_element_type=jnp.float32)
    acc = acc + jnp.dot(xp_ref[2:L + 2, :], w_ref[2], preferred_element_type=jnp.float32)
    o_ref[...] = _leaky(acc + eb_ref[...], ns).astype(o_ref.dtype)


def _conv_norm_res_kernel(xp_ref, w_ref, eb_ref, res_ref, o_ref, *, ns, eps):
    # conv(k=3) + leaky_relu + InstanceNorm1d + residual, fused.  One batch element.
    L = o_ref.shape[0]
    acc = jnp.dot(xp_ref[0:L, :], w_ref[0], preferred_element_type=jnp.float32)
    acc = acc + jnp.dot(xp_ref[1:L + 1, :], w_ref[1], preferred_element_type=jnp.float32)
    acc = acc + jnp.dot(xp_ref[2:L + 2, :], w_ref[2], preferred_element_type=jnp.float32)
    y = _leaky(acc + eb_ref[...], ns)
    mean = jnp.mean(y, axis=0, keepdims=True)                  # stats over time (sublanes)
    var = jnp.mean((y - mean) ** 2, axis=0, keepdims=True)
    y = (y - mean) * jax.lax.rsqrt(var + eps)
    o_ref[...] = (y + res_ref[...].astype(jnp.float32)).astype(o_ref.dtype)


def _dense_block_kernel(x_ref, w1_ref, eb1_ref, w2_ref, eb2_ref, o_ref, *, ns, eps):
    # Two Linear layers (+leaky) + InstanceNorm1d + residual.  One batch element.
    x = x_ref[...]
    h = jnp.dot(x, w1_ref[...], preferred_element_type=jnp.float32)
    h = _leaky(h + eb1_ref[...], ns)
    h2 = jnp.dot(h.astype(MXU_DTYPE), w2_ref[...], preferred_element_type=jnp.float32)
    y = _leaky(h2 + eb2_ref[...], ns)
    mean = jnp.mean(y, axis=0, keepdims=True)
    var = jnp.mean((y - mean) ** 2, axis=0, keepdims=True)
    y = (y - mean) * jax.lax.rsqrt(var + eps)
    o_ref[...] = (y + x.astype(jnp.float32)).astype(o_ref.dtype)


def _gru_proj_kernel(xs_ref, wf_ref, wb_ref, pf_ref, pb_ref):
    # GRU input projections for both directions (x part only), row-tiled, parallel.
    x = xs_ref[...]
    pf_ref[...] = jnp.dot(x, wf_ref[...], preferred_element_type=jnp.float32).astype(pf_ref.dtype)
    pb_ref[...] = jnp.dot(x, wb_ref[...], preferred_element_type=jnp.float32).astype(pb_ref.dtype)


def _gru_rec_kernel(pf_ref, pb_ref, ebif_ref, ebib_ref, whh_ref, bhf_ref, bhb_ref,
                    hf_out_ref, hb_out_ref, hstate_ref, *, batch, group):
    # Bidirectional GRU recurrence over one time chunk.  State carried across chunks
    # in VMEM scratch; fwd chunks arrive in order, bwd chunks arrive reversed via the
    # BlockSpec index maps.  Rows are time-major (t, b).
    B = batch
    rc, H = hf_out_ref.shape
    tch = rc // B
    gb_rows = group * B                          # aligned store granularity (mult of 16)
    n_groups = tch // group
    H3 = 3 * H

    @pl.when(pl.program_id(0) == 0)
    def _():
        hstate_ref[...] = jnp.zeros_like(hstate_ref)

    ebif = ebif_ref[...]
    ebib = ebib_ref[...]
    whh = whh_ref[...]
    bhf = bhf_ref[...]
    bhb = bhb_ref[...]

    def group_step(gidx, carry):
        hf, hb = carry                                           # (B, H) f32 each
        base_f = pl.multiple_of(gidx * gb_rows, gb_rows)
        base_b = pl.multiple_of((n_groups - 1 - gidx) * gb_rows, gb_rows)
        # one aligned load per group per direction
        xf_grp = pf_ref[pl.ds(base_f, gb_rows), :].astype(jnp.float32)
        xb_grp = pb_ref[pl.ds(base_b, gb_rows), :].astype(jnp.float32)
        outs_f = []
        outs_b = []
        for u in range(group):
            xf = xf_grp[u * B:(u + 1) * B, :] + ebif
            xb = xb_grp[(group - 1 - u) * B:(group - u) * B, :] + ebib
            # single recurrent matmul for both directions
            hcat = jnp.concatenate([hf, hb], axis=0).astype(MXU_DTYPE)       # (2B, H)
            gates = jnp.dot(hcat, whh, preferred_element_type=jnp.float32)   # (2B, 6H)
            gf = gates[0:B, 0:H3] + bhf
            gbk = gates[B:2 * B, H3:2 * H3] + bhb
            rf = jax.nn.sigmoid(xf[:, 0:H] + gf[:, 0:H])
            zf = jax.nn.sigmoid(xf[:, H:2 * H] + gf[:, H:2 * H])
            nf = jnp.tanh(xf[:, 2 * H:H3] + rf * gf[:, 2 * H:H3])
            hf = (1.0 - zf) * nf + zf * hf
            rb = jax.nn.sigmoid(xb[:, 0:H] + gbk[:, 0:H])
            zb = jax.nn.sigmoid(xb[:, H:2 * H] + gbk[:, H:2 * H])
            nb = jnp.tanh(xb[:, 2 * H:H3] + rb * gbk[:, 2 * H:H3])
            hb = (1.0 - zb) * nb + zb * hb
            outs_f.append(hf)
            outs_b.append(hb)
        # aligned grouped stores (16 rows) instead of per-step masked partial stores
        hf_out_ref[pl.ds(base_f, gb_rows), :] = (
            jnp.concatenate(outs_f, axis=0).astype(hf_out_ref.dtype))
        hb_out_ref[pl.ds(base_b, gb_rows), :] = (
            jnp.concatenate(outs_b[::-1], axis=0).astype(hb_out_ref.dtype))
        return (hf, hb)

    hf0 = hstate_ref[0:B, :]
    hb0 = hstate_ref[B:2 * B, :]
    hf_fin, hb_fin = jax.lax.fori_loop(0, n_groups, group_step, (hf0, hb0))
    hstate_ref[0:B, :] = hf_fin
    hstate_ref[B:2 * B, :] = hb_fin


def _head_kernel(xs_ref, hf_ref, hb_ref, w5x_ref, w5f_ref, w5b_ref,
                 eb5_ref, wl_ref, bl_ref, o_ref, *, ns):
    # dense5 (as 3 accumulating dots, no concat) + leaky + final linear + exp.
    y5 = jnp.dot(xs_ref[...], w5x_ref[...], preferred_element_type=jnp.float32)
    y5 = y5 + jnp.dot(hf_ref[...], w5f_ref[...], preferred_element_type=jnp.float32)
    y5 = y5 + jnp.dot(hb_ref[...], w5b_ref[...], preferred_element_type=jnp.float32)
    y5 = _leaky(y5 + eb5_ref[...], ns)
    z = jnp.dot(y5.astype(MXU_DTYPE), wl_ref[...],
                preferred_element_type=jnp.float32) + bl_ref[...]
    o_ref[...] = jnp.exp(z)


# --------------------------------------------------------------------------- wrappers
def _call_conv_leaky(xp, w, eb):
    B, Lp, cx = xp.shape
    L = Lp - 2
    cout = w.shape[2]
    eb3 = eb[:, None, :]                                         # (B, 1, Cout)
    return pl.pallas_call(
        functools.partial(_conv_leaky_kernel, ns=NS),
        grid=(B,),
        in_specs=[
            pl.BlockSpec((None, Lp, cx), lambda b: (b, 0, 0)),
            pl.BlockSpec((3, cx, cout), lambda b: (0, 0, 0)),
            pl.BlockSpec((None, 1, cout), lambda b: (b, 0, 0)),
        ],
        out_specs=pl.BlockSpec((None, L, cout), lambda b: (b, 0, 0)),
        out_shape=jax.ShapeDtypeStruct((B, L, cout), ACT_DTYPE),
        compiler_params=_cparams(("parallel",)),
    )(xp, w, eb3)


def _call_conv_norm_res(xp, w, eb, res):
    B, Lp, cx = xp.shape
    L = Lp - 2
    cout = w.shape[2]
    eb3 = eb[:, None, :]
    return pl.pallas_call(
        functools.partial(_conv_norm_res_kernel, ns=NS, eps=EPS),
        grid=(B,),
        in_specs=[
            pl.BlockSpec((None, Lp, cx), lambda b: (b, 0, 0)),
            pl.BlockSpec((3, cx, cout), lambda b: (0, 0, 0)),
            pl.BlockSpec((None, 1, cout), lambda b: (b, 0, 0)),
            pl.BlockSpec((None, L, cout), lambda b: (b, 0, 0)),
        ],
        out_specs=pl.BlockSpec((None, L, cout), lambda b: (b, 0, 0)),
        out_shape=jax.ShapeDtypeStruct((B, L, cout), ACT_DTYPE),
        compiler_params=_cparams(("parallel",)),
    )(xp, w, eb3, res)


def _call_dense_block(x, w1, eb1, w2, eb2):
    B, L, C = x.shape
    C1 = w1.shape[1]
    C2 = w2.shape[1]
    return pl.pallas_call(
        functools.partial(_dense_block_kernel, ns=NS, eps=EPS),
        grid=(B,),
        in_specs=[
            pl.BlockSpec((None, L, C), lambda b: (b, 0, 0)),
            pl.BlockSpec((C, C1), lambda b: (0, 0)),
            pl.BlockSpec((None, 1, C1), lambda b: (b, 0, 0)),
            pl.BlockSpec((C1, C2), lambda b: (0, 0)),
            pl.BlockSpec((None, 1, C2), lambda b: (b, 0, 0)),
        ],
        out_specs=pl.BlockSpec((None, L, C2), lambda b: (b, 0, 0)),
        out_shape=jax.ShapeDtypeStruct((B, L, C2), ACT_DTYPE),
        compiler_params=_cparams(("parallel",)),
    )(x, w1, eb1[:, None, :], w2, eb2[:, None, :])


# --------------------------------------------------------------------------- forward glue
def conv_block(x, pa, pb, emb):
    # x: (B, L, C) NWC bf16.  pa/pb: prepared params of the two convs of the block.
    B, L, _ = x.shape
    ch = pa["w"].shape[2] // 2
    eb_a = emb @ pa["we"] + pa["b"]                              # (B, 2ch) f32
    xp = jnp.pad(x, ((0, 0), (1, 1), (0, 0)), mode="reflect")
    ya = _call_conv_leaky(xp, pa["w"], eb_a)                     # (B, L, 2ch) bf16
    ys = ya.reshape(B, 2 * L, ch)                                # pixel shuffle (weights pre-permuted)
    eb_b = emb @ pb["we"] + pb["b"]                              # (B, ch)
    ysp = jnp.pad(ys, ((0, 0), (1, 1), (0, 0)), mode="reflect")
    # TODO(synk): torch's upsample() calls F.interpolate(x, 2) binding size=2 (literal
    # code would fail to broadcast); we implement the intended scale_factor=2 nearest.
    res = jnp.repeat(x, 2, axis=1)                               # (B, 2L, C) bf16
    return _call_conv_norm_res(ysp, pb["w"], eb_b, res)          # (B, 2L, ch) bf16


def dense_block(x, p1, p2, emb):
    eb1 = emb @ p1["we"] + p1["b"]
    eb2 = emb @ p2["we"] + p2["b"]
    return _call_dense_block(x, p1["w"], eb1, p2["w"], eb2)


def gru_head(h, params, emb4, emb2, c_out):
    g = params["gru"]
    d5 = params["dense5"]
    fl = params["linear"]
    B, L, C = h.shape
    H = g["whh"].shape[0]
    c_h = d5["w_x"].shape[1]
    c_out_pad = fl["w"].shape[1]

    xs2 = jnp.transpose(h, (1, 0, 2)).reshape(L * B, C)          # time-major rows (t, b)

    # ---- GRU input projection (parallel over row tiles) -------------------------
    row_mult = 8 // math.gcd(B, 8)
    tlr = _pick_divisor(L, target=max(row_mult, 512 // max(B, 1)), multiple=row_mult)
    rows = tlr * B
    n_row_tiles = (L * B) // rows
    pf, pb = pl.pallas_call(
        _gru_proj_kernel,
        grid=(n_row_tiles,),
        in_specs=[
            pl.BlockSpec((rows, C), lambda i: (i, 0)),
            pl.BlockSpec((C, 3 * H), lambda i: (0, 0)),
            pl.BlockSpec((C, 3 * H), lambda i: (0, 0)),
        ],
        out_specs=[
            pl.BlockSpec((rows, 3 * H), lambda i: (i, 0)),
            pl.BlockSpec((rows, 3 * H), lambda i: (i, 0)),
        ],
        out_shape=[jax.ShapeDtypeStruct((L * B, 3 * H), ACT_DTYPE),
                   jax.ShapeDtypeStruct((L * B, 3 * H), ACT_DTYPE)],
        compiler_params=_cparams(("parallel",)),
    )(xs2, g["wih_f"], g["wih_b"])

    # ---- GRU recurrence (sequential over time chunks, state in VMEM scratch) ----
    ebif = emb4 @ g["wie_f"] + g["bih_f"]                        # (B, 3H) f32
    ebib = emb4 @ g["wie_b"] + g["bih_b"]
    group = 16 // math.gcd(B, 16)                                # 16-row aligned bf16 stores
    tch = _pick_divisor(L, target=max(group, min(128, L // 2)), multiple=group)
    if tch % group != 0:
        group = math.gcd(tch, group) or 1
    n_chunks = L // tch
    rc = tch * B
    hf, hb = pl.pallas_call(
        functools.partial(_gru_rec_kernel, batch=B, group=group),
        grid=(n_chunks,),
        in_specs=[
            pl.BlockSpec((rc, 3 * H), lambda i: (i, 0)),                      # fwd chunks
            pl.BlockSpec((rc, 3 * H), lambda i: (n_chunks - 1 - i, 0)),       # bwd chunks
            pl.BlockSpec((B, 3 * H), lambda i: (0, 0)),
            pl.BlockSpec((B, 3 * H), lambda i: (0, 0)),
            pl.BlockSpec((H, 6 * H), lambda i: (0, 0)),
            pl.BlockSpec((1, 3 * H), lambda i: (0, 0)),
            pl.BlockSpec((1, 3 * H), lambda i: (0, 0)),
        ],
        out_specs=[
            pl.BlockSpec((rc, H), lambda i: (i, 0)),
            pl.BlockSpec((rc, H), lambda i: (n_chunks - 1 - i, 0)),
        ],
        out_shape=[jax.ShapeDtypeStruct((L * B, H), ACT_DTYPE),
                   jax.ShapeDtypeStruct((L * B, H), ACT_DTYPE)],
        scratch_shapes=[pltpu.VMEM((2 * B, H), jnp.float32)],
        compiler_params=_cparams(("arbitrary",)),
    )(pf, pb, ebif, ebib, g["whh"], g["bhh_f"], g["bhh_b"])

    # ---- head: dense5 + leaky + final linear + exp (parallel over row tiles) ----
    eb5 = emb2 @ d5["we"] + d5["b"]                              # (B, c_h)
    eb5_tile = jnp.tile(eb5, (tlr, 1))                           # (rows, c_h) -- one tile reused by every program
    y = pl.pallas_call(
        functools.partial(_head_kernel, ns=NS),
        grid=(n_row_tiles,),
        in_specs=[
            pl.BlockSpec((rows, C), lambda i: (i, 0)),
            pl.BlockSpec((rows, H), lambda i: (i, 0)),
            pl.BlockSpec((rows, H), lambda i: (i, 0)),
            pl.BlockSpec((C, c_h), lambda i: (0, 0)),
            pl.BlockSpec((H, c_h), lambda i: (0, 0)),
            pl.BlockSpec((H, c_h), lambda i: (0, 0)),
            pl.BlockSpec((rows, c_h), lambda i: (0, 0)),
            pl.BlockSpec((c_h, c_out_pad), lambda i: (0, 0)),
            pl.BlockSpec((1, c_out_pad), lambda i: (0, 0)),
        ],
        out_specs=pl.BlockSpec((rows, c_out_pad), lambda i: (i, 0)),
        out_shape=jax.ShapeDtypeStruct((L * B, c_out_pad), jnp.float32),
        compiler_params=_cparams(("parallel",)),
    )(xs2, hf, hb, d5["w_x"], d5["w_f"], d5["w_b"], eb5_tile, fl["w"], fl["b"])

    y = y[:, :c_out].reshape(L, B, c_out)
    return jnp.transpose(y, (1, 2, 0))                           # (B, c_out, L)


def decoder_forward(params, x, c, *, c_out):
    emb2, emb4, emb6, emb8, embd2, embd4, embrnn = c
    h = jnp.transpose(x, (0, 2, 1)).astype(ACT_DTYPE)            # NCW -> NWC, bf16
    h = conv_block(h, params["conv1"], params["conv2"], embrnn)
    h = conv_block(h, params["conv3"], params["conv4"], embd4)
    h = conv_block(h, params["conv5"], params["conv6"], embd2)
    h = dense_block(h, params["dense1"], params["dense2"], emb8)
    h = dense_block(h, params["dense3"], params["dense4"], emb6)
    return gru_head(h, params, emb4, emb2, c_out)


# --------------------------------------------------------------------------- params
def init_params(key, c_in, c_out, c_h, emb):
    """PyTorch-layout parameters (Conv1d (Cout,Cin,3), Linear (Cout,Cin), GRU names)."""
    keys = iter(jax.random.split(key, 40))

    def u(shape, s):
        return jax.random.uniform(next(keys), shape, jnp.float32, -s, s)

    def conv(ci, co):
        s = 1.0 / math.sqrt(ci * 3)
        return dict(w=u((co, ci, 3), s), b=u((co,), s))

    def lin(ci, co):
        s = 1.0 / math.sqrt(ci)
        return dict(w=u((co, ci), s), b=u((co,), s))

    H = c_h // 2

    def gru_dir(ci):
        s = 1.0 / math.sqrt(H)
        return dict(w_ih=u((3 * H, ci), s), w_hh=u((3 * H, H), s),
                    b_ih=u((3 * H,), s), b_hh=u((3 * H,), s))

    return dict(
        conv1=conv(c_in + emb, 2 * c_h), conv2=conv(c_h + emb, c_h),
        conv3=conv(c_h + emb, 2 * c_h), conv4=conv(c_h + emb, c_h),
        conv5=conv(c_h + emb, 2 * c_h), conv6=conv(c_h + emb, c_h),
        dense1=lin(c_h + emb, c_h), dense2=lin(c_h + emb, c_h),
        dense3=lin(c_h + emb, c_h), dense4=lin(c_h + emb, c_h),
        dense5=lin(2 * c_h + emb, c_h), linear=lin(c_h, c_out),
        gru_f=gru_dir(c_h + emb), gru_b=gru_dir(c_h + emb),
    )


def prepare_params(raw, c_in, c_out, c_h):
    """Convert PyTorch-layout params to kernel layouts (emb split, per-tap conv weights,
    pixel-shuffle column permutation, transposed bf16 matmul weights, lane-padded head)."""
    H = c_h // 2

    def prep_conv(p, cx, shuffle):
        w, b = p["w"], p["b"]                                    # (Cout, Cin, 3), (Cout,)
        cout = w.shape[0]
        wx = jnp.transpose(w[:, :cx, :], (2, 1, 0))              # (3, cx, Cout): tap k = w[:, :cx, k].T
        we = jnp.sum(w[:, cx:, :], axis=2)                       # (Cout, E): emb taps summed
        if shuffle:                                              # fold pixel_shuffle_1d into columns
            ch = cout // 2
            j = jnp.arange(cout)
            perm = 2 * (j % ch) + j // ch
            wx = wx[:, :, perm]
            we = we[perm, :]
            b = b[perm]
        return dict(w=wx.astype(MXU_DTYPE), we=we.T, b=b.reshape(1, cout))

    def prep_lin(p, cx):
        w, b = p["w"], p["b"]
        return dict(w=w[:, :cx].T.astype(MXU_DTYPE), we=w[:, cx:].T, b=b.reshape(1, -1))

    def prep_dense5(p):
        w, b = p["w"], p["b"]                                    # (c_h, 2c_h + E)
        return dict(w_x=w[:, :c_h].T.astype(MXU_DTYPE),
                    w_f=w[:, c_h:c_h + H].T.astype(MXU_DTYPE),
                    w_b=w[:, c_h + H:2 * c_h].T.astype(MXU_DTYPE),
                    we=w[:, 2 * c_h:].T, b=b.reshape(1, -1))

    def prep_linear(p):
        w, b = p["w"], p["b"]                                    # (c_out, c_h)
        pad = (-c_out) % 128                                     # lane-dense output store
        wt = jnp.pad(w.T, ((0, 0), (0, pad)))
        bt = jnp.pad(b, ((0, pad),))
        return dict(w=wt.astype(MXU_DTYPE), b=bt.reshape(1, -1))

    def prep_gru(pf, pb):
        return dict(
            wih_f=pf["w_ih"][:, :c_h].T.astype(MXU_DTYPE),
            wih_b=pb["w_ih"][:, :c_h].T.astype(MXU_DTYPE),
            wie_f=pf["w_ih"][:, c_h:].T, wie_b=pb["w_ih"][:, c_h:].T,
            bih_f=pf["b_ih"].reshape(1, -1), bih_b=pb["b_ih"].reshape(1, -1),
            whh=jnp.concatenate([pf["w_hh"].T, pb["w_hh"].T], axis=1).astype(MXU_DTYPE),
            bhh_f=pf["b_hh"].reshape(1, -1), bhh_b=pb["b_hh"].reshape(1, -1))

    return dict(
        conv1=prep_conv(raw["conv1"], c_in, True), conv2=prep_conv(raw["conv2"], c_h, False),
        conv3=prep_conv(raw["conv3"], c_h, True), conv4=prep_conv(raw["conv4"], c_h, False),
        conv5=prep_conv(raw["conv5"], c_h, True), conv6=prep_conv(raw["conv6"], c_h, False),
        dense1=prep_lin(raw["dense1"], c_h), dense2=prep_lin(raw["dense2"], c_h),
        dense3=prep_lin(raw["dense3"], c_h), dense4=prep_lin(raw["dense4"], c_h),
        dense5=prep_dense5(raw["dense5"]),
        linear=prep_linear(raw["linear"]),
        gru=prep_gru(raw["gru_f"], raw["gru_b"]),
    )


# --------------------------------------------------------------------------- main
if __name__ == "__main__":
    # Small shapes consistent with Decoder(c_in=64, c_out=48, c_h=64, emb_size=32)
    B, T = 2, 8
    C_IN, C_OUT, C_H, EMB = 64, 48, 64, 32

    key = jax.random.PRNGKey(0)
    kx, kc, kp = jax.random.split(key, 3)

    x = jax.random.normal(kx, (B, C_IN, T), jnp.float32)
    c = tuple(jax.random.normal(k, (B, EMB), jnp.float32)
              for k in jax.random.split(kc, 7))   # emb2, emb4, emb6, emb8, embd2, embd4, embrnn

    raw = init_params(kp, C_IN, C_OUT, C_H, EMB)
    params = prepare_params(raw, C_IN, C_OUT, C_H)

    fwd = jax.jit(functools.partial(decoder_forward, c_out=C_OUT))
    out = fwd(params, x, c)
    out = jax.block_until_ready(out)

    assert out.shape == (B, C_OUT, T * 8), out.shape
    assert bool(jnp.all(jnp.isfinite(out)))
    print("KERNEL_OK")
</pallas_src>

<mosaic_0001>
module attributes {stable_mosaic.version = 11 : i64} {
  func.func @_conv_leaky_kernel(%arg0: i32, %arg1: memref<1x10x64xbf16, #tpu.memory_space<vmem>>, %arg2: memref<3x64x128xbf16, #tpu.memory_space<vmem>>, %arg3: memref<1x1x128xf32, #tpu.memory_space<vmem>>, %arg4: memref<1x8x128xbf16, #tpu.memory_space<vmem>>) attributes {dimension_semantics = [#tpu.dimension_semantics<parallel>], iteration_bounds = array<i64: 2>, scalar_prefetch = 0 : i64, scratch_operands = 0 : i64, tpu.core_type = #tpu.core_type<tc>, window_params = [{transform_indices = @transform_0, window_bounds = array<i64: 1, 10, 64>}, {pipeline_mode = #tpu.pipeline_mode<synchronous>, transform_indices = @transform_1, window_bounds = array<i64: 3, 64, 128>}, {transform_indices = @transform_2, window_bounds = array<i64: 1, 1, 128>}, {transform_indices = @transform_3, window_bounds = array<i64: 1, 8, 128>}]} {
    %c0 = arith.constant 0 : index
    %c0_0 = arith.constant 0 : index
    %c0_1 = arith.constant 0 : index
    %0 = vector.load %arg1[%c0, %c0_0, %c0_1] : memref<1x10x64xbf16, #tpu.memory_space<vmem>>, vector<1x8x64xbf16>
    %1 = vector.shape_cast %0 : vector<1x8x64xbf16> to vector<8x64xbf16>
    %c0_2 = arith.constant 0 : index
    %c0_3 = arith.constant 0 : index
    %c0_4 = arith.constant 0 : index
    %2 = vector.load %arg2[%c0_2, %c0_3, %c0_4] : memref<3x64x128xbf16, #tpu.memory_space<vmem>>, vector<1x64x128xbf16>
    %3 = vector.shape_cast %2 : vector<1x64x128xbf16> to vector<64x128xbf16>
    %cst = arith.constant dense<0.000000e+00> : vector<8x128xf32>
    %4 = tpu.matmul %1, %3, %cst {dimension_numbers = #tpu.dot_dimension_numbers<[1], [0], [0], [1], [0, 0, 1, 1], [], []>} : vector<8x64xbf16>, vector<64x128xbf16>, vector<8x128xf32> -> vector<8x128xf32>
    %c0_5 = arith.constant 0 : index
    %c1 = arith.constant 1 : index
    %c0_6 = arith.constant 0 : index
    %5 = vector.load %arg1[%c0_5, %c1, %c0_6] : memref<1x10x64xbf16, #tpu.memory_space<vmem>>, vector<1x8x64xbf16>
    %6 = vector.shape_cast %5 : vector<1x8x64xbf16> to vector<8x64xbf16>
    %c1_7 = arith.constant 1 : index
    %c0_8 = arith.constant 0 : index
    %c0_9 = arith.constant 0 : index
    %7 = vector.load %arg2[%c1_7, %c0_8, %c0_9] : memref<3x64x128xbf16, #tpu.memory_space<vmem>>, vector<1x64x128xbf16>
    %8 = vector.shape_cast %7 : vector<1x64x128xbf16> to vector<64x128xbf16>
    %cst_10 = arith.constant dense<0.000000e+00> : vector<8x128xf32>
    %9 = tpu.matmul %6, %8, %cst_10 {dimension_numbers = #tpu.dot_dimension_numbers<[1], [0], [0], [1], [0, 0, 1, 1], [], []>} : vector<8x64xbf16>, vector<64x128xbf16>, vector<8x128xf32> -> vector<8x128xf32>
    %10 = arith.addf %4, %9 : vector<8x128xf32>
    %c0_11 = arith.constant 0 : index
    %c2 = arith.constant 2 : index
    %c0_12 = arith.constant 0 : index
    %11 = vector.load %arg1[%c0_11, %c2, %c0_12] : memref<1x10x64xbf16, #tpu.memory_space<vmem>>, vector<1x8x64xbf16>
    %12 = vector.shape_cast %11 : vector<1x8x64xbf16> to vector<8x64xbf16>
    %c2_13 = arith.constant 2 : index
    %c0_14 = arith.constant 0 : index
    %c0_15 = arith.constant 0 : index
    %13 = vector.load %arg2[%c2_13, %c0_14, %c0_15] : memref<3x64x128xbf16, #tpu.memory_space<vmem>>, vector<1x64x128xbf16>
    %14 = vector.shape_cast %13 : vector<1x64x128xbf16> to vector<64x128xbf16>
    %cst_16 = arith.constant dense<0.000000e+00> : vector<8x128xf32>
    %15 = tpu.matmul %12, %14, %cst_16 {dimension_numbers = #tpu.dot_dimension_numbers<[1], [0], [0], [1], [0, 0, 1, 1], [], []>} : vector<8x64xbf16>, vector<64x128xbf16>, vector<8x128xf32> -> vector<8x128xf32>
    %16 = arith.addf %10, %15 : vector<8x128xf32>
    %c0_17 = arith.constant 0 : index
    %c0_18 = arith.constant 0 : index
    %c0_19 = arith.constant 0 : index
    %17 = vector.load %arg3[%c0_17, %c0_18, %c0_19] : memref<1x1x128xf32, #tpu.memory_space<vmem>>, vector<1x1x128xf32>
    %18 = vector.shape_cast %17 : vector<1x1x128xf32> to vector<1x128xf32>
    %19 = vector.broadcast %18 : vector<1x128xf32> to vector<8x128xf32>
    %20 = arith.addf %16, %19 : vector<8x128xf32>
    %cst_20 = arith.constant 0.000000e+00 : f32
    %21 = vector.broadcast %cst_20 : f32 to vector<8x128xf32>
    %22 = arith.cmpf oge, %20, %21 : vector<8x128xf32>
    %cst_21 = arith.constant 2.000000e-01 : f32
    %23 = vector.broadcast %cst_21 : f32 to vector<8x128xf32>
    %24 = arith.mulf %23, %20 : vector<8x128xf32>
    %25 = arith.select %22, %20, %24 : vector<8x128xi1>, vector<8x128xf32>
    %26 = arith.truncf %25 : vector<8x128xf32> to vector<8x128xbf16>
    %c0_22 = arith.constant 0 : index
    %c0_23 = arith.constant 0 : index
    %c0_24 = arith.constant 0 : index
    %27 = vector.load %arg4[%c0_22, %c0_23, %c0_24] : memref<1x8x128xbf16, #tpu.memory_space<vmem>>, vector<1x8x128xbf16>
    %28 = vector.shape_cast %27 : vector<1x8x128xbf16> to vector<8x128xbf16>
    %29 = vector.shape_cast %26 : vector<8x128xbf16> to vector<1x8x128xbf16>
    tpu.vector_store %arg4[%c0_22, %c0_23, %c0_24], %29 {strides = array<i32>} : memref<1x8x128xbf16, #tpu.memory_space<vmem>>, vector<1x8x128xbf16>,
    return
  }
  func.func @transform_0(%arg0: i32) -> (i32, i32, i32) {
    %c0_i32 = arith.constant 0 : i32
    %c0_i32_0 = arith.constant 0 : i32
    %c0_i32_1 = arith.constant 0 : i32
    return %arg0, %c0_i32, %c0_i32_0 : i32, i32, i32
  }
  func.func @transform_1(%arg0: i32) -> (i32, i32, i32) {
    %c0_i32 = arith.constant 0 : i32
    %c0_i32_0 = arith.constant 0 : i32
    %c0_i32_1 = arith.constant 0 : i32
    %c0_i32_2 = arith.constant 0 : i32
    return %c0_i32, %c0_i32_0, %c0_i32_1 : i32, i32, i32
  }
  func.func @transform_2(%arg0: i32) -> (i32, i32, i32) {
    %c0_i32 = arith.constant 0 : i32
    %c0_i32_0 = arith.constant 0 : i32
    %c0_i32_1 = arith.constant 0 : i32
    return %arg0, %c0_i32, %c0_i32_0 : i32, i32, i32
  }
  func.func @transform_3(%arg0: i32) -> (i32, i32, i32) {
    %c0_i32 = arith.constant 0 : i32
    %c0_i32_0 = arith.constant 0 : i32
    %c0_i32_1 = arith.constant 0 : i32
    return %arg0, %c0_i32, %c0_i32_0 : i32, i32, i32
  }
}

module attributes {stable_mosaic.version = 11 : i64} {
  func.func @_conv_leaky_kernel(%arg0: i32, %arg1: memref<1x18x64xbf16, #tpu.memory_space<vmem>>, %arg2: memref<3x64x128xbf16, #tpu.memory_space<vmem>>, %arg3: memref<1x1x128xf32, #tpu.memory_space<vmem>>, %arg4: memref<1x16x128xbf16, #tpu.memory_space<vmem>>) attributes {dimension_semantics = [#tpu.dimension_semantics<parallel>], iteration_bounds = array<i64: 2>, scalar_prefetch = 0 : i64, scratch_operands = 0 : i64, tpu.core_type = #tpu.core_type<tc>, window_params = [{transform_indices = @transform_0, window_bounds = array<i64: 1, 18, 64>}, {pipeline_mode = #tpu.pipeline_mode<synchronous>, transform_indices = @transform_1, window_bounds = array<i64: 3, 64, 128>}, {transform_indices = @transform_2, window_bounds = array<i64: 1, 1, 128>}, {transform_indices = @transform_3, window_bounds = array<i64: 1, 16, 128>}]} {
    %c0 = arith.constant 0 : index
    %c0_0 = arith.constant 0 : index
    %c0_1 = arith.constant 0 : index
    %0 = vector.load %arg1[%c0, %c0_0, %c0_1] : memref<1x18x64xbf16, #tpu.memory_space<vmem>>, vector<1x16x64xbf16>
    %1 = vector.shape_cast %0 : vector<1x16x64xbf16> to vector<16x64xbf16>
    %c0_2 = arith.constant 0 : index
    %c0_3 = arith.constant 0 : index
    %c0_4 = arith.constant 0 : index
    %2 = vector.load %arg2[%c0_2, %c0_3, %c0_4] : memref<3x64x128xbf16, #tpu.memory_space<vmem>>, vector<1x64x128xbf16>
    %3 = vector.shape_cast %2 : vector<1x64x128xbf16> to vector<64x128xbf16>
    %cst = arith.constant dense<0.000000e+00> : vector<16x128xf32>
    %4 = tpu.matmul %1, %3, %cst {dimension_numbers = #tpu.dot_dimension_numbers<[1], [0], [0], [1], [0, 0, 1, 1], [], []>} : vector<16x64xbf16>, vector<64x128xbf16>, vector<16x128xf32> -> vector<16x128xf32>
    %c0_5 = arith.constant 0 : index
    %c1 = arith.constant 1 : index
    %c0_6 = arith.constant 0 : index
    %5 = vector.load %arg1[%c0_5, %c1, %c0_6] : memref<1x18x64xbf16, #tpu.memory_space<vmem>>, vector<1x16x64xbf16>
    %6 = vector.shape_cast %5 : vector<1x16x64xbf16> to vector<16x64xbf16>
    %c1_7 = arith.constant 1 : index
    %c0_8 = arith.constant 0 : index
    %c0_9 = arith.constant 0 : index
    %7 = vector.load %arg2[%c1_7, %c0_8, %c0_9] : memref<3x64x128xbf16, #tpu.memory_space<vmem>>, vector<1x64x128xbf16>
    %8 = vector.shape_cast %7 : vector<1x64x128xbf16> to vector<64x128xbf16>
    %cst_10 = arith.constant dense<0.000000e+00> : vector<16x128xf32>
    %9 = tpu.matmul %6, %8, %cst_10 {dimension_numbers = #tpu.dot_dimension_numbers<[1], [0], [0], [1], [0, 0, 1, 1], [], []>} : vector<16x64xbf16>, vector<64x128xbf16>, vector<16x128xf32> -> vector<16x128xf32>
    %10 = arith.addf %4, %9 : vector<16x128xf32>
    %c0_11 = arith.constant 0 : index
    %c2 = arith.constant 2 : index
    %c0_12 = arith.constant 0 : index
    %11 = vector.load %arg1[%c0_11, %c2, %c0_12] : memref<1x18x64xbf16, #tpu.memory_space<vmem>>, vector<1x16x64xbf16>
    %12 = vector.shape_cast %11 : vector<1x16x64xbf16> to vector<16x64xbf16>
    %c2_13 = arith.constant 2 : index
    %c0_14 = arith.constant 0 : index
    %c0_15 = arith.constant 0 : index
    %13 = vector.load %arg2[%c2_13, %c0_14, %c0_15] : memref<3x64x128xbf16, #tpu.memory_space<vmem>>, vector<1x64x128xbf16>
    %14 = vector.shape_cast %13 : vector<1x64x128xbf16> to vector<64x128xbf16>
    %cst_16 = arith.constant dense<0.000000e+00> : vector<16x128xf32>
    %15 = tpu.matmul %12, %14, %cst_16 {dimension_numbers = #tpu.dot_dimension_numbers<[1], [0], [0], [1], [0, 0, 1, 1], [], []>} : vector<16x64xbf16>, vector<64x128xbf16>, vector<16x128xf32> -> vector<16x128xf32>
    %16 = arith.addf %10, %15 : vector<16x128xf32>
    %c0_17 = arith.constant 0 : index
    %c0_18 = arith.constant 0 : index
    %c0_19 = arith.constant 0 : index
    %17 = vector.load %arg3[%c0_17, %c0_18, %c0_19] : memref<1x1x128xf32, #tpu.memory_space<vmem>>, vector<1x1x128xf32>
    %18 = vector.shape_cast %17 : vector<1x1x128xf32> to vector<1x128xf32>
    %19 = vector.broadcast %18 : vector<1x128xf32> to vector<16x128xf32>
    %20 = arith.addf %16, %19 : vector<16x128xf32>
    %cst_20 = arith.constant 0.000000e+00 : f32
    %21 = vector.broadcast %cst_20 : f32 to vector<16x128xf32>
    %22 = arith.cmpf oge, %20, %21 : vector<16x128xf32>
    %cst_21 = arith.constant 2.000000e-01 : f32
    %23 = vector.broadcast %cst_21 : f32 to vector<16x128xf32>
    %24 = arith.mulf %23, %20 : vector<16x128xf32>
    %25 = arith.select %22, %20, %24 : vector<16x128xi1>, vector<16x128xf32>
    %26 = arith.truncf %25 : vector<16x128xf32> to vector<16x128xbf16>
    %c0_22 = arith.constant 0 : index
    %c0_23 = arith.constant 0 : index
    %c0_24 = arith.constant 0 : index
    %27 = vector.load %arg4[%c0_22, %c0_23, %c0_24] : memref<1x16x128xbf16, #tpu.memory_space<vmem>>, vector<1x16x128xbf16>
    %28 = vector.shape_cast %27 : vector<1x16x128xbf16> to vector<16x128xbf16>
    %29 = vector.shape_cast %26 : vector<16x128xbf16> to vector<1x16x128xbf16>
    tpu.vector_store %arg4[%c0_22, %c0_23, %c0_24], %29 {strides = array<i32>} : memref<1x16x128xbf16, #tpu.memory_space<vmem>>, vector<1x16x128xbf16>,
    return
  }
  func.func @transform_0(%arg0: i32) -> (i32, i32, i32) {
    %c0_i32 = arith.constant 0 : i32
    %c0_i32_0 = arith.constant 0 : i32
    %c0_i32_1 = arith.constant 0 : i32
    return %arg0, %c0_i32, %c0_i32_0 : i32, i32, i32
  }
  func.func @transform_1(%arg0: i32) -> (i32, i32, i32) {
    %c0_i32 = arith.constant 0 : i32
    %c0_i32_0 = arith.constant 0 : i32
    %c0_i32_1 = arith.constant 0 : i32
    %c0_i32_2 = arith.constant 0 : i32
    return %c0_i32, %c0_i32_0, %c0_i32_1 : i32, i32, i32
  }
  func.func @transform_2(%arg0: i32) -> (i32, i32, i32) {
    %c0_i32 = arith.constant 0 : i32
    %c0_i32_0 = arith.constant 0 : i32
    %c0_i32_1 = arith.constant 0 : i32
    return %arg0, %c0_i32, %c0_i32_0 : i32, i32, i32
  }
  func.func @transform_3(%arg0: i32) -> (i32, i32, i32) {
    %c0_i32 = arith.constant 0 : i32
    %c0_i32_0 = arith.constant 0 : i32
    %c0_i32_1 = arith.constant 0 : i32
    return %arg0, %c0_i32, %c0_i32_0 : i32, i32, i32
  }
}

module attributes {stable_mosaic.version = 11 : i64} {
  func.func @_conv_norm_res_kernel(%arg0: i32, %arg1: memref<1x18x64xbf16, #tpu.memory_space<vmem>>, %arg2: memref<3x64x64xbf16, #tpu.memory_space<vmem>>, %arg3: memref<1x1x64xf32, #tpu.memory_space<vmem>>, %arg4: memref<1x16x64xbf16, #tpu.memory_space<vmem>>, %arg5: memref<1x16x64xbf16, #tpu.memory_space<vmem>>) attributes {dimension_semantics = [#tpu.dimension_semantics<parallel>], iteration_bounds = array<i64: 2>, scalar_prefetch = 0 : i64, scratch_operands = 0 : i64, tpu.core_type = #tpu.core_type<tc>, window_params = [{transform_indices = @transform_0, window_bounds = array<i64: 1, 18, 64>}, {pipeline_mode = #tpu.pipeline_mode<synchronous>, transform_indices = @transform_1, window_bounds = array<i64: 3, 64, 64>}, {transform_indices = @transform_2, window_bounds = array<i64: 1, 1, 64>}, {transform_indices = @transform_3, window_bounds = array<i64: 1, 16, 64>}, {transform_indices = @transform_4, window_bounds = array<i64: 1, 16, 64>}]} {
    %c0 = arith.constant 0 : index
    %c0_0 = arith.constant 0 : index
    %c0_1 = arith.constant 0 : index
    %0 = vector.load %arg1[%c0, %c0_0, %c0_1] : memref<1x18x64xbf16, #tpu.memory_space<vmem>>, vector<1x16x64xbf16>
    %1 = vector.shape_cast %0 : vector<1x16x64xbf16> to vector<16x64xbf16>
    %c0_2 = arith.constant 0 : index
    %c0_3 = arith.constant 0 : index
    %c0_4 = arith.constant 0 : index
    %2 = vector.load %arg2[%c0_2, %c0_3, %c0_4] : memref<3x64x64xbf16, #tpu.memory_space<vmem>>, vector<1x64x64xbf16>
    %3 = vector.shape_cast %2 : vector<1x64x64xbf16> to vector<64x64xbf16>
    %cst = arith.constant dense<0.000000e+00> : vector<16x64xf32>
    %4 = tpu.matmul %1, %3, %cst {dimension_numbers = #tpu.dot_dimension_numbers<[1], [0], [0], [1], [0, 0, 1, 1], [], []>} : vector<16x64xbf16>, vector<64x64xbf16>, vector<16x64xf32> -> vector<16x64xf32>
    %c0_5 = arith.constant 0 : index
    %c1 = arith.constant 1 : index
    %c0_6 = arith.constant 0 : index
    %5 = vector.load %arg1[%c0_5, %c1, %c0_6] : memref<1x18x64xbf16, #tpu.memory_space<vmem>>, vector<1x16x64xbf16>
    %6 = vector.shape_cast %5 : vector<1x16x64xbf16> to vector<16x64xbf16>
    %c1_7 = arith.constant 1 : index
    %c0_8 = arith.constant 0 : index
    %c0_9 = arith.constant 0 : index
    %7 = vector.load %arg2[%c1_7, %c0_8, %c0_9] : memref<3x64x64xbf16, #tpu.memory_space<vmem>>, vector<1x64x64xbf16>
    %8 = vector.shape_cast %7 : vector<1x64x64xbf16> to vector<64x64xbf16>
    %cst_10 = arith.constant dense<0.000000e+00> : vector<16x64xf32>
    %9 = tpu.matmul %6, %8, %cst_10 {dimension_numbers = #tpu.dot_dimension_numbers<[1], [0], [0], [1], [0, 0, 1, 1], [], []>} : vector<16x64xbf16>, vector<64x64xbf16>, vector<16x64xf32> -> vector<16x64xf32>
    %10 = arith.addf %4, %9 : vector<16x64xf32>
    %c0_11 = arith.constant 0 : index
    %c2 = arith.constant 2 : index
    %c0_12 = arith.constant 0 : index
    %11 = vector.load %arg1[%c0_11, %c2, %c0_12] : memref<1x18x64xbf16, #tpu.memory_space<vmem>>, vector<1x16x64xbf16>
    %12 = vector.shape_cast %11 : vector<1x16x64xbf16> to vector<16x64xbf16>
    %c2_13 = arith.constant 2 : index
    %c0_14 = arith.constant 0 : index
    %c0_15 = arith.constant 0 : index
    %13 = vector.load %arg2[%c2_13, %c0_14, %c0_15] : memref<3x64x64xbf16, #tpu.memory_space<vmem>>, vector<1x64x64xbf16>
    %14 = vector.shape_cast %13 : vector<1x64x64xbf16> to vector<64x64xbf16>
    %cst_16 = arith.constant dense<0.000000e+00> : vector<16x64xf32>
    %15 = tpu.matmul %12, %14, %cst_16 {dimension_numbers = #tpu.dot_dimension_numbers<[1], [0], [0], [1], [0, 0, 1, 1], [], []>} : vector<16x64xbf16>, vector<64x64xbf16>, vector<16x64xf32> -> vector<16x64xf32>
    %16 = arith.addf %10, %15 : vector<16x64xf32>
    %c0_17 = arith.constant 0 : index
    %c0_18 = arith.constant 0 : index
    %c0_19 = arith.constant 0 : index
    %17 = vector.load %arg3[%c0_17, %c0_18, %c0_19] : memref<1x1x64xf32, #tpu.memory_space<vmem>>, vector<1x1x64xf32>
    %18 = vector.shape_cast %17 : vector<1x1x64xf32> to vector<1x64xf32>
    %19 = vector.broadcast %18 : vector<1x64xf32> to vector<16x64xf32>
    %20 = arith.addf %16, %19 : vector<16x64xf32>
    %cst_20 = arith.constant 0.000000e+00 : f32
    %21 = vector.broadcast %cst_20 : f32 to vector<16x64xf32>
    %22 = arith.cmpf oge, %20, %21 : vector<16x64xf32>
    %cst_21 = arith.constant 2.000000e-01 : f32
    %23 = vector.broadcast %cst_21 : f32 to vector<16x64xf32>
    %24 = arith.mulf %23, %20 : vector<16x64xf32>
    %25 = arith.select %22, %20, %24 : vector<16x64xi1>, vector<16x64xf32>
    %cst_22 = arith.constant dense<0.000000e+00> : vector<64xf32>
    %26 = vector.multi_reduction <add>, %25, %cst_22 [0] : vector<16x64xf32> to vector<64xf32>
    %27 = vector.shape_cast %26 : vector<64xf32> to vector<1x64xf32>
    %cst_23 = arith.constant 1.600000e+01 : f32
    %28 = vector.broadcast %cst_23 : f32 to vector<1x64xf32>
    %29 = arith.divf %27, %28 : vector<1x64xf32>
    %30 = vector.broadcast %29 : vector<1x64xf32> to vector<16x64xf32>
    %31 = arith.subf %25, %30 : vector<16x64xf32>
    %32 = arith.mulf %31, %31 : vector<16x64xf32>
    %cst_24 = arith.constant dense<0.000000e+00> : vector<64xf32>
    %33 = vector.multi_reduction <add>, %32, %cst_24 [0] : vector<16x64xf32> to vector<64xf32>
    %34 = vector.shape_cast %33 : vector<64xf32> to vector<1x64xf32>
    %cst_25 = arith.constant 1.600000e+01 : f32
    %35 = vector.broadcast %cst_25 : f32 to vector<1x64xf32>
    %36 = arith.divf %34, %35 : vector<1x64xf32>
    %37 = vector.broadcast %29 : vector<1x64xf32> to vector<16x64xf32>
    %38 = arith.subf %25, %37 : vector<16x64xf32>
    %cst_26 = arith.constant 9.99999974E-6 : f32
    %39 = vector.broadcast %cst_26 : f32 to vector<1x64xf32>
    %40 = arith.addf %36, %39 : vector<1x64xf32>
    %41 = math.rsqrt %40 : vector<1x64xf32>
    %42 = vector.broadcast %41 : vector<1x64xf32> to vector<16x64xf32>
    %43 = arith.mulf %38, %42 : vector<16x64xf32>
    %c0_27 = arith.constant 0 : index
    %c0_28 = arith.constant 0 : index
    %c0_29 = arith.constant 0 : index
    %44 = vector.load %arg4[%c0_27, %c0_28, %c0_29] : memref<1x16x64xbf16, #tpu.memory_space<vmem>>, vector<1x16x64xbf16>
    %45 = vector.shape_cast %44 : vector<1x16x64xbf16> to vector<16x64xbf16>
    %46 = arith.extf %45 : vector<16x64xbf16> to vector<16x64xf32>
    %47 = arith.addf %43, %46 : vector<16x64xf32>
    %48 = arith.truncf %47 : vector<16x64xf32> to vector<16x64xbf16>
    %c0_30 = arith.constant 0 : index
    %c0_31 = arith.constant 0 : index
    %c0_32 = arith.constant 0 : index
    %49 = vector.load %arg5[%c0_30, %c0_31, %c0_32] : memref<1x16x64xbf16, #tpu.memory_space<vmem>>, vector<1x16x64xbf16>
    %50 = vector.shape_cast %49 : vector<1x16x64xbf16> to vector<16x64xbf16>
    %51 = vector.shape_cast %48 : vector<16x64xbf16> to vector<1x16x64xbf16>
    tpu.vector_store %arg5[%c0_30, %c0_31, %c0_32], %51 {strides = array<i32>} : memref<1x16x64xbf16, #tpu.memory_space<vmem>>, vector<1x16x64xbf16>,
    return
  }
  func.func @transform_0(%arg0: i32) -> (i32, i32, i32) {
    %c0_i32 = arith.constant 0 : i32
    %c0_i32_0 = arith.constant 0 : i32
    %c0_i32_1 = arith.constant 0 : i32
    return %arg0, %c0_i32, %c0_i32_0 : i32, i32, i32
  }
  func.func @transform_1(%arg0: i32) -> (i32, i32, i32) {
    %c0_i32 = arith.constant 0 : i32
    %c0_i32_0 = arith.constant 0 : i32
    %c0_i32_1 = arith.constant 0 : i32
    %c0_i32_2 = arith.constant 0 : i32
    return %c0_i32, %c0_i32_0, %c0_i32_1 : i32, i32, i32
  }
  func.func @transform_2(%arg0: i32) -> (i32, i32, i32) {
    %c0_i32 = arith.constant 0 : i32
    %c0_i32_0 = arith.constant 0 : i32
    %c0_i32_1 = arith.constant 0 : i32
    return %arg0, %c0_i32, %c0_i32_0 : i32, i32, i32
  }
  func.func @transform_3(%arg0: i32) -> (i32, i32, i32) {
    %c0_i32 = arith.constant 0 : i32
    %c0_i32_0 = arith.constant 0 : i32
    %c0_i32_1 = arith.constant 0 : i32
    return %arg0, %c0_i32, %c0_i32_0 : i32, i32, i32
  }
  func.func @transform_4(%arg0: i32) -> (i32, i32, i32) {
    %c0_i32 = arith.constant 0 : i32
    %c0_i32_0 = arith.constant 0 : i32
    %c0_i32_1 = arith.constant 0 : i32
    return %arg0, %c0_i32, %c0_i32_0 : i32, i32, i32
  }
}

module attributes {stable_mosaic.version = 11 : i64} {
  func.func @_conv_norm_res_kernel(%arg0: i32, %arg1: memref<1x34x64xbf16, #tpu.memory_space<vmem>>, %arg2: memref<3x64x64xbf16, #tpu.memory_space<vmem>>, %arg3: memref<1x1x64xf32, #tpu.memory_space<vmem>>, %arg4: memref<1x32x64xbf16, #tpu.memory_space<vmem>>, %arg5: memref<1x32x64xbf16, #tpu.memory_space<vmem>>) attributes {dimension_semantics = [#tpu.dimension_semantics<parallel>], iteration_bounds = array<i64: 2>, scalar_prefetch = 0 : i64, scratch_operands = 0 : i64, tpu.core_type = #tpu.core_type<tc>, window_params = [{transform_indices = @transform_0, window_bounds = array<i64: 1, 34, 64>}, {pipeline_mode = #tpu.pipeline_mode<synchronous>, transform_indices = @transform_1, window_bounds = array<i64: 3, 64, 64>}, {transform_indices = @transform_2, window_bounds = array<i64: 1, 1, 64>}, {transform_indices = @transform_3, window_bounds = array<i64: 1, 32, 64>}, {transform_indices = @transform_4, window_bounds = array<i64: 1, 32, 64>}]} {
    %c0 = arith.constant 0 : index
    %c0_0 = arith.constant 0 : index
    %c0_1 = arith.constant 0 : index
    %0 = vector.load %arg1[%c0, %c0_0, %c0_1] : memref<1x34x64xbf16, #tpu.memory_space<vmem>>, vector<1x32x64xbf16>
    %1 = vector.shape_cast %0 : vector<1x32x64xbf16> to vector<32x64xbf16>
    %c0_2 = arith.constant 0 : index
    %c0_3 = arith.constant 0 : index
    %c0_4 = arith.constant 0 : index
    %2 = vector.load %arg2[%c0_2, %c0_3, %c0_4] : memref<3x64x64xbf16, #tpu.memory_space<vmem>>, vector<1x64x64xbf16>
    %3 = vector.shape_cast %2 : vector<1x64x64xbf16> to vector<64x64xbf16>
    %cst = arith.constant dense<0.000000e+00> : vector<32x64xf32>
    %4 = tpu.matmul %1, %3, %cst {dimension_numbers = #tpu.dot_dimension_numbers<[1], [0], [0], [1], [0, 0, 1, 1], [], []>} : vector<32x64xbf16>, vector<64x64xbf16>, vector<32x64xf32> -> vector<32x64xf32>
    %c0_5 = arith.constant 0 : index
    %c1 = arith.constant 1 : index
    %c0_6 = arith.constant 0 : index
    %5 = vector.load %arg1[%c0_5, %c1, %c0_6] : memref<1x34x64xbf16, #tpu.memory_space<vmem>>, vector<1x32x64xbf16>
    %6 = vector.shape_cast %5 : vector<1x32x64xbf16> to vector<32x64xbf16>
    %c1_7 = arith.constant 1 : index
    %c0_8 = arith.constant 0 : index
    %c0_9 = arith.constant 0 : index
    %7 = vector.load %arg2[%c1_7, %c0_8, %c0_9] : memref<3x64x64xbf16, #tpu.memory_space<vmem>>, vector<1x64x64xbf16>
    %8 = vector.shape_cast %7 : vector<1x64x64xbf16> to vector<64x64xbf16>
    %cst_10 = arith.constant dense<0.000000e+00> : vector<32x64xf32>
    %9 = tpu.matmul %6, %8, %cst_10 {dimension_numbers = #tpu.dot_dimension_numbers<[1], [0], [0], [1], [0, 0, 1, 1], [], []>} : vector<32x64xbf16>, vector<64x64xbf16>, vector<32x64xf32> -> vector<32x64xf32>
    %10 = arith.addf %4, %9 : vector<32x64xf32>
    %c0_11 = arith.constant 0 : index
    %c2 = arith.constant 2 : index
    %c0_12 = arith.constant 0 : index
    %11 = vector.load %arg1[%c0_11, %c2, %c0_12] : memref<1x34x64xbf16, #tpu.memory_space<vmem>>, vector<1x32x64xbf16>
    %12 = vector.shape_cast %11 : vector<1x32x64xbf16> to vector<32x64xbf16>
    %c2_13 = arith.constant 2 : index
    %c0_14 = arith.constant 0 : index
    %c0_15 = arith.constant 0 : index
    %13 = vector.load %arg2[%c2_13, %c0_14, %c0_15] : memref<3x64x64xbf16, #tpu.memory_space<vmem>>, vector<1x64x64xbf16>
    %14 = vector.shape_cast %13 : vector<1x64x64xbf16> to vector<64x64xbf16>
    %cst_16 = arith.constant dense<0.000000e+00> : vector<32x64xf32>
    %15 = tpu.matmul %12, %14, %cst_16 {dimension_numbers = #tpu.dot_dimension_numbers<[1], [0], [0], [1], [0, 0, 1, 1], [], []>} : vector<32x64xbf16>, vector<64x64xbf16>, vector<32x64xf32> -> vector<32x64xf32>
    %16 = arith.addf %10, %15 : vector<32x64xf32>
    %c0_17 = arith.constant 0 : index
    %c0_18 = arith.constant 0 : index
    %c0_19 = arith.constant 0 : index
    %17 = vector.load %arg3[%c0_17, %c0_18, %c0_19] : memref<1x1x64xf32, #tpu.memory_space<vmem>>, vector<1x1x64xf32>
    %18 = vector.shape_cast %17 : vector<1x1x64xf32> to vector<1x64xf32>
    %19 = vector.broadcast %18 : vector<1x64xf32> to vector<32x64xf32>
    %20 = arith.addf %16, %19 : vector<32x64xf32>
    %cst_20 = arith.constant 0.000000e+00 : f32
    %21 = vector.broadcast %cst_20 : f32 to vector<32x64xf32>
    %22 = arith.cmpf oge, %20, %21 : vector<32x64xf32>
    %cst_21 = arith.constant 2.000000e-01 : f32
    %23 = vector.broadcast %cst_21 : f32 to vector<32x64xf32>
    %24 = arith.mulf %23, %20 : vector<32x64xf32>
    %25 = arith.select %22, %20, %24 : vector<32x64xi1>, vector<32x64xf32>
    %cst_22 = arith.constant dense<0.000000e+00> : vector<64xf32>
    %26 = vector.multi_reduction <add>, %25, %cst_22 [0] : vector<32x64xf32> to vector<64xf32>
    %27 = vector.shape_cast %26 : vector<64xf32> to vector<1x64xf32>
    %cst_23 = arith.constant 3.200000e+01 : f32
    %28 = vector.broadcast %cst_23 : f32 to vector<1x64xf32>
    %29 = arith.divf %27, %28 : vector<1x64xf32>
    %30 = vector.broadcast %29 : vector<1x64xf32> to vector<32x64xf32>
    %31 = arith.subf %25, %30 : vector<32x64xf32>
    %32 = arith.mulf %31, %31 : vector<32x64xf32>
    %cst_24 = arith.constant dense<0.000000e+00> : vector<64xf32>
    %33 = vector.multi_reduction <add>, %32, %cst_24 [0] : vector<32x64xf32> to vector<64xf32>
    %34 = vector.shape_cast %33 : vector<64xf32> to vector<1x64xf32>
    %cst_25 = arith.constant 3.200000e+01 : f32
    %35 = vector.broadcast %cst_25 : f32 to vector<1x64xf32>
    %36 = arith.divf %34, %35 : vector<1x64xf32>
    %37 = vector.broadcast %29 : vector<1x64xf32> to vector<32x64xf32>
    %38 = arith.subf %25, %37 : vector<32x64xf32>
    %cst_26 = arith.constant 9.99999974E-6 : f32
    %39 = vector.broadcast %cst_26 : f32 to vector<1x64xf32>
    %40 = arith.addf %36, %39 : vector<1x64xf32>
    %41 = math.rsqrt %40 : vector<1x64xf32>
    %42 = vector.broadcast %41 : vector<1x64xf32> to vector<32x64xf32>
    %43 = arith.mulf %38, %42 : vector<32x64xf32>
    %c0_27 = arith.constant 0 : index
    %c0_28 = arith.constant 0 : index
    %c0_29 = arith.constant 0 : index
    %44 = vector.load %arg4[%c0_27, %c0_28, %c0_29] : memref<1x32x64xbf16, #tpu.memory_space<vmem>>, vector<1x32x64xbf16>
    %45 = vector.shape_cast %44 : vector<1x32x64xbf16> to vector<32x64xbf16>
    %46 = arith.extf %45 : vector<32x64xbf16> to vector<32x64xf32>
    %47 = arith.addf %43, %46 : vector<32x64xf32>
    %48 = arith.truncf %47 : vector<32x64xf32> to vector<32x64xbf16>
    %c0_30 = arith.constant 0 : index
    %c0_31 = arith.constant 0 : index
    %c0_32 = arith.constant 0 : index
    %49 = vector.load %arg5[%c0_30, %c0_31, %c0_32] : memref<1x32x64xbf16, #tpu.memory_space<vmem>>, vector<1x32x64xbf16>
    %50 = vector.shape_cast %49 : vector<1x32x64xbf16> to vector<32x64xbf16>
    %51 = vector.shape_cast %48 : vector<32x64xbf16> to vector<1x32x64xbf16>
    tpu.vector_store %arg5[%c0_30, %c0_31, %c0_32], %51 {strides = array<i32>} : memref<1x32x64xbf16, #tpu.memory_space<vmem>>, vector<1x32x64xbf16>,
    return
  }
  func.func @transform_0(%arg0: i32) -> (i32, i32, i32) {
    %c0_i32 = arith.constant 0 : i32
    %c0_i32_0 = arith.constant 0 : i32
    %c0_i32_1 = arith.constant 0 : i32
    return %arg0, %c0_i32, %c0_i32_0 : i32, i32, i32
  }
  func.func @transform_1(%arg0: i32) -> (i32, i32, i32) {
    %c0_i32 = arith.constant 0 : i32
    %c0_i32_0 = arith.constant 0 : i32
    %c0_i32_1 = arith.constant 0 : i32
    %c0_i32_2 = arith.constant 0 : i32
    return %c0_i32, %c0_i32_0, %c0_i32_1 : i32, i32, i32
  }
  func.func @transform_2(%arg0: i32) -> (i32, i32, i32) {
    %c0_i32 = arith.constant 0 : i32
    %c0_i32_0 = arith.constant 0 : i32
    %c0_i32_1 = arith.constant 0 : i32
    return %arg0, %c0_i32, %c0_i32_0 : i32, i32, i32
  }
  func.func @transform_3(%arg0: i32) -> (i32, i32, i32) {
    %c0_i32 = arith.constant 0 : i32
    %c0_i32_0 = arith.constant 0 : i32
    %c0_i32_1 = arith.constant 0 : i32
    return %arg0, %c0_i32, %c0_i32_0 : i32, i32, i32
  }
  func.func @transform_4(%arg0: i32) -> (i32, i32, i32) {
    %c0_i32 = arith.constant 0 : i32
    %c0_i32_0 = arith.constant 0 : i32
    %c0_i32_1 = arith.constant 0 : i32
    return %arg0, %c0_i32, %c0_i32_0 : i32, i32, i32
  }
}

module attributes {stable_mosaic.version = 11 : i64} {
  func.func @_conv_leaky_kernel(%arg0: i32, %arg1: memref<1x34x64xbf16, #tpu.memory_space<vmem>>, %arg2: memref<3x64x128xbf16, #tpu.memory_space<vmem>>, %arg3: memref<1x1x128xf32, #tpu.memory_space<vmem>>, %arg4: memref<1x32x128xbf16, #tpu.memory_space<vmem>>) attributes {dimension_semantics = [#tpu.dimension_semantics<parallel>], iteration_bounds = array<i64: 2>, scalar_prefetch = 0 : i64, scratch_operands = 0 : i64, tpu.core_type = #tpu.core_type<tc>, window_params = [{transform_indices = @transform_0, window_bounds = array<i64: 1, 34, 64>}, {pipeline_mode = #tpu.pipeline_mode<synchronous>, transform_indices = @transform_1, window_bounds = array<i64: 3, 64, 128>}, {transform_indices = @transform_2, window_bounds = array<i64: 1, 1, 128>}, {transform_indices = @transform_3, window_bounds = array<i64: 1, 32, 128>}]} {
    %c0 = arith.constant 0 : index
    %c0_0 = arith.constant 0 : index
    %c0_1 = arith.constant 0 : index
    %0 = vector.load %arg1[%c0, %c0_0, %c0_1] : memref<1x34x64xbf16, #tpu.memory_space<vmem>>, vector<1x32x64xbf16>
    %1 = vector.shape_cast %0 : vector<1x32x64xbf16> to vector<32x64xbf16>
    %c0_2 = arith.constant 0 : index
    %c0_3 = arith.constant 0 : index
    %c0_4 = arith.constant 0 : index
    %2 = vector.load %arg2[%c0_2, %c0_3, %c0_4] : memref<3x64x128xbf16, #tpu.memory_space<vmem>>, vector<1x64x128xbf16>
    %3 = vector.shape_cast %2 : vector<1x64x128xbf16> to vector<64x128xbf16>
    %cst = arith.constant dense<0.000000e+00> : vector<32x128xf32>
    %4 = tpu.matmul %1, %3, %cst {dimension_numbers = #tpu.dot_dimension_numbers<[1], [0], [0], [1], [0, 0, 1, 1], [], []>} : vector<32x64xbf16>, vector<64x128xbf16>, vector<32x128xf32> -> vector<32x128xf32>
    %c0_5 = arith.constant 0 : index
    %c1 = arith.constant 1 : index
    %c0_6 = arith.constant 0 : index
    %5 = vector.load %arg1[%c0_5, %c1, %c0_6] : memref<1x34x64xbf16, #tpu.memory_space<vmem>>, vector<1x32x64xbf16>
    %6 = vector.shape_cast %5 : vector<1x32x64xbf16> to vector<32x64xbf16>
    %c1_7 = arith.constant 1 : index
    %c0_8 = arith.constant 0 : index
    %c0_9 = arith.constant 0 : index
    %7 = vector.load %arg2[%c1_7, %c0_8, %c0_9] : memref<3x64x128xbf16, #tpu.memory_space<vmem>>, vector<1x64x128xbf16>
    %8 = vector.shape_cast %7 : vector<1x64x128xbf16> to vector<64x128xbf16>
    %cst_10 = arith.constant dense<0.000000e+00> : vector<32x128xf32>
    %9 = tpu.matmul %6, %8, %cst_10 {dimension_numbers = #tpu.dot_dimension_numbers<[1], [0], [0], [1], [0, 0, 1, 1], [], []>} : vector<32x64xbf16>, vector<64x128xbf16>, vector<32x128xf32> -> vector<32x128xf32>
    %10 = arith.addf %4, %9 : vector<32x128xf32>
    %c0_11 = arith.constant 0 : index
    %c2 = arith.constant 2 : index
    %c0_12 = arith.constant 0 : index
    %11 = vector.load %arg1[%c0_11, %c2, %c0_12] : memref<1x34x64xbf16, #tpu.memory_space<vmem>>, vector<1x32x64xbf16>
    %12 = vector.shape_cast %11 : vector<1x32x64xbf16> to vector<32x64xbf16>
    %c2_13 = arith.constant 2 : index
    %c0_14 = arith.constant 0 : index
    %c0_15 = arith.constant 0 : index
    %13 = vector.load %arg2[%c2_13, %c0_14, %c0_15] : memref<3x64x128xbf16, #tpu.memory_space<vmem>>, vector<1x64x128xbf16>
    %14 = vector.shape_cast %13 : vector<1x64x128xbf16> to vector<64x128xbf16>
    %cst_16 = arith.constant dense<0.000000e+00> : vector<32x128xf32>
    %15 = tpu.matmul %12, %14, %cst_16 {dimension_numbers = #tpu.dot_dimension_numbers<[1], [0], [0], [1], [0, 0, 1, 1], [], []>} : vector<32x64xbf16>, vector<64x128xbf16>, vector<32x128xf32> -> vector<32x128xf32>
    %16 = arith.addf %10, %15 : vector<32x128xf32>
    %c0_17 = arith.constant 0 : index
    %c0_18 = arith.constant 0 : index
    %c0_19 = arith.constant 0 : index
    %17 = vector.load %arg3[%c0_17, %c0_18, %c0_19] : memref<1x1x128xf32, #tpu.memory_space<vmem>>, vector<1x1x128xf32>
    %18 = vector.shape_cast %17 : vector<1x1x128xf32> to vector<1x128xf32>
    %19 = vector.broadcast %18 : vector<1x128xf32> to vector<32x128xf32>
    %20 = arith.addf %16, %19 : vector<32x128xf32>
    %cst_20 = arith.constant 0.000000e+00 : f32
    %21 = vector.broadcast %cst_20 : f32 to vector<32x128xf32>
    %22 = arith.cmpf oge, %20, %21 : vector<32x128xf32>
    %cst_21 = arith.constant 2.000000e-01 : f32
    %23 = vector.broadcast %cst_21 : f32 to vector<32x128xf32>
    %24 = arith.mulf %23, %20 : vector<32x128xf32>
    %25 = arith.select %22, %20, %24 : vector<32x128xi1>, vector<32x128xf32>
    %26 = arith.truncf %25 : vector<32x128xf32> to vector<32x128xbf16>
    %c0_22 = arith.constant 0 : index
    %c0_23 = arith.constant 0 : index
    %c0_24 = arith.constant 0 : index
    %27 = vector.load %arg4[%c0_22, %c0_23, %c0_24] : memref<1x32x128xbf16, #tpu.memory_space<vmem>>, vector<1x32x128xbf16>
    %28 = vector.shape_cast %27 : vector<1x32x128xbf16> to vector<32x128xbf16>
    %29 = vector.shape_cast %26 : vector<32x128xbf16> to vector<1x32x128xbf16>
    tpu.vector_store %arg4[%c0_22, %c0_23, %c0_24], %29 {strides = array<i32>} : memref<1x32x128xbf16, #tpu.memory_space<vmem>>, vector<1x32x128xbf16>,
    return
  }
  func.func @transform_0(%arg0: i32) -> (i32, i32, i32) {
    %c0_i32 = arith.constant 0 : i32
    %c0_i32_0 = arith.constant 0 : i32
    %c0_i32_1 = arith.constant 0 : i32
    return %arg0, %c0_i32, %c0_i32_0 : i32, i32, i32
  }
  func.func @transform_1(%arg0: i32) -> (i32, i32, i32) {
    %c0_i32 = arith.constant 0 : i32
    %c0_i32_0 = arith.constant 0 : i32
    %c0_i32_1 = arith.constant 0 : i32
    %c0_i32_2 = arith.constant 0 : i32
    return %c0_i32, %c0_i32_0, %c0_i32_1 : i32, i32, i32
  }
  func.func @transform_2(%arg0: i32) -> (i32, i32, i32) {
    %c0_i32 = arith.constant 0 : i32
    %c0_i32_0 = arith.constant 0 : i32
    %c0_i32_1 = arith.constant 0 : i32
    return %arg0, %c0_i32, %c0_i32_0 : i32, i32, i32
  }
  func.func @transform_3(%arg0: i32) -> (i32, i32, i32) {
    %c0_i32 = arith.constant 0 : i32
    %c0_i32_0 = arith.constant 0 : i32
    %c0_i32_1 = arith.constant 0 : i32
    return %arg0, %c0_i32, %c0_i32_0 : i32, i32, i32
  }
}

module attributes {stable_mosaic.version = 11 : i64} {
  func.func @_conv_norm_res_kernel(%arg0: i32, %arg1: memref<1x66x64xbf16, #tpu.memory_space<vmem>>, %arg2: memref<3x64x64xbf16, #tpu.memory_space<vmem>>, %arg3: memref<1x1x64xf32, #tpu.memory_space<vmem>>, %arg4: memref<1x64x64xbf16, #tpu.memory_space<vmem>>, %arg5: memref<1x64x64xbf16, #tpu.memory_space<vmem>>) attributes {dimension_semantics = [#tpu.dimension_semantics<parallel>], iteration_bounds = array<i64: 2>, scalar_prefetch = 0 : i64, scratch_operands = 0 : i64, tpu.core_type = #tpu.core_type<tc>, window_params = [{transform_indices = @transform_0, window_bounds = array<i64: 1, 66, 64>}, {pipeline_mode = #tpu.pipeline_mode<synchronous>, transform_indices = @transform_1, window_bounds = array<i64: 3, 64, 64>}, {transform_indices = @transform_2, window_bounds = array<i64: 1, 1, 64>}, {transform_indices = @transform_3, window_bounds = array<i64: 1, 64, 64>}, {transform_indices = @transform_4, window_bounds = array<i64: 1, 64, 64>}]} {
    %c0 = arith.constant 0 : index
    %c0_0 = arith.constant 0 : index
    %c0_1 = arith.constant 0 : index
    %0 = vector.load %arg1[%c0, %c0_0, %c0_1] : memref<1x66x64xbf16, #tpu.memory_space<vmem>>, vector<1x64x64xbf16>
    %1 = vector.shape_cast %0 : vector<1x64x64xbf16> to vector<64x64xbf16>
    %c0_2 = arith.constant 0 : index
    %c0_3 = arith.constant 0 : index
    %c0_4 = arith.constant 0 : index
    %2 = vector.load %arg2[%c0_2, %c0_3, %c0_4] : memref<3x64x64xbf16, #tpu.memory_space<vmem>>, vector<1x64x64xbf16>
    %3 = vector.shape_cast %2 : vector<1x64x64xbf16> to vector<64x64xbf16>
    %cst = arith.constant dense<0.000000e+00> : vector<64x64xf32>
    %4 = tpu.matmul %1, %3, %cst {dimension_numbers = #tpu.dot_dimension_numbers<[1], [0], [0], [1], [0, 0, 1, 1], [], []>} : vector<64x64xbf16>, vector<64x64xbf16>, vector<64x64xf32> -> vector<64x64xf32>
    %c0_5 = arith.constant 0 : index
    %c1 = arith.constant 1 : index
    %c0_6 = arith.constant 0 : index
    %5 = vector.load %arg1[%c0_5, %c1, %c0_6] : memref<1x66x64xbf16, #tpu.memory_space<vmem>>, vector<1x64x64xbf16>
    %6 = vector.shape_cast %5 : vector<1x64x64xbf16> to vector<64x64xbf16>
    %c1_7 = arith.constant 1 : index
    %c0_8 = arith.constant 0 : index
    %c0_9 = arith.constant 0 : index
    %7 = vector.load %arg2[%c1_7, %c0_8, %c0_9] : memref<3x64x64xbf16, #tpu.memory_space<vmem>>, vector<1x64x64xbf16>
    %8 = vector.shape_cast %7 : vector<1x64x64xbf16> to vector<64x64xbf16>
    %cst_10 = arith.constant dense<0.000000e+00> : vector<64x64xf32>
    %9 = tpu.matmul %6, %8, %cst_10 {dimension_numbers = #tpu.dot_dimension_numbers<[1], [0], [0], [1], [0, 0, 1, 1], [], []>} : vector<64x64xbf16>, vector<64x64xbf16>, vector<64x64xf32> -> vector<64x64xf32>
    %10 = arith.addf %4, %9 : vector<64x64xf32>
    %c0_11 = arith.constant 0 : index
    %c2 = arith.constant 2 : index
    %c0_12 = arith.constant 0 : index
    %11 = vector.load %arg1[%c0_11, %c2, %c0_12] : memref<1x66x64xbf16, #tpu.memory_space<vmem>>, vector<1x64x64xbf16>
    %12 = vector.shape_cast %11 : vector<1x64x64xbf16> to vector<64x64xbf16>
    %c2_13 = arith.constant 2 : index
    %c0_14 = arith.constant 0 : index
    %c0_15 = arith.constant 0 : index
    %13 = vector.load %arg2[%c2_13, %c0_14, %c0_15] : memref<3x64x64xbf16, #tpu.memory_space<vmem>>, vector<1x64x64xbf16>
    %14 = vector.shape_cast %13 : vector<1x64x64xbf16> to vector<64x64xbf16>
    %cst_16 = arith.constant dense<0.000000e+00> : vector<64x64xf32>
    %15 = tpu.matmul %12, %14, %cst_16 {dimension_numbers = #tpu.dot_dimension_numbers<[1], [0], [0], [1], [0, 0, 1, 1], [], []>} : vector<64x64xbf16>, vector<64x64xbf16>, vector<64x64xf32> -> vector<64x64xf32>
    %16 = arith.addf %10, %15 : vector<64x64xf32>
    %c0_17 = arith.constant 0 : index
    %c0_18 = arith.constant 0 : index
    %c0_19 = arith.constant 0 : index
    %17 = vector.load %arg3[%c0_17, %c0_18, %c0_19] : memref<1x1x64xf32, #tpu.memory_space<vmem>>, vector<1x1x64xf32>
    %18 = vector.shape_cast %17 : vector<1x1x64xf32> to vector<1x64xf32>
    %19 = vector.broadcast %18 : vector<1x64xf32> to vector<64x64xf32>
    %20 = arith.addf %16, %19 : vector<64x64xf32>
    %cst_20 = arith.constant 0.000000e+00 : f32
    %21 = vector.broadcast %cst_20 : f32 to vector<64x64xf32>
    %22 = arith.cmpf oge, %20, %21 : vector<64x64xf32>
    %cst_21 = arith.constant 2.000000e-01 : f32
    %23 = vector.broadcast %cst_21 : f32 to vector<64x64xf32>
    %24 = arith.mulf %23, %20 : vector<64x64xf32>
    %25 = arith.select %22, %20, %24 : vector<64x64xi1>, vector<64x64xf32>
    %cst_22 = arith.constant dense<0.000000e+00> : vector<64xf32>
    %26 = vector.multi_reduction <add>, %25, %cst_22 [0] : vector<64x64xf32> to vector<64xf32>
    %27 = vector.shape_cast %26 : vector<64xf32> to vector<1x64xf32>
    %cst_23 = arith.constant 6.400000e+01 : f32
    %28 = vector.broadcast %cst_23 : f32 to vector<1x64xf32>
    %29 = arith.divf %27, %28 : vector<1x64xf32>
    %30 = vector.broadcast %29 : vector<1x64xf32> to vector<64x64xf32>
    %31 = arith.subf %25, %30 : vector<64x64xf32>
    %32 = arith.mulf %31, %31 : vector<64x64xf32>
    %cst_24 = arith.constant dense<0.000000e+00> : vector<64xf32>
    %33 = vector.multi_reduction <add>, %32, %cst_24 [0] : vector<64x64xf32> to vector<64xf32>
    %34 = vector.shape_cast %33 : vector<64xf32> to vector<1x64xf32>
    %cst_25 = arith.constant 6.400000e+01 : f32
    %35 = vector.broadcast %cst_25 : f32 to vector<1x64xf32>
    %36 = arith.divf %34, %35 : vector<1x64xf32>
    %37 = vector.broadcast %29 : vector<1x64xf32> to vector<64x64xf32>
    %38 = arith.subf %25, %37 : vector<64x64xf32>
    %cst_26 = arith.constant 9.99999974E-6 : f32
    %39 = vector.broadcast %cst_26 : f32 to vector<1x64xf32>
    %40 = arith.addf %36, %39 : vector<1x64xf32>
    %41 = math.rsqrt %40 : vector<1x64xf32>
    %42 = vector.broadcast %41 : vector<1x64xf32> to vector<64x64xf32>
    %43 = arith.mulf %38, %42 : vector<64x64xf32>
    %c0_27 = arith.constant 0 : index
    %c0_28 = arith.constant 0 : index
    %c0_29 = arith.constant 0 : index
    %44 = vector.load %arg4[%c0_27, %c0_28, %c0_29] : memref<1x64x64xbf16, #tpu.memory_space<vmem>>, vector<1x64x64xbf16>
    %45 = vector.shape_cast %44 : vector<1x64x64xbf16> to vector<64x64xbf16>
    %46 = arith.extf %45 : vector<64x64xbf16> to vector<64x64xf32>
    %47 = arith.addf %43, %46 : vector<64x64xf32>
    %48 = arith.truncf %47 : vector<64x64xf32> to vector<64x64xbf16>
    %c0_30 = arith.constant 0 : index
    %c0_31 = arith.constant 0 : index
    %c0_32 = arith.constant 0 : index
    %49 = vector.load %arg5[%c0_30, %c0_31, %c0_32] : memref<1x64x64xbf16, #tpu.memory_space<vmem>>, vector<1x64x64xbf16>
    %50 = vector.shape_cast %49 : vector<1x64x64xbf16> to vector<64x64xbf16>
    %51 = vector.shape_cast %48 : vector<64x64xbf16> to vector<1x64x64xbf16>
    tpu.vector_store %arg5[%c0_30, %c0_31, %c0_32], %51 {strides = array<i32>} : memref<1x64x64xbf16, #tpu.memory_space<vmem>>, vector<1x64x64xbf16>,
    return
  }
  func.func @transform_0(%arg0: i32) -> (i32, i32, i32) {
    %c0_i32 = arith.constant 0 : i32
    %c0_i32_0 = arith.constant 0 : i32
    %c0_i32_1 = arith.constant 0 : i32
    return %arg0, %c0_i32, %c0_i32_0 : i32, i32, i32
  }
  func.func @transform_1(%arg0: i32) -> (i32, i32, i32) {
    %c0_i32 = arith.constant 0 : i32
    %c0_i32_0 = arith.constant 0 : i32
    %c0_i32_1 = arith.constant 0 : i32
    %c0_i32_2 = arith.constant 0 : i32
    return %c0_i32, %c0_i32_0, %c0_i32_1 : i32, i32, i32
  }
  func.func @transform_2(%arg0: i32) -> (i32, i32, i32) {
    %c0_i32 = arith.constant 0 : i32
    %c0_i32_0 = arith.constant 0 : i32
    %c0_i32_1 = arith.constant 0 : i32
    return %arg0, %c0_i32, %c0_i32_0 : i32, i32, i32
  }
  func.func @transform_3(%arg0: i32) -> (i32, i32, i32) {
    %c0_i32 = arith.constant 0 : i32
    %c0_i32_0 = arith.constant 0 : i32
    %c0_i32_1 = arith.constant 0 : i32
    return %arg0, %c0_i32, %c0_i32_0 : i32, i32, i32
  }
  func.func @transform_4(%arg0: i32) -> (i32, i32, i32) {
    %c0_i32 = arith.constant 0 : i32
    %c0_i32_0 = arith.constant 0 : i32
    %c0_i32_1 = arith.constant 0 : i32
    return %arg0, %c0_i32, %c0_i32_0 : i32, i32, i32
  }
}

module attributes {stable_mosaic.version = 11 : i64} {
  func.func @_dense_block_kernel(%arg0: i32, %arg1: memref<1x64x64xbf16, #tpu.memory_space<vmem>>, %arg2: memref<64x64xbf16, #tpu.memory_space<vmem>>, %arg3: memref<1x1x64xf32, #tpu.memory_space<vmem>>, %arg4: memref<64x64xbf16, #tpu.memory_space<vmem>>, %arg5: memref<1x1x64xf32, #tpu.memory_space<vmem>>, %arg6: memref<1x64x64xbf16, #tpu.memory_space<vmem>>) attributes {dimension_semantics = [#tpu.dimension_semantics<parallel>], iteration_bounds = array<i64: 2>, scalar_prefetch = 0 : i64, scratch_operands = 0 : i64, tpu.core_type = #tpu.core_type<tc>, window_params = [{transform_indices = @transform_0, window_bounds = array<i64: 1, 64, 64>}, {pipeline_mode = #tpu.pipeline_mode<synchronous>, transform_indices = @transform_1, window_bounds = array<i64: 64, 64>}, {transform_indices = @transform_2, window_bounds = array<i64: 1, 1, 64>}, {pipeline_mode = #tpu.pipeline_mode<synchronous>, transform_indices = @transform_3, window_bounds = array<i64: 64, 64>}, {transform_indices = @transform_4, window_bounds = array<i64: 1, 1, 64>}, {transform_indices = @transform_5, window_bounds = array<i64: 1, 64, 64>}]} {
    %c0 = arith.constant 0 : index
    %c0_0 = arith.constant 0 : index
    %c0_1 = arith.constant 0 : index
    %0 = vector.load %arg1[%c0, %c0_0, %c0_1] : memref<1x64x64xbf16, #tpu.memory_space<vmem>>, vector<1x64x64xbf16>
    %1 = vector.shape_cast %0 : vector<1x64x64xbf16> to vector<64x64xbf16>
    %c0_2 = arith.constant 0 : index
    %c0_3 = arith.constant 0 : index
    %2 = vector.load %arg2[%c0_2, %c0_3] : memref<64x64xbf16, #tpu.memory_space<vmem>>, vector<64x64xbf16>
    %cst = arith.constant dense<0.000000e+00> : vector<64x64xf32>
    %3 = tpu.matmul %1, %2, %cst {dimension_numbers = #tpu.dot_dimension_numbers<[1], [0], [0], [1], [0, 0, 1, 1], [], []>} : vector<64x64xbf16>, vector<64x64xbf16>, vector<64x64xf32> -> vector<64x64xf32>
    %c0_4 = arith.constant 0 : index
    %c0_5 = arith.constant 0 : index
    %c0_6 = arith.constant 0 : index
    %4 = vector.load %arg3[%c0_4, %c0_5, %c0_6] : memref<1x1x64xf32, #tpu.memory_space<vmem>>, vector<1x1x64xf32>
    %5 = vector.shape_cast %4 : vector<1x1x64xf32> to vector<1x64xf32>
    %6 = vector.broadcast %5 : vector<1x64xf32> to vector<64x64xf32>
    %7 = arith.addf %3, %6 : vector<64x64xf32>
    %cst_7 = arith.constant 0.000000e+00 : f32
    %8 = vector.broadcast %cst_7 : f32 to vector<64x64xf32>
    %9 = arith.cmpf oge, %7, %8 : vector<64x64xf32>
    %cst_8 = arith.constant 2.000000e-01 : f32
    %10 = vector.broadcast %cst_8 : f32 to vector<64x64xf32>
    %11 = arith.mulf %10, %7 : vector<64x64xf32>
    %12 = arith.select %9, %7, %11 : vector<64x64xi1>, vector<64x64xf32>
    %13 = arith.truncf %12 : vector<64x64xf32> to vector<64x64xbf16>
    %c0_9 = arith.constant 0 : index
    %c0_10 = arith.constant 0 : index
    %14 = vector.load %arg4[%c0_9, %c0_10] : memref<64x64xbf16, #tpu.memory_space<vmem>>, vector<64x64xbf16>
    %cst_11 = arith.constant dense<0.000000e+00> : vector<64x64xf32>
    %15 = tpu.matmul %13, %14, %cst_11 {dimension_numbers = #tpu.dot_dimension_numbers<[1], [0], [0], [1], [0, 0, 1, 1], [], []>} : vector<64x64xbf16>, vector<64x64xbf16>, vector<64x64xf32> -> vector<64x64xf32>
    %c0_12 = arith.constant 0 : index
    %c0_13 = arith.constant 0 : index
    %c0_14 = arith.constant 0 : index
    %16 = vector.load %arg5[%c0_12, %c0_13, %c0_14] : memref<1x1x64xf32, #tpu.memory_space<vmem>>, vector<1x1x64xf32>
    %17 = vector.shape_cast %16 : vector<1x1x64xf32> to vector<1x64xf32>
    %18 = vector.broadcast %17 : vector<1x64xf32> to vector<64x64xf32>
    %19 = arith.addf %15, %18 : vector<64x64xf32>
    %cst_15 = arith.constant 0.000000e+00 : f32
    %20 = vector.broadcast %cst_15 : f32 to vector<64x64xf32>
    %21 = arith.cmpf oge, %19, %20 : vector<64x64xf32>
    %cst_16 = arith.constant 2.000000e-01 : f32
    %22 = vector.broadcast %cst_16 : f32 to vector<64x64xf32>
    %23 = arith.mulf %22, %19 : vector<64x64xf32>
    %24 = arith.select %21, %19, %23 : vector<64x64xi1>, vector<64x64xf32>
    %cst_17 = arith.constant dense<0.000000e+00> : vector<64xf32>
    %25 = vector.multi_reduction <add>, %24, %cst_17 [0] : vector<64x64xf32> to vector<64xf32>
    %26 = vector.shape_cast %25 : vector<64xf32> to vector<1x64xf32>
    %cst_18 = arith.constant 6.400000e+01 : f32
    %27 = vector.broadcast %cst_18 : f32 to vector<1x64xf32>
    %28 = arith.divf %26, %27 : vector<1x64xf32>
    %29 = vector.broadcast %28 : vector<1x64xf32> to vector<64x64xf32>
    %30 = arith.subf %24, %29 : vector<64x64xf32>
    %31 = arith.mulf %30, %30 : vector<64x64xf32>
    %cst_19 = arith.constant dense<0.000000e+00> : vector<64xf32>
    %32 = vector.multi_reduction <add>, %31, %cst_19 [0] : vector<64x64xf32> to vector<64xf32>
    %33 = vector.shape_cast %32 : vector<64xf32> to vector<1x64xf32>
    %cst_20 = arith.constant 6.400000e+01 : f32
    %34 = vector.broadcast %cst_20 : f32 to vector<1x64xf32>
    %35 = arith.divf %33, %34 : vector<1x64xf32>
    %36 = vector.broadcast %28 : vector<1x64xf32> to vector<64x64xf32>
    %37 = arith.subf %24, %36 : vector<64x64xf32>
    %cst_21 = arith.constant 9.99999974E-6 : f32
    %38 = vector.broadcast %cst_21 : f32 to vector<1x64xf32>
    %39 = arith.addf %35, %38 : vector<1x64xf32>
    %40 = math.rsqrt %39 : vector<1x64xf32>
    %41 = vector.broadcast %40 : vector<1x64xf32> to vector<64x64xf32>
    %42 = arith.mulf %37, %41 : vector<64x64xf32>
    %43 = arith.extf %1 : vector<64x64xbf16> to vector<64x64xf32>
    %44 = arith.addf %42, %43 : vector<64x64xf32>
    %45 = arith.truncf %44 : vector<64x64xf32> to vector<64x64xbf16>
    %c0_22 = arith.constant 0 : index
    %c0_23 = arith.constant 0 : index
    %c0_24 = arith.constant 0 : index
    %46 = vector.load %arg6[%c0_22, %c0_23, %c0_24] : memref<1x64x64xbf16, #tpu.memory_space<vmem>>, vector<1x64x64xbf16>
    %47 = vector.shape_cast %46 : vector<1x64x64xbf16> to vector<64x64xbf16>
    %48 = vector.shape_cast %45 : vector<64x64xbf16> to vector<1x64x64xbf16>
    tpu.vector_store %arg6[%c0_22, %c0_23, %c0_24], %48 {strides = array<i32>} : memref<1x64x64xbf16, #tpu.memory_space<vmem>>, vector<1x64x64xbf16>,
    return
  }
  func.func @transform_0(%arg0: i32) -> (i32, i32, i32) {
    %c0_i32 = arith.constant 0 : i32
    %c0_i32_0 = arith.constant 0 : i32
    %c0_i32_1 = arith.constant 0 : i32
    return %arg0, %c0_i32, %c0_i32_0 : i32, i32, i32
  }
  func.func @transform_1(%arg0: i32) -> (i32, i32) {
    %c0_i32 = arith.constant 0 : i32
    %c0_i32_0 = arith.constant 0 : i32
    %c0_i32_1 = arith.constant 0 : i32
    return %c0_i32, %c0_i32_0 : i32, i32
  }
  func.func @transform_2(%arg0: i32) -> (i32, i32, i32) {
    %c0_i32 = arith.constant 0 : i32
    %c0_i32_0 = arith.constant 0 : i32
    %c0_i32_1 = arith.constant 0 : i32
    return %arg0, %c0_i32, %c0_i32_0 : i32, i32, i32
  }
  func.func @transform_3(%arg0: i32) -> (i32, i32) {
    %c0_i32 = arith.constant 0 : i32
    %c0_i32_0 = arith.constant 0 : i32
    %c0_i32_1 = arith.constant 0 : i32
    return %c0_i32, %c0_i32_0 : i32, i32
  }
  func.func @transform_4(%arg0: i32) -> (i32, i32, i32) {
    %c0_i32 = arith.constant 0 : i32
    %c0_i32_0 = arith.constant 0 : i32
    %c0_i32_1 = arith.constant 0 : i32
    return %arg0, %c0_i32, %c0_i32_0 : i32, i32, i32
  }
  func.func @transform_5(%arg0: i32) -> (i32, i32, i32) {
    %c0_i32 = arith.constant 0 : i32
    %c0_i32_0 = arith.constant 0 : i32
    %c0_i32_1 = arith.constant 0 : i32
    return %arg0, %c0_i32, %c0_i32_0 : i32, i32, i32
  }
}

module attributes {stable_mosaic.version = 11 : i64} {
  func.func @_gru_proj_kernel(%arg0: i32, %arg1: memref<128x64xbf16, #tpu.memory_space<vmem>>, %arg2: memref<64x96xbf16, #tpu.memory_space<vmem>>, %arg3: memref<64x96xbf16, #tpu.memory_space<vmem>>, %arg4: memref<128x96xbf16, #tpu.memory_space<vmem>>, %arg5: memref<128x96xbf16, #tpu.memory_space<vmem>>) attributes {dimension_semantics = [#tpu.dimension_semantics<parallel>], iteration_bounds = array<i64: 1>, scalar_prefetch = 0 : i64, scratch_operands = 0 : i64, tpu.core_type = #tpu.core_type<tc>, window_params = [{transform_indices = @transform_0, window_bounds = array<i64: 128, 64>}, {pipeline_mode = #tpu.pipeline_mode<synchronous>, transform_indices = @transform_1, window_bounds = array<i64: 64, 96>}, {pipeline_mode = #tpu.pipeline_mode<synchronous>, transform_indices = @transform_2, window_bounds = array<i64: 64, 96>}, {transform_indices = @transform_3, window_bounds = array<i64: 128, 96>}, {transform_indices = @transform_4, window_bounds = array<i64: 128, 96>}]} {
    %c0 = arith.constant 0 : index
    %c0_0 = arith.constant 0 : index
    %0 = vector.load %arg1[%c0, %c0_0] : memref<128x64xbf16, #tpu.memory_space<vmem>>, vector<128x64xbf16>
    %c0_1 = arith.constant 0 : index
    %c0_2 = arith.constant 0 : index
    %1 = vector.load %arg2[%c0_1, %c0_2] : memref<64x96xbf16, #tpu.memory_space<vmem>>, vector<64x96xbf16>
    %cst = arith.constant dense<0.000000e+00> : vector<128x96xf32>
    %2 = tpu.matmul %0, %1, %cst {dimension_numbers = #tpu.dot_dimension_numbers<[1], [0], [0], [1], [0, 0, 1, 1], [], []>} : vector<128x64xbf16>, vector<64x96xbf16>, vector<128x96xf32> -> vector<128x96xf32>
    %3 = arith.truncf %2 : vector<128x96xf32> to vector<128x96xbf16>
    %c0_3 = arith.constant 0 : index
    %c0_4 = arith.constant 0 : index
    %4 = vector.load %arg4[%c0_3, %c0_4] : memref<128x96xbf16, #tpu.memory_space<vmem>>, vector<128x96xbf16>
    tpu.vector_store %arg4[%c0_3, %c0_4], %3 {strides = array<i32>} : memref<128x96xbf16, #tpu.memory_space<vmem>>, vector<128x96xbf16>,
    %c0_5 = arith.constant 0 : index
    %c0_6 = arith.constant 0 : index
    %5 = vector.load %arg3[%c0_5, %c0_6] : memref<64x96xbf16, #tpu.memory_space<vmem>>, vector<64x96xbf16>
    %cst_7 = arith.constant dense<0.000000e+00> : vector<128x96xf32>
    %6 = tpu.matmul %0, %5, %cst_7 {dimension_numbers = #tpu.dot_dimension_numbers<[1], [0], [0], [1], [0, 0, 1, 1], [], []>} : vector<128x64xbf16>, vector<64x96xbf16>, vector<128x96xf32> -> vector<128x96xf32>
    %7 = arith.truncf %6 : vector<128x96xf32> to vector<128x96xbf16>
    %c0_8 = arith.constant 0 : index
    %c0_9 = arith.constant 0 : index
    %8 = vector.load %arg5[%c0_8, %c0_9] : memref<128x96xbf16, #tpu.memory_space<vmem>>, vector<128x96xbf16>
    tpu.vector_store %arg5[%c0_8, %c0_9], %7 {strides = array<i32>} : memref<128x96xbf16, #tpu.memory_space<vmem>>, vector<128x96xbf16>,
    return
  }
  func.func @transform_0(%arg0: i32) -> (i32, i32) {
    %c0_i32 = arith.constant 0 : i32
    %c0_i32_0 = arith.constant 0 : i32
    return %arg0, %c0_i32 : i32, i32
  }
  func.func @transform_1(%arg0: i32) -> (i32, i32) {
    %c0_i32 = arith.constant 0 : i32
    %c0_i32_0 = arith.constant 0 : i32
    %c0_i32_1 = arith.constant 0 : i32
    return %c0_i32, %c0_i32_0 : i32, i32
  }
  func.func @transform_2(%arg0: i32) -> (i32, i32) {
    %c0_i32 = arith.constant 0 : i32
    %c0_i32_0 = arith.constant 0 : i32
    %c0_i32_1 = arith.constant 0 : i32
    return %c0_i32, %c0_i32_0 : i32, i32
  }
  func.func @transform_3(%arg0: i32) -> (i32, i32) {
    %c0_i32 = arith.constant 0 : i32
    %c0_i32_0 = arith.constant 0 : i32
    return %arg0, %c0_i32 : i32, i32
  }
  func.func @transform_4(%arg0: i32) -> (i32, i32) {
    %c0_i32 = arith.constant 0 : i32
    %c0_i32_0 = arith.constant 0 : i32
    return %arg0, %c0_i32 : i32, i32
  }
}

module attributes {stable_mosaic.version = 11 : i64} {
  func.func @_gru_rec_kernel(%arg0: i32, %arg1: memref<64x96xbf16, #tpu.memory_space<vmem>>, %arg2: memref<64x96xbf16, #tpu.memory_space<vmem>>, %arg3: memref<2x96xf32, #tpu.memory_space<vmem>>, %arg4: memref<2x96xf32, #tpu.memory_space<vmem>>, %arg5: memref<32x192xbf16, #tpu.memory_space<vmem>>, %arg6: memref<1x96xf32, #tpu.memory_space<vmem>>, %arg7: memref<1x96xf32, #tpu.memory_space<vmem>>, %arg8: memref<64x32xbf16, #tpu.memory_space<vmem>>, %arg9: memref<64x32xbf16, #tpu.memory_space<vmem>>, %arg10: memref<4x32xf32, #tpu.memory_space<vmem>>) attributes {dimension_semantics = [#tpu.dimension_semantics<arbitrary>], iteration_bounds = array<i64: 2>, scalar_prefetch = 0 : i64, scratch_operands = 1 : i64, tpu.core_type = #tpu.core_type<tc>, window_params = [{transform_indices = @transform_0, window_bounds = array<i64: 64, 96>}, {transform_indices = @transform_1, window_bounds = array<i64: 64, 96>}, {pipeline_mode = #tpu.pipeline_mode<synchronous>, transform_indices = @transform_2, window_bounds = array<i64: 2, 96>}, {pipeline_mode = #tpu.pipeline_mode<synchronous>, transform_indices = @transform_3, window_bounds = array<i64: 2, 96>}, {pipeline_mode = #tpu.pipeline_mode<synchronous>, transform_indices = @transform_4, window_bounds = array<i64: 32, 192>}, {pipeline_mode = #tpu.pipeline_mode<synchronous>, transform_indices = @transform_5, window_bounds = array<i64: 1, 96>}, {pipeline_mode = #tpu.pipeline_mode<synchronous>, transform_indices = @transform_6, window_bounds = array<i64: 1, 96>}, {transform_indices = @transform_7, window_bounds = array<i64: 64, 32>}, {transform_indices = @transform_8, window_bounds = array<i64: 64, 32>}]} {
    %c0_i32 = arith.constant 0 : i32
    %0 = arith.cmpi eq, %arg0, %c0_i32 : i32
    %1 = arith.extui %0 : i1 to i32
    %c0_i32_0 = arith.constant 0 : i32
    %2 = arith.cmpi ne, %1, %c0_i32_0 : i32
    scf.if %2 {
      %cst = arith.constant 0.000000e+00 : f32
      %14 = vector.broadcast %cst : f32 to vector<4x32xf32>
      %c0_19 = arith.constant 0 : index
      %c0_20 = arith.constant 0 : index
      %15 = vector.load %arg10[%c0_19, %c0_20] : memref<4x32xf32, #tpu.memory_space<vmem>>, vector<4x32xf32>
      tpu.vector_store %arg10[%c0_19, %c0_20], %14 {strides = array<i32>} : memref<4x32xf32, #tpu.memory_space<vmem>>, vector<4x32xf32>,
    } else {
    }
    %c0 = arith.constant 0 : index
    %c0_1 = arith.constant 0 : index
    %3 = vector.load %arg3[%c0, %c0_1] : memref<2x96xf32, #tpu.memory_space<vmem>>, vector<2x96xf32>
    %c0_2 = arith.constant 0 : index
    %c0_3 = arith.constant 0 : index
    %4 = vector.load %arg4[%c0_2, %c0_3] : memref<2x96xf32, #tpu.memory_space<vmem>>, vector<2x96xf32>
    %c0_4 = arith.constant 0 : index
    %c0_5 = arith.constant 0 : index
    %5 = vector.load %arg5[%c0_4, %c0_5] : memref<32x192xbf16, #tpu.memory_space<vmem>>, vector<32x192xbf16>
    %c0_6 = arith.constant 0 : index
    %c0_7 = arith.constant 0 : index
    %6 = vector.load %arg6[%c0_6, %c0_7] : memref<1x96xf32, #tpu.memory_space<vmem>>, vector<1x96xf32>
    %c0_8 = arith.constant 0 : index
    %c0_9 = arith.constant 0 : index
    %7 = vector.load %arg7[%c0_8, %c0_9] : memref<1x96xf32, #tpu.memory_space<vmem>>, vector<1x96xf32>
    %c0_10 = arith.constant 0 : index
    %c0_11 = arith.constant 0 : index
    %8 = vector.load %arg10[%c0_10, %c0_11] : memref<4x32xf32, #tpu.memory_space<vmem>>, vector<2x32xf32>
    %c2 = arith.constant 2 : index
    %c0_12 = arith.constant 0 : index
    %9 = vector.load %arg10[%c2, %c0_12] : memref<4x32xf32, #tpu.memory_space<vmem>>, vector<2x32xf32>
    %c0_i32_13 = arith.constant 0 : i32
    %c4_i32 = arith.constant 4 : i32
    %10 = arith.addi %c0_i32_13, %c4_i32 : i32
    %c1_i32 = arith.constant 1 : i32
    %11:2 = scf.for %arg11 = %c0_i32_13 to %10 step %c1_i32 iter_args(%arg12 = %8, %arg13 = %9) -> (vector<2x32xf32>, vector<2x32xf32>)  : i32 {
      %c16_i32 = arith.constant 16 : i32
      %14 = arith.muli %arg11, %c16_i32 : i32
      %15 = tpu.assume_multiple %14, 16 : i32
      %c3_i32 = arith.constant 3 : i32
      %16 = arith.subi %c3_i32, %arg11 : i32
      %c16_i32_19 = arith.constant 16 : i32
      %17 = arith.muli %16, %c16_i32_19 : i32
      %18 = tpu.assume_multiple %17, 16 : i32
      %19 = arith.index_cast %15 : i32 to index
      %c0_20 = arith.constant 0 : index
      %20 = vector.load %arg1[%19, %c0_20] : memref<64x96xbf16, #tpu.memory_space<vmem>>, vector<16x96xbf16>
      %21 = arith.extf %20 : vector<16x96xbf16> to vector<16x96xf32>
      %22 = arith.index_cast %18 : i32 to index
      %c0_21 = arith.constant 0 : index
      %23 = vector.load %arg2[%22, %c0_21] : memref<64x96xbf16, #tpu.memory_space<vmem>>, vector<16x96xbf16>
      %24 = arith.extf %23 : vector<16x96xbf16> to vector<16x96xf32>
      %25 = vector.extract_strided_slice %21 {offsets = [0, 0], sizes = [2, 96], strides = [1, 1]} : vector<16x96xf32> to vector<2x96xf32>
      %26 = arith.addf %25, %3 : vector<2x96xf32>
      %27 = vector.extract_strided_slice %24 {offsets = [14, 0], sizes = [2, 96], strides = [1, 1]} : vector<16x96xf32> to vector<2x96xf32>
      %28 = arith.addf %27, %4 : vector<2x96xf32>
      %29 = tpu.concatenate %arg12, %arg13 in 0 : vector<2x32xf32>, vector<2x32xf32> -> vector<4x32xf32>
      %30 = arith.truncf %29 : vector<4x32xf32> to vector<4x32xbf16>
      %cst = arith.constant dense<0.000000e+00> : vector<4x192xf32>
      %31 = tpu.matmul %30, %5, %cst {dimension_numbers = #tpu.dot_dimension_numbers<[1], [0], [0], [1], [0, 0, 1, 1], [], []>} : vector<4x32xbf16>, vector<32x192xbf16>, vector<4x192xf32> -> vector<4x192xf32>
      %32 = vector.extract_strided_slice %31 {offsets = [0, 0], sizes = [2, 96], strides = [1, 1]} : vector<4x192xf32> to vector<2x96xf32>
      %33 = vector.broadcast %6 : vector<1x96xf32> to vector<2x96xf32>
      %34 = arith.addf %32, %33 : vector<2x96xf32>
      %35 = vector.extract_strided_slice %31 {offsets = [2, 96], sizes = [2, 96], strides = [1, 1]} : vector<4x192xf32> to vector<2x96xf32>
      %36 = vector.broadcast %7 : vector<1x96xf32> to vector<2x96xf32>
      %37 = arith.addf %35, %36 : vector<2x96xf32>
      %38 = vector.extract_strided_slice %26 {offsets = [0, 0], sizes = [2, 32], strides = [1, 1]} : vector<2x96xf32> to vector<2x32xf32>
      %39 = vector.extract_strided_slice %34 {offsets = [0, 0], sizes = [2, 32], strides = [1, 1]} : vector<2x96xf32> to vector<2x32xf32>
      %40 = arith.addf %38, %39 : vector<2x32xf32>
      %41 = arith.negf %40 : vector<2x32xf32>
      %42 = math.exp %41 : vector<2x32xf32>
      %cst_22 = arith.constant 1.000000e+00 : f32
      %43 = vector.broadcast %cst_22 : f32 to vector<2x32xf32>
      %44 = arith.addf %43, %42 : vector<2x32xf32>
      %45 = arith.divf %43, %44 : vector<2x32xf32>
      %46 = vector.extract_strided_slice %26 {offsets = [0, 32], sizes = [2, 32], strides = [1, 1]} : vector<2x96xf32> to vector<2x32xf32>
      %47 = vector.extract_strided_slice %34 {offsets = [0, 32], sizes = [2, 32], strides = [1, 1]} : vector<2x96xf32> to vector<2x32xf32>
      %48 = arith.addf %46, %47 : vector<2x32xf32>
      %49 = arith.negf %48 : vector<2x32xf32>
      %50 = math.exp %49 : vector<2x32xf32>
      %cst_23 = arith.constant 1.000000e+00 : f32
      %51 = vector.broadcast %cst_23 : f32 to vector<2x32xf32>
      %52 = arith.addf %51, %50 : vector<2x32xf32>
      %53 = arith.divf %51, %52 : vector<2x32xf32>
      %54 = vector.extract_strided_slice %26 {offsets = [0, 64], sizes = [2, 32], strides = [1, 1]} : vector<2x96xf32> to vector<2x32xf32>
      %55 = vector.extract_strided_slice %34 {offsets = [0, 64], sizes = [2, 32], strides = [1, 1]} : vector<2x96xf32> to vector<2x32xf32>
      %56 = arith.mulf %45, %55 : vector<2x32xf32>
      %57 = arith.addf %54, %56 : vector<2x32xf32>
      %58 = math.tanh %57 : vector<2x32xf32>
      %cst_24 = arith.constant 1.000000e+00 : f32
      %59 = vector.broadcast %cst_24 : f32 to vector<2x32xf32>
      %60 = arith.subf %59, %53 : vector<2x32xf32>
      %61 = arith.mulf %60, %58 : vector<2x32xf32>
      %62 = arith.mulf %53, %arg12 : vector<2x32xf32>
      %63 = arith.addf %61, %62 : vector<2x32xf32>
      %64 = vector.extract_strided_slice %28 {offsets = [0, 0], sizes = [2, 32], strides = [1, 1]} : vector<2x96xf32> to vector<2x32xf32>
      %65 = vector.extract_strided_slice %37 {offsets = [0, 0], sizes = [2, 32], strides = [1, 1]} : vector<2x96xf32> to vector<2x32xf32>
      %66 = arith.addf %64, %65 : vector<2x32xf32>
      %67 = arith.negf %66 : vector<2x32xf32>
      %68 = math.exp %67 : vector<2x32xf32>
      %cst_25 = arith.constant 1.000000e+00 : f32
      %69 = vector.broadcast %cst_25 : f32 to vector<2x32xf32>
      %70 = arith.addf %69, %68 : vector<2x32xf32>
      %71 = arith.divf %69, %70 : vector<2x32xf32>
      %72 = vector.extract_strided_slice %28 {offsets = [0, 32], sizes = [2, 32], strides = [1, 1]} : vector<2x96xf32> to vector<2x32xf32>
      %73 = vector.extract_strided_slice %37 {offsets = [0, 32], sizes = [2, 32], strides = [1, 1]} : vector<2x96xf32> to vector<2x32xf32>
      %74 = arith.addf %72, %73 : vector<2x32xf32>
      %75 = arith.negf %74 : vector<2x32xf32>
      %76 = math.exp %75 : vector<2x32xf32>
      %cst_26 = arith.constant 1.000000e+00 : f32
      %77 = vector.broadcast %cst_26 : f32 to vector<2x32xf32>
      %78 = arith.addf %77, %76 : vector<2x32xf32>
      %79 = arith.divf %77, %78 : vector<2x32xf32>
      %80 = vector.extract_strided_slice %28 {offsets = [0, 64], sizes = [2, 32], strides = [1, 1]} : vector<2x96xf32> to vector<2x32xf32>
      %81 = vector.extract_strided_slice %37 {offsets = [0, 64], sizes = [2, 32], strides = [1, 1]} : vector<2x96xf32> to vector<2x32xf32>
      %82 = arith.mulf %71, %81 : vector<2x32xf32>
      %83 = arith.addf %80, %82 : vector<2x32xf32>
      %84 = math.tanh %83 : vector<2x32xf32>
      %cst_27 = arith.constant 1.000000e+00 : f32
      %85 = vector.broadcast %cst_27 : f32 to vector<2x32xf32>
      %86 = arith.subf %85, %79 : vector<2x32xf32>
      %87 = arith.mulf %86, %84 : vector<2x32xf32>
      %88 = arith.mulf %79, %arg13 : vector<2x32xf32>
      %89 = arith.addf %87, %88 : vector<2x32xf32>
      %90 = vector.extract_strided_slice %21 {offsets = [2, 0], sizes = [2, 96], strides = [1, 1]} : vector<16x96xf32> to vector<2x96xf32>
      %91 = arith.addf %90, %3 : vector<2x96xf32>
      %92 = vector.extract_strided_slice %24 {offsets = [12, 0], sizes = [2, 96], strides = [1, 1]} : vector<16x96xf32> to vector<2x96xf32>
      %93 = arith.addf %92, %4 : vector<2x96xf32>
      %94 = tpu.concatenate %63, %89 in 0 : vector<2x32xf32>, vector<2x32xf32> -> vector<4x32xf32>
      %95 = arith.truncf %94 : vector<4x32xf32> to vector<4x32xbf16>
      %cst_28 = arith.constant dense<0.000000e+00> : vector<4x192xf32>
      %96 = tpu.matmul %95, %5, %cst_28 {dimension_numbers = #tpu.dot_dimension_numbers<[1], [0], [0], [1], [0, 0, 1, 1], [], []>} : vector<4x32xbf16>, vector<32x192xbf16>, vector<4x192xf32> -> vector<4x192xf32>
      %97 = vector.extract_strided_slice %96 {offsets = [0, 0], sizes = [2, 96], strides = [1, 1]} : vector<4x192xf32> to vector<2x96xf32>
      %98 = vector.broadcast %6 : vector<1x96xf32> to vector<2x96xf32>
      %99 = arith.addf %97, %98 : vector<2x96xf32>
      %100 = vector.extract_strided_slice %96 {offsets = [2, 96], sizes = [2, 96], strides = [1, 1]} : vector<4x192xf32> to vector<2x96xf32>
      %101 = vector.broadcast %7 : vector<1x96xf32> to vector<2x96xf32>
      %102 = arith.addf %100, %101 : vector<2x96xf32>
      %103 = vector.extract_strided_slice %91 {offsets = [0, 0], sizes = [2, 32], strides = [1, 1]} : vector<2x96xf32> to vector<2x32xf32>
      %104 = vector.extract_strided_slice %99 {offsets = [0, 0], sizes = [2, 32], strides = [1, 1]} : vector<2x96xf32> to vector<2x32xf32>
      %105 = arith.addf %103, %104 : vector<2x32xf32>
      %106 = arith.negf %105 : vector<2x32xf32>
      %107 = math.exp %106 : vector<2x32xf32>
      %cst_29 = arith.constant 1.000000e+00 : f32
      %108 = vector.broadcast %cst_29 : f32 to vector<2x32xf32>
      %109 = arith.addf %108, %107 : vector<2x32xf32>
      %110 = arith.divf %108, %109 : vector<2x32xf32>
      %111 = vector.extract_strided_slice %91 {offsets = [0, 32], sizes = [2, 32], strides = [1, 1]} : vector<2x96xf32> to vector<2x32xf32>
      %112 = vector.extract_strided_slice %99 {offsets = [0, 32], sizes = [2, 32], strides = [1, 1]} : vector<2x96xf32> to vector<2x32xf32>
      %113 = arith.addf %111, %112 : vector<2x32xf32>
      %114 = arith.negf %113 : vector<2x32xf32>
      %115 = math.exp %114 : vector<2x32xf32>
      %cst_30 = arith.constant 1.000000e+00 : f32
      %116 = vector.broadcast %cst_30 : f32 to vector<2x32xf32>
      %117 = arith.addf %116, %115 : vector<2x32xf32>
      %118 = arith.divf %116, %117 : vector<2x32xf32>
      %119 = vector.extract_strided_slice %91 {offsets = [0, 64], sizes = [2, 32], strides = [1, 1]} : vector<2x96xf32> to vector<2x32xf32>
      %120 = vector.extract_strided_slice %99 {offsets = [0, 64], sizes = [2, 32], strides = [1, 1]} : vector<2x96xf32> to vector<2x32xf32>
      %121 = arith.mulf %110, %120 : vector<2x32xf32>
      %122 = arith.addf %119, %121 : vector<2x32xf32>
      %123 = math.tanh %122 : vector<2x32xf32>
      %cst_31 = arith.constant 1.000000e+00 : f32
      %124 = vector.broadcast %cst_31 : f32 to vector<2x32xf32>
      %125 = arith.subf %124, %118 : vector<2x32xf32>
      %126 = arith.mulf %125, %123 : vector<2x32xf32>
      %127 = arith.mulf %118, %63 : vector<2x32xf32>
      %128 = arith.addf %126, %127 : vector<2x32xf32>
      %129 = vector.extract_strided_slice %93 {offsets = [0, 0], sizes = [2, 32], strides = [1, 1]} : vector<2x96xf32> to vector<2x32xf32>
      %130 = vector.extract_strided_slice %102 {offsets = [0, 0], sizes = [2, 32], strides = [1, 1]} : vector<2x96xf32> to vector<2x32xf32>
      %131 = arith.addf %129, %130 : vector<2x32xf32>
      %132 = arith.negf %131 : vector<2x32xf32>
      %133 = math.exp %132 : vector<2x32xf32>
      %cst_32 = arith.constant 1.000000e+00 : f32
      %134 = vector.broadcast %cst_32 : f32 to vector<2x32xf32>
      %135 = arith.addf %134, %133 : vector<2x32xf32>
      %136 = arith.divf %134, %135 : vector<2x32xf32>
      %137 = vector.extract_strided_slice %93 {offsets = [0, 32], sizes = [2, 32], strides = [1, 1]} : vector<2x96xf32> to vector<2x32xf32>
      %138 = vector.extract_strided_slice %102 {offsets = [0, 32], sizes = [2, 32], strides = [1, 1]} : vector<2x96xf32> to vector<2x32xf32>
      %139 = arith.addf %137, %138 : vector<2x32xf32>
      %140 = arith.negf %139 : vector<2x32xf32>
      %141 = math.exp %140 : vector<2x32xf32>
      %cst_33 = arith.constant 1.000000e+00 : f32
      %142 = vector.broadcast %cst_33 : f32 to vector<2x32xf32>
      %143 = arith.addf %142, %141 : vector<2x32xf32>
      %144 = arith.divf %142, %143 : vector<2x32xf32>
      %145 = vector.extract_strided_slice %93 {offsets = [0, 64], sizes = [2, 32], strides = [1, 1]} : vector<2x96xf32> to vector<2x32xf32>
      %146 = vector.extract_strided_slice %102 {offsets = [0, 64], sizes = [2, 32], strides = [1, 1]} : vector<2x96xf32> to vector<2x32xf32>
      %147 = arith.mulf %136, %146 : vector<2x32xf32>
      %148 = arith.addf %145, %147 : vector<2x32xf32>
      %149 = math.tanh %148 : vector<2x32xf32>
      %cst_34 = arith.constant 1.000000e+00 : f32
      %150 = vector.broadcast %cst_34 : f32 to vector<2x32xf32>
      %151 = arith.subf %150, %144 : vector<2x32xf32>
      %152 = arith.mulf %151, %149 : vector<2x32xf32>
      %153 = arith.mulf %144, %89 : vector<2x32xf32>
      %154 = arith.addf %152, %153 : vector<2x32xf32>
      %155 = vector.extract_strided_slice %21 {offsets = [4, 0], sizes = [2, 96], strides = [1, 1]} : vector<16x96xf32> to vector<2x96xf32>
      %156 = arith.addf %155, %3 : vector<2x96xf32>
      %157 = vector.extract_strided_slice %24 {offsets = [10, 0], sizes = [2, 96], strides = [1, 1]} : vector<16x96xf32> to vector<2x96xf32>
      %158 = arith.addf %157, %4 : vector<2x96xf32>
      %159 = tpu.concatenate %128, %154 in 0 : vector<2x32xf32>, vector<2x32xf32> -> vector<4x32xf32>
      %160 = arith.truncf %159 : vector<4x32xf32> to vector<4x32xbf16>
      %cst_35 = arith.constant dense<0.000000e+00> : vector<4x192xf32>
      %161 = tpu.matmul %160, %5, %cst_35 {dimension_numbers = #tpu.dot_dimension_numbers<[1], [0], [0], [1], [0, 0, 1, 1], [], []>} : vector<4x32xbf16>, vector<32x192xbf16>, vector<4x192xf32> -> vector<4x192xf32>
      %162 = vector.extract_strided_slice %161 {offsets = [0, 0], sizes = [2, 96], strides = [1, 1]} : vector<4x192xf32> to vector<2x96xf32>
      %163 = vector.broadcast %6 : vector<1x96xf32> to vector<2x96xf32>
      %164 = arith.addf %162, %163 : vector<2x96xf32>
      %165 = vector.extract_strided_slice %161 {offsets = [2, 96], sizes = [2, 96], strides = [1, 1]} : vector<4x192xf32> to vector<2x96xf32>
      %166 = vector.broadcast %7 : vector<1x96xf32> to vector<2x96xf32>
      %167 = arith.addf %165, %166 : vector<2x96xf32>
      %168 = vector.extract_strided_slice %156 {offsets = [0, 0], sizes = [2, 32], strides = [1, 1]} : vector<2x96xf32> to vector<2x32xf32>
      %169 = vector.extract_strided_slice %164 {offsets = [0, 0], sizes = [2, 32], strides = [1, 1]} : vector<2x96xf32> to vector<2x32xf32>
      %170 = arith.addf %168, %169 : vector<2x32xf32>
      %171 = arith.negf %170 : vector<2x32xf32>
      %172 = math.exp %171 : vector<2x32xf32>
      %cst_36 = arith.constant 1.000000e+00 : f32
      %173 = vector.broadcast %cst_36 : f32 to vector<2x32xf32>
      %174 = arith.addf %173, %172 : vector<2x32xf32>
      %175 = arith.divf %173, %174 : vector<2x32xf32>
      %176 = vector.extract_strided_slice %156 {offsets = [0, 32], sizes = [2, 32], strides = [1, 1]} : vector<2x96xf32> to vector<2x32xf32>
      %177 = vector.extract_strided_slice %164 {offsets = [0, 32], sizes = [2, 32], strides = [1, 1]} : vector<2x96xf32> to vector<2x32xf32>
      %178 = arith.addf %176, %177 : vector<2x32xf32>
      %179 = arith.negf %178 : vector<2x32xf32>
      %180 = math.exp %179 : vector<2x32xf32>
      %cst_37 = arith.constant 1.000000e+00 : f32
      %181 = vector.broadcast %cst_37 : f32 to vector<2x32xf32>
      %182 = arith.addf %181, %180 : vector<2x32xf32>
      %183 = arith.divf %181, %182 : vector<2x32xf32>
      %184 = vector.extract_strided_slice %156 {offsets = [0, 64], sizes = [2, 32], strides = [1, 1]} : vector<2x96xf32> to vector<2x32xf32>
      %185 = vector.extract_strided_slice %164 {offsets = [0, 64], sizes = [2, 32], strides = [1, 1]} : vector<2x96xf32> to vector<2x32xf32>
      %186 = arith.mulf %175, %185 : vector<2x32xf32>
      %187 = arith.addf %184, %186 : vector<2x32xf32>
      %188 = math.tanh %187 : vector<2x32xf32>
      %cst_38 = arith.constant 1.000000e+00 : f32
      %189 = vector.broadcast %cst_38 : f32 to vector<2x32xf32>
      %190 = arith.subf %189, %183 : vector<2x32xf32>
      %191 = arith.mulf %190, %188 : vector<2x32xf32>
      %192 = arith.mulf %183, %128 : vector<2x32xf32>
      %193 = arith.addf %191, %192 : vector<2x32xf32>
      %194 = vector.extract_strided_slice %158 {offsets = [0, 0], sizes = [2, 32], strides = [1, 1]} : vector<2x96xf32> to vector<2x32xf32>
      %195 = vector.extract_strided_slice %167 {offsets = [0, 0], sizes = [2, 32], strides = [1, 1]} : vector<2x96xf32> to vector<2x32xf32>
      %196 = arith.addf %194, %195 : vector<2x32xf32>
      %197 = arith.negf %196 : vector<2x32xf32>
      %198 = math.exp %197 : vector<2x32xf32>
      %cst_39 = arith.constant 1.000000e+00 : f32
      %199 = vector.broadcast %cst_39 : f32 to vector<2x32xf32>
      %200 = arith.addf %199, %198 : vector<2x32xf32>
      %201 = arith.divf %199, %200 : vector<2x32xf32>
      %202 = vector.extract_strided_slice %158 {offsets = [0, 32], sizes = [2, 32], strides = [1, 1]} : vector<2x96xf32> to vector<2x32xf32>
      %203 = vector.extract_strided_slice %167 {offsets = [0, 32], sizes = [2, 32], strides = [1, 1]} : vector<2x96xf32> to vector<2x32xf32>
      %204 = arith.addf %202, %203 : vector<2x32xf32>
      %205 = arith.negf %204 : vector<2x32xf32>
      %206 = math.exp %205 : vector<2x32xf32>
      %cst_40 = arith.constant 1.000000e+00 : f32
      %207 = vector.broadcast %cst_40 : f32 to vector<2x32xf32>
      %208 = arith.addf %207, %206 : vector<2x32xf32>
      %209 = arith.divf %207, %208 : vector<2x32xf32>
      %210 = vector.extract_strided_slice %158 {offsets = [0, 64], sizes = [2, 32], strides = [1, 1]} : vector<2x96xf32> to vector<2x32xf32>
      %211 = vector.extract_strided_slice %167 {offsets = [0, 64], sizes = [2, 32], strides = [1, 1]} : vector<2x96xf32> to vector<2x32xf32>
      %212 = arith.mulf %201, %211 : vector<2x32xf32>
      %213 = arith.addf %210, %212 : vector<2x32xf32>
      %214 = math.tanh %213 : vector<2x32xf32>
      %cst_41 = arith.constant 1.000000e+00 : f32
      %215 = vector.broadcast %cst_41 : f32 to vector<2x32xf32>
      %216 = arith.subf %215, %209 : vector<2x32xf32>
      %217 = arith.mulf %216, %214 : vector<2x32xf32>
      %218 = arith.mulf %209, %154 : vector<2x32xf32>
      %219 = arith.addf %217, %218 : vector<2x32xf32>
      %220 = vector.extract_strided_slice %21 {offsets = [6, 0], sizes = [2, 96], strides = [1, 1]} : vector<16x96xf32> to vector<2x96xf32>
      %221 = arith.addf %220, %3 : vector<2x96xf32>
      %222 = vector.extract_strided_slice %24 {offsets = [8, 0], sizes = [2, 96], strides = [1, 1]} : vector<16x96xf32> to vector<2x96xf32>
      %223 = arith.addf %222, %4 : vector<2x96xf32>
      %224 = tpu.concatenate %193, %219 in 0 : vector<2x32xf32>, vector<2x32xf32> -> vector<4x32xf32>
      %225 = arith.truncf %224 : vector<4x32xf32> to vector<4x32xbf16>
      %cst_42 = arith.constant dense<0.000000e+00> : vector<4x192xf32>
      %226 = tpu.matmul %225, %5, %cst_42 {dimension_numbers = #tpu.dot_dimension_numbers<[1], [0], [0], [1], [0, 0, 1, 1], [], []>} : vector<4x32xbf16>, vector<32x192xbf16>, vector<4x192xf32> -> vector<4x192xf32>
      %227 = vector.extract_strided_slice %226 {offsets = [0, 0], sizes = [2, 96], strides = [1, 1]} : vector<4x192xf32> to vector<2x96xf32>
      %228 = vector.broadcast %6 : vector<1x96xf32> to vector<2x96xf32>
      %229 = arith.addf %227, %228 : vector<2x96xf32>
      %230 = vector.extract_strided_slice %226 {offsets = [2, 96], sizes = [2, 96], strides = [1, 1]} : vector<4x192xf32> to vector<2x96xf32>
      %231 = vector.broadcast %7 : vector<1x96xf32> to vector<2x96xf32>
      %232 = arith.addf %230, %231 : vector<2x96xf32>
      %233 = vector.extract_strided_slice %221 {offsets = [0, 0], sizes = [2, 32], strides = [1, 1]} : vector<2x96xf32> to vector<2x32xf32>
      %234 = vector.extract_strided_slice %229 {offsets = [0, 0], sizes = [2, 32], strides = [1, 1]} : vector<2x96xf32> to vector<2x32xf32>
      %235 = arith.addf %233, %234 : vector<2x32xf32>
      %236 = arith.negf %235 : vector<2x32xf32>
      %237 = math.exp %236 : vector<2x32xf32>
      %cst_43 = arith.constant 1.000000e+00 : f32
      %238 = vector.broadcast %cst_43 : f32 to vector<2x32xf32>
      %239 = arith.addf %238, %237 : vector<2x32xf32>
      %240 = arith.divf %238, %239 : vector<2x32xf32>
      %241 = vector.extract_strided_slice %221 {offsets = [0, 32], sizes = [2, 32], strides = [1, 1]} : vector<2x96xf32> to vector<2x32xf32>
      %242 = vector.extract_strided_slice %229 {offsets = [0, 32], sizes = [2, 32], strides = [1, 1]} : vector<2x96xf32> to vector<2x32xf32>
      %243 = arith.addf %241, %242 : vector<2x32xf32>
      %244 = arith.negf %243 : vector<2x32xf32>
      %245 = math.exp %244 : vector<2x32xf32>
      %cst_44 = arith.constant 1.000000e+00 : f32
      %246 = vector.broadcast %cst_44 : f32 to vector<2x32xf32>
      %247 = arith.addf %246, %245 : vector<2x32xf32>
      %248 = arith.divf %246, %247 : vector<2x32xf32>
      %249 = vector.extract_strided_slice %221 {offsets = [0, 64], sizes = [2, 32], strides = [1, 1]} : vector<2x96xf32> to vector<2x32xf32>
      %250 = vector.extract_strided_slice %229 {offsets = [0, 64], sizes = [2, 32], strides = [1, 1]} : vector<2x96xf32> to vector<2x32xf32>
      %251 = arith.mulf %240, %250 : vector<2x32xf32>
      %252 = arith.addf %249, %251 : vector<2x32xf32>
      %253 = math.tanh %252 : vector<2x32xf32>
      %cst_45 = arith.constant 1.000000e+00 : f32
      %254 = vector.broadcast %cst_45 : f32 to vector<2x32xf32>
      %255 = arith.subf %254, %248 : vector<2x32xf32>
      %256 = arith.mulf %255, %253 : vector<2x32xf32>
      %257 = arith.mulf %248, %193 : vector<2x32xf32>
      %258 = arith.addf %256, %257 : vector<2x32xf32>
      %259 = vector.extract_strided_slice %223 {offsets = [0, 0], sizes = [2, 32], strides = [1, 1]} : vector<2x96xf32> to vector<2x32xf32>
      %260 = vector.extract_strided_slice %232 {offsets = [0, 0], sizes = [2, 32], strides = [1, 1]} : vector<2x96xf32> to vector<2x32xf32>
      %261 = arith.addf %259, %260 : vector<2x32xf32>
      %262 = arith.negf %261 : vector<2x32xf32>
      %263 = math.exp %262 : vector<2x32xf32>
      %cst_46 = arith.constant 1.000000e+00 : f32
      %264 = vector.broadcast %cst_46 : f32 to vector<2x32xf32>
      %265 = arith.addf %264, %263 : vector<2x32xf32>
      %266 = arith.divf %264, %265 : vector<2x32xf32>
      %267 = vector.extract_strided_slice %223 {offsets = [0, 32], sizes = [2, 32], strides = [1, 1]} : vector<2x96xf32> to vector<2x32xf32>
      %268 = vector.extract_strided_slice %232 {offsets = [0, 32], sizes = [2, 32], strides = [1, 1]} : vector<2x96xf32> to vector<2x32xf32>
      %269 = arith.addf %267, %268 : vector<2x32xf32>
      %270 = arith.negf %269 : vector<2x32xf32>
      %271 = math.exp %270 : vector<2x32xf32>
      %cst_47 = arith.constant 1.000000e+00 : f32
      %272 = vector.broadcast %cst_47 : f32 to vector<2x32xf32>
      %273 = arith.addf %272, %271 : vector<2x32xf32>
      %274 = arith.divf %272, %273 : vector<2x32xf32>
      %275 = vector.extract_strided_slice %223 {offsets = [0, 64], sizes = [2, 32], strides = [1, 1]} : vector<2x96xf32> to vector<2x32xf32>
      %276 = vector.extract_strided_slice %232 {offsets = [0, 64], sizes = [2, 32], strides = [1, 1]} : vector<2x96xf32> to vector<2x32xf32>
      %277 = arith.mulf %266, %276 : vector<2x32xf32>
      %278 = arith.addf %275, %277 : vector<2x32xf32>
      %279 = math.tanh %278 : vector<2x32xf32>
      %cst_48 = arith.constant 1.000000e+00 : f32
      %280 = vector.broadcast %cst_48 : f32 to vector<2x32xf32>
      %281 = arith.subf %280, %274 : vector<2x32xf32>
      %282 = arith.mulf %281, %279 : vector<2x32xf32>
      %283 = arith.mulf %274, %219 : vector<2x32xf32>
      %284 = arith.addf %282, %283 : vector<2x32xf32>
      %285 = vector.extract_strided_slice %21 {offsets = [8, 0], sizes = [2, 96], strides = [1, 1]} : vector<16x96xf32> to vector<2x96xf32>
      %286 = arith.addf %285, %3 : vector<2x96xf32>
      %287 = vector.extract_strided_slice %24 {offsets = [6, 0], sizes = [2, 96], strides = [1, 1]} : vector<16x96xf32> to vector<2x96xf32>
      %288 = arith.addf %287, %4 : vector<2x96xf32>
      %289 = tpu.concatenate %258, %284 in 0 : vector<2x32xf32>, vector<2x32xf32> -> vector<4x32xf32>
      %290 = arith.truncf %289 : vector<4x32xf32> to vector<4x32xbf16>
      %cst_49 = arith.constant dense<0.000000e+00> : vector<4x192xf32>
      %291 = tpu.matmul %290, %5, %cst_49 {dimension_numbers = #tpu.dot_dimension_numbers<[1], [0], [0], [1], [0, 0, 1, 1], [], []>} : vector<4x32xbf16>, vector<32x192xbf16>, vector<4x192xf32> -> vector<4x192xf32>
      %292 = vector.extract_strided_slice %291 {offsets = [0, 0], sizes = [2, 96], strides = [1, 1]} : vector<4x192xf32> to vector<2x96xf32>
      %293 = vector.broadcast %6 : vector<1x96xf32> to vector<2x96xf32>
      %294 = arith.addf %292, %293 : vector<2x96xf32>
      %295 = vector.extract_strided_slice %291 {offsets = [2, 96], sizes = [2, 96], strides = [1, 1]} : vector<4x192xf32> to vector<2x96xf32>
      %296 = vector.broadcast %7 : vector<1x96xf32> to vector<2x96xf32>
      %297 = arith.addf %295, %296 : vector<2x96xf32>
      %298 = vector.extract_strided_slice %286 {offsets = [0, 0], sizes = [2, 32], strides = [1, 1]} : vector<2x96xf32> to vector<2x32xf32>
      %299 = vector.extract_strided_slice %294 {offsets = [0, 0], sizes = [2, 32], strides = [1, 1]} : vector<2x96xf32> to vector<2x32xf32>
      %300 = arith.addf %298, %299 : vector<2x32xf32>
      %301 = arith.negf %300 : vector<2x32xf32>
      %302 = math.exp %301 : vector<2x32xf32>
      %cst_50 = arith.constant 1.000000e+00 : f32
      %303 = vector.broadcast %cst_50 : f32 to vector<2x32xf32>
      %304 = arith.addf %303, %302 : vector<2x32xf32>
      %305 = arith.divf %303, %304 : vector<2x32xf32>
      %306 = vector.extract_strided_slice %286 {offsets = [0, 32], sizes = [2, 32], strides = [1, 1]} : vector<2x96xf32> to vector<2x32xf32>
      %307 = vector.extract_strided_slice %294 {offsets = [0, 32], sizes = [2, 32], strides = [1, 1]} : vector<2x96xf32> to vector<2x32xf32>
      %308 = arith.addf %306, %307 : vector<2x32xf32>
      %309 = arith.negf %308 : vector<2x32xf32>
      %310 = math.exp %309 : vector<2x32xf32>
      %cst_51 = arith.constant 1.000000e+00 : f32
      %311 = vector.broadcast %cst_51 : f32 to vector<2x32xf32>
      %312 = arith.addf %311, %310 : vector<2x32xf32>
      %313 = arith.divf %311, %312 : vector<2x32xf32>
      %314 = vector.extract_strided_slice %286 {offsets = [0, 64], sizes = [2, 32], strides = [1, 1]} : vector<2x96xf32> to vector<2x32xf32>
      %315 = vector.extract_strided_slice %294 {offsets = [0, 64], sizes = [2, 32], strides = [1, 1]} : vector<2x96xf32> to vector<2x32xf32>
      %316 = arith.mulf %305, %315 : vector<2x32xf32>
      %317 = arith.addf %314, %316 : vector<2x32xf32>
      %318 = math.tanh %317 : vector<2x32xf32>
      %cst_52 = arith.constant 1.000000e+00 : f32
      %319 = vector.broadcast %cst_52 : f32 to vector<2x32xf32>
      %320 = arith.subf %319, %313 : vector<2x32xf32>
      %321 = arith.mulf %320, %318 : vector<2x32xf32>
      %322 = arith.mulf %313, %258 : vector<2x32xf32>
      %323 = arith.addf %321, %322 : vector<2x32xf32>
      %324 = vector.extract_strided_slice %288 {offsets = [0, 0], sizes = [2, 32], strides = [1, 1]} : vector<2x96xf32> to vector<2x32xf32>
      %325 = vector.extract_strided_slice %297 {offsets = [0, 0], sizes = [2, 32], strides = [1, 1]} : vector<2x96xf32> to vector<2x32xf32>
      %326 = arith.addf %324, %325 : vector<2x32xf32>
      %327 = arith.negf %326 : vector<2x32xf32>
      %328 = math.exp %327 : vector<2x32xf32>
      %cst_53 = arith.constant 1.000000e+00 : f32
      %329 = vector.broadcast %cst_53 : f32 to vector<2x32xf32>
      %330 = arith.addf %329, %328 : vector<2x32xf32>
      %331 = arith.divf %329, %330 : vector<2x32xf32>
      %332 = vector.extract_strided_slice %288 {offsets = [0, 32], sizes = [2, 32], strides = [1, 1]} : vector<2x96xf32> to vector<2x32xf32>
      %333 = vector.extract_strided_slice %297 {offsets = [0, 32], sizes = [2, 32], strides = [1, 1]} : vector<2x96xf32> to vector<2x32xf32>
      %334 = arith.addf %332, %333 : vector<2x32xf32>
      %335 = arith.negf %334 : vector<2x32xf32>
      %336 = math.exp %335 : vector<2x32xf32>
      %cst_54 = arith.constant 1.000000e+00 : f32
      %337 = vector.broadcast %cst_54 : f32 to vector<2x32xf32>
      %338 = arith.addf %337, %336 : vector<2x32xf32>
      %339 = arith.divf %337, %338 : vector<2x32xf32>
      %340 = vector.extract_strided_slice %288 {offsets = [0, 64], sizes = [2, 32], strides = [1, 1]} : vector<2x96xf32> to vector<2x32xf32>
      %341 = vector.extract_strided_slice %297 {offsets = [0, 64], sizes = [2, 32], strides = [1, 1]} : vector<2x96xf32> to vector<2x32xf32>
      %342 = arith.mulf %331, %341 : vector<2x32xf32>
      %343 = arith.addf %340, %342 : vector<2x32xf32>
      %344 = math.tanh %343 : vector<2x32xf32>
      %cst_55 = arith.constant 1.000000e+00 : f32
      %345 = vector.broadcast %cst_55 : f32 to vector<2x32xf32>
      %346 = arith.subf %345, %339 : vector<2x32xf32>
      %347 = arith.mulf %346, %344 : vector<2x32xf32>
      %348 = arith.mulf %339, %284 : vector<2x32xf32>
      %349 = arith.addf %347, %348 : vector<2x32xf32>
      %350 = vector.extract_strided_slice %21 {offsets = [10, 0], sizes = [2, 96], strides = [1, 1]} : vector<16x96xf32> to vector<2x96xf32>
      %351 = arith.addf %350, %3 : vector<2x96xf32>
      %352 = vector.extract_strided_slice %24 {offsets = [4, 0], sizes = [2, 96], strides = [1, 1]} : vector<16x96xf32> to vector<2x96xf32>
      %353 = arith.addf %352, %4 : vector<2x96xf32>
      %354 = tpu.concatenate %323, %349 in 0 : vector<2x32xf32>, vector<2x32xf32> -> vector<4x32xf32>
      %355 = arith.truncf %354 : vector<4x32xf32> to vector<4x32xbf16>
      %cst_56 = arith.constant dense<0.000000e+00> : vector<4x192xf32>
      %356 = tpu.matmul %355, %5, %cst_56 {dimension_numbers = #tpu.dot_dimension_numbers<[1], [0], [0], [1], [0, 0, 1, 1], [], []>} : vector<4x32xbf16>, vector<32x192xbf16>, vector<4x192xf32> -> vector<4x192xf32>
      %357 = vector.extract_strided_slice %356 {offsets = [0, 0], sizes = [2, 96], strides = [1, 1]} : vector<4x192xf32> to vector<2x96xf32>
      %358 = vector.broadcast %6 : vector<1x96xf32> to vector<2x96xf32>
      %359 = arith.addf %357, %358 : vector<2x96xf32>
      %360 = vector.extract_strided_slice %356 {offsets = [2, 96], sizes = [2, 96], strides = [1, 1]} : vector<4x192xf32> to vector<2x96xf32>
      %361 = vector.broadcast %7 : vector<1x96xf32> to vector<2x96xf32>
      %362 = arith.addf %360, %361 : vector<2x96xf32>
      %363 = vector.extract_strided_slice %351 {offsets = [0, 0], sizes = [2, 32], strides = [1, 1]} : vector<2x96xf32> to vector<2x32xf32>
      %364 = vector.extract_strided_slice %359 {offsets = [0, 0], sizes = [2, 32], strides = [1, 1]} : vector<2x96xf32> to vector<2x32xf32>
      %365 = arith.addf %363, %364 : vector<2x32xf32>
      %366 = arith.negf %365 : vector<2x32xf32>
      %367 = math.exp %366 : vector<2x32xf32>
      %cst_57 = arith.constant 1.000000e+00 : f32
      %368 = vector.broadcast %cst_57 : f32 to vector<2x32xf32>
      %369 = arith.addf %368, %367 : vector<2x32xf32>
      %370 = arith.divf %368, %369 : vector<2x32xf32>
      %371 = vector.extract_strided_slice %351 {offsets = [0, 32], sizes = [2, 32], strides = [1, 1]} : vector<2x96xf32> to vector<2x32xf32>
      %372 = vector.extract_strided_slice %359 {offsets = [0, 32], sizes = [2, 32], strides = [1, 1]} : vector<2x96xf32> to vector<2x32xf32>
      %373 = arith.addf %371, %372 : vector<2x32xf32>
      %374 = arith.negf %373 : vector<2x32xf32>
      %375 = math.exp %374 : vector<2x32xf32>
      %cst_58 = arith.constant 1.000000e+00 : f32
      %376 = vector.broadcast %cst_58 : f32 to vector<2x32xf32>
      %377 = arith.addf %376, %375 : vector<2x32xf32>
      %378 = arith.divf %376, %377 : vector<2x32xf32>
      %379 = vector.extract_strided_slice %351 {offsets = [0, 64], sizes = [2, 32], strides = [1, 1]} : vector<2x96xf32> to vector<2x32xf32>
      %380 = vector.extract_strided_slice %359 {offsets = [0, 64], sizes = [2, 32], strides = [1, 1]} : vector<2x96xf32> to vector<2x32xf32>
      %381 = arith.mulf %370, %380 : vector<2x32xf32>
      %382 = arith.addf %379, %381 : vector<2x32xf32>
      %383 = math.tanh %382 : vector<2x32xf32>
      %cst_59 = arith.constant 1.000000e+00 : f32
      %384 = vector.broadcast %cst_59 : f32 to vector<2x32xf32>
      %385 = arith.subf %384, %378 : vector<2x32xf32>
      %386 = arith.mulf %385, %383 : vector<2x32xf32>
      %387 = arith.mulf %378, %323 : vector<2x32xf32>
      %388 = arith.addf %386, %387 : vector<2x32xf32>
      %389 = vector.extract_strided_slice %353 {offsets = [0, 0], sizes = [2, 32], strides = [1, 1]} : vector<2x96xf32> to vector<2x32xf32>
      %390 = vector.extract_strided_slice %362 {offsets = [0, 0], sizes = [2, 32], strides = [1, 1]} : vector<2x96xf32> to vector<2x32xf32>
      %391 = arith.addf %389, %390 : vector<2x32xf32>
      %392 = arith.negf %391 : vector<2x32xf32>
      %393 = math.exp %392 : vector<2x32xf32>
      %cst_60 = arith.constant 1.000000e+00 : f32
      %394 = vector.broadcast %cst_60 : f32 to vector<2x32xf32>
      %395 = arith.addf %394, %393 : vector<2x32xf32>
      %396 = arith.divf %394, %395 : vector<2x32xf32>
      %397 = vector.extract_strided_slice %353 {offsets = [0, 32], sizes = [2, 32], strides = [1, 1]} : vector<2x96xf32> to vector<2x32xf32>
      %398 = vector.extract_strided_slice %362 {offsets = [0, 32], sizes = [2, 32], strides = [1, 1]} : vector<2x96xf32> to vector<2x32xf32>
      %399 = arith.addf %397, %398 : vector<2x32xf32>
      %400 = arith.negf %399 : vector<2x32xf32>
      %401 = math.exp %400 : vector<2x32xf32>
      %cst_61 = arith.constant 1.000000e+00 : f32
      %402 = vector.broadcast %cst_61 : f32 to vector<2x32xf32>
      %403 = arith.addf %402, %401 : vector<2x32xf32>
      %404 = arith.divf %402, %403 : vector<2x32xf32>
      %405 = vector.extract_strided_slice %353 {offsets = [0, 64], sizes = [2, 32], strides = [1, 1]} : vector<2x96xf32> to vector<2x32xf32>
      %406 = vector.extract_strided_slice %362 {offsets = [0, 64], sizes = [2, 32], strides = [1, 1]} : vector<2x96xf32> to vector<2x32xf32>
      %407 = arith.mulf %396, %406 : vector<2x32xf32>
      %408 = arith.addf %405, %407 : vector<2x32xf32>
      %409 = math.tanh %408 : vector<2x32xf32>
      %cst_62 = arith.constant 1.000000e+00 : f32
      %410 = vector.broadcast %cst_62 : f32 to vector<2x32xf32>
      %411 = arith.subf %410, %404 : vector<2x32xf32>
      %412 = arith.mulf %411, %409 : vector<2x32xf32>
      %413 = arith.mulf %404, %349 : vector<2x32xf32>
      %414 = arith.addf %412, %413 : vector<2x32xf32>
      %415 = vector.extract_strided_slice %21 {offsets = [12, 0], sizes = [2, 96], strides = [1, 1]} : vector<16x96xf32> to vector<2x96xf32>
      %416 = arith.addf %415, %3 : vector<2x96xf32>
      %417 = vector.extract_strided_slice %24 {offsets = [2, 0], sizes = [2, 96], strides = [1, 1]} : vector<16x96xf32> to vector<2x96xf32>
      %418 = arith.addf %417, %4 : vector<2x96xf32>
      %419 = tpu.concatenate %388, %414 in 0 : vector<2x32xf32>, vector<2x32xf32> -> vector<4x32xf32>
      %420 = arith.truncf %419 : vector<4x32xf32> to vector<4x32xbf16>
      %cst_63 = arith.constant dense<0.000000e+00> : vector<4x192xf32>
      %421 = tpu.matmul %420, %5, %cst_63 {dimension_numbers = #tpu.dot_dimension_numbers<[1], [0], [0], [1], [0, 0, 1, 1], [], []>} : vector<4x32xbf16>, vector<32x192xbf16>, vector<4x192xf32> -> vector<4x192xf32>
      %422 = vector.extract_strided_slice %421 {offsets = [0, 0], sizes = [2, 96], strides = [1, 1]} : vector<4x192xf32> to vector<2x96xf32>
      %423 = vector.broadcast %6 : vector<1x96xf32> to vector<2x96xf32>
      %424 = arith.addf %422, %423 : vector<2x96xf32>
      %425 = vector.extract_strided_slice %421 {offsets = [2, 96], sizes = [2, 96], strides = [1, 1]} : vector<4x192xf32> to vector<2x96xf32>
      %426 = vector.broadcast %7 : vector<1x96xf32> to vector<2x96xf32>
      %427 = arith.addf %425, %426 : vector<2x96xf32>
      %428 = vector.extract_strided_slice %416 {offsets = [0, 0], sizes = [2, 32], strides = [1, 1]} : vector<2x96xf32> to vector<2x32xf32>
      %429 = vector.extract_strided_slice %424 {offsets = [0, 0], sizes = [2, 32], strides = [1, 1]} : vector<2x96xf32> to vector<2x32xf32>
      %430 = arith.addf %428, %429 : vector<2x32xf32>
      %431 = arith.negf %430 : vector<2x32xf32>
      %432 = math.exp %431 : vector<2x32xf32>
      %cst_64 = arith.constant 1.000000e+00 : f32
      %433 = vector.broadcast %cst_64 : f32 to vector<2x32xf32>
      %434 = arith.addf %433, %432 : vector<2x32xf32>
      %435 = arith.divf %433, %434 : vector<2x32xf32>
      %436 = vector.extract_strided_slice %416 {offsets = [0, 32], sizes = [2, 32], strides = [1, 1]} : vector<2x96xf32> to vector<2x32xf32>
      %437 = vector.extract_strided_slice %424 {offsets = [0, 32], sizes = [2, 32], strides = [1, 1]} : vector<2x96xf32> to vector<2x32xf32>
      %438 = arith.addf %436, %437 : vector<2x32xf32>
      %439 = arith.negf %438 : vector<2x32xf32>
      %440 = math.exp %439 : vector<2x32xf32>
      %cst_65 = arith.constant 1.000000e+00 : f32
      %441 = vector.broadcast %cst_65 : f32 to vector<2x32xf32>
      %442 = arith.addf %441, %440 : vector<2x32xf32>
      %443 = arith.divf %441, %442 : vector<2x32xf32>
      %444 = vector.extract_strided_slice %416 {offsets = [0, 64], sizes = [2, 32], strides = [1, 1]} : vector<2x96xf32> to vector<2x32xf32>
      %445 = vector.extract_strided_slice %424 {offsets = [0, 64], sizes = [2, 32], strides = [1, 1]} : vector<2x96xf32> to vector<2x32xf32>
      %446 = arith.mulf %435, %445 : vector<2x32xf32>
      %447 = arith.addf %444, %446 : vector<2x32xf32>
      %448 = math.tanh %447 : vector<2x32xf32>
      %cst_66 = arith.constant 1.000000e+00 : f32
      %449 = vector.broadcast %cst_66 : f32 to vector<2x32xf32>
      %450 = arith.subf %449, %443 : vector<2x32xf32>
      %451 = arith.mulf %450, %448 : vector<2x32xf32>
      %452 = arith.mulf %443, %388 : vector<2x32xf32>
      %453 = arith.addf %451, %452 : vector<2x32xf32>
      %454 = vector.extract_strided_slice %418 {offsets = [0, 0], sizes = [2, 32], strides = [1, 1]} : vector<2x96xf32> to vector<2x32xf32>
      %455 = vector.extract_strided_slice %427 {offsets = [0, 0], sizes = [2, 32], strides = [1, 1]} : vector<2x96xf32> to vector<2x32xf32>
      %456 = arith.addf %454, %455 : vector<2x32xf32>
      %457 = arith.negf %456 : vector<2x32xf32>
      %458 = math.exp %457 : vector<2x32xf32>
      %cst_67 = arith.constant 1.000000e+00 : f32
      %459 = vector.broadcast %cst_67 : f32 to vector<2x32xf32>
      %460 = arith.addf %459, %458 : vector<2x32xf32>
      %461 = arith.divf %459, %460 : vector<2x32xf32>
      %462 = vector.extract_strided_slice %418 {offsets = [0, 32], sizes = [2, 32], strides = [1, 1]} : vector<2x96xf32> to vector<2x32xf32>
      %463 = vector.extract_strided_slice %427 {offsets = [0, 32], sizes = [2, 32], strides = [1, 1]} : vector<2x96xf32> to vector<2x32xf32>
      %464 = arith.addf %462, %463 : vector<2x32xf32>
      %465 = arith.negf %464 : vector<2x32xf32>
      %466 = math.exp %465 : vector<2x32xf32>
      %cst_68 = arith.constant 1.000000e+00 : f32
      %467 = vector.broadcast %cst_68 : f32 to vector<2x32xf32>
      %468 = arith.addf %467, %466 : vector<2x32xf32>
      %469 = arith.divf %467, %468 : vector<2x32xf32>
      %470 = vector.extract_strided_slice %418 {offsets = [0, 64], sizes = [2, 32], strides = [1, 1]} : vector<2x96xf32> to vector<2x32xf32>
      %471 = vector.extract_strided_slice %427 {offsets = [0, 64], sizes = [2, 32], strides = [1, 1]} : vector<2x96xf32> to vector<2x32xf32>
      %472 = arith.mulf %461, %471 : vector<2x32xf32>
      %473 = arith.addf %470, %472 : vector<2x32xf32>
      %474 = math.tanh %473 : vector<2x32xf32>
      %cst_69 = arith.constant 1.000000e+00 : f32
      %475 = vector.broadcast %cst_69 : f32 to vector<2x32xf32>
      %476 = arith.subf %475, %469 : vector<2x32xf32>
      %477 = arith.mulf %476, %474 : vector<2x32xf32>
      %478 = arith.mulf %469, %414 : vector<2x32xf32>
      %479 = arith.addf %477, %478 : vector<2x32xf32>
      %480 = vector.extract_strided_slice %21 {offsets = [14, 0], sizes = [2, 96], strides = [1, 1]} : vector<16x96xf32> to vector<2x96xf32>
      %481 = arith.addf %480, %3 : vector<2x96xf32>
      %482 = vector.extract_strided_slice %24 {offsets = [0, 0], sizes = [2, 96], strides = [1, 1]} : vector<16x96xf32> to vector<2x96xf32>
      %483 = arith.addf %482, %4 : vector<2x96xf32>
      %484 = tpu.concatenate %453, %479 in 0 : vector<2x32xf32>, vector<2x32xf32> -> vector<4x32xf32>
      %485 = arith.truncf %484 : vector<4x32xf32> to vector<4x32xbf16>
      %cst_70 = arith.constant dense<0.000000e+00> : vector<4x192xf32>
      %486 = tpu.matmul %485, %5, %cst_70 {dimension_numbers = #tpu.dot_dimension_numbers<[1], [0], [0], [1], [0, 0, 1, 1], [], []>} : vector<4x32xbf16>, vector<32x192xbf16>, vector<4x192xf32> -> vector<4x192xf32>
      %487 = vector.extract_strided_slice %486 {offsets = [0, 0], sizes = [2, 96], strides = [1, 1]} : vector<4x192xf32> to vector<2x96xf32>
      %488 = vector.broadcast %6 : vector<1x96xf32> to vector<2x96xf32>
      %489 = arith.addf %487, %488 : vector<2x96xf32>
      %490 = vector.extract_strided_slice %486 {offsets = [2, 96], sizes = [2, 96], strides = [1, 1]} : vector<4x192xf32> to vector<2x96xf32>
      %491 = vector.broadcast %7 : vector<1x96xf32> to vector<2x96xf32>
      %492 = arith.addf %490, %491 : vector<2x96xf32>
      %493 = vector.extract_strided_slice %481 {offsets = [0, 0], sizes = [2, 32], strides = [1, 1]} : vector<2x96xf32> to vector<2x32xf32>
      %494 = vector.extract_strided_slice %489 {offsets = [0, 0], sizes = [2, 32], strides = [1, 1]} : vector<2x96xf32> to vector<2x32xf32>
      %495 = arith.addf %493, %494 : vector<2x32xf32>
      %496 = arith.negf %495 : vector<2x32xf32>
      %497 = math.exp %496 : vector<2x32xf32>
      %cst_71 = arith.constant 1.000000e+00 : f32
      %498 = vector.broadcast %cst_71 : f32 to vector<2x32xf32>
      %499 = arith.addf %498, %497 : vector<2x32xf32>
      %500 = arith.divf %498, %499 : vector<2x32xf32>
      %501 = vector.extract_strided_slice %481 {offsets = [0, 32], sizes = [2, 32], strides = [1, 1]} : vector<2x96xf32> to vector<2x32xf32>
      %502 = vector.extract_strided_slice %489 {offsets = [0, 32], sizes = [2, 32], strides = [1, 1]} : vector<2x96xf32> to vector<2x32xf32>
      %503 = arith.addf %501, %502 : vector<2x32xf32>
      %504 = arith.negf %503 : vector<2x32xf32>
      %505 = math.exp %504 : vector<2x32xf32>
      %cst_72 = arith.constant 1.000000e+00 : f32
      %506 = vector.broadcast %cst_72 : f32 to vector<2x32xf32>
      %507 = arith.addf %506, %505 : vector<2x32xf32>
      %508 = arith.divf %506, %507 : vector<2x32xf32>
      %509 = vector.extract_strided_slice %481 {offsets = [0, 64], sizes = [2, 32], strides = [1, 1]} : vector<2x96xf32> to vector<2x32xf32>
      %510 = vector.extract_strided_slice %489 {offsets = [0, 64], sizes = [2, 32], strides = [1, 1]} : vector<2x96xf32> to vector<2x32xf32>
      %511 = arith.mulf %500, %510 : vector<2x32xf32>
      %512 = arith.addf %509, %511 : vector<2x32xf32>
      %513 = math.tanh %512 : vector<2x32xf32>
      %cst_73 = arith.constant 1.000000e+00 : f32
      %514 = vector.broadcast %cst_73 : f32 to vector<2x32xf32>
      %515 = arith.subf %514, %508 : vector<2x32xf32>
      %516 = arith.mulf %515, %513 : vector<2x32xf32>
      %517 = arith.mulf %508, %453 : vector<2x32xf32>
      %518 = arith.addf %516, %517 : vector<2x32xf32>
      %519 = vector.extract_strided_slice %483 {offsets = [0, 0], sizes = [2, 32], strides = [1, 1]} : vector<2x96xf32> to vector<2x32xf32>
      %520 = vector.extract_strided_slice %492 {offsets = [0, 0], sizes = [2, 32], strides = [1, 1]} : vector<2x96xf32> to vector<2x32xf32>
      %521 = arith.addf %519, %520 : vector<2x32xf32>
      %522 = arith.negf %521 : vector<2x32xf32>
      %523 = math.exp %522 : vector<2x32xf32>
      %cst_74 = arith.constant 1.000000e+00 : f32
      %524 = vector.broadcast %cst_74 : f32 to vector<2x32xf32>
      %525 = arith.addf %524, %523 : vector<2x32xf32>
      %526 = arith.divf %524, %525 : vector<2x32xf32>
      %527 = vector.extract_strided_slice %483 {offsets = [0, 32], sizes = [2, 32], strides = [1, 1]} : vector<2x96xf32> to vector<2x32xf32>
      %528 = vector.extract_strided_slice %492 {offsets = [0, 32], sizes = [2, 32], strides = [1, 1]} : vector<2x96xf32> to vector<2x32xf32>
      %529 = arith.addf %527, %528 : vector<2x32xf32>
      %530 = arith.negf %529 : vector<2x32xf32>
      %531 = math.exp %530 : vector<2x32xf32>
      %cst_75 = arith.constant 1.000000e+00 : f32
      %532 = vector.broadcast %cst_75 : f32 to vector<2x32xf32>
      %533 = arith.addf %532, %531 : vector<2x32xf32>
      %534 = arith.divf %532, %533 : vector<2x32xf32>
      %535 = vector.extract_strided_slice %483 {offsets = [0, 64], sizes = [2, 32], strides = [1, 1]} : vector<2x96xf32> to vector<2x32xf32>
      %536 = vector.extract_strided_slice %492 {offsets = [0, 64], sizes = [2, 32], strides = [1, 1]} : vector<2x96xf32> to vector<2x32xf32>
      %537 = arith.mulf %526, %536 : vector<2x32xf32>
      %538 = arith.addf %535, %537 : vector<2x32xf32>
      %539 = math.tanh %538 : vector<2x32xf32>
      %cst_76 = arith.constant 1.000000e+00 : f32
      %540 = vector.broadcast %cst_76 : f32 to vector<2x32xf32>
      %541 = arith.subf %540, %534 : vector<2x32xf32>
      %542 = arith.mulf %541, %539 : vector<2x32xf32>
      %543 = arith.mulf %534, %479 : vector<2x32xf32>
      %544 = arith.addf %542, %543 : vector<2x32xf32>
      %545 = tpu.concatenate %63, %128, %193, %258, %323, %388, %453, %518 in 0 : vector<2x32xf32>, vector<2x32xf32>, vector<2x32xf32>, vector<2x32xf32>, vector<2x32xf32>, vector<2x32xf32>, vector<2x32xf32>, vector<2x32xf32> -> vector<16x32xf32>
      %546 = arith.truncf %545 : vector<16x32xf32> to vector<16x32xbf16>
      %547 = arith.index_cast %15 : i32 to index
      %c0_77 = arith.constant 0 : index
      %548 = vector.load %arg8[%547, %c0_77] : memref<64x32xbf16, #tpu.memory_space<vmem>>, vector<16x32xbf16>
      tpu.vector_store %arg8[%547, %c0_77], %546 {strides = array<i32>} : memref<64x32xbf16, #tpu.memory_space<vmem>>, vector<16x32xbf16>,
      %549 = tpu.concatenate %544, %479, %414, %349, %284, %219, %154, %89 in 0 : vector<2x32xf32>, vector<2x32xf32>, vector<2x32xf32>, vector<2x32xf32>, vector<2x32xf32>, vector<2x32xf32>, vector<2x32xf32>, vector<2x32xf32> -> vector<16x32xf32>
      %550 = arith.truncf %549 : vector<16x32xf32> to vector<16x32xbf16>
      %551 = arith.index_cast %18 : i32 to index
      %c0_78 = arith.constant 0 : index
      %552 = vector.load %arg9[%551, %c0_78] : memref<64x32xbf16, #tpu.memory_space<vmem>>, vector<16x32xbf16>
      tpu.vector_store %arg9[%551, %c0_78], %550 {strides = array<i32>} : memref<64x32xbf16, #tpu.memory_space<vmem>>, vector<16x32xbf16>,
      scf.yield %518, %544 : vector<2x32xf32>, vector<2x32xf32>
    }
    %c4_i32_14 = arith.constant 4 : i32
    %c0_15 = arith.constant 0 : index
    %c0_16 = arith.constant 0 : index
    %12 = vector.load %arg10[%c0_15, %c0_16] : memref<4x32xf32, #tpu.memory_space<vmem>>, vector<2x32xf32>
    tpu.vector_store %arg10[%c0_15, %c0_16], %11#0 {strides = array<i32>} : memref<4x32xf32, #tpu.memory_space<vmem>>, vector<2x32xf32>,
    %c2_17 = arith.constant 2 : index
    %c0_18 = arith.constant 0 : index
    %13 = vector.load %arg10[%c2_17, %c0_18] : memref<4x32xf32, #tpu.memory_space<vmem>>, vector<2x32xf32>
    tpu.vector_store %arg10[%c2_17, %c0_18], %11#1 {strides = array<i32>} : memref<4x32xf32, #tpu.memory_space<vmem>>, vector<2x32xf32>,
    return
  }
  func.func @transform_0(%arg0: i32) -> (i32, i32) {
    %c0_i32 = arith.constant 0 : i32
    %c0_i32_0 = arith.constant 0 : i32
    return %arg0, %c0_i32 : i32, i32
  }
  func.func @transform_1(%arg0: i32) -> (i32, i32) {
    %c1_i32 = arith.constant 1 : i32
    %0 = arith.subi %c1_i32, %arg0 : i32
    %c0_i32 = arith.constant 0 : i32
    %c0_i32_0 = arith.constant 0 : i32
    return %0, %c0_i32 : i32, i32
  }
  func.func @transform_2(%arg0: i32) -> (i32, i32) {
    %c0_i32 = arith.constant 0 : i32
    %c0_i32_0 = arith.constant 0 : i32
    %c0_i32_1 = arith.constant 0 : i32
    return %c0_i32, %c0_i32_0 : i32, i32
  }
  func.func @transform_3(%arg0: i32) -> (i32, i32) {
    %c0_i32 = arith.constant 0 : i32
    %c0_i32_0 = arith.constant 0 : i32
    %c0_i32_1 = arith.constant 0 : i32
    return %c0_i32, %c0_i32_0 : i32, i32
  }
  func.func @transform_4(%arg0: i32) -> (i32, i32) {
    %c0_i32 = arith.constant 0 : i32
    %c0_i32_0 = arith.constant 0 : i32
    %c0_i32_1 = arith.constant 0 : i32
    return %c0_i32, %c0_i32_0 : i32, i32
  }
  func.func @transform_5(%arg0: i32) -> (i32, i32) {
    %c0_i32 = arith.constant 0 : i32
    %c0_i32_0 = arith.constant 0 : i32
    %c0_i32_1 = arith.constant 0 : i32
    return %c0_i32, %c0_i32_0 : i32, i32
  }
  func.func @transform_6(%arg0: i32) -> (i32, i32) {
    %c0_i32 = arith.constant 0 : i32
    %c0_i32_0 = arith.constant 0 : i32
    %c0_i32_1 = arith.constant 0 : i32
    return %c0_i32, %c0_i32_0 : i32, i32
  }
  func.func @transform_7(%arg0: i32) -> (i32, i32) {
    %c0_i32 = arith.constant 0 : i32
    %c0_i32_0 = arith.constant 0 : i32
    return %arg0, %c0_i32 : i32, i32
  }
  func.func @transform_8(%arg0: i32) -> (i32, i32) {
    %c1_i32 = arith.constant 1 : i32
    %0 = arith.subi %c1_i32, %arg0 : i32
    %c0_i32 = arith.constant 0 : i32
    %c0_i32_0 = arith.constant 0 : i32
    return %0, %c0_i32 : i32, i32
  }
}

module attributes {stable_mosaic.version = 11 : i64} {
  func.func @_head_kernel(%arg0: i32, %arg1: memref<128x64xbf16, #tpu.memory_space<vmem>>, %arg2: memref<128x32xbf16, #tpu.memory_space<vmem>>, %arg3: memref<128x32xbf16, #tpu.memory_space<vmem>>, %arg4: memref<64x64xbf16, #tpu.memory_space<vmem>>, %arg5: memref<32x64xbf16, #tpu.memory_space<vmem>>, %arg6: memref<32x64xbf16, #tpu.memory_space<vmem>>, %arg7: memref<128x64xf32, #tpu.memory_space<vmem>>, %arg8: memref<64x128xbf16, #tpu.memory_space<vmem>>, %arg9: memref<1x128xf32, #tpu.memory_space<vmem>>, %arg10: memref<128x128xf32, #tpu.memory_space<vmem>>) attributes {dimension_semantics = [#tpu.dimension_semantics<parallel>], iteration_bounds = array<i64: 1>, scalar_prefetch = 0 : i64, scratch_operands = 0 : i64, tpu.core_type = #tpu.core_type<tc>, window_params = [{transform_indices = @transform_0, window_bounds = array<i64: 128, 64>}, {transform_indices = @transform_1, window_bounds = array<i64: 128, 32>}, {transform_indices = @transform_2, window_bounds = array<i64: 128, 32>}, {pipeline_mode = #tpu.pipeline_mode<synchronous>, transform_indices = @transform_3, window_bounds = array<i64: 64, 64>}, {pipeline_mode = #tpu.pipeline_mode<synchronous>, transform_indices = @transform_4, window_bounds = array<i64: 32, 64>}, {pipeline_mode = #tpu.pipeline_mode<synchronous>, transform_indices = @transform_5, window_bounds = array<i64: 32, 64>}, {pipeline_mode = #tpu.pipeline_mode<synchronous>, transform_indices = @transform_6, window_bounds = array<i64: 128, 64>}, {pipeline_mode = #tpu.pipeline_mode<synchronous>, transform_indices = @transform_7, window_bounds = array<i64: 64, 128>}, {pipeline_mode = #tpu.pipeline_mode<synchronous>, transform_indices = @transform_8, window_bounds = array<i64: 1, 128>}, {transform_indices = @transform_9, window_bounds = array<i64: 128, 128>}]} {
    %c0 = arith.constant 0 : index
    %c0_0 = arith.constant 0 : index
    %0 = vector.load %arg1[%c0, %c0_0] : memref<128x64xbf16, #tpu.memory_space<vmem>>, vector<128x64xbf16>
    %c0_1 = arith.constant 0 : index
    %c0_2 = arith.constant 0 : index
    %1 = vector.load %arg4[%c0_1, %c0_2] : memref<64x64xbf16, #tpu.memory_space<vmem>>, vector<64x64xbf16>
    %cst = arith.constant dense<0.000000e+00> : vector<128x64xf32>
    %2 = tpu.matmul %0, %1, %cst {dimension_numbers = #tpu.dot_dimension_numbers<[1], [0], [0], [1], [0, 0, 1, 1], [], []>} : vector<128x64xbf16>, vector<64x64xbf16>, vector<128x64xf32> -> vector<128x64xf32>
    %c0_3 = arith.constant 0 : index
    %c0_4 = arith.constant 0 : index
    %3 = vector.load %arg2[%c0_3, %c0_4] : memref<128x32xbf16, #tpu.memory_space<vmem>>, vector<128x32xbf16>
    %c0_5 = arith.constant 0 : index
    %c0_6 = arith.constant 0 : index
    %4 = vector.load %arg5[%c0_5, %c0_6] : memref<32x64xbf16, #tpu.memory_space<vmem>>, vector<32x64xbf16>
    %cst_7 = arith.constant dense<0.000000e+00> : vector<128x64xf32>
    %5 = tpu.matmul %3, %4, %cst_7 {dimension_numbers = #tpu.dot_dimension_numbers<[1], [0], [0], [1], [0, 0, 1, 1], [], []>} : vector<128x32xbf16>, vector<32x64xbf16>, vector<128x64xf32> -> vector<128x64xf32>
    %6 = arith.addf %2, %5 : vector<128x64xf32>
    %c0_8 = arith.constant 0 : index
    %c0_9 = arith.constant 0 : index
    %7 = vector.load %arg3[%c0_8, %c0_9] : memref<128x32xbf16, #tpu.memory_space<vmem>>, vector<128x32xbf16>
    %c0_10 = arith.constant 0 : index
    %c0_11 = arith.constant 0 : index
    %8 = vector.load %arg6[%c0_10, %c0_11] : memref<32x64xbf16, #tpu.memory_space<vmem>>, vector<32x64xbf16>
    %cst_12 = arith.constant dense<0.000000e+00> : vector<128x64xf32>
    %9 = tpu.matmul %7, %8, %cst_12 {dimension_numbers = #tpu.dot_dimension_numbers<[1], [0], [0], [1], [0, 0, 1, 1], [], []>} : vector<128x32xbf16>, vector<32x64xbf16>, vector<128x64xf32> -> vector<128x64xf32>
    %10 = arith.addf %6, %9 : vector<128x64xf32>
    %c0_13 = arith.constant 0 : index
    %c0_14 = arith.constant 0 : index
    %11 = vector.load %arg7[%c0_13, %c0_14] : memref<128x64xf32, #tpu.memory_space<vmem>>, vector<128x64xf32>
    %12 = arith.addf %10, %11 : vector<128x64xf32>
    %cst_15 = arith.constant 0.000000e+00 : f32
    %13 = vector.broadcast %cst_15 : f32 to vector<128x64xf32>
    %14 = arith.cmpf oge, %12, %13 : vector<128x64xf32>
    %cst_16 = arith.constant 2.000000e-01 : f32
    %15 = vector.broadcast %cst_16 : f32 to vector<128x64xf32>
    %16 = arith.mulf %15, %12 : vector<128x64xf32>
    %17 = arith.select %14, %12, %16 : vector<128x64xi1>, vector<128x64xf32>
    %18 = arith.truncf %17 : vector<128x64xf32> to vector<128x64xbf16>
    %c0_17 = arith.constant 0 : index
    %c0_18 = arith.constant 0 : index
    %19 = vector.load %arg8[%c0_17, %c0_18] : memref<64x128xbf16, #tpu.memory_space<vmem>>, vector<64x128xbf16>
    %cst_19 = arith.constant dense<0.000000e+00> : vector<128x128xf32>
    %20 = tpu.matmul %18, %19, %cst_19 {dimension_numbers = #tpu.dot_dimension_numbers<[1], [0], [0], [1], [0, 0, 1, 1], [], []>} : vector<128x64xbf16>, vector<64x128xbf16>, vector<128x128xf32> -> vector<128x128xf32>
    %c0_20 = arith.constant 0 : index
    %c0_21 = arith.constant 0 : index
    %21 = vector.load %arg9[%c0_20, %c0_21] : memref<1x128xf32, #tpu.memory_space<vmem>>, vector<1x128xf32>
    %22 = vector.broadcast %21 : vector<1x128xf32> to vector<128x128xf32>
    %23 = arith.addf %20, %22 : vector<128x128xf32>
    %24 = math.exp %23 : vector<128x128xf32>
    %c0_22 = arith.constant 0 : index
    %c0_23 = arith.constant 0 : index
    %25 = vector.load %arg10[%c0_22, %c0_23] : memref<128x128xf32, #tpu.memory_space<vmem>>, vector<128x128xf32>
    tpu.vector_store %arg10[%c0_22, %c0_23], %24 {strides = array<i32>} : memref<128x128xf32, #tpu.memory_space<vmem>>, vector<128x128xf32>,
    return
  }
  func.func @transform_0(%arg0: i32) -> (i32, i32) {
    %c0_i32 = arith.constant 0 : i32
    %c0_i32_0 = arith.constant 0 : i32
    return %arg0, %c0_i32 : i32, i32
  }
  func.func @transform_1(%arg0: i32) -> (i32, i32) {
    %c0_i32 = arith.constant 0 : i32
    %c0_i32_0 = arith.constant 0 : i32
    return %arg0, %c0_i32 : i32, i32
  }
  func.func @transform_2(%arg0: i32) -> (i32, i32) {
    %c0_i32 = arith.constant 0 : i32
    %c0_i32_0 = arith.constant 0 : i32
    return %arg0, %c0_i32 : i32, i32
  }
  func.func @transform_3(%arg0: i32) -> (i32, i32) {
    %c0_i32 = arith.constant 0 : i32
    %c0_i32_0 = arith.constant 0 : i32
    %c0_i32_1 = arith.constant 0 : i32
    return %c0_i32, %c0_i32_0 : i32, i32
  }
  func.func @transform_4(%arg0: i32) -> (i32, i32) {
    %c0_i32 = arith.constant 0 : i32
    %c0_i32_0 = arith.constant 0 : i32
    %c0_i32_1 = arith.constant 0 : i32
    return %c0_i32, %c0_i32_0 : i32, i32
  }
  func.func @transform_5(%arg0: i32) -> (i32, i32) {
    %c0_i32 = arith.constant 0 : i32
    %c0_i32_0 = arith.constant 0 : i32
    %c0_i32_1 = arith.constant 0 : i32
    return %c0_i32, %c0_i32_0 : i32, i32
  }
  func.func @transform_6(%arg0: i32) -> (i32, i32) {
    %c0_i32 = arith.constant 0 : i32
    %c0_i32_0 = arith.constant 0 : i32
    %c0_i32_1 = arith.constant 0 : i32
    return %c0_i32, %c0_i32_0 : i32, i32
  }
  func.func @transform_7(%arg0: i32) -> (i32, i32) {
    %c0_i32 = arith.constant 0 : i32
    %c0_i32_0 = arith.constant 0 : i32
    %c0_i32_1 = arith.constant 0 : i32
    return %c0_i32, %c0_i32_0 : i32, i32
  }
  func.func @transform_8(%arg0: i32) -> (i32, i32) {
    %c0_i32 = arith.constant 0 : i32
    %c0_i32_0 = arith.constant 0 : i32
    %c0_i32_1 = arith.constant 0 : i32
    return %c0_i32, %c0_i32_0 : i32, i32
  }
  func.func @transform_9(%arg0: i32) -> (i32, i32) {
    %c0_i32 = arith.constant 0 : i32
    %c0_i32_0 = arith.constant 0 : i32
    return %arg0, %c0_i32 : i32, i32
  }
}

</mosaic_0001>

<bundles_post_ra>
// kernel: decoder_forward.12
= control target key start
LH: loop header
LB: loop body
LE: loop exit
PB: predicated region body
PF: predicated region fallthrough
CT: control target
= control target key end

     0   :  { %s712_s15 = smov 0   ;;  %s783_s0 = inlined_call_operand.vmem [shape: bf16[2,18,64], index: 0, kind: input, shape index: {}]   ;;  %s784_s1 = inlined_call_operand.vmem [shape: bf16[3,64,64], index: 1, kind: input, shape index: {}]   ;;  %s785_s2 = inlined_call_operand.vmem [shape: f32[2,1,64], index: 2, kind: input, shape index: {}]   ;;  %s786_s3 = inlined_call_operand.vmem [shape: bf16[2,16,64], index: 3, kind: input, shape index: {}]   ;;  %s787_s4 = inlined_call_operand.vmem [shape: bf16[2,16,64], index: 4, kind: output, shape index: {}]  }
   0x1 LB: > { %s559_s16 = sadd.s32 4294967295, %s684_s15   ;;  %p563_p0 = scmp.ge.s32.totalorder %s684_s15, 1  ;;  %s684_s15 = sphi %s712_s15, %s14_s15  }
   0x2   : > { %p180_p1 = scmp.lt.s32.totalorder %s684_s15, 3 }
   0x4   : > { %p181_p2 = pnand %p563_p0, %p180_p1 }
   0x5   : > { %p214_p3 = scmp.lt.s32.totalorder (!%p181_p2), %s559_s16, 1 }
   0x6   : > { %184 = sbr.rel (%p181_p2) target bundleno = 242 (0xf2), region = 36 }
   0xb   : > { %v647_v0 = vld [vmem:[%s784_s1 + $0x38] sm:$0xff]  ;;  %v646_v3 = vld [vmem:[%s784_s1 + $0x30] sm:$0xff]  ;;  %s789_s16 = smov (!%p214_p3, %s559_s16), 1  ;;  %v645_v6 = vld [vmem:[%s784_s1 + $0x28] sm:$0xff]  ;;  %vm369_vm0 = vcmask 1046528   ;;  %vm298_vm2 = vcmask 523264  }
   0xc   : > { %v643_v1 = vld [vmem:[%s784_s1 + $0x18] sm:$0xff]  ;;  %306 = vmatpush.bf16.msra.mxu0 %v647_v0  ;;  %v642_v4 = vld [vmem:[%s784_s1 + $0x10] sm:$0xff]  ;;  %s663_s29 = smul.u32 12, %s789_s16  ;;  %v641_v7 = vld [vmem:[%s784_s1 + $0x8] sm:$0xff]  ;;  %vm261_vm1 = vsmask.f32 7424  ;;  %s221_s23 = scalar_lea.vmem %s785_s2, %s789_s16 }
   0xd   : > { %v651_v2 = vld [vmem:[%s784_s1 + $0x58] sm:$0xff]  ;;  %346 = vmatpush.bf16.msra.mxu1 %v643_v1  ;;  %v650_v5 = vld [vmem:[%s784_s1 + $0x50] sm:$0xff]  ;;  %v649_v8 = vld [vmem:[%s784_s1 + $0x48] sm:$0xff]  ;;  %v686_v35 = vmov 16.0   ;;  %s638_s24 = sshll.u32 %s789_s16, 3  ;;  %vm480_vm9 = vcmask 519168  }
   0xe   : > { %404 = vmatpush.bf16.msra.mxu2 %v651_v2  ;;  %s218_s12 = scalar_lea.vmem %s783_s0, %s663_s29  ;;  %v644_v17 = vld [vmem:[%s784_s1 + $0x20] sm:$0xff]  ;;  %674 = vrcp.f32 %v686_v35  ;;  %s226_s27 = scalar_lea.vmem %s786_s3, %s638_s24 }
   0xf   : > { %v653_v9 = vld [vmem:[%s218_s12] sm:$0xff]   ;;  %v243_v10 = vld [vmem:[%s218_s12 + $0x8] sm:$0x1]  ;;  %s231_s29 = scalar_lea.vmem %s787_s4, %s638_s24 }
  0x10   : > { %307 = vmatpush.bf16.msra.mxu0 %v646_v3  ;;  %v660_v11 = vld [vmem:[%s218_s12] sm:$0xf0]  ;;  %v258_v12 = vunpack.c.l.b16 %v243_v10  ;;  %v263_v13 = vshrl.u32 %v653_v9, 16  ;;  %v265_v14 = vshll.u32 %v653_v9, 16  ;;  %v661_v15 = vld [vmem:[%s218_s12] sm:$0xe] }
  0x11   : > { %347 = vmatpush.bf16.msra.mxu1 %v642_v4  ;;  %v662_v16 = vor.u32 %v661_v15, %v660_v11  ;;  %v640_v18 = vld [vmem:[%s784_s1] sm:$0xff] }
  0x12   : > { %405 = vmatpush.bf16.msra.mxu2 %v650_v5  ;;  %v260_v19 = vpack.c.b16 %v258_v12, %v258_v12  ;;  %v267_v20 = vrot.slane %v265_v14, 1  ;;  %v648_v21 = vld [vmem:[%s784_s1 + $0x40] sm:$0xff] }
  0x13   : > { %v370_v22 = vrot.slane %v662_v16, 1  ;;  %v673_v34 = vld [vmem:[%s221_s23] ss:$0 sm:$0xff] }
  0x14   : > { %308 = vmatpush.bf16.msra.mxu0 %v645_v6  ;;  %v268_v23 = vor.u32 %v267_v20, %v263_v13  ;;  %v270_v24 = vshll.u32 %v260_v19, 16  ;;  %v371_v25 = vrot.slane %v260_v19, 1  ;;  %v675_v41 = vpop.eup %674  ;;  %v657_v19 = vld [vmem:[%s226_s27] sm:$0xff]  }
  0x15   : > { %348 = vmatpush.bf16.msra.mxu1 %v641_v7  ;;  %v438_v45 = vmul.f32 16.0, %v675_v41  ;;  %vm442_vm5 = vweird.f32 %v675_v41 }
  0x16   : > { %406 = vmatpush.bf16.msra.mxu2 %v649_v8  ;;  %v272_v26 = vrot.slane %v270_v24, 1  ;;  %v372_v27 = vsel %vm369_vm0, %v370_v22, %v371_v25  ;;  %v659_v22 = vunpack.c.h.bf16 %v657_v19 }
  0x17   : > { %v439_v51 = vsub.f32 1.0, %v438_v45 }
  0x18   : > { %309 = vmatpush.bf16.msra.mxu0 %v644_v17  ;;  %v273_v28 = vsel %vm261_vm1, %v268_v23, %v272_v26 }
  0x19   : > { %349 = vmatpush.bf16.msra.mxu1 %v640_v18  ;;  %v440_v54 = vmul.f32 %v675_v41, %v439_v51 }
  0x1a   : > { %407 = vmatpush.bf16.msra.mxu2 %v648_v21  ;;  %v658_v21 = vunpack.c.l.bf16 %v657_v19 }
  0x1b   : > { %593 = vmatmul.msk.bf16.vlgmr.msra.gmra.mxu0 %vm298_vm2, %v273_v28  ;;  %v441_v57 = vadd.f32 %v675_v41, %v440_v54 }
  0x1c   : > { %610 = vmatmul.msk.bf16.vlgmr.msra.gmra.mxu1 %vm298_vm2, %v653_v9 }
  0x1d   : > { %635 = vmatmul.msk.bf16.vlgmr.msra.gmra.mxu2 %vm298_vm2, %v372_v27  ;;  %v443_v60 = vsel %vm442_vm5, %v675_v41, %v441_v57 }
  0x98   : > { %v311_v29 = vpop.f32.mrf.mxu0 }
  0x99   : > { %v351_v30 = vpop.f32.mrf.mxu1 }
  0x9a   : > { %v352_v31 = vadd.f32 %v351_v30, %v311_v29 }
  0xa0   : > { %v409_v32 = vpop.f32.mrf.mxu2  ;;  %v313_v36 = vpop.f32.mrf.mxu0 }
  0xa1   : > { %v414_v33 = vadd.f32 %v409_v32, %v352_v31  ;;  %v353_v37 = vpop.f32.mrf.mxu1 }
  0xa2   : > { %v354_v39 = vadd.f32 %v353_v37, %v313_v36 }
  0xa3   : > { %v420_v38 = vadd.f32 %v673_v34, %v414_v33 }
  0xa5   : > { %v424_v42 = vmul.f32 0.2, %v420_v38  ;;  %vm422_vm3 = vcmp.ge.f32.partialorder %v420_v38, 0.0 }
  0xa7   : > { %v426_v46 = vsel %vm422_vm3, %v420_v38, %v424_v42 }
  0xa8   : > { %v411_v40 = vpop.f32.mrf.mxu2  ;;  %v428_v49 = vsel %vm298_vm2, %v426_v46, 0.0 }
  0xa9   : > { %v415_v43 = vadd.f32 %v411_v40, %v354_v39 }
  0xab   : > { %v421_v44 = vadd.f32 %v673_v34, %v415_v43 }
  0xad   : > { %vm423_vm4 = vcmp.ge.f32.partialorder %v421_v44, 0.0  ;;  %v425_v47 = vmul.f32 0.2, %v421_v44 }
  0xaf   : > { %v427_v48 = vsel %vm423_vm4, %v421_v44, %v425_v47 }
  0xb0   : > { %v429_v50 = vsel %vm298_vm2, %v427_v48, 0.0 }
  0xb1   : > { %v430_v52 = vadd.f32 %v429_v50, %v428_v49 }
  0xb3   : > { %v431_v53 = vrot.slane %v430_v52, 4 }
  0xb5   : > { %v432_v55 = vadd.f32 %v431_v53, %v430_v52 }
  0xb7   : > { %v433_v56 = vrot.slane %v432_v55, 2 }
  0xb9   : > { %v434_v58 = vadd.f32 %v433_v56, %v432_v55 }
  0xbb   : > { %v435_v59 = vrot.slane %v434_v58, 1 }
  0xbd   : > { %v436_v61 = vadd.f32 %v435_v59, %v434_v58 }
  0xbf   : > { %v444_v62 = vmul.f32 %v443_v60, %v436_v61 }
  0xc1   : > { %v445_v63 = vsub.f32 %v426_v46, %v444_v62  ;;  %v446_v0 = vsub.f32 %v427_v48, %v444_v62 }
  0xc3   : > { %v447_v1 = vmul.f32 %v445_v63, %v445_v63  ;;  %v448_v2 = vmul.f32 %v446_v0, %v446_v0 }
  0xc5   : > { %v449_v3 = vsel %vm298_vm2, %v447_v1, 0.0  ;;  %v450_v4 = vsel %vm298_vm2, %v448_v2, 0.0 }
  0xc6   : > { %v451_v5 = vadd.f32 %v450_v4, %v449_v3 }
  0xc8   : > { %v452_v6 = vrot.slane %v451_v5, 4 }
  0xca   : > { %v453_v7 = vadd.f32 %v452_v6, %v451_v5 }
  0xcc   : > { %v454_v8 = vrot.slane %v453_v7, 2 }
  0xce   : > { %v455_v9 = vadd.f32 %v454_v8, %v453_v7 }
  0xd0   : > { %v456_v10 = vrot.slane %v455_v9, 1 }
  0xd2   : > { %v457_v11 = vadd.f32 %v456_v10, %v455_v9 }
  0xd4   : > { %v458_v12 = vmul.f32 %v457_v11, %v443_v60 }
  0xd6   : > { %v459_v13 = vadd.f32 1e-05, %v458_v12 }
  0xd8   : > { %676 = vrsqrt.f32 %v459_v13  ;;  %vm466_vm7 = vweird.f32 %v459_v13 }
  0xde   : > { %v677_v14 = vpop.eup %676 }
  0xdf   : > { %v461_v15 = vmul.f32 %v677_v14, %v459_v13  ;;  %vm467_vm6 = vweird.f32 %v677_v14 }
  0xe0   : > { %vm468_vm8 = vmor %vm466_vm7, %vm467_vm6 }
  0xe1   : > { %v462_v16 = vmul.f32 %v677_v14, %v461_v15 }
  0xe3   : > { %v463_v17 = vmul.f32 0.5, %v462_v16 }
  0xe5   : > { %v464_v18 = vsub.f32 1.5, %v463_v17 }
  0xe7   : > { %v465_v20 = vmul.f32 %v677_v14, %v464_v18 }
  0xe9   : > { %v469_v23 = vsel %vm468_vm8, %v677_v14, %v465_v20 }
  0xea   : > { %v470_v24 = vmul.f32 %v469_v23, %v445_v63  ;;  %v471_v25 = vmul.f32 %v469_v23, %v446_v0 }
  0xec   : > { %v476_v26 = vadd.f32 %v658_v21, %v470_v24  ;;  %v477_v27 = vadd.f32 %v659_v22, %v471_v25 }
  0xee   : > { %v478_v28 = vpack.c.bf16 %v476_v26, %v476_v26  ;;  %v479_v29 = vpack.c.bf16 %v477_v27, %v477_v27 }
  0xf0   : > { %481 = vst.msk [vmem:[%s231_s29] sm:$0xf] %vm480_vm9, %v478_v28 }
  0xf1   : > { %482 = vst.msk [vmem:[%s231_s29 + $0x4] sm:$0xf] %vm480_vm9, %v479_v29 }
  0xf2 PF: > { %s14_s15 = sadd.s32 1, %s684_s15  }
  0xf3   : > { %p11_p4 = scmp.ge.s32.totalorder %s14_s15, 4  }
  0xf5   :  { %13 = sbr.rel (!%p11_p4) target bundleno = 1 (0x1), region = 74 }

// kernel: decoder_forward.13
= control target key start
LH: loop header
LB: loop body
LE: loop exit
PB: predicated region body
PF: predicated region fallthrough
CT: control target
= control target key end

     0   :  { %8 = vsyncpa [#allocation3], 0  ;;  %s654_s12 = smov 0   ;;  %s682_s0 = inlined_call_operand.vmem [shape: bf16[2,18,64], index: 0, kind: input, shape index: {}]   ;;  %s683_s1 = inlined_call_operand.hbm [shape: bf16[3,64,128], index: 1, kind: input, shape index: {}]   ;;  %s684_s2 = inlined_call_operand.vmem [shape: f32[2,1,128], index: 2, kind: input, shape index: {}]   ;;  %s685_s3 = inlined_call_operand.vmem [shape: bf16[2,16,128], index: 3, kind: output, shape index: {}]  }
   0x1 LB: > { %s129_s15 = sshll.u32 %s683_s1, 4  ;;  %s478_s16 = sadd.s32 4294967295, %s629_s12   ;;  %s629_s12 = sphi %s654_s12, %s14_s12   ;;  %s130_s15 = int_to_ptr.hbm [resolvable:$true] %s129_s15 }
   0x2   : > { %p480_p0 = scmp.ge.s32.totalorder %s629_s12, 1  ;;  %p118_p1 = scmp.lt.s32.totalorder %s629_s12, 3 }
   0x3   : > { %p575_p2 = scmp.eq.s32.totalorder %s478_s16, 0  ;;  %s631_s17 = smov [#allocation2]  }
   0x4   : > { %p119_p3 = pnand %p480_p0, %p118_p1  ;;  %s131_s18 = sshll.u32 %s631_s17, 4  ;;  %s132_s18 = int_to_ptr.vmem [resolvable:$true] %s131_s18 }
   0x5   : > { %s632_s19 = smov 64   ;;  %s633_s20 = smov 4  }
   0x6   : > { %p571_p4 = pneg %p119_p3  ;;  %161 = sbr.rel (%p119_p3) target bundleno = 180 (0xb4), region = 32 }
   0x8   : > { %p572_p5 = pnand %p575_p2, %p571_p4 }
   0xa   : > { %574 = dma.hbm_to_vmem [thread:$0]  (!%p572_p5), %s130_s15, 1536, %s132_s18, [#allocation3], %s632_s19, %s632_s19, %s633_s20  }
   0xb   : > { %624 = dma.done.wait (%p575_p2), [#allocation3], 1536  }
   0xc   : > { %626 = vsyncadd (%p575_p2), [#allocation3], 4294965760  ;;  %p189_p6 = scmp.lt.s32.totalorder %s478_s16, 1  ;;  %v549_v0 = vld [vmem:[#allocation2 + $0x38] sm:$0xff]  ;;  %v548_v3 = vld [vmem:[#allocation2 + $0x30] sm:$0xff]  ;;  %vm339_vm1 = vcmask 1046528  }
   0xd   : > { %v545_v1 = vld [vmem:[#allocation2 + $0x18] sm:$0xff]  ;;  %276 = vmatpush.bf16.msra.mxu0 %v549_v0  ;;  %v544_v4 = vld [vmem:[#allocation2 + $0x10] sm:$0xff]  ;;  %v547_v12 = vld [vmem:[#allocation2 + $0x28] sm:$0xff]  ;;  %vm231_vm0 = vsmask.f32 7424  ;;  %vm268_vm2 = vcmask 523264  }
   0xe   : > { %s687_s16 = smov (!%p189_p6, %s478_s16), 1  ;;  %v553_v2 = vld [vmem:[#allocation2 + $0x58] sm:$0xff]  ;;  %316 = vmatpush.bf16.msra.mxu1 %v545_v1  ;;  %v552_v5 = vld [vmem:[#allocation2 + $0x50] sm:$0xff]  ;;  %v543_v13 = vld [vmem:[#allocation2 + $0x8] sm:$0xff] }
   0xf   : > { %s566_s21 = smul.u32 12, %s687_s16  ;;  %374 = vmatpush.bf16.msra.mxu2 %v553_v2  ;;  %v551_v15 = vld [vmem:[#allocation2 + $0x48] sm:$0xff]  ;;  %v546_v20 = vld [vmem:[#allocation2 + $0x20] sm:$0xff]  ;;  %s196_s27 = scalar_lea.vmem %s684_s2, %s687_s16 }
  0x10   : > { %v542_v21 = vld [vmem:[#allocation2] sm:$0xff]  ;;  %s541_s28 = sshll.u32 %s687_s16, 3 }
  0x11   : > { %s193_s24 = scalar_lea.vmem %s682_s0, %s566_s21  ;;  %277 = vmatpush.bf16.msra.mxu0 %v548_v3  ;;  %v550_v23 = vld [vmem:[#allocation2 + $0x40] sm:$0xff]  ;;  %s201_s4 = scalar_lea.vmem %s685_s3, %s541_s28 }
  0x12   : > { %v555_v6 = vld [vmem:[%s193_s24] sm:$0xff]   ;;  %v213_v7 = vld [vmem:[%s193_s24 + $0x8] sm:$0x1]  ;;  %317 = vmatpush.bf16.msra.mxu1 %v544_v4 }
  0x13   : > { %v563_v8 = vld [vmem:[%s193_s24] sm:$0xf0]  ;;  %v228_v9 = vunpack.c.l.b16 %v213_v7  ;;  %v235_v10 = vshll.u32 %v555_v6, 16  ;;  %v564_v11 = vld [vmem:[%s193_s24] sm:$0xe]  ;;  %v233_v14 = vshrl.u32 %v555_v6, 16  ;;  %375 = vmatpush.bf16.msra.mxu2 %v552_v5 }
  0x14   : > { %v565_v18 = vor.u32 %v564_v11, %v563_v8  ;;  %v588_v34 = vld [vmem:[%s196_s27] ss:$0 sm:$0xff] }
  0x15   : > { %v230_v16 = vpack.c.b16 %v228_v9, %v228_v9  ;;  %v237_v17 = vrot.slane %v235_v10, 1  ;;  %278 = vmatpush.bf16.msra.mxu0 %v547_v12 }
  0x16   : > { %318 = vmatpush.bf16.msra.mxu1 %v543_v13  ;;  %v340_v25 = vrot.slane %v565_v18, 1 }
  0x17   : > { %v240_v19 = vshll.u32 %v230_v16, 16  ;;  %v238_v22 = vor.u32 %v237_v17, %v233_v14  ;;  %376 = vmatpush.bf16.msra.mxu2 %v551_v15  ;;  %v341_v26 = vrot.slane %v230_v16, 1 }
  0x19   : > { %v242_v24 = vrot.slane %v240_v19, 1  ;;  %279 = vmatpush.bf16.msra.mxu0 %v546_v20  ;;  %v342_v28 = vsel %vm339_vm1, %v340_v25, %v341_v26 }
  0x1a   : > { %319 = vmatpush.bf16.msra.mxu1 %v542_v21 }
  0x1b   : > { %v243_v27 = vsel %vm231_vm0, %v238_v22, %v242_v24  ;;  %377 = vmatpush.bf16.msra.mxu2 %v550_v23 }
  0x1c   : > { %504 = vmatmul.msk.bf16.vlgmr.msra.gmra.mxu0 %vm268_vm2, %v243_v27 }
  0x1d   : > { %521 = vmatmul.msk.bf16.vlgmr.msra.gmra.mxu1 %vm268_vm2, %v555_v6 }
  0x1e   : > { %538 = vmatmul.msk.bf16.vlgmr.msra.gmra.mxu2 %vm268_vm2, %v342_v28 }
  0x99   : > { %v281_v29 = vpop.f32.mrf.mxu0 }
  0x9a   : > { %v321_v30 = vpop.f32.mrf.mxu1 }
  0x9b   : > { %v322_v31 = vadd.f32 %v321_v30, %v281_v29 }
  0xa1   : > { %v379_v32 = vpop.f32.mrf.mxu2  ;;  %v283_v35 = vpop.f32.mrf.mxu0 }
  0xa2   : > { %v384_v33 = vadd.f32 %v379_v32, %v322_v31  ;;  %v323_v36 = vpop.f32.mrf.mxu1 }
  0xa3   : > { %v324_v38 = vadd.f32 %v323_v36, %v283_v35 }
  0xa4   : > { %v390_v37 = vadd.f32 %v588_v34, %v384_v33 }
  0xa6   : > { %v394_v41 = vmul.f32 0.2, %v390_v37  ;;  %vm392_vm3 = vcmp.ge.f32.partialorder %v390_v37, 0.0 }
  0xa8   : > { %v396_v44 = vsel %vm392_vm3, %v390_v37, %v394_v41 }
  0xa9   : > { %v381_v39 = vpop.f32.mrf.mxu2 }
  0xaa   : > { %v385_v40 = vadd.f32 %v381_v39, %v324_v38 }
  0xac   : > { %v391_v42 = vadd.f32 %v588_v34, %v385_v40 }
  0xae   : > { %vm393_vm4 = vcmp.ge.f32.partialorder %v391_v42, 0.0  ;;  %v395_v43 = vmul.f32 0.2, %v391_v42 }
  0xb0   : > { %v397_v45 = vsel %vm393_vm4, %v391_v42, %v395_v43 }
  0xb1   : > { %v561_v46 = vpack.c.bf16 %v397_v45, %v396_v44 }
  0xb3   : > { %562 = vst [vmem:[%s201_s4] sm:$0xff] %v561_v46  }
  0xb4 PF: > { %s14_s12 = sadd.s32 1, %s629_s12  }
  0xb5   : > { %p11_p7 = scmp.ge.s32.totalorder %s14_s12, 4  }
  0xb7   :  { %13 = sbr.rel (!%p11_p7) target bundleno = 1 (0x1), region = 72 }
  0xbc   :  { %423 = vsyncpa [#allocation3], 1 }
  0xbd   :  { %425 = vsyncpa [#allocation3 + $0x1], 1 }

// kernel: decoder_forward.11
= control target key start
LH: loop header
LB: loop body
LE: loop exit
PB: predicated region body
PF: predicated region fallthrough
CT: control target
= control target key end

     0   :  { %8 = vsyncpa [#allocation3], 0  ;;  %s615_s12 = smov 0   ;;  %s643_s0 = inlined_call_operand.vmem [shape: bf16[2,10,64], index: 0, kind: input, shape index: {}]   ;;  %s644_s1 = inlined_call_operand.hbm [shape: bf16[3,64,128], index: 1, kind: input, shape index: {}]   ;;  %s645_s2 = inlined_call_operand.vmem [shape: f32[2,1,128], index: 2, kind: input, shape index: {}]   ;;  %s646_s3 = inlined_call_operand.vmem [shape: bf16[2,8,128], index: 3, kind: output, shape index: {}]  }
   0x1 LB: > { %s129_s15 = sshll.u32 %s644_s1, 4  ;;  %s452_s16 = sadd.s32 4294967295, %s590_s12   ;;  %s590_s12 = sphi %s615_s12, %s14_s12   ;;  %s130_s15 = int_to_ptr.hbm [resolvable:$true] %s129_s15 }
   0x2   : > { %p454_p0 = scmp.ge.s32.totalorder %s590_s12, 1  ;;  %p118_p1 = scmp.lt.s32.totalorder %s590_s12, 3 }
   0x3   : > { %p536_p2 = scmp.eq.s32.totalorder %s452_s16, 0  ;;  %s592_s17 = smov [#allocation2]  }
   0x4   : > { %p119_p3 = pnand %p454_p0, %p118_p1  ;;  %s131_s18 = sshll.u32 %s592_s17, 4  ;;  %s132_s18 = int_to_ptr.vmem [resolvable:$true] %s131_s18 }
   0x5   : > { %s593_s19 = smov 64   ;;  %s594_s20 = smov 4  }
   0x6   : > { %p532_p4 = pneg %p119_p3  ;;  %161 = sbr.rel (%p119_p3) target bundleno = 172 (0xac), region = 32 }
   0x8   : > { %p533_p5 = pnand %p536_p2, %p532_p4 }
   0xa   : > { %535 = dma.hbm_to_vmem [thread:$0]  (!%p533_p5), %s130_s15, 1536, %s132_s18, [#allocation3], %s593_s19, %s593_s19, %s594_s20  }
   0xb   : > { %585 = dma.done.wait (%p536_p2), [#allocation3], 1536  }
   0xc   : > { %587 = vsyncadd (%p536_p2), [#allocation3], 4294965760  ;;  %p188_p6 = scmp.lt.s32.totalorder %s452_s16, 1  ;;  %v523_v0 = vld [vmem:[#allocation2 + $0x38] sm:$0xff]  ;;  %v522_v3 = vld [vmem:[#allocation2 + $0x30] sm:$0xff]  ;;  %vm256_vm0 = vcmask 523264  }
   0xd   : > { %v519_v1 = vld [vmem:[#allocation2 + $0x18] sm:$0xff]  ;;  %264 = vmatpush.bf16.msra.mxu0 %v523_v0  ;;  %v518_v4 = vld [vmem:[#allocation2 + $0x10] sm:$0xff]  ;;  %v521_v11 = vld [vmem:[#allocation2 + $0x28] sm:$0xff] }
   0xe   : > { %s648_s16 = smov (!%p188_p6, %s452_s16), 1  ;;  %v527_v2 = vld [vmem:[#allocation2 + $0x58] sm:$0xff]  ;;  %304 = vmatpush.bf16.msra.mxu1 %v519_v1  ;;  %v526_v5 = vld [vmem:[#allocation2 + $0x50] sm:$0xff]  ;;  %v517_v12 = vld [vmem:[#allocation2 + $0x8] sm:$0xff] }
   0xf   : > { %s515_s21 = sshll.u32 %s648_s16, 3  ;;  %358 = vmatpush.bf16.msra.mxu2 %v527_v2  ;;  %v525_v14 = vld [vmem:[#allocation2 + $0x48] sm:$0xff]  ;;  %v520_v18 = vld [vmem:[#allocation2 + $0x20] sm:$0xff]  ;;  %s195_s27 = scalar_lea.vmem %s645_s2, %s648_s16 }
  0x10   : > { %s192_s24 = scalar_lea.vmem %s643_s0, %s515_s21  ;;  %v516_v19 = vld [vmem:[#allocation2] sm:$0xff]  ;;  %s461_s28 = sshll.u32 %s648_s16, 2 }
  0x11   : > { %v201_v6 = vld [vmem:[%s192_s24] sm:$0xf]  ;;  %v210_v7 = vld [vmem:[%s192_s24 + $0x4] sm:$0x1]  ;;  %265 = vmatpush.bf16.msra.mxu0 %v522_v3  ;;  %s199_s4 = scalar_lea.vmem %s646_s3, %s461_s28 }
  0x12   : > { %v313_v8 = vld [vmem:[%s192_s24] sm:$0xe]  ;;  %v222_v9 = vunpack.c.l.b16 %v201_v6  ;;  %v223_v10 = vunpack.c.l.b16 %v210_v7  ;;  %305 = vmatpush.bf16.msra.mxu1 %v518_v4  ;;  %v549_v28 = vld [vmem:[%s195_s27] ss:$0 sm:$0xff] }
  0x13   : > { %v324_v13 = vunpack.c.l.b16 %v313_v8  ;;  %359 = vmatpush.bf16.msra.mxu2 %v526_v5  ;;  %v524_v21 = vld [vmem:[#allocation2 + $0x40] sm:$0xff] }
  0x14   : > { %v224_v15 = vpack.c.b16 %v223_v10, %v222_v9 }
  0x15   : > { %266 = vmatpush.bf16.msra.mxu0 %v521_v11  ;;  %v325_v20 = vpack.c.b16 %v223_v10, %v324_v13 }
  0x16   : > { %v226_v16 = vshrl.u32 %v224_v15, 16  ;;  %v228_v17 = vshll.u32 %v224_v15, 16  ;;  %306 = vmatpush.bf16.msra.mxu1 %v517_v12 }
  0x17   : > { %360 = vmatpush.bf16.msra.mxu2 %v525_v14  ;;  %v326_v24 = vrot.slane %v325_v20, 1 }
  0x18   : > { %v230_v22 = vrot.slane %v228_v17, 1 }
  0x19   : > { %267 = vmatpush.bf16.msra.mxu0 %v520_v18 }
  0x1a   : > { %v231_v23 = vor.u32 %v230_v22, %v226_v16  ;;  %307 = vmatpush.bf16.msra.mxu1 %v516_v19 }
  0x1b   : > { %361 = vmatpush.bf16.msra.mxu2 %v524_v21 }
  0x1c   : > { %478 = vmatmul.msk.bf16.vlgmr.msra.gmra.mxu0 %vm256_vm0, %v231_v23 }
  0x1d   : > { %495 = vmatmul.msk.bf16.vlgmr.msra.gmra.mxu1 %vm256_vm0, %v201_v6 }
  0x1e   : > { %512 = vmatmul.msk.bf16.vlgmr.msra.gmra.mxu2 %vm256_vm0, %v326_v24 }
  0x99   : > { %v269_v25 = vpop.f32.mrf.mxu0 }
  0x9a   : > { %v309_v26 = vpop.f32.mrf.mxu1 }
  0x9b   : > { %v310_v27 = vadd.f32 %v309_v26, %v269_v25 }
  0xa1   : > { %v363_v29 = vpop.f32.mrf.mxu2  ;;  %v271_v31 = vpop.f32.mrf.mxu0 }
  0xa2   : > { %v367_v30 = vadd.f32 %v363_v29, %v310_v27  ;;  %v311_v32 = vpop.f32.mrf.mxu1 }
  0xa4   : > { %v372_v33 = vadd.f32 %v549_v28, %v367_v30 }
  0xa6   : > { %vm373_vm1 = vcmp.ge.f32.partialorder %v372_v33, 0.0  ;;  %v374_v34 = vmul.f32 0.2, %v372_v33 }
  0xa8   : > { %v375_v35 = vsel %vm373_vm1, %v372_v33, %v374_v34 }
  0xa9   : > { %v376_v36 = vpack.c.bf16 %v375_v35, %v375_v35  ;;  %v365_v37 = vpop.f32.mrf.mxu2 }
  0xab   : > { %377 = vst [vmem:[%s199_s4] sm:$0xf] %v376_v36 }
  0xac PF: > { %s14_s12 = sadd.s32 1, %s590_s12  }
  0xad   : > { %p11_p7 = scmp.ge.s32.totalorder %s14_s12, 4  }
  0xaf   :  { %13 = sbr.rel (!%p11_p7) target bundleno = 1 (0x1), region = 72 }
  0xb4   :  { %397 = vsyncpa [#allocation3], 1 }
  0xb5   :  { %399 = vsyncpa [#allocation3 + $0x1], 1 }

// kernel: decoder_forward.14
= control target key start
LH: loop header
LB: loop body
LE: loop exit
PB: predicated region body
PF: predicated region fallthrough
CT: control target
= control target key end

     0   :  { %s803_s15 = smov 0   ;;  %s885_s0 = inlined_call_operand.vmem [shape: bf16[2,34,64], index: 0, kind: input, shape index: {}]   ;;  %s886_s1 = inlined_call_operand.vmem [shape: bf16[3,64,64], index: 1, kind: input, shape index: {}]   ;;  %s887_s2 = inlined_call_operand.vmem [shape: f32[2,1,64], index: 2, kind: input, shape index: {}]   ;;  %s888_s3 = inlined_call_operand.vmem [shape: bf16[2,32,64], index: 3, kind: input, shape index: {}]   ;;  %s889_s4 = inlined_call_operand.vmem [shape: bf16[2,32,64], index: 4, kind: output, shape index: {}]  }
   0x1 LB: > { %s633_s16 = sadd.s32 4294967295, %s775_s15   ;;  %p637_p0 = scmp.ge.s32.totalorder %s775_s15, 1  ;;  %s775_s15 = sphi %s803_s15, %s14_s15  }
   0x2   : > { %p180_p1 = scmp.lt.s32.totalorder %s775_s15, 3 }
   0x4   : > { %p181_p2 = pnand %p637_p0, %p180_p1 }
   0x5   : > { %p214_p3 = scmp.lt.s32.totalorder (!%p181_p2), %s633_s16, 1 }
   0x6   : > { %184 = sbr.rel (%p181_p2) target bundleno = 264 (0x108), region = 36 }
   0xb   : > { %v729_v0 = vld [vmem:[%s886_s1 + $0x38] sm:$0xff]  ;;  %v728_v3 = vld [vmem:[%s886_s1 + $0x30] sm:$0xff]  ;;  %s891_s16 = smov (!%p214_p3, %s633_s16), 1  ;;  %v727_v6 = vld [vmem:[%s886_s1 + $0x28] sm:$0xff]  ;;  %vm268_vm0 = vsmask.f32 7424 }
   0xc   : > { %v725_v1 = vld [vmem:[%s886_s1 + $0x18] sm:$0xff]  ;;  %324 = vmatpush.bf16.msra.mxu0 %v729_v0  ;;  %v724_v4 = vld [vmem:[%s886_s1 + $0x10] sm:$0xff]  ;;  %750 = vmatpush.bf16.msra.mxu3 %v729_v0  ;;  %s754_s29 = smul.u32 20, %s891_s16  ;;  %v723_v7 = vld [vmem:[%s886_s1 + $0x8] sm:$0xff]  ;;  %vm399_vm1 = vcmask 1046528   ;;  %vm313_vm2 = vcmask 523264   ;;  %s221_s23 = scalar_lea.vmem %s887_s2, %s891_s16 }
   0xd   : > { %v733_v2 = vld [vmem:[%s886_s1 + $0x58] sm:$0xff]  ;;  %371 = vmatpush.bf16.msra.mxu1 %v725_v1  ;;  %v732_v5 = vld [vmem:[%s886_s1 + $0x50] sm:$0xff]  ;;  %v731_v8 = vld [vmem:[%s886_s1 + $0x48] sm:$0xff]  ;;  %v777_v57 = vmov 32.0   ;;  %s719_s24 = sshll.u32 %s891_s16, 4  ;;  %vm552_vm11 = vcmask 519168  }
   0xe   : > { %439 = vmatpush.bf16.msra.mxu2 %v733_v2  ;;  %s218_s12 = scalar_lea.vmem %s885_s0, %s754_s29  ;;  %v726_v19 = vld [vmem:[%s886_s1 + $0x20] sm:$0xff]  ;;  %765 = vrcp.f32 %v777_v57  ;;  %s226_s27 = scalar_lea.vmem %s888_s3, %s719_s24 }
   0xf   : > { %v735_v9 = vld [vmem:[%s218_s12] sm:$0xff]   ;;  %v721_v10 = vld [vmem:[%s218_s12 + $0x8] sm:$0xff]  ;;  %v245_v15 = vld [vmem:[%s218_s12 + $0x10] sm:$0x1]  ;;  %s231_s29 = scalar_lea.vmem %s889_s4, %s719_s24 }
  0x10   : > { %325 = vmatpush.bf16.msra.mxu0 %v728_v3  ;;  %751 = vmatpush.bf16.msra.mxu3 %v728_v3  ;;  %v746_v11 = vld [vmem:[%s218_s12] sm:$0xf0]  ;;  %v270_v12 = vshrl.u32 %v735_v9, 16  ;;  %v272_v13 = vshll.u32 %v735_v9, 16  ;;  %v747_v14 = vld [vmem:[%s218_s12] sm:$0xe]  ;;  %v264_v18 = vunpack.c.l.b16 %v245_v15 }
  0x11   : > { %372 = vmatpush.bf16.msra.mxu1 %v724_v4  ;;  %v277_v16 = vshll.u32 %v721_v10, 16  ;;  %v748_v17 = vor.u32 %v747_v14, %v746_v11  ;;  %v722_v20 = vld [vmem:[%s886_s1] sm:$0xff]  ;;  %v281_v22 = vshrl.u32 %v721_v10, 16  ;;  %v401_v26 = vrot.slane %v721_v10, 1 }
  0x12   : > { %440 = vmatpush.bf16.msra.mxu2 %v732_v5  ;;  %v274_v21 = vrot.slane %v272_v13, 1  ;;  %v730_v23 = vld [vmem:[%s886_s1 + $0x40] sm:$0xff]  ;;  %v267_v27 = vpack.c.b16 %v264_v18, %v264_v18 }
  0x13   : > { %v279_v24 = vrot.slane %v277_v16, 1  ;;  %v400_v25 = vrot.slane %v748_v17, 1  ;;  %v764_v49 = vld [vmem:[%s221_s23] ss:$0 sm:$0xff] }
  0x14   : > { %326 = vmatpush.bf16.msra.mxu0 %v727_v6  ;;  %752 = vmatpush.bf16.msra.mxu3 %v727_v6  ;;  %v275_v28 = vor.u32 %v274_v21, %v270_v12  ;;  %v285_v30 = vshll.u32 %v267_v27, 16  ;;  %v403_v35 = vrot.slane %v267_v27, 1  ;;  %v766_v1 = vpop.eup %765 }
  0x15   : > { %373 = vmatpush.bf16.msra.mxu1 %v723_v7  ;;  %v283_v29 = vor.u32 %v281_v22, %v279_v24  ;;  %v402_v32 = vsel %vm399_vm1, %v400_v25, %v401_v26  ;;  %vm496_vm7 = vweird.f32 %v766_v1 }
  0x16   : > { %441 = vmatpush.bf16.msra.mxu2 %v731_v8  ;;  %v280_v31 = vsel %vm268_vm0, %v275_v28, %v279_v24  ;;  %v287_v33 = vrot.slane %v285_v30, 1  ;;  %v404_v36 = vsel %vm399_vm1, %v401_v26, %v403_v35 }
  0x18   : > { %327 = vmatpush.bf16.msra.mxu0 %v726_v19  ;;  %753 = vmatpush.bf16.msra.mxu3 %v726_v19  ;;  %v288_v34 = vsel %vm268_vm0, %v283_v29, %v287_v33 }
  0x19   : > { %374 = vmatpush.bf16.msra.mxu1 %v722_v20 }
  0x1a   : > { %442 = vmatpush.bf16.msra.mxu2 %v730_v23 }
  0x1b   : > { %671 = vmatmul.msk.bf16.vlgmr.msra.gmra.mxu0 %vm313_vm2, %v280_v31  ;;  %672 = vmatmul.msk.bf16.vlgmr.msra.gmra.mxu3 %vm313_vm2, %v288_v34 }
  0x1c   : > { %689 = vmatmul.msk.bf16.vlgmr.msra.gmra.mxu1 %vm313_vm2, %v735_v9  ;;  %v492_v9 = vmul.f32 32.0, %v766_v1 }
  0x1d   : > { %715 = vmatmul.msk.bf16.vlgmr.msra.gmra.mxu2 %vm313_vm2, %v402_v32 }
  0x1e   : > { %v493_v15 = vsub.f32 1.0, %v492_v9 }
  0x20   : > { %v494_v18 = vmul.f32 %v766_v1, %v493_v15 }
  0x22   : > { %v495_v21 = vadd.f32 %v766_v1, %v494_v18 }
  0x24   : > { %v497_v24 = vsel %vm496_vm7, %v766_v1, %v495_v21 }
  0x2c   : > { %690 = vmatmul.msk.bf16.gmra.mxu1 %vm313_vm2, %v721_v10 }
  0x2d   : > { %716 = vmatmul.msk.bf16.gmra.mxu2 %vm313_vm2, %v404_v36 }
  0x98   : > { %v329_v38 = vpop.f32.mrf.mxu0 }
  0x99   : > { %v376_v37 = vpop.f32.mrf.mxu1 }
  0x9a   : > { %v377_v43 = vadd.f32 %v376_v37, %v329_v38 }
  0x9e   : > { %v334_v47 = vpop.f32.mrf.mxu3 }
  0xa0   : > { %v444_v39 = vpop.f32.mrf.mxu2  ;;  %v331_v41 = vpop.f32.mrf.mxu0 }
  0xa1   : > { %v378_v40 = vpop.f32.mrf.mxu1  ;;  %v454_v48 = vadd.f32 %v444_v39, %v377_v43 }
  0xa2   : > { %v379_v44 = vadd.f32 %v378_v40, %v331_v41 }
  0xa3   : > { %v462_v53 = vadd.f32 %v764_v49, %v454_v48 }
  0xa5   : > { %v470_v59 = vmul.f32 0.2, %v462_v53  ;;  %vm466_vm4 = vcmp.ge.f32.partialorder %v462_v53, 0.0 }
  0xa6   : > { %v336_v61 = vpop.f32.mrf.mxu3 }
  0xa7   : > { %v474_v2 = vsel %vm466_vm4, %v462_v53, %v470_v59 }
  0xa8   : > { %v446_v42 = vpop.f32.mrf.mxu2  ;;  %v478_v7 = vsel %vm313_vm2, %v474_v2, 0.0 }
  0xa9   : > { %v381_v45 = vpop.f32.mrf.mxu1  ;;  %v455_v46 = vadd.f32 %v446_v42, %v379_v44 }
  0xaa   : > { %v382_v50 = vadd.f32 %v381_v45, %v334_v47 }
  0xab   : > { %v463_v51 = vadd.f32 %v764_v49, %v455_v46 }
  0xad   : > { %v471_v55 = vmul.f32 0.2, %v463_v51  ;;  %vm467_vm3 = vcmp.ge.f32.partialorder %v463_v51, 0.0 }
  0xaf   : > { %v475_v62 = vsel %vm467_vm3, %v463_v51, %v471_v55  ;;  %v739_v55 = vld [vmem:[%s226_s27] sm:$0xff]  }
  0xb0   : > { %v449_v52 = vpop.f32.mrf.mxu2  ;;  %v479_v5 = vsel %vm313_vm2, %v475_v62, 0.0  ;;  %v741_v59 = vunpack.c.h.bf16 %v739_v55 }
  0xb1   : > { %v456_v54 = vadd.f32 %v449_v52, %v382_v50  ;;  %v383_v58 = vpop.f32.mrf.mxu1  ;;  %v480_v10 = vadd.f32 %v479_v5, %v478_v7 }
  0xb2   : > { %v384_v63 = vadd.f32 %v383_v58, %v336_v61  ;;  %v740_v58 = vunpack.c.l.bf16 %v739_v55 }
  0xb3   : > { %v464_v56 = vadd.f32 %v764_v49, %v456_v54 }
  0xb5   : > { %v472_v60 = vmul.f32 0.2, %v464_v56  ;;  %vm468_vm5 = vcmp.ge.f32.partialorder %v464_v56, 0.0 }
  0xb7   : > { %v476_v3 = vsel %vm468_vm5, %v464_v56, %v472_v60  ;;  %v749_v56 = vld [vmem:[%s226_s27 + $0x8] sm:$0xff]  }
  0xb8   : > { %v451_v0 = vpop.f32.mrf.mxu2  ;;  %v481_v8 = vsel %vm313_vm2, %v476_v3, 0.0  ;;  %v744_v60 = vunpack.c.l.bf16 %v749_v56  ;;  %v745_v61 = vunpack.c.h.bf16 %v749_v56 }
  0xb9   : > { %v457_v4 = vadd.f32 %v451_v0, %v384_v63  ;;  %v482_v12 = vadd.f32 %v481_v8, %v480_v10 }
  0xbb   : > { %v465_v6 = vadd.f32 %v764_v49, %v457_v4 }
  0xbd   : > { %vm469_vm6 = vcmp.ge.f32.partialorder %v465_v6, 0.0  ;;  %v473_v11 = vmul.f32 0.2, %v465_v6 }
  0xbf   : > { %v477_v13 = vsel %vm469_vm6, %v465_v6, %v473_v11 }
  0xc0   : > { %v483_v14 = vsel %vm313_vm2, %v477_v13, 0.0 }
  0xc1   : > { %v484_v16 = vadd.f32 %v483_v14, %v482_v12 }
  0xc3   : > { %v485_v17 = vrot.slane %v484_v16, 4 }
  0xc5   : > { %v486_v19 = vadd.f32 %v485_v17, %v484_v16 }
  0xc7   : > { %v487_v20 = vrot.slane %v486_v19, 2 }
  0xc9   : > { %v488_v22 = vadd.f32 %v487_v20, %v486_v19 }
  0xcb   : > { %v489_v23 = vrot.slane %v488_v22, 1 }
  0xcd   : > { %v490_v25 = vadd.f32 %v489_v23, %v488_v22 }
  0xcf   : > { %v498_v26 = vmul.f32 %v497_v24, %v490_v25 }
  0xd1   : > { %v499_v27 = vsub.f32 %v474_v2, %v498_v26  ;;  %v500_v28 = vsub.f32 %v475_v62, %v498_v26  ;;  %v501_v29 = vsub.f32 %v476_v3, %v498_v26  ;;  %v502_v30 = vsub.f32 %v477_v13, %v498_v26 }
  0xd3   : > { %v503_v31 = vmul.f32 %v499_v27, %v499_v27  ;;  %v504_v32 = vmul.f32 %v500_v28, %v500_v28  ;;  %v505_v33 = vmul.f32 %v501_v29, %v501_v29  ;;  %v506_v34 = vmul.f32 %v502_v30, %v502_v30 }
  0xd5   : > { %v507_v35 = vsel %vm313_vm2, %v503_v31, 0.0  ;;  %v508_v36 = vsel %vm313_vm2, %v504_v32, 0.0  ;;  %v510_v38 = vsel %vm313_vm2, %v505_v33, 0.0  ;;  %v512_v40 = vsel %vm313_vm2, %v506_v34, 0.0 }
  0xd6   : > { %v509_v37 = vadd.f32 %v508_v36, %v507_v35 }
  0xd8   : > { %v511_v39 = vadd.f32 %v510_v38, %v509_v37 }
  0xda   : > { %v513_v41 = vadd.f32 %v512_v40, %v511_v39 }
  0xdc   : > { %v514_v42 = vrot.slane %v513_v41, 4 }
  0xde   : > { %v515_v43 = vadd.f32 %v514_v42, %v513_v41 }
  0xe0   : > { %v516_v44 = vrot.slane %v515_v43, 2 }
  0xe2   : > { %v517_v45 = vadd.f32 %v516_v44, %v515_v43 }
  0xe4   : > { %v518_v46 = vrot.slane %v517_v45, 1 }
  0xe6   : > { %v519_v47 = vadd.f32 %v518_v46, %v517_v45 }
  0xe8   : > { %v520_v48 = vmul.f32 %v519_v47, %v497_v24 }
  0xea   : > { %v521_v49 = vadd.f32 1e-05, %v520_v48 }
  0xec   : > { %767 = vrsqrt.f32 %v521_v49  ;;  %vm528_vm9 = vweird.f32 %v521_v49 }
  0xf2   : > { %v768_v50 = vpop.eup %767 }
  0xf3   : > { %v523_v51 = vmul.f32 %v768_v50, %v521_v49  ;;  %vm529_vm8 = vweird.f32 %v768_v50 }
  0xf4   : > { %vm530_vm10 = vmor %vm528_vm9, %vm529_vm8 }
  0xf5   : > { %v524_v52 = vmul.f32 %v768_v50, %v523_v51 }
  0xf7   : > { %v525_v53 = vmul.f32 0.5, %v524_v52 }
  0xf9   : > { %v526_v54 = vsub.f32 1.5, %v525_v53 }
  0xfb   : > { %v527_v57 = vmul.f32 %v768_v50, %v526_v54 }
  0xfd   : > { %v531_v62 = vsel %vm530_vm10, %v768_v50, %v527_v57 }
  0xfe   : > { %v532_v63 = vmul.f32 %v531_v62, %v499_v27  ;;  %v533_v0 = vmul.f32 %v531_v62, %v500_v28  ;;  %v534_v1 = vmul.f32 %v531_v62, %v501_v29  ;;  %v535_v2 = vmul.f32 %v531_v62, %v502_v30 }
 0x100   : > { %v544_v3 = vadd.f32 %v740_v58, %v532_v63  ;;  %v545_v4 = vadd.f32 %v741_v59, %v533_v0  ;;  %v546_v5 = vadd.f32 %v744_v60, %v534_v1  ;;  %v547_v6 = vadd.f32 %v745_v61, %v535_v2 }
 0x102   : > { %v548_v7 = vpack.c.bf16 %v544_v3, %v544_v3  ;;  %v549_v8 = vpack.c.bf16 %v545_v4, %v545_v4  ;;  %v550_v9 = vpack.c.bf16 %v546_v5, %v546_v5  ;;  %v551_v10 = vpack.c.bf16 %v547_v6, %v547_v6 }
 0x104   : > { %553 = vst.msk [vmem:[%s231_s29] sm:$0xf] %vm552_vm11, %v548_v7 }
 0x105   : > { %554 = vst.msk [vmem:[%s231_s29 + $0x4] sm:$0xf] %vm552_vm11, %v549_v8 }
 0x106   : > { %555 = vst.msk [vmem:[%s231_s29 + $0x8] sm:$0xf] %vm552_vm11, %v550_v9 }
 0x107   : > { %556 = vst.msk [vmem:[%s231_s29 + $0xc] sm:$0xf] %vm552_vm11, %v551_v10 }
 0x108 PF: > { %s14_s15 = sadd.s32 1, %s775_s15  }
 0x109   : > { %p11_p4 = scmp.ge.s32.totalorder %s14_s15, 4  }
 0x10b   :  { %13 = sbr.rel (!%p11_p4) target bundleno = 1 (0x1), region = 74 }

// kernel: decoder_forward.15
= control target key start
LH: loop header
LB: loop body
LE: loop exit
PB: predicated region body
PF: predicated region fallthrough
CT: control target
= control target key end

     0   :  { %s661_s12 = smov 0   ;;  %s726_s0 = inlined_call_operand.vmem [shape: bf16[2,34,64], index: 0, kind: input, shape index: {}]   ;;  %s727_s1 = inlined_call_operand.vmem [shape: bf16[3,64,128], index: 1, kind: input, shape index: {}]   ;;  %s728_s2 = inlined_call_operand.vmem [shape: f32[2,1,128], index: 2, kind: input, shape index: {}]   ;;  %s729_s3 = inlined_call_operand.vmem [shape: bf16[2,32,128], index: 3, kind: output, shape index: {}]  }
   0x1 LB: > { %s503_s13 = sadd.s32 4294967295, %s639_s12   ;;  %p507_p0 = scmp.ge.s32.totalorder %s639_s12, 1  ;;  %s639_s12 = sphi %s661_s12, %s13_s12  }
   0x2   : > { %p145_p1 = scmp.lt.s32.totalorder %s639_s12, 3 }
   0x4   : > { %p146_p2 = pnand %p507_p0, %p145_p1 }
   0x5   : > { %p172_p3 = scmp.lt.s32.totalorder (!%p146_p2), %s503_s13, 1 }
   0x6   : > { %149 = sbr.rel (%p146_p2) target bundleno = 195 (0xc3), region = 32 }
   0xb   : > { %v596_v0 = vld [vmem:[%s727_s1 + $0x38] sm:$0xff]  ;;  %v595_v3 = vld [vmem:[%s727_s1 + $0x30] sm:$0xff]  ;;  %s731_s13 = smov (!%p172_p3, %s503_s13), 1  ;;  %v594_v6 = vld [vmem:[%s727_s1 + $0x28] sm:$0xff]  ;;  %vm221_vm0 = vsmask.f32 7424 }
   0xc   : > { %v592_v1 = vld [vmem:[%s727_s1 + $0x18] sm:$0xff]  ;;  %277 = vmatpush.bf16.msra.mxu0 %v596_v0  ;;  %v591_v4 = vld [vmem:[%s727_s1 + $0x10] sm:$0xff]  ;;  %619 = vmatpush.bf16.msra.mxu3 %v596_v0  ;;  %s623_s26 = smul.u32 20, %s731_s13  ;;  %v590_v7 = vld [vmem:[%s727_s1 + $0x8] sm:$0xff]  ;;  %vm352_vm1 = vcmask 1046528   ;;  %vm266_vm2 = vcmask 523264   ;;  %s179_s19 = scalar_lea.vmem %s728_s2, %s731_s13 }
   0xd   : > { %v600_v2 = vld [vmem:[%s727_s1 + $0x58] sm:$0xff]  ;;  %324 = vmatpush.bf16.msra.mxu1 %v592_v1  ;;  %v599_v5 = vld [vmem:[%s727_s1 + $0x50] sm:$0xff]  ;;  %v598_v8 = vld [vmem:[%s727_s1 + $0x48] sm:$0xff]  ;;  %s587_s20 = sshll.u32 %s731_s13, 4 }
   0xe   : > { %392 = vmatpush.bf16.msra.mxu2 %v600_v2  ;;  %s176_s8 = scalar_lea.vmem %s726_s0, %s623_s26  ;;  %v593_v19 = vld [vmem:[%s727_s1 + $0x20] sm:$0xff]  ;;  %s184_s23 = scalar_lea.vmem %s729_s3, %s587_s20 }
   0xf   : > { %v602_v9 = vld [vmem:[%s176_s8] sm:$0xff]   ;;  %v588_v10 = vld [vmem:[%s176_s8 + $0x8] sm:$0xff]  ;;  %v198_v15 = vld [vmem:[%s176_s8 + $0x10] sm:$0x1] }
  0x10   : > { %278 = vmatpush.bf16.msra.mxu0 %v595_v3  ;;  %620 = vmatpush.bf16.msra.mxu3 %v595_v3  ;;  %v615_v11 = vld [vmem:[%s176_s8] sm:$0xf0]  ;;  %v223_v12 = vshrl.u32 %v602_v9, 16  ;;  %v225_v13 = vshll.u32 %v602_v9, 16  ;;  %v616_v14 = vld [vmem:[%s176_s8] sm:$0xe]  ;;  %v217_v18 = vunpack.c.l.b16 %v198_v15 }
  0x11   : > { %325 = vmatpush.bf16.msra.mxu1 %v591_v4  ;;  %v230_v16 = vshll.u32 %v588_v10, 16  ;;  %v617_v17 = vor.u32 %v616_v14, %v615_v11  ;;  %v589_v20 = vld [vmem:[%s727_s1] sm:$0xff]  ;;  %v234_v22 = vshrl.u32 %v588_v10, 16  ;;  %v354_v26 = vrot.slane %v588_v10, 1 }
  0x12   : > { %393 = vmatpush.bf16.msra.mxu2 %v599_v5  ;;  %v227_v21 = vrot.slane %v225_v13, 1  ;;  %v597_v23 = vld [vmem:[%s727_s1 + $0x40] sm:$0xff]  ;;  %v220_v27 = vpack.c.b16 %v217_v18, %v217_v18 }
  0x13   : > { %v232_v24 = vrot.slane %v230_v16, 1  ;;  %v353_v25 = vrot.slane %v617_v17, 1  ;;  %v632_v43 = vld [vmem:[%s179_s19] ss:$0 sm:$0xff] }
  0x14   : > { %279 = vmatpush.bf16.msra.mxu0 %v594_v6  ;;  %621 = vmatpush.bf16.msra.mxu3 %v594_v6  ;;  %v228_v28 = vor.u32 %v227_v21, %v223_v12  ;;  %v238_v30 = vshll.u32 %v220_v27, 16  ;;  %v356_v35 = vrot.slane %v220_v27, 1 }
  0x15   : > { %326 = vmatpush.bf16.msra.mxu1 %v590_v7  ;;  %v236_v29 = vor.u32 %v234_v22, %v232_v24  ;;  %v355_v32 = vsel %vm352_vm1, %v353_v25, %v354_v26 }
  0x16   : > { %394 = vmatpush.bf16.msra.mxu2 %v598_v8  ;;  %v233_v31 = vsel %vm221_vm0, %v228_v28, %v232_v24  ;;  %v240_v33 = vrot.slane %v238_v30, 1  ;;  %v357_v36 = vsel %vm352_vm1, %v354_v26, %v356_v35 }
  0x18   : > { %280 = vmatpush.bf16.msra.mxu0 %v593_v19  ;;  %622 = vmatpush.bf16.msra.mxu3 %v593_v19  ;;  %v241_v34 = vsel %vm221_vm0, %v236_v29, %v240_v33 }
  0x19   : > { %327 = vmatpush.bf16.msra.mxu1 %v589_v20 }
  0x1a   : > { %395 = vmatpush.bf16.msra.mxu2 %v597_v23 }
  0x1b   : > { %539 = vmatmul.msk.bf16.vlgmr.msra.gmra.mxu0 %vm266_vm2, %v233_v31  ;;  %540 = vmatmul.msk.bf16.vlgmr.msra.gmra.mxu3 %vm266_vm2, %v241_v34 }
  0x1c   : > { %557 = vmatmul.msk.bf16.vlgmr.msra.gmra.mxu1 %vm266_vm2, %v602_v9 }
  0x1d   : > { %583 = vmatmul.msk.bf16.vlgmr.msra.gmra.mxu2 %vm266_vm2, %v355_v32 }
  0x2c   : > { %558 = vmatmul.msk.bf16.gmra.mxu1 %vm266_vm2, %v588_v10 }
  0x2d   : > { %584 = vmatmul.msk.bf16.gmra.mxu2 %vm266_vm2, %v357_v36 }
  0x98   : > { %v282_v38 = vpop.f32.mrf.mxu0 }
  0x99   : > { %v329_v37 = vpop.f32.mrf.mxu1 }
  0x9a   : > { %v330_v39 = vadd.f32 %v329_v37, %v282_v38 }
  0x9e   : > { %v287_v52 = vpop.f32.mrf.mxu3 }
  0xa0   : > { %v397_v40 = vpop.f32.mrf.mxu2  ;;  %v284_v44 = vpop.f32.mrf.mxu0 }
  0xa1   : > { %v331_v41 = vpop.f32.mrf.mxu1  ;;  %v407_v42 = vadd.f32 %v397_v40, %v330_v39 }
  0xa2   : > { %v332_v46 = vadd.f32 %v331_v41, %v284_v44 }
  0xa3   : > { %v415_v45 = vadd.f32 %v632_v43, %v407_v42 }
  0xa5   : > { %v423_v50 = vmul.f32 0.2, %v415_v45  ;;  %vm419_vm3 = vcmp.ge.f32.partialorder %v415_v45, 0.0 }
  0xa6   : > { %v289_v61 = vpop.f32.mrf.mxu3 }
  0xa7   : > { %v427_v54 = vsel %vm419_vm3, %v415_v45, %v423_v50 }
  0xa8   : > { %v399_v47 = vpop.f32.mrf.mxu2 }
  0xa9   : > { %v408_v48 = vadd.f32 %v399_v47, %v332_v46  ;;  %v334_v49 = vpop.f32.mrf.mxu1 }
  0xaa   : > { %v335_v56 = vadd.f32 %v334_v49, %v287_v52 }
  0xab   : > { %v416_v51 = vadd.f32 %v632_v43, %v408_v48 }
  0xad   : > { %vm420_vm4 = vcmp.ge.f32.partialorder %v416_v51, 0.0  ;;  %v424_v53 = vmul.f32 0.2, %v416_v51 }
  0xaf   : > { %v428_v55 = vsel %vm420_vm4, %v416_v51, %v424_v53 }
  0xb0   : > { %v608_v57 = vpack.c.bf16 %v428_v55, %v427_v54  ;;  %v402_v58 = vpop.f32.mrf.mxu2 }
  0xb1   : > { %v409_v59 = vadd.f32 %v402_v58, %v335_v56  ;;  %v336_v60 = vpop.f32.mrf.mxu1 }
  0xb2   : > { %609 = vst [vmem:[%s184_s23] sm:$0xff] %v608_v57   ;;  %v337_v63 = vadd.f32 %v336_v60, %v289_v61 }
  0xb3   : > { %v417_v62 = vadd.f32 %v632_v43, %v409_v59 }
  0xb5   : > { %v425_v2 = vmul.f32 0.2, %v417_v62  ;;  %vm421_vm5 = vcmp.ge.f32.partialorder %v417_v62, 0.0 }
  0xb7   : > { %v429_v5 = vsel %vm421_vm5, %v417_v62, %v425_v2 }
  0xb8   : > { %v404_v0 = vpop.f32.mrf.mxu2 }
  0xb9   : > { %v410_v1 = vadd.f32 %v404_v0, %v337_v63 }
  0xbb   : > { %v418_v3 = vadd.f32 %v632_v43, %v410_v1 }
  0xbd   : > { %vm422_vm6 = vcmp.ge.f32.partialorder %v418_v3, 0.0  ;;  %v426_v4 = vmul.f32 0.2, %v418_v3 }
  0xbf   : > { %v430_v6 = vsel %vm422_vm6, %v418_v3, %v426_v4 }
  0xc0   : > { %v613_v7 = vpack.c.bf16 %v430_v6, %v429_v5 }
  0xc2   : > { %618 = vst [vmem:[%s184_s23 + $0x8] sm:$0xff] %v613_v7  }
  0xc3 PF: > { %s13_s12 = sadd.s32 1, %s639_s12  }
  0xc4   : > { %p10_p4 = scmp.ge.s32.totalorder %s13_s12, 4  }
  0xc6   :  { %12 = sbr.rel (!%p10_p4) target bundleno = 1 (0x1), region = 67 }

// kernel: decoder_forward.16
= control target key start
LH: loop header
LB: loop body
LE: loop exit
PB: predicated region body
PF: predicated region fallthrough
CT: control target
= control target key end

     0   :  { %s985_s15 = smov 0   ;;  %s1154_s0 = inlined_call_operand.vmem [shape: bf16[2,66,64], index: 0, kind: input, shape index: {}]   ;;  %s1155_s1 = inlined_call_operand.vmem [shape: bf16[3,64,64], index: 1, kind: input, shape index: {}]   ;;  %s1156_s2 = inlined_call_operand.vmem [shape: f32[2,1,64], index: 2, kind: input, shape index: {}]   ;;  %s1157_s3 = inlined_call_operand.vmem [shape: bf16[2,64,64], index: 3, kind: input, shape index: {}]   ;;  %s1158_s4 = inlined_call_operand.vmem [shape: bf16[2,64,64], index: 4, kind: output, shape index: {}]  }
   0x1 LB: > { %s781_s16 = sadd.s32 4294967295, %s957_s15   ;;  %p785_p0 = scmp.ge.s32.totalorder %s957_s15, 1  ;;  %s957_s15 = sphi %s985_s15, %s14_s15  }
   0x2   : > { %p180_p1 = scmp.lt.s32.totalorder %s957_s15, 3 }
   0x4   : > { %p181_p2 = pnand %p785_p0, %p180_p1 }
   0x5   : > { %p214_p3 = scmp.lt.s32.totalorder (!%p181_p2), %s781_s16, 1 }
   0x6   : > { %184 = sbr.rel (%p181_p2) target bundleno = 296 (0x128), region = 36 }
   0xb   : > { %v893_v0 = vld [vmem:[%s1155_s1 + $0x38] sm:$0xff]  ;;  %v892_v3 = vld [vmem:[%s1155_s1 + $0x30] sm:$0xff]  ;;  %s1160_s16 = smov (!%p214_p3, %s781_s16), 1  ;;  %v891_v6 = vld [vmem:[%s1155_s1 + $0x28] sm:$0xff]  ;;  %vm282_vm0 = vsmask.f32 7424 }
   0xc   : > { %v999_v1 = vld [vmem:[%s1155_s1 + $0x58] sm:$0xff]  ;;  %360 = vmatpush.bf16.msra.mxu0 %v893_v0  ;;  %924 = vmatpush.bf16.msra.mxu3 %v893_v0  ;;  %v1013_v4 = vld [vmem:[%s1155_s1 + $0x50] sm:$0xff]  ;;  %s936_s29 = smul.u32 36, %s1160_s16  ;;  %v1025_v7 = vld [vmem:[%s1155_s1 + $0x48] sm:$0xff]  ;;  %vm459_vm1 = vcmask 1046528   ;;  %vm343_vm2 = vcmask 523264   ;;  %s221_s23 = scalar_lea.vmem %s1156_s2, %s1160_s16 }
   0xd   : > { %v889_v2 = vld [vmem:[%s1155_s1 + $0x18] sm:$0xff]  ;;  %932 = vmatpush.bf16.msra.mxu2 %v999_v1  ;;  %v888_v5 = vld [vmem:[%s1155_s1 + $0x10] sm:$0xff]  ;;  %v887_v8 = vld [vmem:[%s1155_s1 + $0x8] sm:$0xff]  ;;  %s881_s26 = sshll.u32 %s1160_s16, 5  ;;  %vm696_vm15 = vcmask 519168  }
   0xe   : > { %928 = vmatpush.bf16.msra.mxu1 %v889_v2  ;;  %s1033_s12 = scalar_lea.vmem %s1154_s0, %s936_s29  ;;  %v890_v17 = vld [vmem:[%s1155_s1 + $0x20] sm:$0xff]  ;;  %s226_s29 = scalar_lea.vmem %s1157_s3, %s881_s26 }
   0xf   : > { %v899_v9 = vld [vmem:[%s1033_s12] sm:$0xff]   ;;  %v1038_v10 = vld [vmem:[%s1033_s12 + $0x8] sm:$0xff]  ;;  %v884_v11 = vld [vmem:[%s1033_s12 + $0x10] sm:$0xff]  ;;  %s231_s6 = scalar_lea.vmem %s1158_s4, %s881_s26 }
  0x10   : > { %361 = vmatpush.bf16.msra.mxu0 %v892_v3  ;;  %925 = vmatpush.bf16.msra.mxu3 %v892_v3  ;;  %v284_v12 = vshrl.u32 %v899_v9, 16  ;;  %v286_v13 = vshll.u32 %v899_v9, 16  ;;  %v291_v14 = vshll.u32 %v1038_v10, 16  ;;  %v295_v15 = vshrl.u32 %v1038_v10, 16  ;;  %v894_v19 = vld [vmem:[%s1155_s1 + $0x40] sm:$0xff]  ;;  %v885_v30 = vld [vmem:[%s1033_s12 + $0x18] sm:$0xff] }
  0x11   : > { %933 = vmatpush.bf16.msra.mxu2 %v1013_v4  ;;  %v299_v16 = vshll.u32 %v884_v11, 16  ;;  %v886_v20 = vld [vmem:[%s1155_s1] sm:$0xff]  ;;  %v461_v23 = vrot.slane %v1038_v10, 1  ;;  %v463_v24 = vrot.slane %v884_v11, 1  ;;  %v303_v31 = vshrl.u32 %v884_v11, 16 }
  0x12   : > { %929 = vmatpush.bf16.msra.mxu1 %v888_v5  ;;  %v288_v18 = vrot.slane %v286_v13, 1  ;;  %v293_v21 = vrot.slane %v291_v14, 1  ;;  %v307_v32 = vshll.u32 %v885_v30, 16  ;;  %v465_v35 = vrot.slane %v885_v30, 1  ;;  %v249_v36 = vld [vmem:[%s1033_s12 + $0x20] sm:$0x1] }
  0x13   : > { %v301_v22 = vrot.slane %v299_v16, 1  ;;  %v464_v29 = vsel %vm459_vm1, %v461_v23, %v463_v24  ;;  %v276_v38 = vunpack.c.l.b16 %v249_v36  ;;  %v918_v41 = vld [vmem:[%s1033_s12] sm:$0xf0]  ;;  %v919_v42 = vld [vmem:[%s1033_s12] sm:$0xe]  ;;  %v311_v43 = vshrl.u32 %v885_v30, 16 }
  0x14   : > { %362 = vmatpush.bf16.msra.mxu0 %v891_v6  ;;  %926 = vmatpush.bf16.msra.mxu3 %v891_v6  ;;  %v289_v25 = vor.u32 %v288_v18, %v284_v12  ;;  %v297_v26 = vor.u32 %v295_v15, %v293_v21  ;;  %v309_v34 = vrot.slane %v307_v32, 1  ;;  %v466_v39 = vsel %vm459_vm1, %v463_v24, %v465_v35 }
  0x15   : > { %934 = vmatpush.bf16.msra.mxu2 %v1025_v7  ;;  %v305_v33 = vor.u32 %v303_v31, %v301_v22  ;;  %v281_v40 = vpack.c.b16 %v276_v38, %v276_v38  ;;  %v920_v45 = vor.u32 %v919_v42, %v918_v41 }
  0x16   : > { %930 = vmatpush.bf16.msra.mxu1 %v887_v8  ;;  %v294_v27 = vsel %vm282_vm0, %v289_v25, %v293_v21  ;;  %v302_v28 = vsel %vm282_vm0, %v297_v26, %v301_v22  ;;  %v313_v46 = vor.u32 %v311_v43, %v309_v34 }
  0x17   : > { %v310_v37 = vsel %vm282_vm0, %v305_v33, %v309_v34  ;;  %v315_v44 = vshll.u32 %v281_v40, 16  ;;  %v460_v48 = vrot.slane %v920_v45, 1  ;;  %v467_v49 = vrot.slane %v281_v40, 1 }
  0x18   : > { %363 = vmatpush.bf16.msra.mxu0 %v890_v17  ;;  %927 = vmatpush.bf16.msra.mxu3 %v890_v17 }
  0x19   : > { %935 = vmatpush.bf16.msra.mxu2 %v894_v19  ;;  %v317_v47 = vrot.slane %v315_v44, 1  ;;  %v462_v51 = vsel %vm459_vm1, %v460_v48, %v461_v23  ;;  %v468_v52 = vsel %vm459_vm1, %v465_v35, %v467_v49 }
  0x1a   : > { %931 = vmatpush.bf16.msra.mxu1 %v886_v20 }
  0x1b   : > { %827 = vmatmul.msk.bf16.vlgmr.msra.gmra.mxu0 %vm343_vm2, %v294_v27  ;;  %828 = vmatmul.msk.bf16.vlgmr.msra.gmra.mxu3 %vm343_vm2, %v302_v28  ;;  %v318_v50 = vsel %vm282_vm0, %v313_v46, %v317_v47 }
  0x1c   : > { %421 = vmatpush.bf16.msrb.mxu0 %v889_v2  ;;  %876 = vmatmul.msk.bf16.vlgmr.msra.gmra.mxu2 %vm343_vm2, %v464_v29 }
  0x1d   : > { %848 = vmatmul.msk.bf16.vlgmr.msra.gmra.mxu1 %vm343_vm2, %v1038_v10 }
  0x20   : > { %422 = vmatpush.bf16.msrb.mxu0 %v888_v5 }
  0x24   : > { %423 = vmatpush.bf16.msrb.mxu0 %v887_v8 }
  0x28   : > { %424 = vmatpush.bf16.msrb.mxu0 %v886_v20 }
  0x2b   : > { %829 = vmatmul.msk.bf16.gmra.mxu3 %vm343_vm2, %v310_v37  ;;  %847 = vmatmul.msk.bf16.vlgmr.msrb.gmra.mxu0 %vm343_vm2, %v899_v9 }
  0x2c   : > { %509 = vmatpush.bf16.msra.mxu0 %v999_v1  ;;  %877 = vmatmul.msk.bf16.gmra.mxu2 %vm343_vm2, %v466_v39  ;;  %v959_v39 = vmov 64.0  }
  0x2d   : > { %849 = vmatmul.msk.bf16.gmra.mxu1 %vm343_vm2, %v884_v11  ;;  %v946_v11 = vld [vmem:[%s221_s23] ss:$0 sm:$0xff]  ;;  %947 = vrcp.f32 %v959_v39 }
  0x30   : > { %510 = vmatpush.bf16.msra.mxu0 %v1013_v4 }
  0x34   : > { %511 = vmatpush.bf16.msra.mxu0 %v1025_v7 }
  0x38   : > { %512 = vmatpush.bf16.msra.mxu0 %v894_v19 }
  0x3b   : > { %830 = vmatmul.msk.bf16.gmra.mxu3 %vm343_vm2, %v318_v50  ;;  %875 = vmatmul.msk.bf16.vlgmr.msra.gmra.mxu0 %vm343_vm2, %v462_v51 }
  0x3c   : > { %878 = vmatmul.msk.bf16.gmra.mxu2 %vm343_vm2, %v468_v52 }
  0x3d   : > { %850 = vmatmul.msk.bf16.gmra.mxu1 %vm343_vm2, %v885_v30 }
  0x98   : > { %v365_v53 = vpop.f32.mrf.mxu0 }
  0x9a   : > { %v431_v54 = vpop.f32.mrf.mxu1 }
  0x9e   : > { %v370_v55 = vpop.f32.mrf.mxu3 }
  0x9f   : > { %v519_v56 = vpop.f32.mrf.mxu2  ;;  %v432_v3 = vadd.f32 %v431_v54, %v370_v55 }
  0xa0   : > { %v367_v57 = vpop.f32.mrf.mxu0 }
  0xa1   : > { %v536_v10 = vadd.f32 %v519_v56, %v432_v3  ;;  %v948_v56 = vpop.eup %947 }
  0xa2   : > { %v433_v58 = vpop.f32.mrf.mxu1  ;;  %vm604_vm11 = vweird.f32 %v948_v56 }
  0xa3   : > { %v548_v17 = vadd.f32 %v946_v11, %v536_v10 }
  0xa5   : > { %vm556_vm3 = vcmp.ge.f32.partialorder %v548_v17, 0.0  ;;  %v564_v28 = vmul.f32 0.2, %v548_v17 }
  0xa6   : > { %v372_v59 = vpop.f32.mrf.mxu3 }
  0xa7   : > { %v521_v60 = vpop.f32.mrf.mxu2  ;;  %v434_v7 = vadd.f32 %v433_v58, %v372_v59  ;;  %v572_v36 = vsel %vm556_vm3, %v548_v17, %v564_v28 }
  0xa8   : > { %v426_v61 = vpop.f32.mrf.mxu0  ;;  %v581_v51 = vsel %vm343_vm2, %v572_v36, 0.0 }
  0xa9   : > { %v427_v5 = vadd.f32 %v426_v61, %v365_v53  ;;  %v537_v13 = vadd.f32 %v521_v60, %v434_v7 }
  0xaa   : > { %v436_v62 = vpop.f32.mrf.mxu1 }
  0xab   : > { %v549_v23 = vadd.f32 %v946_v11, %v537_v13 }
  0xad   : > { %v565_v32 = vmul.f32 0.2, %v549_v23  ;;  %vm557_vm6 = vcmp.ge.f32.partialorder %v549_v23, 0.0 }
  0xae   : > { %v375_v63 = vpop.f32.mrf.mxu3 }
  0xaf   : > { %v524_v0 = vpop.f32.mrf.mxu2  ;;  %v437_v12 = vadd.f32 %v436_v62, %v375_v63  ;;  %v573_v47 = vsel %vm557_vm6, %v549_v23, %v565_v32 }
  0xb0   : > { %v428_v1 = vpop.f32.mrf.mxu0 }
  0xb1   : > { %v538_v19 = vadd.f32 %v524_v0, %v437_v12  ;;  %v429_v20 = vadd.f32 %v428_v1, %v367_v57  ;;  %v583_v57 = vsel %vm343_vm2, %v573_v47, 0.0  ;;  %v600_v1 = vmul.f32 64.0, %v948_v56 }
  0xb2   : > { %v438_v2 = vpop.f32.mrf.mxu1 }
  0xb3   : > { %v550_v29 = vadd.f32 %v946_v11, %v538_v19  ;;  %v601_v7 = vsub.f32 1.0, %v600_v1  ;;  %v922_v1 = vld [vmem:[%s226_s29 + $0x10] sm:$0xff]  }
  0xb5   : > { %v566_v40 = vmul.f32 0.2, %v550_v29  ;;  %vm558_vm7 = vcmp.ge.f32.partialorder %v550_v29, 0.0  ;;  %v602_v10 = vmul.f32 %v948_v56, %v601_v7 }
  0xb6   : > { %v377_v4 = vpop.f32.mrf.mxu3 }
  0xb7   : > { %v526_v6 = vpop.f32.mrf.mxu2  ;;  %v439_v15 = vadd.f32 %v438_v2, %v377_v4  ;;  %v574_v52 = vsel %vm558_vm7, %v550_v29, %v566_v40  ;;  %v603_v13 = vadd.f32 %v948_v56, %v602_v10  ;;  %v913_v10 = vunpack.c.h.bf16 %v922_v1 }
  0xb8   : > { %v514_v8 = vpop.f32.mrf.mxu0  ;;  %v585_v61 = vsel %vm343_vm2, %v574_v52, 0.0 }
  0xb9   : > { %v534_v9 = vadd.f32 %v514_v8, %v427_v5  ;;  %v539_v25 = vadd.f32 %v526_v6, %v439_v15 }
  0xba   : > { %v441_v14 = vpop.f32.mrf.mxu1 }
  0xbb   : > { %v546_v16 = vadd.f32 %v946_v11, %v534_v9  ;;  %v551_v33 = vadd.f32 %v946_v11, %v539_v25 }
  0xbd   : > { %v562_v26 = vmul.f32 0.2, %v546_v16  ;;  %vm554_vm4 = vcmp.ge.f32.partialorder %v546_v16, 0.0  ;;  %v567_v48 = vmul.f32 0.2, %v551_v33  ;;  %vm559_vm8 = vcmp.ge.f32.partialorder %v551_v33, 0.0 }
  0xbe   : > { %v380_v18 = vpop.f32.mrf.mxu3 }
  0xbf   : > { %v442_v21 = vadd.f32 %v441_v14, %v380_v18  ;;  %v529_v22 = vpop.f32.mrf.mxu2  ;;  %v570_v34 = vsel %vm554_vm4, %v546_v16, %v562_v26  ;;  %v575_v58 = vsel %vm559_vm8, %v551_v33, %v567_v48  ;;  %v605_v16 = vsel %vm604_vm11, %v948_v56, %v603_v13 }
  0xc0   : > { %v516_v24 = vpop.f32.mrf.mxu0  ;;  %v578_v44 = vsel %vm343_vm2, %v570_v34, 0.0  ;;  %v587_v0 = vsel %vm343_vm2, %v575_v58, 0.0 }
  0xc1   : > { %v535_v27 = vadd.f32 %v516_v24, %v429_v20  ;;  %v540_v30 = vadd.f32 %v529_v22, %v442_v21 }
  0xc2   : > { %v443_v37 = vpop.f32.mrf.mxu1 }
  0xc3   : > { %v547_v31 = vadd.f32 %v946_v11, %v535_v27  ;;  %v552_v41 = vadd.f32 %v946_v11, %v540_v30 }
  0xc5   : > { %vm555_vm5 = vcmp.ge.f32.partialorder %v547_v31, 0.0  ;;  %v563_v35 = vmul.f32 0.2, %v547_v31  ;;  %v568_v53 = vmul.f32 0.2, %v552_v41  ;;  %vm560_vm9 = vcmp.ge.f32.partialorder %v552_v41, 0.0 }
  0xc6   : > { %v382_v38 = vpop.f32.mrf.mxu3 }
  0xc7   : > { %v571_v42 = vsel %vm555_vm5, %v547_v31, %v563_v35  ;;  %v444_v43 = vadd.f32 %v443_v37, %v382_v38  ;;  %v531_v46 = vpop.f32.mrf.mxu2  ;;  %v576_v62 = vsel %vm560_vm9, %v552_v41, %v568_v53 }
  0xc8   : > { %v579_v45 = vsel %vm343_vm2, %v571_v42, 0.0  ;;  %v589_v4 = vsel %vm343_vm2, %v576_v62, 0.0 }
  0xc9   : > { %v580_v49 = vadd.f32 %v579_v45, %v578_v44  ;;  %v541_v50 = vadd.f32 %v531_v46, %v444_v43 }
  0xcb   : > { %v582_v54 = vadd.f32 %v581_v51, %v580_v49  ;;  %v553_v55 = vadd.f32 %v946_v11, %v541_v50 }
  0xcd   : > { %v584_v59 = vadd.f32 %v583_v57, %v582_v54  ;;  %v569_v60 = vmul.f32 0.2, %v553_v55  ;;  %vm561_vm10 = vcmp.ge.f32.partialorder %v553_v55, 0.0 }
  0xcf   : > { %v586_v63 = vadd.f32 %v585_v61, %v584_v59  ;;  %v577_v2 = vsel %vm561_vm10, %v553_v55, %v569_v60 }
  0xd0   : > { %v591_v6 = vsel %vm343_vm2, %v577_v2, 0.0 }
  0xd1   : > { %v588_v3 = vadd.f32 %v587_v0, %v586_v63  ;;  %v921_v0 = vld [vmem:[%s226_s29 + $0x8] sm:$0xff]  }
  0xd2   : > { %v909_v7 = vunpack.c.h.bf16 %v921_v0 }
  0xd3   : > { %v590_v5 = vadd.f32 %v589_v4, %v588_v3 }
  0xd5   : > { %v592_v8 = vadd.f32 %v591_v6, %v590_v5  ;;  %v908_v6 = vunpack.c.l.bf16 %v921_v0 }
  0xd7   : > { %v593_v9 = vrot.slane %v592_v8, 4 }
  0xd9   : > { %v594_v11 = vadd.f32 %v593_v9, %v592_v8  ;;  %v912_v8 = vunpack.c.l.bf16 %v922_v1 }
  0xdb   : > { %v595_v12 = vrot.slane %v594_v11, 2 }
  0xdd   : > { %v596_v14 = vadd.f32 %v595_v12, %v594_v11 }
  0xdf   : > { %v597_v15 = vrot.slane %v596_v14, 1 }
  0xe1   : > { %v598_v17 = vadd.f32 %v597_v15, %v596_v14 }
  0xe3   : > { %v606_v18 = vmul.f32 %v605_v16, %v598_v17 }
  0xe5   : > { %v1099_v19 = vsub.f32 %v570_v34, %v606_v18  ;;  %v1101_v20 = vsub.f32 %v571_v42, %v606_v18  ;;  %v1103_v21 = vsub.f32 %v572_v36, %v606_v18  ;;  %v1105_v22 = vsub.f32 %v573_v47, %v606_v18 }
  0xe6   : > { %v1107_v23 = vsub.f32 %v574_v52, %v606_v18  ;;  %v612_v27 = vsub.f32 %v575_v58, %v606_v18  ;;  %v613_v32 = vsub.f32 %v576_v62, %v606_v18  ;;  %v614_v36 = vsub.f32 %v577_v2, %v606_v18  ;;  %v903_v62 = vld [vmem:[%s226_s29] sm:$0xff]   ;;  %v923_v2 = vld [vmem:[%s226_s29 + $0x18] sm:$0xff]  }
  0xe7   : > { %v615_v24 = vmul.f32 %v1099_v19, %v1099_v19  ;;  %v616_v25 = vmul.f32 %v1101_v20, %v1101_v20  ;;  %v617_v26 = vmul.f32 %v1103_v21, %v1103_v21  ;;  %v618_v28 = vmul.f32 %v1105_v22, %v1105_v22 }
  0xe8   : > { %v619_v33 = vmul.f32 %v1107_v23, %v1107_v23  ;;  %v620_v37 = vmul.f32 %v612_v27, %v612_v27  ;;  %v621_v40 = vmul.f32 %v613_v32, %v613_v32  ;;  %v622_v43 = vmul.f32 %v614_v36, %v614_v36 }
  0xe9   : > { %v623_v29 = vsel %vm343_vm2, %v615_v24, 0.0  ;;  %v624_v30 = vsel %vm343_vm2, %v616_v25, 0.0  ;;  %v626_v34 = vsel %vm343_vm2, %v617_v26, 0.0  ;;  %v628_v38 = vsel %vm343_vm2, %v618_v28, 0.0 }
  0xea   : > { %v625_v31 = vadd.f32 %v624_v30, %v623_v29  ;;  %v630_v41 = vsel %vm343_vm2, %v619_v33, 0.0  ;;  %v632_v44 = vsel %vm343_vm2, %v620_v37, 0.0  ;;  %v634_v46 = vsel %vm343_vm2, %v621_v40, 0.0 }
  0xeb   : > { %v636_v48 = vsel %vm343_vm2, %v622_v43, 0.0  ;;  %v904_v4 = vunpack.c.l.bf16 %v903_v62  ;;  %v905_v5 = vunpack.c.h.bf16 %v903_v62  ;;  %v916_v11 = vunpack.c.l.bf16 %v923_v2 }
  0xec   : > { %v627_v35 = vadd.f32 %v626_v34, %v625_v31  ;;  %v917_v12 = vunpack.c.h.bf16 %v923_v2 }
  0xee   : > { %v629_v39 = vadd.f32 %v628_v38, %v627_v35 }
  0xf0   : > { %v631_v42 = vadd.f32 %v630_v41, %v629_v39 }
  0xf2   : > { %v633_v45 = vadd.f32 %v632_v44, %v631_v42 }
  0xf4   : > { %v635_v47 = vadd.f32 %v634_v46, %v633_v45 }
  0xf6   : > { %v637_v49 = vadd.f32 %v636_v48, %v635_v47 }
  0xf8   : > { %v638_v50 = vrot.slane %v637_v49, 4 }
  0xfa   : > { %v639_v51 = vadd.f32 %v638_v50, %v637_v49 }
  0xfc   : > { %v640_v52 = vrot.slane %v639_v51, 2 }
  0xfe   : > { %v641_v53 = vadd.f32 %v640_v52, %v639_v51 }
 0x100   : > { %v642_v54 = vrot.slane %v641_v53, 1 }
 0x102   : > { %v643_v55 = vadd.f32 %v642_v54, %v641_v53 }
 0x104   : > { %v644_v56 = vmul.f32 %v643_v55, %v605_v16 }
 0x106   : > { %v645_v57 = vadd.f32 1e-05, %v644_v56 }
 0x108   : > { %949 = vrsqrt.f32 %v645_v57  ;;  %vm652_vm13 = vweird.f32 %v645_v57 }
 0x10e   : > { %v950_v58 = vpop.eup %949 }
 0x10f   : > { %v647_v59 = vmul.f32 %v950_v58, %v645_v57  ;;  %vm653_vm12 = vweird.f32 %v950_v58 }
 0x110   : > { %vm654_vm14 = vmor %vm652_vm13, %vm653_vm12 }
 0x111   : > { %v648_v60 = vmul.f32 %v950_v58, %v647_v59 }
 0x113   : > { %v649_v61 = vmul.f32 0.5, %v648_v60 }
 0x115   : > { %v650_v63 = vsub.f32 1.5, %v649_v61 }
 0x117   : > { %v651_v3 = vmul.f32 %v950_v58, %v650_v63 }
 0x119   : > { %v655_v9 = vsel %vm654_vm14, %v950_v58, %v651_v3 }
 0x11a   : > { %v656_v13 = vmul.f32 %v655_v9, %v1099_v19  ;;  %v657_v14 = vmul.f32 %v655_v9, %v1101_v20  ;;  %v658_v15 = vmul.f32 %v655_v9, %v1103_v21  ;;  %v659_v16 = vmul.f32 %v655_v9, %v1105_v22 }
 0x11b   : > { %v660_v17 = vmul.f32 %v655_v9, %v1107_v23  ;;  %v661_v18 = vmul.f32 %v655_v9, %v612_v27  ;;  %v662_v24 = vmul.f32 %v655_v9, %v613_v32  ;;  %v663_v25 = vmul.f32 %v655_v9, %v614_v36 }
 0x11c   : > { %v680_v26 = vadd.f32 %v904_v4, %v656_v13  ;;  %v681_v28 = vadd.f32 %v905_v5, %v657_v14  ;;  %v682_v29 = vadd.f32 %v908_v6, %v658_v15  ;;  %v683_v30 = vadd.f32 %v909_v7, %v659_v16 }
 0x11d   : > { %v684_v19 = vadd.f32 %v912_v8, %v660_v17  ;;  %v685_v20 = vadd.f32 %v913_v10, %v661_v18  ;;  %v686_v21 = vadd.f32 %v916_v11, %v662_v24  ;;  %v687_v23 = vadd.f32 %v917_v12, %v663_v25 }
 0x11e   : > { %v688_v31 = vpack.c.bf16 %v680_v26, %v680_v26  ;;  %v689_v22 = vpack.c.bf16 %v681_v28, %v681_v28  ;;  %v690_v33 = vpack.c.bf16 %v682_v29, %v682_v29  ;;  %v691_v27 = vpack.c.bf16 %v683_v30, %v683_v30 }
 0x11f   : > { %v692_v32 = vpack.c.bf16 %v684_v19, %v684_v19  ;;  %v693_v34 = vpack.c.bf16 %v685_v20, %v685_v20  ;;  %v694_v35 = vpack.c.bf16 %v686_v21, %v686_v21  ;;  %v695_v36 = vpack.c.bf16 %v687_v23, %v687_v23 }
 0x120   : > { %697 = vst.msk [vmem:[%s231_s6] sm:$0xf] %vm696_vm15, %v688_v31 }
 0x121   : > { %698 = vst.msk [vmem:[%s231_s6 + $0x4] sm:$0xf] %vm696_vm15, %v689_v22 }
 0x122   : > { %699 = vst.msk [vmem:[%s231_s6 + $0x8] sm:$0xf] %vm696_vm15, %v690_v33 }
 0x123   : > { %700 = vst.msk [vmem:[%s231_s6 + $0xc] sm:$0xf] %vm696_vm15, %v691_v27 }
 0x124   : > { %701 = vst.msk [vmem:[%s231_s6 + $0x10] sm:$0xf] %vm696_vm15, %v692_v32 }
 0x125   : > { %702 = vst.msk [vmem:[%s231_s6 + $0x14] sm:$0xf] %vm696_vm15, %v693_v34 }
 0x126   : > { %703 = vst.msk [vmem:[%s231_s6 + $0x18] sm:$0xf] %vm696_vm15, %v694_v35 }
 0x127   : > { %704 = vst.msk [vmem:[%s231_s6 + $0x1c] sm:$0xf] %vm696_vm15, %v695_v36 }
 0x128 PF: > { %s14_s15 = sadd.s32 1, %s957_s15  }
 0x129   : > { %p11_p4 = scmp.ge.s32.totalorder %s14_s15, 4  }
 0x12b   :  { %13 = sbr.rel (!%p11_p4) target bundleno = 1 (0x1), region = 74 }

// kernel: decoder_forward.17
= control target key start
LH: loop header
LB: loop body
LE: loop exit
PB: predicated region body
PF: predicated region fallthrough
CT: control target
= control target key end

     0   :  { %s824_s18 = smov 0   ;;  %s932_s0 = inlined_call_operand.vmem [shape: bf16[2,64,64], index: 0, kind: input, shape index: {}]   ;;  %s933_s1 = inlined_call_operand.vmem [shape: bf16[64,64], index: 1, kind: input, shape index: {}]   ;;  %s934_s2 = inlined_call_operand.vmem [shape: f32[2,1,64], index: 2, kind: input, shape index: {}]   ;;  %s935_s3 = inlined_call_operand.vmem [shape: bf16[64,64], index: 3, kind: input, shape index: {}]   ;;  %s936_s4 = inlined_call_operand.vmem [shape: f32[2,1,64], index: 4, kind: input, shape index: {}]   ;;  %s937_s5 = inlined_call_operand.vmem [shape: bf16[2,64,64], index: 5, kind: output, shape index: {}]  }
   0x1 LB: > { %s681_s19 = sadd.s32 4294967295, %s791_s18   ;;  %p685_p0 = scmp.ge.s32.totalorder %s791_s18, 1  ;;  %s791_s18 = sphi %s824_s18, %s15_s18  }
   0x2   : > { %p203_p1 = scmp.lt.s32.totalorder %s791_s18, 3 }
   0x4   : > { %p204_p2 = pnand %p685_p0, %p203_p1 }
   0x5   : > { %p237_p3 = scmp.lt.s32.totalorder (!%p204_p2), %s681_s19, 1 }
   0x6   : > { %207 = sbr.rel (%p204_p2) target bundleno = 419 (0x1a3), region = 40 }
   0xb   : > { %v757_v0 = vld [vmem:[%s933_s1 + $0x18] sm:$0xff]  ;;  %v756_v1 = vld [vmem:[%s933_s1 + $0x10] sm:$0xff]  ;;  %s939_s19 = smov (!%p237_p3, %s681_s19), 1  ;;  %v755_v2 = vld [vmem:[%s933_s1 + $0x8] sm:$0xff]  ;;  %vm318_vm0 = vcmask 523264  }
   0xc   : > { %335 = vmatpush.bf16.msra.mxu0 %v757_v0  ;;  %762 = vmatpush.bf16.msra.mxu2 %v757_v0  ;;  %s244_s26 = scalar_lea.vmem %s934_s2, %s939_s19  ;;  %s748_s29 = sshll.u32 %s939_s19, 5  ;;  %v754_v3 = vld [vmem:[%s933_s1] sm:$0xff]  ;;  %v761_v8 = vld [vmem:[%s935_s3 + $0x18] sm:$0xff]  ;;  %v760_v9 = vld [vmem:[%s935_s3 + $0x10] sm:$0xff] }
   0xd   : > { %s856_s9 = scalar_lea.vmem %s932_s0, %s748_s29  ;;  %s247_s12 = scalar_lea.vmem %s936_s4, %s939_s19  ;;  %440 = vmatpush.bf16.msra.mxu1 %v761_v8  ;;  %766 = vmatpush.bf16.msra.mxu3 %v761_v8  ;;  %v759_v10 = vld [vmem:[%s935_s3 + $0x8] sm:$0xff]  ;;  %v758_v11 = vld [vmem:[%s935_s3] sm:$0xff] }
   0xe   : > { %v750_v4 = vld [vmem:[%s856_s9] sm:$0xff]  ;;  %v752_v5 = vld [vmem:[%s856_s9 + $0x10] sm:$0xff]  ;;  %v751_v6 = vld [vmem:[%s856_s9 + $0x8] sm:$0xff]  ;;  %s252_s30 = scalar_lea.vmem %s937_s5, %s748_s29 }
   0xf   : > { %v753_v7 = vld [vmem:[%s856_s9 + $0x18] sm:$0xff]  ;;  %v779_v13 = vld [vmem:[%s244_s26] ss:$0 sm:$0xff] }
  0x10   : > { %336 = vmatpush.bf16.msra.mxu0 %v756_v1  ;;  %763 = vmatpush.bf16.msra.mxu2 %v756_v1  ;;  %v780_v51 = vld [vmem:[%s247_s12] ss:$0 sm:$0xff] }
  0x11   : > { %441 = vmatpush.bf16.msra.mxu1 %v760_v9  ;;  %767 = vmatpush.bf16.msra.mxu3 %v760_v9 }
  0x14   : > { %337 = vmatpush.bf16.msra.mxu0 %v755_v2  ;;  %764 = vmatpush.bf16.msra.mxu2 %v755_v2 }
  0x15   : > { %442 = vmatpush.bf16.msra.mxu1 %v759_v10  ;;  %768 = vmatpush.bf16.msra.mxu3 %v759_v10 }
  0x18   : > { %338 = vmatpush.bf16.msra.mxu0 %v754_v3  ;;  %765 = vmatpush.bf16.msra.mxu2 %v754_v3 }
  0x19   : > { %443 = vmatpush.bf16.msra.mxu1 %v758_v11  ;;  %769 = vmatpush.bf16.msra.mxu3 %v758_v11 }
  0x1b   : > { %722 = vmatmul.msk.bf16.vlgmr.msra.gmra.mxu0 %vm318_vm0, %v750_v4  ;;  %724 = vmatmul.msk.bf16.vlgmr.msra.gmra.mxu2 %vm318_vm0, %v752_v5 }
  0x2b   : > { %723 = vmatmul.msk.bf16.gmra.mxu0 %vm318_vm0, %v751_v6  ;;  %725 = vmatmul.msk.bf16.gmra.mxu2 %vm318_vm0, %v753_v7 }
  0x98   : > { %v340_v12 = vpop.f32.mrf.mxu0 }
  0x99   : > { %v341_v14 = vadd.f32 %v779_v13, %v340_v12  ;;  %v793_v12 = vmov 64.0  }
  0x9a   : > { %781 = vrcp.f32 %v793_v12 }
  0x9b   : > { %v368_v17 = vmul.f32 0.2, %v341_v14  ;;  %vm360_vm1 = vcmp.ge.f32.partialorder %v341_v14, 0.0 }
  0x9d   : > { %v376_v21 = vsel %vm360_vm1, %v341_v14, %v368_v17 }
  0x9e   : > { %v350_v15 = vpop.f32.mrf.mxu2 }
  0x9f   : > { %v351_v19 = vadd.f32 %v779_v13, %v350_v15 }
  0xa0   : > { %v342_v16 = vpop.f32.mrf.mxu0 }
  0xa1   : > { %v343_v18 = vadd.f32 %v779_v13, %v342_v16  ;;  %v372_v25 = vmul.f32 0.2, %v351_v19  ;;  %vm364_vm3 = vcmp.ge.f32.partialorder %v351_v19, 0.0 }
  0xa3   : > { %vm361_vm2 = vcmp.ge.f32.partialorder %v343_v18, 0.0  ;;  %v369_v20 = vmul.f32 0.2, %v343_v18  ;;  %v380_v29 = vsel %vm364_vm3, %v351_v19, %v372_v25 }
  0xa5   : > { %v377_v22 = vsel %vm361_vm2, %v343_v18, %v369_v20 }
  0xa6   : > { %v352_v23 = vpop.f32.mrf.mxu2  ;;  %v384_v24 = vpack.c.bf16 %v377_v22, %v376_v21 }
  0xa7   : > { %v353_v26 = vadd.f32 %v779_v13, %v352_v23  ;;  %v782_v23 = vpop.eup %781 }
  0xa8   : > { %v345_v27 = vpop.f32.mrf.mxu0  ;;  %742 = vmatmul.msk.bf16.vlgmr.msra.gmra.mxu1 %vm318_vm0, %v384_v24  ;;  %vm515_vm2 = vweird.f32 %v782_v23 }
  0xa9   : > { %vm365_vm4 = vcmp.ge.f32.partialorder %v353_v26, 0.0  ;;  %v373_v28 = vmul.f32 0.2, %v353_v26  ;;  %v346_v32 = vadd.f32 %v779_v13, %v345_v27 }
  0xab   : > { %v381_v30 = vsel %vm365_vm4, %v353_v26, %v373_v28  ;;  %v370_v35 = vmul.f32 0.2, %v346_v32  ;;  %vm362_vm5 = vcmp.ge.f32.partialorder %v346_v32, 0.0 }
  0xac   : > { %v386_v31 = vpack.c.bf16 %v381_v30, %v380_v29  ;;  %v511_v29 = vmul.f32 64.0, %v782_v23 }
  0xad   : > { %v378_v39 = vsel %vm362_vm5, %v346_v32, %v370_v35  ;;  %vm599_vm5 = vcmask 519168  }
  0xae   : > { %v355_v33 = vpop.f32.mrf.mxu2  ;;  %744 = vmatmul.msk.bf16.vlgmr.msra.gmra.mxu3 %vm318_vm0, %v386_v31  ;;  %v512_v35 = vsub.f32 1.0, %v511_v29 }
  0xaf   : > { %v356_v37 = vadd.f32 %v779_v13, %v355_v33 }
  0xb0   : > { %v347_v34 = vpop.f32.mrf.mxu0 }
  0xb1   : > { %v348_v36 = vadd.f32 %v779_v13, %v347_v34  ;;  %v374_v43 = vmul.f32 0.2, %v356_v37  ;;  %vm366_vm7 = vcmp.ge.f32.partialorder %v356_v37, 0.0 }
  0xb3   : > { %vm363_vm6 = vcmp.ge.f32.partialorder %v348_v36, 0.0  ;;  %v371_v38 = vmul.f32 0.2, %v348_v36  ;;  %v382_v46 = vsel %vm366_vm7, %v356_v37, %v374_v43 }
  0xb5   : > { %v379_v40 = vsel %vm363_vm6, %v348_v36, %v371_v38  ;;  %v513_v38 = vmul.f32 %v782_v23, %v512_v35 }
  0xb6   : > { %v357_v41 = vpop.f32.mrf.mxu2  ;;  %v385_v42 = vpack.c.bf16 %v379_v40, %v378_v39 }
  0xb7   : > { %v358_v44 = vadd.f32 %v779_v13, %v357_v41  ;;  %v514_v41 = vadd.f32 %v782_v23, %v513_v38 }
  0xb8   : > { %743 = vmatmul.msk.bf16.gmra.mxu1 %vm318_vm0, %v385_v42 }
  0xb9   : > { %vm367_vm8 = vcmp.ge.f32.partialorder %v358_v44, 0.0  ;;  %v375_v45 = vmul.f32 0.2, %v358_v44 }
  0xbb   : > { %v383_v47 = vsel %vm367_vm8, %v358_v44, %v375_v45  ;;  %v516_v44 = vsel %vm515_vm2, %v782_v23, %v514_v41 }
  0xbc   : > { %v387_v48 = vpack.c.bf16 %v383_v47, %v382_v46 }
  0xbe   : > { %745 = vmatmul.msk.bf16.gmra.mxu3 %vm318_vm0, %v387_v48 }
 0x125   : > { %v445_v49 = vpop.f32.mrf.mxu1 }
 0x126   : > { %v446_v54 = vadd.f32 %v780_v51, %v445_v49 }
 0x128   : > { %v473_v58 = vmul.f32 0.2, %v446_v54  ;;  %vm465_vm10 = vcmp.ge.f32.partialorder %v446_v54, 0.0 }
 0x12a   : > { %v481_v63 = vsel %vm465_vm10, %v446_v54, %v473_v58 }
 0x12b   : > { %v489_v6 = vsel %vm318_vm0, %v481_v63, 0.0 }
 0x12d   : > { %v447_v50 = vpop.f32.mrf.mxu1 }
 0x12e   : > { %v448_v53 = vadd.f32 %v780_v51, %v447_v50 }
 0x130   : > { %v474_v56 = vmul.f32 0.2, %v448_v53  ;;  %vm466_vm9 = vcmp.ge.f32.partialorder %v448_v53, 0.0 }
 0x131   : > { %v455_v52 = vpop.f32.mrf.mxu3 }
 0x132   : > { %v456_v60 = vadd.f32 %v780_v51, %v455_v52  ;;  %v482_v62 = vsel %vm466_vm9, %v448_v53, %v474_v56 }
 0x133   : > { %v490_v1 = vsel %vm318_vm0, %v482_v62, 0.0 }
 0x134   : > { %v477_v2 = vmul.f32 0.2, %v456_v60  ;;  %vm469_vm12 = vcmp.ge.f32.partialorder %v456_v60, 0.0  ;;  %v491_v8 = vadd.f32 %v490_v1, %v489_v6 }
 0x135   : > { %v450_v55 = vpop.f32.mrf.mxu1 }
 0x136   : > { %v451_v57 = vadd.f32 %v780_v51, %v450_v55  ;;  %v485_v10 = vsel %vm469_vm12, %v456_v60, %v477_v2 }
 0x137   : > { %v496_v19 = vsel %vm318_vm0, %v485_v10, 0.0 }
 0x138   : > { %v475_v59 = vmul.f32 0.2, %v451_v57  ;;  %vm467_vm11 = vcmp.ge.f32.partialorder %v451_v57, 0.0 }
 0x139   : > { %v457_v61 = vpop.f32.mrf.mxu3 }
 0x13a   : > { %v483_v0 = vsel %vm467_vm11, %v451_v57, %v475_v59  ;;  %v458_v4 = vadd.f32 %v780_v51, %v457_v61 }
 0x13b   : > { %v492_v7 = vsel %vm318_vm0, %v483_v0, 0.0 }
 0x13c   : > { %v493_v13 = vadd.f32 %v492_v7, %v491_v8  ;;  %v478_v14 = vmul.f32 0.2, %v458_v4  ;;  %vm470_vm14 = vcmp.ge.f32.partialorder %v458_v4, 0.0 }
 0x13d   : > { %v452_v3 = vpop.f32.mrf.mxu1 }
 0x13e   : > { %v453_v5 = vadd.f32 %v780_v51, %v452_v3  ;;  %v486_v20 = vsel %vm470_vm14, %v458_v4, %v478_v14 }
 0x13f   : > { %v498_v24 = vsel %vm318_vm0, %v486_v20, 0.0 }
 0x140   : > { %vm468_vm13 = vcmp.ge.f32.partialorder %v453_v5, 0.0  ;;  %v476_v9 = vmul.f32 0.2, %v453_v5 }
 0x141   : > { %v460_v11 = vpop.f32.mrf.mxu3 }
 0x142   : > { %v484_v15 = vsel %vm468_vm13, %v453_v5, %v476_v9  ;;  %v461_v16 = vadd.f32 %v780_v51, %v460_v11 }
 0x143   : > { %v494_v17 = vsel %vm318_vm0, %v484_v15, 0.0 }
 0x144   : > { %v495_v18 = vadd.f32 %v494_v17, %v493_v13  ;;  %v479_v22 = vmul.f32 0.2, %v461_v16  ;;  %vm471_vm15 = vcmp.ge.f32.partialorder %v461_v16, 0.0 }
 0x146   : > { %v497_v21 = vadd.f32 %v496_v19, %v495_v18  ;;  %v487_v26 = vsel %vm471_vm15, %v461_v16, %v479_v22 }
 0x147   : > { %v500_v31 = vsel %vm318_vm0, %v487_v26, 0.0 }
 0x148   : > { %v499_v27 = vadd.f32 %v498_v24, %v497_v21 }
 0x149   : > { %v462_v25 = vpop.f32.mrf.mxu3 }
 0x14a   : > { %v463_v28 = vadd.f32 %v780_v51, %v462_v25  ;;  %v501_v32 = vadd.f32 %v500_v31, %v499_v27  ;;  %v256_v27 = vld [vmem:[%s856_s9 + $0x8] sm:$0xff]  }
 0x14b   : > { %v578_v35 = vunpack.c.h.bf16 %v256_v27 }
 0x14c   : > { %vm472_vm1 = vcmp.ge.f32.partialorder %v463_v28, 0.0  ;;  %v480_v30 = vmul.f32 0.2, %v463_v28 }
 0x14e   : > { %v488_v33 = vsel %vm472_vm1, %v463_v28, %v480_v30  ;;  %v258_v28 = vld [vmem:[%s856_s9 + $0x10] sm:$0xff]   ;;  %v260_v30 = vld [vmem:[%s856_s9 + $0x18] sm:$0xff]  }
 0x14f   : > { %v502_v34 = vsel %vm318_vm0, %v488_v33, 0.0  ;;  %v580_v38 = vunpack.c.h.bf16 %v258_v28 }
 0x150   : > { %v503_v36 = vadd.f32 %v502_v34, %v501_v32  ;;  %v577_v34 = vunpack.c.l.bf16 %v256_v27 }
 0x152   : > { %v504_v37 = vrot.slane %v503_v36, 4 }
 0x154   : > { %v505_v39 = vadd.f32 %v504_v37, %v503_v36  ;;  %v579_v36 = vunpack.c.l.bf16 %v258_v28 }
 0x156   : > { %v506_v40 = vrot.slane %v505_v39, 2 }
 0x158   : > { %v507_v42 = vadd.f32 %v506_v40, %v505_v39  ;;  %v581_v39 = vunpack.c.l.bf16 %v260_v30  ;;  %v582_v40 = vunpack.c.h.bf16 %v260_v30 }
 0x15a   : > { %v508_v43 = vrot.slane %v507_v42, 1 }
 0x15c   : > { %v509_v45 = vadd.f32 %v508_v43, %v507_v42 }
 0x15e   : > { %v517_v46 = vmul.f32 %v516_v44, %v509_v45 }
 0x160   : > { %v518_v47 = vsub.f32 %v481_v63, %v517_v46  ;;  %v519_v48 = vsub.f32 %v482_v62, %v517_v46  ;;  %v520_v49 = vsub.f32 %v483_v0, %v517_v46  ;;  %v521_v50 = vsub.f32 %v484_v15, %v517_v46 }
 0x161   : > { %v522_v51 = vsub.f32 %v485_v10, %v517_v46  ;;  %v523_v55 = vsub.f32 %v486_v20, %v517_v46  ;;  %v524_v60 = vsub.f32 %v487_v26, %v517_v46  ;;  %v525_v63 = vsub.f32 %v488_v33, %v517_v46  ;;  %v254_v26 = vld [vmem:[%s856_s9] sm:$0xff]  }
 0x162   : > { %v526_v52 = vmul.f32 %v518_v47, %v518_v47  ;;  %v527_v53 = vmul.f32 %v519_v48, %v519_v48  ;;  %v528_v54 = vmul.f32 %v520_v49, %v520_v49  ;;  %v529_v56 = vmul.f32 %v521_v50, %v521_v50 }
 0x163   : > { %v530_v61 = vmul.f32 %v522_v51, %v522_v51  ;;  %v531_v62 = vmul.f32 %v523_v55, %v523_v55  ;;  %v532_v4 = vmul.f32 %v524_v60, %v524_v60  ;;  %v533_v7 = vmul.f32 %v525_v63, %v525_v63 }
 0x164   : > { %v534_v57 = vsel %vm318_vm0, %v526_v52, 0.0  ;;  %v535_v58 = vsel %vm318_vm0, %v527_v53, 0.0  ;;  %v537_v1 = vsel %vm318_vm0, %v528_v54, 0.0  ;;  %v539_v0 = vsel %vm318_vm0, %v529_v56, 0.0 }
 0x165   : > { %v536_v59 = vadd.f32 %v535_v58, %v534_v57  ;;  %v541_v5 = vsel %vm318_vm0, %v530_v61, 0.0  ;;  %v543_v8 = vsel %vm318_vm0, %v531_v62, 0.0  ;;  %v545_v10 = vsel %vm318_vm0, %v532_v4, 0.0 }
 0x166   : > { %v547_v12 = vsel %vm318_vm0, %v533_v7, 0.0  ;;  %v575_v32 = vunpack.c.l.bf16 %v254_v26  ;;  %v576_v33 = vunpack.c.h.bf16 %v254_v26 }
 0x167   : > { %v538_v2 = vadd.f32 %v537_v1, %v536_v59 }
 0x169   : > { %v540_v3 = vadd.f32 %v539_v0, %v538_v2 }
 0x16b   : > { %v542_v6 = vadd.f32 %v541_v5, %v540_v3 }
 0x16d   : > { %v544_v9 = vadd.f32 %v543_v8, %v542_v6 }
 0x16f   : > { %v546_v11 = vadd.f32 %v545_v10, %v544_v9 }
 0x171   : > { %v548_v13 = vadd.f32 %v547_v12, %v546_v11 }
 0x173   : > { %v549_v14 = vrot.slane %v548_v13, 4 }
 0x175   : > { %v550_v15 = vadd.f32 %v549_v14, %v548_v13 }
 0x177   : > { %v551_v16 = vrot.slane %v550_v15, 2 }
 0x179   : > { %v552_v17 = vadd.f32 %v551_v16, %v550_v15 }
 0x17b   : > { %v553_v18 = vrot.slane %v552_v17, 1 }
 0x17d   : > { %v554_v19 = vadd.f32 %v553_v18, %v552_v17 }
 0x17f   : > { %v555_v20 = vmul.f32 %v554_v19, %v516_v44 }
 0x181   : > { %v556_v21 = vadd.f32 1e-05, %v555_v20 }
 0x183   : > { %783 = vrsqrt.f32 %v556_v21  ;;  %vm563_vm3 = vweird.f32 %v556_v21 }
 0x189   : > { %v784_v22 = vpop.eup %783 }
 0x18a   : > { %v558_v23 = vmul.f32 %v784_v22, %v556_v21  ;;  %vm564_vm0 = vweird.f32 %v784_v22 }
 0x18b   : > { %vm565_vm4 = vmor %vm563_vm3, %vm564_vm0 }
 0x18c   : > { %v559_v24 = vmul.f32 %v784_v22, %v558_v23 }
 0x18e   : > { %v560_v25 = vmul.f32 0.5, %v559_v24 }
 0x190   : > { %v561_v29 = vsub.f32 1.5, %v560_v25 }
 0x192   : > { %v562_v31 = vmul.f32 %v784_v22, %v561_v29 }
 0x194   : > { %v566_v37 = vsel %vm565_vm4, %v784_v22, %v562_v31 }
 0x195   : > { %v567_v41 = vmul.f32 %v566_v37, %v518_v47  ;;  %v568_v42 = vmul.f32 %v566_v37, %v519_v48  ;;  %v569_v43 = vmul.f32 %v566_v37, %v520_v49  ;;  %v570_v44 = vmul.f32 %v566_v37, %v521_v50 }
 0x196   : > { %v571_v45 = vmul.f32 %v566_v37, %v522_v51  ;;  %v572_v46 = vmul.f32 %v566_v37, %v523_v55  ;;  %v573_v52 = vmul.f32 %v566_v37, %v524_v60  ;;  %v574_v53 = vmul.f32 %v566_v37, %v525_v63 }
 0x197   : > { %v583_v54 = vadd.f32 %v575_v32, %v567_v41  ;;  %v584_v56 = vadd.f32 %v576_v33, %v568_v42  ;;  %v585_v57 = vadd.f32 %v577_v34, %v569_v43  ;;  %v586_v58 = vadd.f32 %v578_v35, %v570_v44 }
 0x198   : > { %v587_v59 = vadd.f32 %v579_v36, %v571_v45  ;;  %v588_v61 = vadd.f32 %v580_v38, %v572_v46  ;;  %v589_v47 = vadd.f32 %v581_v39, %v573_v52  ;;  %v590_v51 = vadd.f32 %v582_v40, %v574_v53 }
 0x199   : > { %v591_v48 = vpack.c.bf16 %v583_v54, %v583_v54  ;;  %v592_v49 = vpack.c.bf16 %v584_v56, %v584_v56  ;;  %v593_v50 = vpack.c.bf16 %v585_v57, %v585_v57  ;;  %v594_v55 = vpack.c.bf16 %v586_v58, %v586_v58 }
 0x19a   : > { %v595_v60 = vpack.c.bf16 %v587_v59, %v587_v59  ;;  %v596_v1 = vpack.c.bf16 %v588_v61, %v588_v61  ;;  %v597_v2 = vpack.c.bf16 %v589_v47, %v589_v47  ;;  %v598_v63 = vpack.c.bf16 %v590_v51, %v590_v51 }
 0x19b   : > { %600 = vst.msk [vmem:[%s252_s30] sm:$0xf] %vm599_vm5, %v591_v48 }
 0x19c   : > { %601 = vst.msk [vmem:[%s252_s30 + $0x4] sm:$0xf] %vm599_vm5, %v592_v49 }
 0x19d   : > { %602 = vst.msk [vmem:[%s252_s30 + $0x8] sm:$0xf] %vm599_vm5, %v593_v50 }
 0x19e   : > { %603 = vst.msk [vmem:[%s252_s30 + $0xc] sm:$0xf] %vm599_vm5, %v594_v55 }
 0x19f   : > { %604 = vst.msk [vmem:[%s252_s30 + $0x10] sm:$0xf] %vm599_vm5, %v595_v60 }
 0x1a0   : > { %605 = vst.msk [vmem:[%s252_s30 + $0x14] sm:$0xf] %vm599_vm5, %v596_v1 }
 0x1a1   : > { %606 = vst.msk [vmem:[%s252_s30 + $0x18] sm:$0xf] %vm599_vm5, %v597_v2 }
 0x1a2   : > { %607 = vst.msk [vmem:[%s252_s30 + $0x1c] sm:$0xf] %vm599_vm5, %v598_v63 }
 0x1a3 PF: > { %s15_s18 = sadd.s32 1, %s791_s18  }
 0x1a4   : > { %p12_p4 = scmp.ge.s32.totalorder %s15_s18, 4  }
 0x1a6   :  { %14 = sbr.rel (!%p12_p4) target bundleno = 1 (0x1), region = 76 }

// kernel: decoder_forward.19
= control target key start
LH: loop header
LB: loop body
LE: loop exit
PB: predicated region body
PF: predicated region fallthrough
CT: control target
= control target key end

     0   :  { %vm105_vm0 = vcmask 523264   ;;  %vm195_vm1 = vcmask 781312   ;;  %s654_s1 = inlined_call_operand.vmem [shape: bf16[64,96], index: 1, kind: input, shape index: {}]   ;;  %s655_s2 = inlined_call_operand.vmem [shape: bf16[64,96], index: 2, kind: input, shape index: {}]   ;;  %s656_s0 = inlined_call_operand.vmem [shape: bf16[128,64], index: 0, kind: input, shape index: {}]   ;;  %s657_s3 = inlined_call_operand.vmem [shape: bf16[128,96], index: 3, kind: output, shape index: {0}]   ;;  %s658_s4 = inlined_call_operand.vmem [shape: bf16[128,96], index: 4, kind: output, shape index: {1}]  }
   0x1   :  { %v424_v0 = vld [vmem:[%s654_s1 + $0x18] sm:$0xff]  ;;  %v423_v2 = vld [vmem:[%s654_s1 + $0x10] sm:$0xff]  ;;  %v422_v4 = vld [vmem:[%s654_s1 + $0x8] sm:$0xff] }
   0x2   :  { %v428_v1 = vld [vmem:[%s655_s2 + $0x18] sm:$0xff]  ;;  %134 = vmatpush.bf16.msra.mxu0 %v424_v0  ;;  %429 = vmatpush.bf16.msra.mxu2 %v424_v0  ;;  %v427_v3 = vld [vmem:[%s655_s2 + $0x10] sm:$0xff]  ;;  %v426_v5 = vld [vmem:[%s655_s2 + $0x8] sm:$0xff] }
   0x3   :  { %248 = vmatpush.bf16.msra.mxu1 %v428_v1  ;;  %433 = vmatpush.bf16.msra.mxu3 %v428_v1  ;;  %v421_v6 = vld [vmem:[%s654_s1] sm:$0xff]  ;;  %v414_v10 = vld [vmem:[%s656_s0 + $0x8] sm:$0xff]  ;;  %v415_v12 = vld [vmem:[%s656_s0 + $0x10] sm:$0xff] }
   0x4   :  { %v425_v7 = vld [vmem:[%s655_s2] sm:$0xff]  ;;  %v418_v11 = vld [vmem:[%s656_s0 + $0x28] sm:$0xff]  ;;  %v419_v13 = vld [vmem:[%s656_s0 + $0x30] sm:$0xff] }
   0x5   :  { %v413_v8 = vld [vmem:[%s656_s0] sm:$0xff]  ;;  %v416_v14 = vld [vmem:[%s656_s0 + $0x18] sm:$0xff] }
   0x6   :  { %135 = vmatpush.bf16.msra.mxu0 %v423_v2  ;;  %430 = vmatpush.bf16.msra.mxu2 %v423_v2  ;;  %v417_v9 = vld [vmem:[%s656_s0 + $0x20] sm:$0xff]  ;;  %v420_v15 = vld [vmem:[%s656_s0 + $0x38] sm:$0xff] }
   0x7   :  { %249 = vmatpush.bf16.msra.mxu1 %v427_v3  ;;  %434 = vmatpush.bf16.msra.mxu3 %v427_v3 }
   0xa   :  { %136 = vmatpush.bf16.msra.mxu0 %v422_v4  ;;  %431 = vmatpush.bf16.msra.mxu2 %v422_v4 }
   0xb   :  { %250 = vmatpush.bf16.msra.mxu1 %v426_v5  ;;  %435 = vmatpush.bf16.msra.mxu3 %v426_v5 }
   0xe   :  { %137 = vmatpush.bf16.msra.mxu0 %v421_v6  ;;  %432 = vmatpush.bf16.msra.mxu2 %v421_v6 }
   0xf   :  { %251 = vmatpush.bf16.msra.mxu1 %v425_v7  ;;  %436 = vmatpush.bf16.msra.mxu3 %v425_v7 }
  0x11   :  { %381 = vmatmul.msk.bf16.vlgmr.msra.gmra.mxu0 %vm105_vm0, %v413_v8  ;;  %385 = vmatmul.msk.bf16.vlgmr.msra.gmra.mxu2 %vm105_vm0, %v417_v9 }
  0x12   :  { %405 = vmatmul.msk.bf16.vlgmr.msra.gmra.mxu1 %vm105_vm0, %v413_v8  ;;  %409 = vmatmul.msk.bf16.vlgmr.msra.gmra.mxu3 %vm105_vm0, %v417_v9 }
  0x21   :  { %382 = vmatmul.msk.bf16.gmra.mxu0 %vm105_vm0, %v414_v10  ;;  %386 = vmatmul.msk.bf16.gmra.mxu2 %vm105_vm0, %v418_v11 }
  0x22   :  { %406 = vmatmul.msk.bf16.gmra.mxu1 %vm105_vm0, %v414_v10  ;;  %410 = vmatmul.msk.bf16.gmra.mxu3 %vm105_vm0, %v418_v11 }
  0x31   :  { %383 = vmatmul.msk.bf16.gmra.mxu0 %vm105_vm0, %v415_v12  ;;  %387 = vmatmul.msk.bf16.gmra.mxu2 %vm105_vm0, %v419_v13 }
  0x32   :  { %407 = vmatmul.msk.bf16.gmra.mxu1 %vm105_vm0, %v415_v12  ;;  %411 = vmatmul.msk.bf16.gmra.mxu3 %vm105_vm0, %v419_v13 }
  0x41   :  { %384 = vmatmul.msk.bf16.gmra.mxu0 %vm105_vm0, %v416_v14  ;;  %388 = vmatmul.msk.bf16.gmra.mxu2 %vm105_vm0, %v420_v15 }
  0x42   :  { %408 = vmatmul.msk.bf16.gmra.mxu1 %vm105_vm0, %v416_v14  ;;  %412 = vmatmul.msk.bf16.gmra.mxu3 %vm105_vm0, %v420_v15 }
  0x8e   :  { %v139_v16 = vpop.f32.mrf.mxu0 }
  0x8f   :  { %v179_v17 = vpack.c.bf16 %v139_v16, %v139_v16  ;;  %v253_v18 = vpop.f32.mrf.mxu1 }
  0x90   :  { %v293_v19 = vpack.c.bf16 %v253_v18, %v253_v18 }
  0x91   :  { %196 = vst.msk [vmem:[%s657_s3] sm:$0xf] %vm195_vm1, %v179_v17 }
  0x92   :  { %309 = vst.msk [vmem:[%s658_s4] sm:$0xf] %vm195_vm1, %v293_v19 }
  0x94   :  { %v159_v20 = vpop.f32.mrf.mxu2 }
  0x95   :  { %v187_v21 = vpack.c.bf16 %v159_v20, %v159_v20  ;;  %v273_v22 = vpop.f32.mrf.mxu3 }
  0x96   :  { %v301_v23 = vpack.c.bf16 %v273_v22, %v273_v22  ;;  %v141_v24 = vpop.f32.mrf.mxu0 }
  0x97   :  { %204 = vst.msk [vmem:[%s657_s3 + $0x20] sm:$0xf] %vm195_vm1, %v187_v21  ;;  %v180_v25 = vpack.c.bf16 %v141_v24, %v141_v24  ;;  %v255_v26 = vpop.f32.mrf.mxu1 }
  0x98   :  { %317 = vst.msk [vmem:[%s658_s4 + $0x20] sm:$0xf] %vm195_vm1, %v301_v23  ;;  %v294_v27 = vpack.c.bf16 %v255_v26, %v255_v26 }
  0x99   :  { %197 = vst.msk [vmem:[%s657_s3 + $0x4] sm:$0xf] %vm195_vm1, %v180_v25 }
  0x9a   :  { %310 = vst.msk [vmem:[%s658_s4 + $0x4] sm:$0xf] %vm195_vm1, %v294_v27 }
  0x9c   :  { %v161_v28 = vpop.f32.mrf.mxu2 }
  0x9d   :  { %v188_v29 = vpack.c.bf16 %v161_v28, %v161_v28  ;;  %v275_v30 = vpop.f32.mrf.mxu3 }
  0x9e   :  { %v302_v31 = vpack.c.bf16 %v275_v30, %v275_v30  ;;  %v144_v32 = vpop.f32.mrf.mxu0 }
  0x9f   :  { %205 = vst.msk [vmem:[%s657_s3 + $0x24] sm:$0xf] %vm195_vm1, %v188_v29  ;;  %v181_v33 = vpack.c.bf16 %v144_v32, %v144_v32  ;;  %v258_v34 = vpop.f32.mrf.mxu1 }
  0xa0   :  { %318 = vst.msk [vmem:[%s658_s4 + $0x24] sm:$0xf] %vm195_vm1, %v302_v31  ;;  %v295_v35 = vpack.c.bf16 %v258_v34, %v258_v34 }
  0xa1   :  { %198 = vst.msk [vmem:[%s657_s3 + $0x8] sm:$0xf] %vm195_vm1, %v181_v33 }
  0xa2   :  { %311 = vst.msk [vmem:[%s658_s4 + $0x8] sm:$0xf] %vm195_vm1, %v295_v35 }
  0xa4   :  { %v164_v36 = vpop.f32.mrf.mxu2 }
  0xa5   :  { %v189_v37 = vpack.c.bf16 %v164_v36, %v164_v36  ;;  %v278_v38 = vpop.f32.mrf.mxu3 }
  0xa6   :  { %v303_v39 = vpack.c.bf16 %v278_v38, %v278_v38  ;;  %v146_v40 = vpop.f32.mrf.mxu0 }
  0xa7   :  { %206 = vst.msk [vmem:[%s657_s3 + $0x28] sm:$0xf] %vm195_vm1, %v189_v37  ;;  %v182_v41 = vpack.c.bf16 %v146_v40, %v146_v40  ;;  %v260_v42 = vpop.f32.mrf.mxu1 }
  0xa8   :  { %319 = vst.msk [vmem:[%s658_s4 + $0x28] sm:$0xf] %vm195_vm1, %v303_v39  ;;  %v296_v43 = vpack.c.bf16 %v260_v42, %v260_v42 }
  0xa9   :  { %199 = vst.msk [vmem:[%s657_s3 + $0xc] sm:$0xf] %vm195_vm1, %v182_v41 }
  0xaa   :  { %312 = vst.msk [vmem:[%s658_s4 + $0xc] sm:$0xf] %vm195_vm1, %v296_v43 }
  0xac   :  { %v166_v44 = vpop.f32.mrf.mxu2 }
  0xad   :  { %v190_v45 = vpack.c.bf16 %v166_v44, %v166_v44  ;;  %v280_v46 = vpop.f32.mrf.mxu3 }
  0xae   :  { %v304_v47 = vpack.c.bf16 %v280_v46, %v280_v46  ;;  %v149_v48 = vpop.f32.mrf.mxu0 }
  0xaf   :  { %207 = vst.msk [vmem:[%s657_s3 + $0x2c] sm:$0xf] %vm195_vm1, %v190_v45  ;;  %v183_v49 = vpack.c.bf16 %v149_v48, %v149_v48  ;;  %v263_v50 = vpop.f32.mrf.mxu1 }
  0xb0   :  { %320 = vst.msk [vmem:[%s658_s4 + $0x2c] sm:$0xf] %vm195_vm1, %v304_v47  ;;  %v297_v51 = vpack.c.bf16 %v263_v50, %v263_v50 }
  0xb1   :  { %200 = vst.msk [vmem:[%s657_s3 + $0x10] sm:$0xf] %vm195_vm1, %v183_v49 }
  0xb2   :  { %313 = vst.msk [vmem:[%s658_s4 + $0x10] sm:$0xf] %vm195_vm1, %v297_v51 }
  0xb4   :  { %v169_v52 = vpop.f32.mrf.mxu2 }
  0xb5   :  { %v191_v53 = vpack.c.bf16 %v169_v52, %v169_v52  ;;  %v283_v54 = vpop.f32.mrf.mxu3 }
  0xb6   :  { %v305_v55 = vpack.c.bf16 %v283_v54, %v283_v54  ;;  %v151_v56 = vpop.f32.mrf.mxu0 }
  0xb7   :  { %208 = vst.msk [vmem:[%s657_s3 + $0x30] sm:$0xf] %vm195_vm1, %v191_v53  ;;  %v184_v57 = vpack.c.bf16 %v151_v56, %v151_v56  ;;  %v265_v58 = vpop.f32.mrf.mxu1 }
  0xb8   :  { %321 = vst.msk [vmem:[%s658_s4 + $0x30] sm:$0xf] %vm195_vm1, %v305_v55  ;;  %v298_v59 = vpack.c.bf16 %v265_v58, %v265_v58 }
  0xb9   :  { %201 = vst.msk [vmem:[%s657_s3 + $0x14] sm:$0xf] %vm195_vm1, %v184_v57 }
  0xba   :  { %314 = vst.msk [vmem:[%s658_s4 + $0x14] sm:$0xf] %vm195_vm1, %v298_v59 }
  0xbc   :  { %v171_v60 = vpop.f32.mrf.mxu2 }
  0xbd   :  { %v192_v61 = vpack.c.bf16 %v171_v60, %v171_v60  ;;  %v285_v62 = vpop.f32.mrf.mxu3 }
  0xbe   :  { %v306_v63 = vpack.c.bf16 %v285_v62, %v285_v62  ;;  %v154_v0 = vpop.f32.mrf.mxu0 }
  0xbf   :  { %209 = vst.msk [vmem:[%s657_s3 + $0x34] sm:$0xf] %vm195_vm1, %v192_v61  ;;  %v185_v1 = vpack.c.bf16 %v154_v0, %v154_v0  ;;  %v268_v2 = vpop.f32.mrf.mxu1 }
  0xc0   :  { %322 = vst.msk [vmem:[%s658_s4 + $0x34] sm:$0xf] %vm195_vm1, %v306_v63  ;;  %v299_v3 = vpack.c.bf16 %v268_v2, %v268_v2 }
  0xc1   :  { %202 = vst.msk [vmem:[%s657_s3 + $0x18] sm:$0xf] %vm195_vm1, %v185_v1 }
  0xc2   :  { %315 = vst.msk [vmem:[%s658_s4 + $0x18] sm:$0xf] %vm195_vm1, %v299_v3 }
  0xc4   :  { %v174_v4 = vpop.f32.mrf.mxu2 }
  0xc5   :  { %v193_v5 = vpack.c.bf16 %v174_v4, %v174_v4  ;;  %v288_v6 = vpop.f32.mrf.mxu3 }
  0xc6   :  { %v307_v7 = vpack.c.bf16 %v288_v6, %v288_v6  ;;  %v156_v8 = vpop.f32.mrf.mxu0 }
  0xc7   :  { %210 = vst.msk [vmem:[%s657_s3 + $0x38] sm:$0xf] %vm195_vm1, %v193_v5  ;;  %v186_v9 = vpack.c.bf16 %v156_v8, %v156_v8  ;;  %v270_v10 = vpop.f32.mrf.mxu1 }
  0xc8   :  { %323 = vst.msk [vmem:[%s658_s4 + $0x38] sm:$0xf] %vm195_vm1, %v307_v7  ;;  %v300_v11 = vpack.c.bf16 %v270_v10, %v270_v10 }
  0xc9   :  { %203 = vst.msk [vmem:[%s657_s3 + $0x1c] sm:$0xf] %vm195_vm1, %v186_v9 }
  0xca   :  { %316 = vst.msk [vmem:[%s658_s4 + $0x1c] sm:$0xf] %vm195_vm1, %v300_v11 }
  0xcc   :  { %v176_v12 = vpop.f32.mrf.mxu2 }
  0xcd   :  { %v194_v13 = vpack.c.bf16 %v176_v12, %v176_v12  ;;  %v290_v14 = vpop.f32.mrf.mxu3 }
  0xce   :  { %v308_v15 = vpack.c.bf16 %v290_v14, %v290_v14 }
  0xcf   :  { %211 = vst.msk [vmem:[%s657_s3 + $0x3c] sm:$0xf] %vm195_vm1, %v194_v13 }
  0xd0   :  { %324 = vst.msk [vmem:[%s658_s4 + $0x3c] sm:$0xf] %vm195_vm1, %v308_v15 }

// kernel: decoder_forward.21
= control target key start
LH: loop header
LB: loop body
LE: loop exit
PB: predicated region body
PF: predicated region fallthrough
CT: control target
= control target key end

     0   :  { %vm129_vm0 = vcmask 261120   ;;  %vm267_vm1 = vcmask 523264   ;;  %s1303_s4 = inlined_call_operand.vmem [shape: bf16[32,64], index: 4, kind: input, shape index: {}]   ;;  %s1304_s3 = inlined_call_operand.vmem [shape: bf16[64,64], index: 3, kind: input, shape index: {}]   ;;  %s1305_s5 = inlined_call_operand.vmem [shape: bf16[32,64], index: 5, kind: input, shape index: {}]   ;;  %s1306_s1 = inlined_call_operand.vmem [shape: bf16[128,32], index: 1, kind: input, shape index: {}]   ;;  %s1307_s2 = inlined_call_operand.vmem [shape: bf16[128,32], index: 2, kind: input, shape index: {}]   ;;  %s1308_s0 = inlined_call_operand.vmem [shape: bf16[128,64], index: 0, kind: input, shape index: {}]   ;;  %s1309_s7 = inlined_call_operand.vmem [shape: bf16[64,128], index: 7, kind: input, shape index: {}]   ;;  %s1310_s6 = inlined_call_operand.vmem [shape: f32[128,64], index: 6, kind: input, shape index: {}]   ;;  %s1311_s8 = inlined_call_operand.vmem [shape: f32[1,128], index: 8, kind: input, shape index: {}]   ;;  %s1312_s9 = inlined_call_operand.vmem [shape: f32[128,128], index: 9, kind: output, shape index: {}]  }
   0x1   :  { %v948_v0 = vld [vmem:[%s1303_s4 + $0x8] sm:$0xff]  ;;  %v938_v1 = vld [vmem:[%s1304_s3 + $0x18] sm:$0xff]  ;;  %v947_v3 = vld [vmem:[%s1303_s4] sm:$0xff] }
   0x2   :  { %v958_v2 = vld [vmem:[%s1305_s5 + $0x8] sm:$0xff]  ;;  %160 = vmatpush.bf16.msra.mxu0 %v948_v0  ;;  %296 = vmatpush.bf16.msra.mxu1 %v938_v1  ;;  %v937_v4 = vld [vmem:[%s1304_s3 + $0x10] sm:$0xff]  ;;  %v957_v5 = vld [vmem:[%s1305_s5] sm:$0xff] }
   0x3   :  { %443 = vmatpush.bf16.msra.mxu2 %v958_v2  ;;  %v939_v6 = vld [vmem:[%s1306_s1] sm:$0xff]  ;;  %v936_v8 = vld [vmem:[%s1304_s3 + $0x8] sm:$0xff]  ;;  %v941_v14 = vld [vmem:[%s1306_s1 + $0x10] sm:$0xff] }
   0x4   :  { %v949_v7 = vld [vmem:[%s1307_s2] sm:$0xff]  ;;  %v940_v11 = vld [vmem:[%s1306_s1 + $0x8] sm:$0xff]  ;;  %v951_v15 = vld [vmem:[%s1307_s2 + $0x10] sm:$0xff] }
   0x5   :  { %v935_v9 = vld [vmem:[%s1304_s3] sm:$0xff]  ;;  %v950_v12 = vld [vmem:[%s1307_s2 + $0x8] sm:$0xff]  ;;  %v929_v16 = vld [vmem:[%s1308_s0 + $0x10] sm:$0xff] }
   0x6   :  { %161 = vmatpush.bf16.msra.mxu0 %v947_v3  ;;  %297 = vmatpush.bf16.msra.mxu1 %v937_v4  ;;  %v927_v10 = vld [vmem:[%s1308_s0] sm:$0xff]  ;;  %v928_v13 = vld [vmem:[%s1308_s0 + $0x8] sm:$0xff]  ;;  %v942_v17 = vld [vmem:[%s1306_s1 + $0x18] sm:$0xff] }
   0x7   :  { %444 = vmatpush.bf16.msra.mxu2 %v957_v5  ;;  %v952_v18 = vld [vmem:[%s1307_s2 + $0x18] sm:$0xff]  ;;  %v943_v20 = vld [vmem:[%s1306_s1 + $0x20] sm:$0xff]  ;;  %v944_v23 = vld [vmem:[%s1306_s1 + $0x28] sm:$0xff] }
   0x8   :  { %v930_v19 = vld [vmem:[%s1308_s0 + $0x18] sm:$0xff]  ;;  %v953_v21 = vld [vmem:[%s1307_s2 + $0x20] sm:$0xff]  ;;  %v954_v24 = vld [vmem:[%s1307_s2 + $0x28] sm:$0xff] }
   0x9   :  { %791 = vmatmul.msk.bf16.vlgmr.msra.gmra.mxu0 %vm129_vm0, %v939_v6  ;;  %v931_v22 = vld [vmem:[%s1308_s0 + $0x20] sm:$0xff]  ;;  %v932_v25 = vld [vmem:[%s1308_s0 + $0x28] sm:$0xff]  ;;  %v945_v26 = vld [vmem:[%s1306_s1 + $0x30] sm:$0xff] }
   0xa   :  { %895 = vmatmul.msk.bf16.vlgmr.msra.gmra.mxu2 %vm129_vm0, %v949_v7  ;;  %298 = vmatpush.bf16.msra.mxu1 %v936_v8  ;;  %v955_v27 = vld [vmem:[%s1307_s2 + $0x30] sm:$0xff]  ;;  %v962_v29 = vld [vmem:[%s1309_s7 + $0x18] sm:$0xff]  ;;  %v960_v33 = vld [vmem:[%s1309_s7 + $0x8] sm:$0xff] }
   0xb   :  { %v933_v28 = vld [vmem:[%s1308_s0 + $0x30] sm:$0xff]  ;;  %654 = vmatpush.bf16.msra.mxu3 %v962_v29  ;;  %v946_v30 = vld [vmem:[%s1306_s1 + $0x38] sm:$0xff]  ;;  %v959_v35 = vld [vmem:[%s1309_s7] sm:$0xff] }
   0xc   :  { %v956_v31 = vld [vmem:[%s1307_s2 + $0x38] sm:$0xff]  ;;  %v961_v32 = vld [vmem:[%s1309_s7 + $0x10] sm:$0xff]  ;;  %v502_v42 = vld [vmem:[%s1310_s6] sm:$0xff] }
   0xd   :  { %v934_v34 = vld [vmem:[%s1308_s0 + $0x38] sm:$0xff]  ;;  %v503_v48 = vld [vmem:[%s1310_s6 + $0x8] sm:$0xff]  ;;  %v504_v61 = vld [vmem:[%s1310_s6 + $0x10] sm:$0xff] }
   0xe   :  { %299 = vmatpush.bf16.msra.mxu1 %v935_v9  ;;  %v505_v3 = vld [vmem:[%s1310_s6 + $0x18] sm:$0xff] }
   0xf   :  { %655 = vmatpush.bf16.msra.mxu3 %v961_v32 }
  0x11   :  { %847 = vmatmul.msk.bf16.vlgmr.msra.gmra.mxu1 %vm267_vm1, %v927_v10 }
  0x13   :  { %656 = vmatpush.bf16.msra.mxu3 %v960_v33 }
  0x17   :  { %657 = vmatpush.bf16.msra.mxu3 %v959_v35  ;;  %v508_v35 = vld [vmem:[%s1310_s6 + $0x30] sm:$0xff] }
  0x19   :  { %792 = vmatmul.msk.bf16.gmra.mxu0 %vm129_vm0, %v940_v11 }
  0x1a   :  { %896 = vmatmul.msk.bf16.gmra.mxu2 %vm129_vm0, %v950_v12 }
  0x21   :  { %848 = vmatmul.msk.bf16.gmra.mxu1 %vm267_vm1, %v928_v13 }
  0x29   :  { %793 = vmatmul.msk.bf16.gmra.mxu0 %vm129_vm0, %v941_v14 }
  0x2a   :  { %897 = vmatmul.msk.bf16.gmra.mxu2 %vm129_vm0, %v951_v15 }
  0x31   :  { %849 = vmatmul.msk.bf16.gmra.mxu1 %vm267_vm1, %v929_v16  ;;  %v506_v16 = vld [vmem:[%s1310_s6 + $0x20] sm:$0xff] }
  0x39   :  { %794 = vmatmul.msk.bf16.gmra.mxu0 %vm129_vm0, %v942_v17 }
  0x3a   :  { %898 = vmatmul.msk.bf16.gmra.mxu2 %vm129_vm0, %v952_v18 }
  0x41   :  { %850 = vmatmul.msk.bf16.gmra.mxu1 %vm267_vm1, %v930_v19 }
  0x49   :  { %795 = vmatmul.msk.bf16.gmra.mxu0 %vm129_vm0, %v943_v20 }
  0x4a   :  { %899 = vmatmul.msk.bf16.gmra.mxu2 %vm129_vm0, %v953_v21 }
  0x51   :  { %851 = vmatmul.msk.bf16.gmra.mxu1 %vm267_vm1, %v931_v22  ;;  %v507_v22 = vld [vmem:[%s1310_s6 + $0x28] sm:$0xff] }
  0x59   :  { %796 = vmatmul.msk.bf16.gmra.mxu0 %vm129_vm0, %v944_v23 }
  0x5a   :  { %900 = vmatmul.msk.bf16.gmra.mxu2 %vm129_vm0, %v954_v24 }
  0x61   :  { %852 = vmatmul.msk.bf16.gmra.mxu1 %vm267_vm1, %v932_v25 }
  0x69   :  { %797 = vmatmul.msk.bf16.gmra.mxu0 %vm129_vm0, %v945_v26 }
  0x6a   :  { %901 = vmatmul.msk.bf16.gmra.mxu2 %vm129_vm0, %v955_v27 }
  0x71   :  { %853 = vmatmul.msk.bf16.gmra.mxu1 %vm267_vm1, %v933_v28 }
  0x79   :  { %798 = vmatmul.msk.bf16.gmra.mxu0 %vm129_vm0, %v946_v30 }
  0x7a   :  { %902 = vmatmul.msk.bf16.gmra.mxu2 %vm129_vm0, %v956_v31 }
  0x81   :  { %854 = vmatmul.msk.bf16.gmra.mxu1 %vm267_vm1, %v934_v34 }
  0x86   :  { %v163_v36 = vpop.f32.mrf.mxu0 }
  0x8d   :  { %v446_v37 = vpop.f32.mrf.mxu2 }
  0x8e   :  { %v165_v38 = vpop.f32.mrf.mxu0  ;;  %v301_v39 = vpop.f32.mrf.mxu1 }
  0x8f   :  { %v302_v40 = vadd.f32 %v301_v39, %v163_v36 }
  0x91   :  { %v486_v41 = vadd.f32 %v446_v37, %v302_v40 }
  0x93   :  { %v518_v46 = vadd.f32 %v502_v42, %v486_v41  ;;  %v509_v41 = vld [vmem:[%s1310_s6 + $0x38] sm:$0xff] }
  0x95   :  { %v448_v43 = vpop.f32.mrf.mxu2  ;;  %v550_v50 = vmul.f32 0.2, %v518_v46  ;;  %vm534_vm2 = vcmp.ge.f32.partialorder %v518_v46, 0.0 }
  0x96   :  { %v168_v44 = vpop.f32.mrf.mxu0  ;;  %v303_v45 = vpop.f32.mrf.mxu1 }
  0x97   :  { %v304_v47 = vadd.f32 %v303_v45, %v165_v38  ;;  %v566_v57 = vsel %vm534_vm2, %v518_v46, %v550_v50 }
  0x99   :  { %v487_v49 = vadd.f32 %v448_v43, %v304_v47 }
  0x9b   :  { %v519_v51 = vadd.f32 %v503_v48, %v487_v49 }
  0x9d   :  { %v551_v52 = vmul.f32 0.2, %v519_v51  ;;  %v451_v53 = vpop.f32.mrf.mxu2  ;;  %vm535_vm3 = vcmp.ge.f32.partialorder %v519_v51, 0.0 }
  0x9e   :  { %v170_v54 = vpop.f32.mrf.mxu0  ;;  %v306_v55 = vpop.f32.mrf.mxu1 }
  0x9f   :  { %v307_v56 = vadd.f32 %v306_v55, %v168_v44  ;;  %v567_v58 = vsel %vm535_vm3, %v519_v51, %v551_v52 }
  0xa0   :  { %v582_v59 = vpack.c.bf16 %v567_v58, %v566_v57 }
  0xa1   :  { %v488_v60 = vadd.f32 %v451_v53, %v307_v56 }
  0xa2   :  { %919 = vmatmul.msk.bf16.vlgmr.msra.gmra.mxu3 %vm267_vm1, %v582_v59 }
  0xa3   :  { %v520_v1 = vadd.f32 %v504_v61, %v488_v60  ;;  %v511_v60 = vld [vmem:[%s1310_s6 + $0x48] sm:$0xff] }
  0xa5   :  { %v453_v62 = vpop.f32.mrf.mxu2  ;;  %v552_v5 = vmul.f32 0.2, %v520_v1  ;;  %vm536_vm4 = vcmp.ge.f32.partialorder %v520_v1, 0.0 }
  0xa6   :  { %v173_v63 = vpop.f32.mrf.mxu0  ;;  %v308_v0 = vpop.f32.mrf.mxu1 }
  0xa7   :  { %v309_v2 = vadd.f32 %v308_v0, %v170_v54  ;;  %v568_v12 = vsel %vm536_vm4, %v520_v1, %v552_v5  ;;  %v510_v54 = vld [vmem:[%s1310_s6 + $0x40] sm:$0xff] }
  0xa9   :  { %v489_v4 = vadd.f32 %v453_v62, %v309_v2 }
  0xab   :  { %v521_v6 = vadd.f32 %v505_v3, %v489_v4 }
  0xad   :  { %v553_v7 = vmul.f32 0.2, %v521_v6  ;;  %v456_v8 = vpop.f32.mrf.mxu2  ;;  %vm537_vm5 = vcmp.ge.f32.partialorder %v521_v6, 0.0 }
  0xae   :  { %v175_v9 = vpop.f32.mrf.mxu0  ;;  %v311_v10 = vpop.f32.mrf.mxu1 }
  0xaf   :  { %v312_v11 = vadd.f32 %v311_v10, %v173_v63  ;;  %v569_v13 = vsel %vm537_vm5, %v521_v6, %v553_v7 }
  0xb0   :  { %v583_v14 = vpack.c.bf16 %v569_v13, %v568_v12 }
  0xb1   :  { %v490_v15 = vadd.f32 %v456_v8, %v312_v11 }
  0xb2   :  { %920 = vmatmul.msk.bf16.gmra.mxu3 %vm267_vm1, %v583_v14 }
  0xb3   :  { %v522_v20 = vadd.f32 %v506_v16, %v490_v15  ;;  %v513_v15 = vld [vmem:[%s1310_s6 + $0x58] sm:$0xff] }
  0xb5   :  { %v458_v17 = vpop.f32.mrf.mxu2  ;;  %v554_v24 = vmul.f32 0.2, %v522_v20  ;;  %vm538_vm6 = vcmp.ge.f32.partialorder %v522_v20, 0.0 }
  0xb6   :  { %v178_v18 = vpop.f32.mrf.mxu0  ;;  %v313_v19 = vpop.f32.mrf.mxu1 }
  0xb7   :  { %v314_v21 = vadd.f32 %v313_v19, %v175_v9  ;;  %v570_v31 = vsel %vm538_vm6, %v522_v20, %v554_v24  ;;  %v512_v9 = vld [vmem:[%s1310_s6 + $0x50] sm:$0xff] }
  0xb9   :  { %v491_v23 = vadd.f32 %v458_v17, %v314_v21 }
  0xbb   :  { %v523_v25 = vadd.f32 %v507_v22, %v491_v23 }
  0xbd   :  { %v555_v26 = vmul.f32 0.2, %v523_v25  ;;  %v461_v27 = vpop.f32.mrf.mxu2  ;;  %vm539_vm7 = vcmp.ge.f32.partialorder %v523_v25, 0.0 }
  0xbe   :  { %v180_v28 = vpop.f32.mrf.mxu0  ;;  %v316_v29 = vpop.f32.mrf.mxu1 }
  0xbf   :  { %v317_v30 = vadd.f32 %v316_v29, %v178_v18  ;;  %v571_v32 = vsel %vm539_vm7, %v523_v25, %v555_v26 }
  0xc0   :  { %v584_v33 = vpack.c.bf16 %v571_v32, %v570_v31 }
  0xc1   :  { %v492_v34 = vadd.f32 %v461_v27, %v317_v30 }
  0xc2   :  { %921 = vmatmul.msk.bf16.gmra.mxu3 %vm267_vm1, %v584_v33  ;;  %v515_v33 = vld [vmem:[%s1310_s6 + $0x68] sm:$0xff] }
  0xc3   :  { %v524_v39 = vadd.f32 %v508_v35, %v492_v34 }
  0xc5   :  { %v463_v36 = vpop.f32.mrf.mxu2  ;;  %v556_v43 = vmul.f32 0.2, %v524_v39  ;;  %vm540_vm8 = vcmp.ge.f32.partialorder %v524_v39, 0.0 }
  0xc6   :  { %v183_v37 = vpop.f32.mrf.mxu0  ;;  %v318_v38 = vpop.f32.mrf.mxu1 }
  0xc7   :  { %v319_v40 = vadd.f32 %v318_v38, %v180_v28  ;;  %v572_v50 = vsel %vm540_vm8, %v524_v39, %v556_v43  ;;  %v514_v28 = vld [vmem:[%s1310_s6 + $0x60] sm:$0xff] }
  0xc9   :  { %v493_v42 = vadd.f32 %v463_v36, %v319_v40 }
  0xcb   :  { %v525_v44 = vadd.f32 %v509_v41, %v493_v42 }
  0xcd   :  { %v557_v45 = vmul.f32 0.2, %v525_v44  ;;  %v466_v46 = vpop.f32.mrf.mxu2  ;;  %vm541_vm9 = vcmp.ge.f32.partialorder %v525_v44, 0.0 }
  0xce   :  { %v185_v47 = vpop.f32.mrf.mxu0  ;;  %v321_v48 = vpop.f32.mrf.mxu1 }
  0xcf   :  { %v322_v49 = vadd.f32 %v321_v48, %v183_v37  ;;  %v573_v51 = vsel %vm541_vm9, %v525_v44, %v557_v45 }
  0xd0   :  { %v585_v52 = vpack.c.bf16 %v573_v51, %v572_v50 }
  0xd1   :  { %v494_v53 = vadd.f32 %v466_v46, %v322_v49  ;;  %v516_v46 = vld [vmem:[%s1310_s6 + $0x70] sm:$0xff] }
  0xd2   :  { %922 = vmatmul.msk.bf16.gmra.mxu3 %vm267_vm1, %v585_v52  ;;  %v517_v52 = vld [vmem:[%s1310_s6 + $0x78] sm:$0xff] }
  0xd3   :  { %v526_v58 = vadd.f32 %v510_v54, %v494_v53 }
  0xd5   :  { %v468_v55 = vpop.f32.mrf.mxu2  ;;  %v558_v62 = vmul.f32 0.2, %v526_v58  ;;  %vm542_vm10 = vcmp.ge.f32.partialorder %v526_v58, 0.0 }
  0xd6   :  { %v188_v56 = vpop.f32.mrf.mxu0  ;;  %v323_v57 = vpop.f32.mrf.mxu1 }
  0xd7   :  { %v324_v59 = vadd.f32 %v323_v57, %v185_v47  ;;  %v574_v5 = vsel %vm542_vm10, %v526_v58, %v558_v62 }
  0xd9   :  { %v495_v61 = vadd.f32 %v468_v55, %v324_v59 }
  0xdb   :  { %v527_v63 = vadd.f32 %v511_v60, %v495_v61  ;;  %v1237_v60 = vld [vmem:[%s1311_s8] ss:$0 sm:$0xff] }
  0xdd   :  { %v559_v0 = vmul.f32 0.2, %v527_v63  ;;  %v471_v1 = vpop.f32.mrf.mxu2  ;;  %vm543_vm11 = vcmp.ge.f32.partialorder %v527_v63, 0.0 }
  0xde   :  { %v190_v2 = vpop.f32.mrf.mxu0  ;;  %v326_v3 = vpop.f32.mrf.mxu1 }
  0xdf   :  { %v327_v4 = vadd.f32 %v326_v3, %v188_v56  ;;  %v575_v6 = vsel %vm543_vm11, %v527_v63, %v559_v0 }
  0xe0   :  { %v586_v7 = vpack.c.bf16 %v575_v6, %v574_v5 }
  0xe1   :  { %v496_v8 = vadd.f32 %v471_v1, %v327_v4 }
  0xe2   :  { %923 = vmatmul.msk.bf16.gmra.mxu3 %vm267_vm1, %v586_v7 }
  0xe3   :  { %v528_v12 = vadd.f32 %v512_v9, %v496_v8 }
  0xe5   :  { %v473_v10 = vpop.f32.mrf.mxu2  ;;  %v560_v17 = vmul.f32 0.2, %v528_v12  ;;  %vm544_vm12 = vcmp.ge.f32.partialorder %v528_v12, 0.0 }
  0xe6   :  { %v328_v11 = vpop.f32.mrf.mxu1  ;;  %v193_v14 = vpop.f32.mrf.mxu0 }
  0xe7   :  { %v329_v13 = vadd.f32 %v328_v11, %v190_v2  ;;  %v576_v23 = vsel %vm544_vm12, %v528_v12, %v560_v17 }
  0xe9   :  { %v497_v16 = vadd.f32 %v473_v10, %v329_v13 }
  0xeb   :  { %v529_v18 = vadd.f32 %v513_v15, %v497_v16 }
  0xed   :  { %v561_v19 = vmul.f32 0.2, %v529_v18  ;;  %v476_v20 = vpop.f32.mrf.mxu2  ;;  %vm545_vm13 = vcmp.ge.f32.partialorder %v529_v18, 0.0 }
  0xee   :  { %v331_v21 = vpop.f32.mrf.mxu1  ;;  %v195_v26 = vpop.f32.mrf.mxu0 }
  0xef   :  { %v332_v22 = vadd.f32 %v331_v21, %v193_v14  ;;  %v577_v24 = vsel %vm545_vm13, %v529_v18, %v561_v19 }
  0xf0   :  { %v587_v25 = vpack.c.bf16 %v577_v24, %v576_v23 }
  0xf1   :  { %v498_v27 = vadd.f32 %v476_v20, %v332_v22 }
  0xf2   :  { %924 = vmatmul.msk.bf16.gmra.mxu3 %vm267_vm1, %v587_v25 }
  0xf3   :  { %v530_v31 = vadd.f32 %v514_v28, %v498_v27 }
  0xf5   :  { %v478_v29 = vpop.f32.mrf.mxu2  ;;  %v562_v35 = vmul.f32 0.2, %v530_v31  ;;  %vm546_vm14 = vcmp.ge.f32.partialorder %v530_v31, 0.0 }
  0xf6   :  { %v333_v30 = vpop.f32.mrf.mxu1  ;;  %v198_v37 = vpop.f32.mrf.mxu0 }
  0xf7   :  { %v334_v32 = vadd.f32 %v333_v30, %v195_v26  ;;  %v578_v42 = vsel %vm546_vm14, %v530_v31, %v562_v35 }
  0xf9   :  { %v499_v34 = vadd.f32 %v478_v29, %v334_v32 }
  0xfb   :  { %v531_v36 = vadd.f32 %v515_v33, %v499_v34 }
  0xfd   :  { %v563_v38 = vmul.f32 0.2, %v531_v36  ;;  %vm547_vm15 = vcmp.ge.f32.partialorder %v531_v36, 0.0  ;;  %v481_v39 = vpop.f32.mrf.mxu2 }
  0xfe   :  { %v336_v40 = vpop.f32.mrf.mxu1  ;;  %v200_v47 = vpop.f32.mrf.mxu0 }
  0xff   :  { %v337_v41 = vadd.f32 %v336_v40, %v198_v37  ;;  %v579_v43 = vsel %vm547_vm15, %v531_v36, %v563_v38 }
 0x100   :  { %v588_v44 = vpack.c.bf16 %v579_v43, %v578_v42 }
 0x101   :  { %v500_v45 = vadd.f32 %v481_v39, %v337_v41 }
 0x102   :  { %925 = vmatmul.msk.bf16.gmra.mxu3 %vm267_vm1, %v588_v44 }
 0x103   :  { %v532_v49 = vadd.f32 %v516_v46, %v500_v45 }
 0x105   :  { %v483_v51 = vpop.f32.mrf.mxu2  ;;  %v564_v54 = vmul.f32 0.2, %v532_v49  ;;  %vm548_vm0 = vcmp.ge.f32.partialorder %v532_v49, 0.0 }
 0x106   :  { %v338_v48 = vpop.f32.mrf.mxu1 }
 0x107   :  { %v339_v50 = vadd.f32 %v338_v48, %v200_v47  ;;  %v580_v57 = vsel %vm548_vm0, %v532_v49, %v564_v54 }
 0x109   :  { %v501_v53 = vadd.f32 %v483_v51, %v339_v50 }
 0x10b   :  { %v533_v55 = vadd.f32 %v517_v52, %v501_v53 }
 0x10d   :  { %v565_v56 = vmul.f32 0.2, %v533_v55  ;;  %vm549_vm2 = vcmp.ge.f32.partialorder %v533_v55, 0.0 }
 0x10f   :  { %v581_v58 = vsel %vm549_vm2, %v533_v55, %v565_v56 }
 0x110   :  { %v589_v59 = vpack.c.bf16 %v581_v58, %v580_v57 }
 0x112   :  { %926 = vmatmul.msk.bf16.gmra.mxu3 %vm267_vm1, %v589_v59 }
 0x125   :  { %v659_v61 = vpop.f32.mrf.mxu3 }
 0x126   :  { %v660_v62 = vadd.f32 %v1237_v60, %v659_v61 }
 0x128   :  { %v699_v63 = vmul.f32 1.442695, %v660_v62 }
 0x12a   :  { %964 = vpow2.f32 %v699_v63 }
 0x12d   :  { %v661_v0 = vpop.f32.mrf.mxu3 }
 0x12e   :  { %v662_v1 = vadd.f32 %v1237_v60, %v661_v0 }
 0x130   :  { %v965_v2 = vpop.eup %964  ;;  %v701_v3 = vmul.f32 1.442695, %v662_v1 }
 0x131   :  { %731 = vst [vmem:[%s1312_s9] sm:$0xff] %v965_v2 }
 0x132   :  { %966 = vpow2.f32 %v701_v3 }
 0x135   :  { %v664_v4 = vpop.f32.mrf.mxu3 }
 0x136   :  { %v665_v5 = vadd.f32 %v1237_v60, %v664_v4 }
 0x138   :  { %v967_v6 = vpop.eup %966  ;;  %v703_v7 = vmul.f32 1.442695, %v665_v5 }
 0x139   :  { %732 = vst [vmem:[%s1312_s9 + $0x8] sm:$0xff] %v967_v6 }
 0x13a   :  { %968 = vpow2.f32 %v703_v7 }
 0x13d   :  { %v666_v8 = vpop.f32.mrf.mxu3 }
 0x13e   :  { %v667_v9 = vadd.f32 %v1237_v60, %v666_v8 }
 0x140   :  { %v969_v10 = vpop.eup %968  ;;  %v705_v11 = vmul.f32 1.442695, %v667_v9 }
 0x141   :  { %733 = vst [vmem:[%s1312_s9 + $0x10] sm:$0xff] %v969_v10 }
 0x142   :  { %970 = vpow2.f32 %v705_v11 }
 0x145   :  { %v669_v12 = vpop.f32.mrf.mxu3 }
 0x146   :  { %v670_v13 = vadd.f32 %v1237_v60, %v669_v12 }
 0x148   :  { %v971_v14 = vpop.eup %970  ;;  %v707_v15 = vmul.f32 1.442695, %v670_v13 }
 0x149   :  { %734 = vst [vmem:[%s1312_s9 + $0x18] sm:$0xff] %v971_v14 }
 0x14a   :  { %972 = vpow2.f32 %v707_v15 }
 0x14d   :  { %v671_v16 = vpop.f32.mrf.mxu3 }
 0x14e   :  { %v672_v17 = vadd.f32 %v1237_v60, %v671_v16 }
 0x150   :  { %v973_v18 = vpop.eup %972  ;;  %v709_v19 = vmul.f32 1.442695, %v672_v17 }
 0x151   :  { %735 = vst [vmem:[%s1312_s9 + $0x20] sm:$0xff] %v973_v18 }
 0x152   :  { %974 = vpow2.f32 %v709_v19 }
 0x155   :  { %v674_v20 = vpop.f32.mrf.mxu3 }
 0x156   :  { %v675_v21 = vadd.f32 %v1237_v60, %v674_v20 }
 0x158   :  { %v975_v22 = vpop.eup %974  ;;  %v711_v23 = vmul.f32 1.442695, %v675_v21 }
 0x159   :  { %736 = vst [vmem:[%s1312_s9 + $0x28] sm:$0xff] %v975_v22 }
 0x15a   :  { %976 = vpow2.f32 %v711_v23 }
 0x15d   :  { %v676_v24 = vpop.f32.mrf.mxu3 }
 0x15e   :  { %v677_v25 = vadd.f32 %v1237_v60, %v676_v24 }
 0x160   :  { %v977_v26 = vpop.eup %976  ;;  %v713_v27 = vmul.f32 1.442695, %v677_v25 }
 0x161   :  { %737 = vst [vmem:[%s1312_s9 + $0x30] sm:$0xff] %v977_v26 }
 0x162   :  { %978 = vpow2.f32 %v713_v27 }
 0x165   :  { %v679_v28 = vpop.f32.mrf.mxu3 }
 0x166   :  { %v680_v29 = vadd.f32 %v1237_v60, %v679_v28 }
 0x168   :  { %v979_v30 = vpop.eup %978  ;;  %v715_v31 = vmul.f32 1.442695, %v680_v29 }
 0x169   :  { %738 = vst [vmem:[%s1312_s9 + $0x38] sm:$0xff] %v979_v30 }
 0x16a   :  { %980 = vpow2.f32 %v715_v31 }
 0x16d   :  { %v681_v32 = vpop.f32.mrf.mxu3 }
 0x16e   :  { %v682_v33 = vadd.f32 %v1237_v60, %v681_v32 }
 0x170   :  { %v981_v34 = vpop.eup %980  ;;  %v717_v35 = vmul.f32 1.442695, %v682_v33 }
 0x171   :  { %739 = vst [vmem:[%s1312_s9 + $0x40] sm:$0xff] %v981_v34 }
 0x172   :  { %982 = vpow2.f32 %v717_v35 }
 0x175   :  { %v684_v36 = vpop.f32.mrf.mxu3 }
 0x176   :  { %v685_v37 = vadd.f32 %v1237_v60, %v684_v36 }
 0x178   :  { %v983_v38 = vpop.eup %982  ;;  %v719_v39 = vmul.f32 1.442695, %v685_v37 }
 0x179   :  { %740 = vst [vmem:[%s1312_s9 + $0x48] sm:$0xff] %v983_v38 }
 0x17a   :  { %984 = vpow2.f32 %v719_v39 }
 0x17d   :  { %v686_v40 = vpop.f32.mrf.mxu3 }
 0x17e   :  { %v687_v41 = vadd.f32 %v1237_v60, %v686_v40 }
 0x180   :  { %v985_v42 = vpop.eup %984  ;;  %v721_v43 = vmul.f32 1.442695, %v687_v41 }
 0x181   :  { %741 = vst [vmem:[%s1312_s9 + $0x50] sm:$0xff] %v985_v42 }
 0x182   :  { %986 = vpow2.f32 %v721_v43 }
 0x185   :  { %v689_v44 = vpop.f32.mrf.mxu3 }
 0x186   :  { %v690_v45 = vadd.f32 %v1237_v60, %v689_v44 }
 0x188   :  { %v987_v46 = vpop.eup %986  ;;  %v723_v47 = vmul.f32 1.442695, %v690_v45 }
 0x189   :  { %742 = vst [vmem:[%s1312_s9 + $0x58] sm:$0xff] %v987_v46 }
 0x18a   :  { %988 = vpow2.f32 %v723_v47 }
 0x18d   :  { %v691_v48 = vpop.f32.mrf.mxu3 }
 0x18e   :  { %v692_v49 = vadd.f32 %v1237_v60, %v691_v48 }
 0x190   :  { %v989_v50 = vpop.eup %988  ;;  %v725_v51 = vmul.f32 1.442695, %v692_v49 }
 0x191   :  { %743 = vst [vmem:[%s1312_s9 + $0x60] sm:$0xff] %v989_v50 }
 0x192   :  { %990 = vpow2.f32 %v725_v51 }
 0x195   :  { %v694_v52 = vpop.f32.mrf.mxu3 }
 0x196   :  { %v695_v53 = vadd.f32 %v1237_v60, %v694_v52 }
 0x198   :  { %v991_v54 = vpop.eup %990  ;;  %v727_v55 = vmul.f32 1.442695, %v695_v53 }
 0x199   :  { %744 = vst [vmem:[%s1312_s9 + $0x68] sm:$0xff] %v991_v54 }
 0x19a   :  { %992 = vpow2.f32 %v727_v55 }
 0x19d   :  { %v696_v56 = vpop.f32.mrf.mxu3 }
 0x19e   :  { %v697_v57 = vadd.f32 %v1237_v60, %v696_v56 }
 0x1a0   :  { %v993_v58 = vpop.eup %992  ;;  %v729_v59 = vmul.f32 1.442695, %v697_v57 }
 0x1a1   :  { %745 = vst [vmem:[%s1312_s9 + $0x70] sm:$0xff] %v993_v58 }
 0x1a2   :  { %994 = vpow2.f32 %v729_v59 }
 0x1a8   :  { %v995_v61 = vpop.eup %994 }
 0x1a9   :  { %746 = vst [vmem:[%s1312_s9 + $0x78] sm:$0xff] %v995_v61 }

// kernel: decoder_forward.20
= control target key start
LH: loop header
LB: loop body
LE: loop exit
PB: predicated region body
PF: predicated region fallthrough
CT: control target
= control target key end

     0   :  { %s2199_s27 = smov 0   ;;  %s2703_s0 = inlined_call_operand.vmem [shape: bf16[128,96], index: 0, kind: input, shape index: {}]   ;;  %s2704_s1 = inlined_call_operand.vmem [shape: bf16[128,96], index: 1, kind: input, shape index: {}]   ;;  %s2705_s2 = inlined_call_operand.vmem [shape: f32[2,96], index: 2, kind: input, shape index: {}]   ;;  %s2706_s3 = inlined_call_operand.vmem [shape: f32[2,96], index: 3, kind: input, shape index: {}]   ;;  %s2707_s4 = inlined_call_operand.vmem [shape: bf16[32,192], index: 4, kind: input, shape index: {}]   ;;  %s2708_s5 = inlined_call_operand.vmem [shape: f32[1,96], index: 5, kind: input, shape index: {}]   ;;  %s2709_s6 = inlined_call_operand.vmem [shape: f32[1,96], index: 6, kind: input, shape index: {}]   ;;  %s2710_s7 = inlined_call_operand.vmem [shape: bf16[128,32], index: 7, kind: output, shape index: {0}]   ;;  %s2711_s8 = inlined_call_operand.vmem [shape: bf16[128,32], index: 8, kind: output, shape index: {1}]  }
   0x1 LB: > { %s1864_s28 = sadd.s32 4294967295, %s2136_s27   ;;  %p1868_p0 = scmp.ge.s32.totalorder %s2136_s27, 1  ;;  %s2136_s27 = sphi %s2199_s27, %s19_s27  }
   0x2   : > { %p283_p1 = scmp.lt.s32.totalorder %s2136_s27, 3 }
   0x4   : > { %p284_p2 = pnand %p1868_p0, %p283_p1 }
   0x5   : > { %s1869_s29 = sshll.u32 (!%p284_p2), %s1864_s28, 3  ;;  %s335_s30 = ssub.s32 (!%p284_p2), 1, %s1864_s28 }
   0x6   : > { %287 = sbr.rel (%p284_p2) target bundleno = 4997 (0x1385), region = 48  ;;  %p330_p3 = scmp.lt.s32.totalorder (!%p284_p2), %s1869_s29, 15 }
   0x7   : > { %s1871_s9 = sshll.u32 (!%p284_p2), %s335_s30, 3  ;;  %p1877_p5 = scmp.ne.s32.totalorder (!%p284_p2), %s1864_s28, 0 }
   0x8   : > { %p337_p4 = scmp.lt.s32.totalorder (!%p284_p2), %s1871_s9, 15 }
   0xb   : > { %s2715_s29 = smov (!%p330_p3, %s1869_s29), 15  ;;  %s2717_s9 = smov (!%p337_p4, %s1871_s9), 15 }
   0xc   : > { %s1870_s10 = sshll.u32 %s2715_s29, 2  ;;  %s1872_s14 = sshll.u32 %s2717_s9, 2 }
   0xd   : > { %s2210_s13 = scalar_lea.vmem %s2703_s0, %s1870_s10  ;;  %s2215_s17 = scalar_lea.vmem %s2704_s1, %s1872_s14 }
   0xe   : > { %s2220_s20 = scalar_lea.vmem %s2710_s7, %s1870_s10  ;;  %s2225_s23 = scalar_lea.vmem %s2711_s8, %s1872_s14 }
   0xf   : > { %361 = sbr.rel (%p1877_p5) target bundleno = 22 (0x16), region = 52 }
  0x14   : > { %vm362_vm0 = vcmask 257024   ;;  %v2150_v0 = vmov 0.0  }
  0x15   : > { %363 = vst.msk [vmem:[#allocation2] sm:$0xf] %vm362_vm0, %v2150_v0 }
  0x16 PF: > { %v2230_v1 = vld [vmem:[%s2705_s2] sm:$0x3]  ;;  %v2240_v3 = vld [vmem:[%s2707_s4 + $0x4] sm:$0xf]  ;;  %v2250_v5 = vld [vmem:[%s2707_s4 + $0x8] sm:$0xf0] }
  0x17   : > { %v2235_v2 = vld [vmem:[%s2706_s3] sm:$0x3]  ;;  %v2255_v6 = vld [vmem:[%s2707_s4 + $0x4] sm:$0xf0]  ;;  %v2260_v7 = vld [vmem:[%s2707_s4 + $0x14] sm:$0xf] }
  0x18   : > { %v2245_v4 = vld [vmem:[%s2707_s4] sm:$0xf]  ;;  %v2265_v8 = vld [vmem:[%s2707_s4 + $0x10] sm:$0xf]  ;;  %v2270_v9 = vld [vmem:[%s2707_s4 + $0x18] sm:$0xf0] }
  0x19   : > { %v2275_v10 = vld [vmem:[%s2707_s4 + $0x14] sm:$0xf0]  ;;  %v2280_v11 = vld [vmem:[%s2708_s5] sm:$0x1]  ;;  %s2291_s10 = smov 0  }
  0x1a   : > { %v2285_v12 = vld [vmem:[%s2709_s6] sm:$0x1] }
  0x1c   : > { %v372_v13 = vld [vmem:[#allocation2] sm:$0x3]   ;;  %v373_v14 = vld [vmem:[#allocation2 + $0x2] sm:$0x3]  }
  0x1d LB: >> { %v2304_v15 = vor.u32 %v2275_v10, %v2265_v8  ;;  %v2308_v16 = vor.u32 %v2260_v7, %v2270_v9  ;;  %v2312_v17 = vor.u32 %v2255_v6, %v2245_v4  ;;  %v2316_v18 = vor.u32 %v2240_v3, %v2250_v5  ;;  %s2151_s11 = smov 96   ;;  %s2152_s12 = smov 32   ;;  %s2148_s10 = sphi %s2291_s10, %s379_s10   ;;  %v2144_v13 = vphi %v372_v13, %v2713_v13   ;;  %v2140_v14 = vphi %v373_v14, %v2712_v14  }
  0x1e   : >> { %vm409_vm1 = vcmask 1041408   ;;  %v467_v19 = vperm.slane %v2285_v12, 0  ;;  %v407_v20 = vrot.slane %v2140_v14, 6  ;;  %vm432_vm2 = vcmask 261120   ;;  %s2153_s14 = smov 64   ;;  %s1878_s15 = sshll.u32 %s2148_s10, 4 }
  0x1f   : >> { %442 = vmatpush.bf16.msra.mxu0 %v2304_v15  ;;  %455 = vmatpush.bf16.msra.mxu1 %v2308_v16  ;;  %v2352_v30 = vperm.slane %v2280_v11, 0  ;;  %s2358_s16 = sshra.s32 %s1878_s15, 3  ;;  %s383_s21 = ssub.s32 3, %s2148_s10  ;;  %v403_v41 = vrot.slane %v2235_v2, 2 }
  0x20   : >> { %612 = vmatpush.bf16.msra.mxu2 %v2304_v15  ;;  %625 = vmatpush.bf16.msra.mxu3 %v2308_v16  ;;  %v410_v21 = vsel %vm409_vm1, %v2144_v13, %v407_v20  ;;  %s1880_s18 = sshll.u32 %s2358_s16, 2  ;;  %s1879_s22 = sshll.u32 %s383_s21, 4 }
  0x21   : >> { %468 = vrot.lane.b32.xlu0 %v467_v19, %s2151_s11  ;;  %v411_v22 = vpack.c.bf16 %v410_v21, %v410_v21  ;;  %s388_s19 = scalar_lea.vmem %s2210_s13, %s1880_s18  ;;  %s393_s24 = sshra.s32 %s1879_s22, 3 }
  0x22   : >> { %v2365_v34 = vld [vmem:[%s388_s19] sm:$0xff]   ;;  %s2370_s25 = sshll.u32 %s393_s24, 2  ;;  %s2660_s29 = scalar_lea.vmem %s2220_s20, %s1880_s18 }
  0x23   : >> { %443 = vmatpush.bf16.msra.mxu0 %v2312_v17  ;;  %456 = vmatpush.bf16.msra.mxu1 %v2316_v18  ;;  %v2368_v35 = vunpack.c.l.bf16 %v2365_v34  ;;  %s396_s26 = scalar_lea.vmem %s2215_s17, %s2370_s25  ;;  %s2668_s30 = scalar_lea.vmem %s2225_s23, %s2370_s25 }
  0x24   : >> { %613 = vmatpush.bf16.msra.mxu2 %v2312_v17  ;;  %626 = vmatpush.bf16.msra.mxu3 %v2316_v18  ;;  %v2376_v38 = vld [vmem:[%s396_s26] sm:$0xff]   ;;  %s379_s10 = sadd.s32 1, %s2148_s10  }
  0x25   : >> { %v401_v36 = vadd.f32 %v2368_v35, %v2230_v1  ;;  %v2379_v40 = vunpack.c.h.bf16 %v2376_v38  ;;  %p376_p6 = scmp.ge.s32.totalorder %s379_s10, 4  }
  0x26   : >> { %1898 = vmatmul.msk.bf16.vlgmr.msra.gmra.mxu0 %vm432_vm2, %v411_v22  ;;  %1899 = vmatmul.msk.bf16.vlgmr.msra.gmra.mxu1 %vm432_vm2, %v411_v22 }
  0x27   : >> { %775 = vmatpush.bf16.msrb.mxu0 %v2304_v15  ;;  %788 = vmatpush.bf16.msrb.mxu1 %v2308_v16  ;;  %v405_v42 = vadd.f32 %v2379_v40, %v403_v41 }
  0x28   : >> { %928 = vmatpush.bf16.msrb.mxu2 %v2304_v15  ;;  %941 = vmatpush.bf16.msrb.mxu3 %v2308_v16 }
  0x2b   : >> { %776 = vmatpush.bf16.msrb.mxu0 %v2312_v17  ;;  %789 = vmatpush.bf16.msrb.mxu1 %v2316_v18 }
  0x2c   : >> { %929 = vmatpush.bf16.msrb.mxu2 %v2312_v17  ;;  %942 = vmatpush.bf16.msrb.mxu3 %v2316_v18 }
  0x2f   : >> { %1087 = vmatpush.bf16.msra.mxu0 %v2304_v15  ;;  %1100 = vmatpush.bf16.msra.mxu1 %v2308_v16 }
  0x33   : >> { %1088 = vmatpush.bf16.msra.mxu0 %v2312_v17  ;;  %1101 = vmatpush.bf16.msra.mxu1 %v2316_v18 }
  0x93   : >> { %v2345_v23 = vpop.permute.xlu0 %468 }
  0xa3   : >> { %v445_v24 = vpop.f32.mrf.mxu0  ;;  %v458_v25 = vpop.f32.mrf.mxu1 }
  0xa4   : >> { %v471_v26 = vadd.f32 %v2345_v23, %v445_v24  ;;  %v472_v27 = vadd.f32 %v2345_v23, %v458_v25  ;;  %v465_v33 = vadd.f32 %v2352_v30, %v445_v24 }
  0xa6   : >> { %v517_v28 = vrot.slane %v471_v26, 4  ;;  %v542_v29 = vrot.slane %v472_v27, 4  ;;  %v473_v37 = vadd.f32 %v465_v33, %v401_v36 }
  0xa8   : >> { %566 = vrot.lane.b32.xlu1 %v542_v29, %s2151_s11  ;;  %518 = vrot.lane.b32.xlu0 %v517_v28, %s2152_s12  ;;  %v1900_v39 = vmul.f32 -1.442695, %v473_v37 }
  0xaa   : >> { %1990 = vpow2.f32 %v1900_v39 }
  0xab   : >> { %v447_v31 = vpop.f32.mrf.mxu0  ;;  %v460_v32 = vpop.f32.mrf.mxu1 }
  0xb0   : >> { %543 = vrot.lane.b32.xlu0 %v542_v29, %s2152_s12  ;;  %494 = vrot.lane.b32.xlu1 %v465_v33, %s2153_s14  ;;  %v1991_v45 = vpop.eup %1990  ;;  %v582_v29 = vrot.slane %v2140_v14, 2 }
  0xb1   : >> { %v477_v47 = vadd.f32 1.0, %v1991_v45 }
  0xb3   : >> { %v489_v21 = vand.u32 2147483648, %v477_v47  ;;  %vm483_vm8 = vweird.f32 %v477_v47  ;;  %v487_v22 = vand.u32 2147483647, %v477_v47 }
  0xb5   : >> { %v490_v26 = vor.u32 1.1754944e-38, %v489_v21  ;;  %vm488_vm10 = vcmp.eq.f32.partialorder %v487_v22, 8.507059e+37 }
 0x11a   : >> { %v519_v43 = vpop.permute.xlu0 %518  ;;  %v567_v59 = vpop.permute.xlu1 %566 }
 0x11b   : >> { %v521_v44 = vadd.f32 %v519_v43, %v405_v42 }
 0x11d   : >> { %v1901_v46 = vmul.f32 -1.442695, %v521_v44 }
 0x11f   : >> { %1992 = vpow2.f32 %v1901_v46 }
 0x120   : >> { %1994 = vrcp.f32 %v477_v47 }
 0x122   : >> { %v495_v25 = vpop.permute.xlu1 %494  ;;  %v544_v44 = vpop.permute.xlu0 %543 }
 0x123   : >> { %v546_v45 = vadd.f32 %v544_v44, %v405_v42  ;;  %v589_v44 = vrot.slane %v2230_v1, 6 }
 0x125   : >> { %v1993_v48 = vpop.eup %1992  ;;  %v1902_v14 = vmul.f32 -1.442695, %v546_v45  ;;  %v591_v45 = vadd.f32 %v2368_v35, %v589_v44 }
 0x126   : >> { %v525_v49 = vadd.f32 1.0, %v1993_v48  ;;  %v1995_v50 = vpop.eup %1994 }
 0x127   : >> { %v479_v51 = vmul.f32 %v1995_v50, %v477_v47  ;;  %vm484_vm7 = vweird.f32 %v1995_v50 }
 0x128   : >> { %1996 = vrcp.f32 %v525_v49  ;;  %v537_v56 = vand.u32 2147483648, %v525_v49  ;;  %v535_v58 = vand.u32 2147483647, %v525_v49  ;;  %vm531_vm4 = vweird.f32 %v525_v49  ;;  %vm485_vm9 = vmor %vm483_vm8, %vm484_vm7 }
 0x129   : >> { %v480_v54 = vsub.f32 1.0, %v479_v51 }
 0x12a   : >> { %v538_v62 = vor.u32 1.1754944e-38, %v537_v56  ;;  %vm536_vm6 = vcmp.eq.f32.partialorder %v535_v58, 8.507059e+37 }
 0x12b   : >> { %v481_v60 = vmul.f32 %v1995_v50, %v480_v54 }
 0x12d   : >> { %v482_v19 = vadd.f32 %v1995_v50, %v481_v60 }
 0x12e   : >> { %v1997_v52 = vpop.eup %1996 }
 0x12f   : >> { %v527_v53 = vmul.f32 %v1997_v52, %v525_v49  ;;  %vm532_vm3 = vweird.f32 %v1997_v52  ;;  %v486_v24 = vsel %vm485_vm9, %v1995_v50, %v482_v19 }
 0x130   : >> { %vm533_vm5 = vmor %vm531_vm4, %vm532_vm3  ;;  %v491_v27 = vsel %vm488_vm10, %v490_v26, %v486_v24 }
 0x131   : >> { %v528_v55 = vsub.f32 1.0, %v527_v53  ;;  %v497_v28 = vmul.f32 %v495_v25, %v491_v27 }
 0x133   : >> { %v529_v57 = vmul.f32 %v1997_v52, %v528_v55 }
 0x135   : >> { %v530_v61 = vadd.f32 %v1997_v52, %v529_v57 }
 0x137   : >> { %v534_v63 = vsel %vm533_vm5, %v1997_v52, %v530_v61  ;;  %v504_v61 = vsub.f32 1.0, %v491_v27 }
 0x138   : >> { %v539_v0 = vsel %vm536_vm6, %v538_v62, %v534_v63 }
 0x139   : >> { %v569_v20 = vmul.f32 %v567_v59, %v539_v0 }
 0x13b   : >> { %571 = vrot.lane.b32.xlu2 %v569_v20, %s2153_s14 }
 0x143   : >> { %499 = vrot.lane.b32.xlu2 %v497_v28, %s2153_s14 }
 0x14b   : >> { %583 = vrot.lane.b32.xlu2 %v582_v29, %s2152_s12 }
 0x195   : >> { %v572_v31 = vpop.permute.xlu2 %571 }
 0x196   : >> { %v574_v32 = vadd.f32 %v572_v31, %v405_v42 }
 0x198   : >> { %1998 = vtanh.f32 %v574_v32 }
 0x19d   : >> { %v500_v33 = vpop.permute.xlu2 %499 }
 0x19e   : >> { %v1999_v37 = vpop.eup %1998  ;;  %v502_v39 = vadd.f32 %v500_v33, %v401_v36 }
 0x19f   : >> { %578 = vrot.lane.b32.xlu1 %v1999_v37, %s2151_s11 }
 0x1a0   : >> { %2000 = vtanh.f32 %v502_v39 }
 0x1a1   : >> { %2002 = vpow2.f32 %v1902_v14 }
 0x1a5   : >> { %v584_v57 = vpop.permute.xlu2 %583 }
 0x1a6   : >> { %v2001_v43 = vpop.eup %2000 }
 0x1a7   : >> { %511 = vrot.lane.b32.xlu1 %v2144_v13, %s2152_s12  ;;  %506 = vrot.lane.b32.xlu0 %v2001_v43, %s2151_s11  ;;  %v2003_v46 = vpop.eup %2002 }
 0x1a8   : >> { %v550_v47 = vadd.f32 1.0, %v2003_v46 }
 0x1aa   : >> { %2004 = vrcp.f32 %v550_v47  ;;  %v562_v52 = vand.u32 2147483648, %v550_v47  ;;  %vm556_vm12 = vweird.f32 %v550_v47  ;;  %v560_v53 = vand.u32 2147483647, %v550_v47 }
 0x1ac   : >> { %v563_v54 = vor.u32 1.1754944e-38, %v562_v52  ;;  %vm561_vm14 = vcmp.eq.f32.partialorder %v560_v53, 8.507059e+37  ;;  %v592_v53 = vrot.slane %v2235_v2, 4 }
 0x1b0   : >> { %v2005_v48 = vpop.eup %2004 }
 0x1b1   : >> { %v552_v49 = vmul.f32 %v2005_v48, %v550_v47  ;;  %vm557_vm11 = vweird.f32 %v2005_v48 }
 0x1b2   : >> { %vm558_vm13 = vmor %vm556_vm12, %vm557_vm11 }
 0x1b3   : >> { %v553_v50 = vsub.f32 1.0, %v552_v49 }
 0x1b5   : >> { %v554_v36 = vmul.f32 %v2005_v48, %v553_v50 }
 0x1b7   : >> { %v555_v51 = vadd.f32 %v2005_v48, %v554_v36 }
 0x1b9   : >> { %v559_v13 = vsel %vm558_vm13, %v2005_v48, %v555_v51 }
 0x1ba   : >> { %v564_v55 = vsel %vm561_vm14, %v563_v54, %v559_v13 }
 0x1bb   : >> { %v576_v56 = vsub.f32 1.0, %v564_v55  ;;  %v586_v59 = vmul.f32 %v584_v57, %v564_v55 }
 0x211   : >> { %v579_v42 = vpop.permute.xlu1 %578 }
 0x212   : >> { %v581_v58 = vmul.f32 %v579_v42, %v576_v56  ;;  %v594_v42 = vadd.f32 %v2379_v40, %v592_v53 }
 0x214   : >> { %v2393_v60 = vadd.f32 %v586_v59, %v581_v58 }
 0x216   : >> { %v596_v20 = vrot.slane %v2393_v60, 4 }
 0x219   : >> { %v512_v62 = vpop.permute.xlu1 %511  ;;  %v507_v63 = vpop.permute.xlu0 %506 }
 0x21a   : >> { %v514_v0 = vmul.f32 %v512_v62, %v491_v27  ;;  %v509_v19 = vmul.f32 %v507_v63, %v504_v61 }
 0x21c   : >> { %v2396_v21 = vadd.f32 %v514_v0, %v509_v19 }
 0x21e   : >> { %v598_v22 = vsel %vm409_vm1, %v2396_v21, %v596_v20 }
 0x21f   : >> { %v599_v24 = vpack.c.bf16 %v598_v22, %v598_v22 }
 0x221   : >> { %601 = vrot.lane.b32.xlu2 %v599_v24, %s2151_s11 }
 0x27b   : >> { %v602_v25 = vpop.permute.xlu2 %601 }
 0x27c   : >> { %1903 = vmatmul.msk.bf16.vlgmr.msra.gmra.mxu2 %vm432_vm2, %v602_v25  ;;  %1904 = vmatmul.msk.bf16.vlgmr.msra.gmra.mxu3 %vm432_vm2, %v602_v25 }
 0x27d   : >> { %1238 = vmatpush.bf16.msra.mxu2 %v2304_v15  ;;  %1251 = vmatpush.bf16.msra.mxu3 %v2308_v16 }
 0x281   : >> { %1239 = vmatpush.bf16.msra.mxu2 %v2312_v17  ;;  %1252 = vmatpush.bf16.msra.mxu3 %v2316_v18 }
 0x2ff   : >> { %v615_v26 = vpop.f32.mrf.mxu2  ;;  %v628_v27 = vpop.f32.mrf.mxu3 }
 0x300   : >> { %v632_v28 = vadd.f32 %v615_v26, %v2352_v30  ;;  %v633_v29 = vadd.f32 %v615_v26, %v2345_v23  ;;  %v634_v31 = vadd.f32 %v628_v27, %v2345_v23 }
 0x302   : >> { %v636_v32 = vrot.slane %v632_v28, 6  ;;  %v680_v33 = vrot.slane %v633_v29, 6  ;;  %v705_v37 = vrot.slane %v634_v31, 6 }
 0x304   : >> { %729 = vrot.lane.b32.xlu2 %v705_v37, %s2151_s11  ;;  %681 = vrot.lane.b32.xlu0 %v680_v33, %s2152_s12  ;;  %v638_v14 = vadd.f32 %v636_v32, %v591_v45 }
 0x305   : >> { %658 = vrot.lane.b32.xlu1 %v636_v32, %s2153_s14 }
 0x306   : >> { %v1905_v46 = vmul.f32 -1.442695, %v638_v14 }
 0x307   : >> { %v617_v39 = vpop.f32.mrf.mxu2  ;;  %v630_v43 = vpop.f32.mrf.mxu3 }
 0x308   : >> { %2006 = vpow2.f32 %v1905_v46 }
 0x30c   : >> { %706 = vrot.lane.b32.xlu2 %v705_v37, %s2152_s12 }
 0x30e   : >> { %v2007_v47 = vpop.eup %2006 }
 0x30f   : >> { %v642_v48 = vadd.f32 1.0, %v2007_v47 }
 0x311   : >> { %2008 = vrcp.f32 %v642_v48  ;;  %v654_v13 = vand.u32 2147483648, %v642_v48  ;;  %vm648_vm0 = vweird.f32 %v642_v48  ;;  %v652_v54 = vand.u32 2147483647, %v642_v48 }
 0x313   : >> { %v655_v56 = vor.u32 1.1754944e-38, %v654_v13  ;;  %vm653_vm4 = vcmp.eq.f32.partialorder %v652_v54, 8.507059e+37 }
 0x317   : >> { %v2009_v49 = vpop.eup %2008 }
 0x318   : >> { %v644_v50 = vmul.f32 %v2009_v49, %v642_v48  ;;  %vm649_vm15 = vweird.f32 %v2009_v49 }
 0x319   : >> { %vm650_vm3 = vmor %vm648_vm0, %vm649_vm15 }
 0x31a   : >> { %v645_v36 = vsub.f32 1.0, %v644_v50 }
 0x31c   : >> { %v646_v51 = vmul.f32 %v2009_v49, %v645_v36 }
 0x31e   : >> { %v647_v52 = vadd.f32 %v2009_v49, %v646_v51 }
 0x320   : >> { %v651_v55 = vsel %vm650_vm3, %v2009_v49, %v647_v52 }
 0x321   : >> { %v656_v61 = vsel %vm653_vm4, %v655_v56, %v651_v55 }
 0x35e   : >> { %v730_v32 = vpop.permute.xlu2 %729 }
 0x366   : >> { %v707_v49 = vpop.permute.xlu2 %706 }
 0x367   : >> { %v709_v50 = vadd.f32 %v707_v49, %v594_v42 }
 0x369   : >> { %v1907_v36 = vmul.f32 -1.442695, %v709_v50 }
 0x376   : >> { %v682_v57 = vpop.permute.xlu0 %681 }
 0x377   : >> { %v684_v58 = vadd.f32 %v682_v57, %v594_v42  ;;  %v659_v59 = vpop.permute.xlu1 %658 }
 0x378   : >> { %v661_v62 = vmul.f32 %v659_v59, %v656_v61 }
 0x379   : >> { %v1906_v63 = vmul.f32 -1.442695, %v684_v58 }
 0x37a   : >> { %663 = vrot.lane.b32.xlu0 %v661_v62, %s2153_s14 }
 0x37b   : >> { %2010 = vpow2.f32 %v1906_v63 }
 0x381   : >> { %v2011_v0 = vpop.eup %2010 }
 0x382   : >> { %v688_v19 = vadd.f32 1.0, %v2011_v0  ;;  %v668_v0 = vsub.f32 1.0, %v656_v61 }
 0x384   : >> { %2012 = vrcp.f32 %v688_v19  ;;  %v700_v25 = vand.u32 2147483648, %v688_v19  ;;  %v698_v27 = vand.u32 2147483647, %v688_v19  ;;  %vm694_vm6 = vweird.f32 %v688_v19 }
 0x386   : >> { %v701_v29 = vor.u32 1.1754944e-38, %v700_v25  ;;  %vm699_vm8 = vcmp.eq.f32.partialorder %v698_v27, 8.507059e+37  ;;  %v745_v25 = vrot.slane %v2393_v60, 2 }
 0x38a   : >> { %v2013_v20 = vpop.eup %2012 }
 0x38b   : >> { %v690_v22 = vmul.f32 %v2013_v20, %v688_v19  ;;  %vm695_vm5 = vweird.f32 %v2013_v20  ;;  %v675_v19 = vrot.slane %v2396_v21, 6 }
 0x38c   : >> { %vm696_vm7 = vmor %vm694_vm6, %vm695_vm5 }
 0x38d   : >> { %v691_v24 = vsub.f32 1.0, %v690_v22  ;;  %v677_v22 = vmul.f32 %v675_v19, %v656_v61 }
 0x38f   : >> { %v692_v26 = vmul.f32 %v2013_v20, %v691_v24 }
 0x391   : >> { %v693_v28 = vadd.f32 %v2013_v20, %v692_v26 }
 0x393   : >> { %v697_v31 = vsel %vm696_vm7, %v2013_v20, %v693_v28  ;;  %vm1686_vm7 = vcmask 1043456  }
 0x394   : >> { %v702_v33 = vsel %vm699_vm8, %v701_v29, %v697_v31 }
 0x395   : >> { %v732_v37 = vmul.f32 %v730_v32, %v702_v33 }
 0x397   : >> { %734 = vrot.lane.b32.xlu1 %v732_v37, %s2153_s14 }
 0x3ec   : >> { %v664_v39 = vpop.permute.xlu0 %663 }
 0x3ed   : >> { %v666_v43 = vadd.f32 %v664_v39, %v591_v45 }
 0x3ef   : >> { %2014 = vtanh.f32 %v666_v43 }
 0x3f5   : >> { %v2015_v14 = vpop.eup %2014 }
 0x3f6   : >> { %670 = vrot.lane.b32.xlu0 %v2015_v14, %s2151_s11 }
 0x409   : >> { %v735_v46 = vpop.permute.xlu1 %734 }
 0x40a   : >> { %v737_v47 = vadd.f32 %v735_v46, %v594_v42 }
 0x40c   : >> { %2016 = vtanh.f32 %v737_v47 }
 0x40d   : >> { %2018 = vpow2.f32 %v1907_v36 }
 0x412   : >> { %v2017_v48 = vpop.eup %2016 }
 0x413   : >> { %741 = vrot.lane.b32.xlu1 %v2017_v48, %s2151_s11  ;;  %v2019_v51 = vpop.eup %2018 }
 0x414   : >> { %v713_v52 = vadd.f32 1.0, %v2019_v51  ;;  %v749_v51 = vrot.slane %v2230_v1, 4 }
 0x416   : >> { %2020 = vrcp.f32 %v713_v52  ;;  %v725_v57 = vand.u32 2147483648, %v713_v52  ;;  %vm719_vm10 = vweird.f32 %v713_v52  ;;  %v723_v58 = vand.u32 2147483647, %v713_v52 }
 0x418   : >> { %v726_v63 = vor.u32 1.1754944e-38, %v725_v57  ;;  %vm724_vm12 = vcmp.eq.f32.partialorder %v723_v58, 8.507059e+37 }
 0x41c   : >> { %v2021_v13 = vpop.eup %2020 }
 0x41d   : >> { %v715_v54 = vmul.f32 %v2021_v13, %v713_v52  ;;  %vm720_vm9 = vweird.f32 %v2021_v13  ;;  %v751_v52 = vadd.f32 %v2368_v35, %v749_v51 }
 0x41e   : >> { %vm721_vm11 = vmor %vm719_vm10, %vm720_vm9 }
 0x41f   : >> { %v716_v45 = vsub.f32 1.0, %v715_v54 }
 0x421   : >> { %v717_v55 = vmul.f32 %v2021_v13, %v716_v45 }
 0x423   : >> { %v718_v56 = vadd.f32 %v2021_v13, %v717_v55 }
 0x425   : >> { %v722_v59 = vsel %vm721_vm11, %v2021_v13, %v718_v56 }
 0x426   : >> { %v727_v42 = vsel %vm724_vm12, %v726_v63, %v722_v59 }
 0x427   : >> { %v739_v24 = vsub.f32 1.0, %v727_v42  ;;  %v747_v28 = vmul.f32 %v745_v25, %v727_v42 }
 0x468   : >> { %v671_v62 = vpop.permute.xlu0 %670 }
 0x469   : >> { %v673_v20 = vmul.f32 %v671_v62, %v668_v0  ;;  %v752_v62 = vrot.slane %v2235_v2, 6 }
 0x46b   : >> { %v2428_v27 = vadd.f32 %v677_v22, %v673_v20  ;;  %v754_v19 = vadd.f32 %v2379_v40, %v752_v62 }
 0x46d   : >> { %v756_v32 = vrot.slane %v2428_v27, 2 }
 0x485   : >> { %v742_v26 = vpop.permute.xlu1 %741 }
 0x486   : >> { %v744_v29 = vmul.f32 %v742_v26, %v739_v24 }
 0x488   : >> { %v2430_v31 = vadd.f32 %v747_v28, %v744_v29 }
 0x48a   : >> { %v759_v33 = vrot.slane %v2430_v31, 2 }
 0x48c   : >> { %v761_v37 = vsel %vm409_vm1, %v756_v32, %v759_v33 }
 0x48d   : >> { %v762_v39 = vpack.c.bf16 %v761_v37, %v761_v37 }
 0x48f   : >> { %764 = vrot.lane.b32.xlu2 %v762_v39, %s2151_s11 }
 0x4e9   : >> { %v765_v61 = vpop.permute.xlu2 %764 }
 0x4ea   : >> { %1908 = vmatmul.msk.bf16.vlgmr.msrb.gmra.mxu0 %vm432_vm2, %v765_v61  ;;  %1909 = vmatmul.msk.bf16.vlgmr.msrb.gmra.mxu1 %vm432_vm2, %v765_v61 }
 0x4eb   : >> { %1397 = vmatpush.bf16.msrb.mxu0 %v2304_v15  ;;  %1410 = vmatpush.bf16.msrb.mxu1 %v2308_v16 }
 0x4ef   : >> { %1398 = vmatpush.bf16.msrb.mxu0 %v2312_v17  ;;  %1411 = vmatpush.bf16.msrb.mxu1 %v2316_v18 }
 0x567   : >> { %v778_v43 = vpop.f32.mrf.mxu0  ;;  %v791_v14 = vpop.f32.mrf.mxu1 }
 0x568   : >> { %v795_v46 = vadd.f32 %v778_v43, %v2352_v30  ;;  %v796_v47 = vadd.f32 %v778_v43, %v2345_v23  ;;  %v797_v48 = vadd.f32 %v791_v14, %v2345_v23 }
 0x56a   : >> { %v799_v49 = vrot.slane %v795_v46, 4  ;;  %889 = vrot.lane.b32.xlu2 %v797_v48, %s2151_s11  ;;  %842 = vrot.lane.b32.xlu0 %v796_v47, %s2152_s12 }
 0x56c   : >> { %821 = vrot.lane.b32.xlu1 %v799_v49, %s2153_s14  ;;  %v801_v13 = vadd.f32 %v799_v49, %v751_v52 }
 0x56e   : >> { %v1910_v54 = vmul.f32 -1.442695, %v801_v13 }
 0x56f   : >> { %v780_v50 = vpop.f32.mrf.mxu0  ;;  %v793_v36 = vpop.f32.mrf.mxu1 }
 0x570   : >> { %2022 = vpow2.f32 %v1910_v54 }
 0x572   : >> { %866 = vrot.lane.b32.xlu2 %v797_v48, %s2152_s12 }
 0x576   : >> { %v2023_v45 = vpop.eup %2022 }
 0x577   : >> { %v805_v55 = vadd.f32 1.0, %v2023_v45 }
 0x579   : >> { %2024 = vrcp.f32 %v805_v55  ;;  %v817_v0 = vand.u32 2147483648, %v805_v55  ;;  %vm811_vm14 = vweird.f32 %v805_v55  ;;  %v815_v42 = vand.u32 2147483647, %v805_v55 }
 0x57b   : >> { %v818_v24 = vor.u32 1.1754944e-38, %v817_v0  ;;  %vm816_vm0 = vcmp.eq.f32.partialorder %v815_v42, 8.507059e+37 }
 0x57f   : >> { %v2025_v56 = vpop.eup %2024 }
 0x580   : >> { %v807_v57 = vmul.f32 %v2025_v56, %v805_v55  ;;  %vm812_vm13 = vweird.f32 %v2025_v56 }
 0x581   : >> { %vm813_vm15 = vmor %vm811_vm14, %vm812_vm13 }
 0x582   : >> { %v808_v58 = vsub.f32 1.0, %v807_v57 }
 0x584   : >> { %v809_v59 = vmul.f32 %v2025_v56, %v808_v58 }
 0x586   : >> { %v810_v63 = vadd.f32 %v2025_v56, %v809_v59 }
 0x588   : >> { %v814_v20 = vsel %vm813_vm15, %v2025_v56, %v810_v63 }
 0x589   : >> { %v819_v28 = vsel %vm816_vm0, %v818_v24, %v814_v20 }
 0x5c4   : >> { %v890_v13 = vpop.permute.xlu2 %889 }
 0x5cc   : >> { %v867_v0 = vpop.permute.xlu2 %866 }
 0x5cd   : >> { %v869_v42 = vadd.f32 %v867_v0, %v754_v19 }
 0x5cf   : >> { %v1912_v20 = vmul.f32 -1.442695, %v869_v42 }
 0x5dc   : >> { %v843_v22 = vpop.permute.xlu0 %842 }
 0x5dd   : >> { %v845_v25 = vadd.f32 %v843_v22, %v754_v19 }
 0x5de   : >> { %v822_v26 = vpop.permute.xlu1 %821 }
 0x5df   : >> { %v1911_v29 = vmul.f32 -1.442695, %v845_v25  ;;  %v824_v32 = vmul.f32 %v822_v26, %v819_v28  ;;  %v831_v25 = vsub.f32 1.0, %v819_v28 }
 0x5e1   : >> { %2026 = vpow2.f32 %v1911_v29  ;;  %826 = vrot.lane.b32.xlu0 %v824_v32, %s2153_s14 }
 0x5e7   : >> { %v2027_v37 = vpop.eup %2026 }
 0x5e8   : >> { %v849_v39 = vadd.f32 1.0, %v2027_v37 }
 0x5ea   : >> { %2028 = vrcp.f32 %v849_v39  ;;  %v861_v46 = vand.u32 2147483648, %v849_v39  ;;  %v859_v48 = vand.u32 2147483647, %v849_v39  ;;  %vm855_vm4 = vweird.f32 %v849_v39 }
 0x5ec   : >> { %v862_v50 = vor.u32 1.1754944e-38, %v861_v46  ;;  %vm860_vm6 = vcmp.eq.f32.partialorder %v859_v48, 8.507059e+37 }
 0x5f0   : >> { %v2029_v61 = vpop.eup %2028 }
 0x5f1   : >> { %v851_v43 = vmul.f32 %v2029_v61, %v849_v39  ;;  %vm856_vm3 = vweird.f32 %v2029_v61 }
 0x5f2   : >> { %vm857_vm5 = vmor %vm855_vm4, %vm856_vm3 }
 0x5f3   : >> { %v852_v14 = vsub.f32 1.0, %v851_v43 }
 0x5f5   : >> { %v853_v47 = vmul.f32 %v2029_v61, %v852_v14 }
 0x5f7   : >> { %v854_v49 = vadd.f32 %v2029_v61, %v853_v47 }
 0x5f9   : >> { %v858_v36 = vsel %vm857_vm5, %v2029_v61, %v854_v49  ;;  %v1685_v61 = vsel %vm409_vm1, %v2396_v21, %v2428_v27 }
 0x5fa   : >> { %v863_v54 = vsel %vm860_vm6, %v862_v50, %v858_v36  ;;  %vm1688_vm6 = vcmask 1045504  }
 0x5fb   : >> { %v892_v45 = vmul.f32 %v890_v13, %v863_v54 }
 0x5fd   : >> { %894 = vrot.lane.b32.xlu1 %v892_v45, %s2153_s14 }
 0x653   : >> { %v827_v55 = vpop.permute.xlu0 %826 }
 0x654   : >> { %v829_v56 = vadd.f32 %v827_v55, %v751_v52  ;;  %v837_v52 = vrot.slane %v2428_v27, 6 }
 0x656   : >> { %2030 = vtanh.f32 %v829_v56  ;;  %v839_v29 = vmul.f32 %v837_v52, %v819_v28 }
 0x65c   : >> { %v2031_v57 = vpop.eup %2030 }
 0x65d   : >> { %833 = vrot.lane.b32.xlu0 %v2031_v57, %s2151_s11 }
 0x66f   : >> { %v895_v58 = vpop.permute.xlu1 %894 }
 0x670   : >> { %v897_v59 = vadd.f32 %v895_v58, %v754_v19 }
 0x672   : >> { %2032 = vtanh.f32 %v897_v59 }
 0x673   : >> { %2034 = vpow2.f32 %v1912_v20 }
 0x678   : >> { %v2033_v63 = vpop.eup %2032 }
 0x679   : >> { %901 = vrot.lane.b32.xlu1 %v2033_v63, %s2151_s11  ;;  %v2035_v22 = vpop.eup %2034 }
 0x67a   : >> { %v873_v24 = vadd.f32 1.0, %v2035_v22 }
 0x67c   : >> { %2036 = vrcp.f32 %v873_v24  ;;  %v885_v48 = vand.u32 2147483648, %v873_v24  ;;  %vm879_vm9 = vweird.f32 %v873_v24  ;;  %v883_v28 = vand.u32 2147483647, %v873_v24 }
 0x67e   : >> { %v886_v50 = vor.u32 1.1754944e-38, %v885_v48  ;;  %vm884_vm11 = vcmp.eq.f32.partialorder %v883_v28, 8.507059e+37 }
 0x682   : >> { %v2037_v37 = vpop.eup %2036 }
 0x683   : >> { %v875_v19 = vmul.f32 %v2037_v37, %v873_v24  ;;  %vm880_vm8 = vweird.f32 %v2037_v37 }
 0x684   : >> { %vm881_vm10 = vmor %vm879_vm9, %vm880_vm8 }
 0x685   : >> { %v876_v14 = vsub.f32 1.0, %v875_v19 }
 0x687   : >> { %v877_v46 = vmul.f32 %v2037_v37, %v876_v14 }
 0x689   : >> { %v878_v47 = vadd.f32 %v2037_v37, %v877_v46 }
 0x68b   : >> { %v882_v49 = vsel %vm881_vm10, %v2037_v37, %v878_v47 }
 0x68c   : >> { %v887_v36 = vsel %vm884_vm11, %v886_v50, %v882_v49 }
 0x68d   : >> { %v899_v13 = vsub.f32 1.0, %v887_v36  ;;  %v905_v21 = vmul.f32 %v887_v36, %v759_v33 }
 0x6cf   : >> { %v834_v26 = vpop.permute.xlu0 %833 }
 0x6d0   : >> { %v836_v32 = vmul.f32 %v834_v26, %v831_v25 }
 0x6d2   : >> { %v2464_v39 = vadd.f32 %v839_v29, %v836_v32 }
 0x6d4   : >> { %v2471_v43 = vsel %vm1686_vm7, %v1685_v61, %v2464_v39  ;;  %v912_v45 = vrot.slane %v2464_v39, 4 }
 0x6eb   : >> { %v902_v54 = vpop.permute.xlu1 %901 }
 0x6ec   : >> { %v904_v27 = vmul.f32 %v902_v54, %v899_v13 }
 0x6ee   : >> { %v2476_v55 = vadd.f32 %v905_v21, %v904_v27 }
 0x6f0   : >> { %v914_v56 = vsel %vm409_vm1, %v912_v45, %v2476_v55 }
 0x6f1   : >> { %v915_v57 = vpack.c.bf16 %v914_v56, %v914_v56 }
 0x6f3   : >> { %917 = vrot.lane.b32.xlu2 %v915_v57, %s2151_s11 }
 0x74d   : >> { %v918_v58 = vpop.permute.xlu2 %917 }
 0x74e   : >> { %1913 = vmatmul.msk.bf16.vlgmr.msrb.gmra.mxu2 %vm432_vm2, %v918_v58  ;;  %1914 = vmatmul.msk.bf16.vlgmr.msrb.gmra.mxu3 %vm432_vm2, %v918_v58 }
 0x74f   : >> { %1548 = vmatpush.bf16.msrb.mxu2 %v2304_v15  ;;  %1561 = vmatpush.bf16.msrb.mxu3 %v2308_v16 }
 0x753   : >> { %1549 = vmatpush.bf16.msrb.mxu2 %v2312_v17  ;;  %1562 = vmatpush.bf16.msrb.mxu3 %v2316_v18  ;;  %v907_v17 = vrot.slane %v2230_v1, 2 }
 0x755   : >> { %v909_v18 = vadd.f32 %v2368_v35, %v907_v17  ;;  %v910_v35 = vadd.f32 %v2379_v40, %v2235_v2 }
 0x7d1   : >> { %v931_v33 = vpop.f32.mrf.mxu2  ;;  %v944_v59 = vpop.f32.mrf.mxu3 }
 0x7d2   : >> { %v948_v63 = vadd.f32 %v931_v33, %v2352_v30  ;;  %v949_v0 = vadd.f32 %v931_v33, %v2345_v23  ;;  %v950_v42 = vadd.f32 %v944_v59, %v2345_v23 }
 0x7d4   : >> { %v952_v20 = vrot.slane %v948_v63, 2  ;;  %v995_v22 = vrot.slane %v949_v0, 2  ;;  %v1020_v24 = vrot.slane %v950_v42, 2 }
 0x7d6   : >> { %1044 = vrot.lane.b32.xlu2 %v1020_v24, %s2151_s11  ;;  %996 = vrot.lane.b32.xlu0 %v995_v22, %s2152_s12  ;;  %v954_v25 = vadd.f32 %v952_v20, %v909_v18 }
 0x7d7   : >> { %974 = vrot.lane.b32.xlu1 %v952_v20, %s2153_s14 }
 0x7d8   : >> { %v1915_v52 = vmul.f32 -1.442695, %v954_v25 }
 0x7d9   : >> { %v933_v15 = vpop.f32.mrf.mxu2  ;;  %v946_v16 = vpop.f32.mrf.mxu3 }
 0x7da   : >> { %2038 = vpow2.f32 %v1915_v52 }
 0x7de   : >> { %1021 = vrot.lane.b32.xlu2 %v1020_v24, %s2152_s12 }
 0x7e0   : >> { %v2039_v26 = vpop.eup %2038 }
 0x7e1   : >> { %v958_v29 = vadd.f32 1.0, %v2039_v26 }
 0x7e3   : >> { %2040 = vrcp.f32 %v958_v29  ;;  %v970_v46 = vand.u32 2147483648, %v958_v29  ;;  %vm964_vm13 = vweird.f32 %v958_v29  ;;  %v968_v47 = vand.u32 2147483647, %v958_v29 }
 0x7e5   : >> { %v971_v28 = vor.u32 1.1754944e-38, %v970_v46  ;;  %vm969_vm15 = vcmp.eq.f32.partialorder %v968_v47, 8.507059e+37 }
 0x7e9   : >> { %v2041_v32 = vpop.eup %2040 }
 0x7ea   : >> { %v960_v37 = vmul.f32 %v2041_v32, %v958_v29  ;;  %vm965_vm12 = vweird.f32 %v2041_v32 }
 0x7eb   : >> { %vm966_vm14 = vmor %vm964_vm13, %vm965_vm12 }
 0x7ec   : >> { %v961_v61 = vsub.f32 1.0, %v960_v37 }
 0x7ee   : >> { %v962_v19 = vmul.f32 %v2041_v32, %v961_v61 }
 0x7f0   : >> { %v963_v14 = vadd.f32 %v2041_v32, %v962_v19 }
 0x7f2   : >> { %v967_v48 = vsel %vm966_vm14, %v2041_v32, %v963_v14 }
 0x7f3   : >> { %v972_v13 = vsel %vm969_vm15, %v971_v28, %v967_v48 }
 0x7f4   : >> { %v984_v46 = vsub.f32 1.0, %v972_v13 }
 0x830   : >> { %v1045_v20 = vpop.permute.xlu2 %1044 }
 0x838   : >> { %v1022_v32 = vpop.permute.xlu2 %1021 }
 0x839   : >> { %v1024_v37 = vadd.f32 %v1022_v32, %v910_v35 }
 0x83b   : >> { %v1917_v61 = vmul.f32 -1.442695, %v1024_v37 }
 0x848   : >> { %v997_v49 = vpop.permute.xlu0 %996 }
 0x849   : >> { %v999_v50 = vadd.f32 %v997_v49, %v910_v35  ;;  %v975_v36 = vpop.permute.xlu1 %974 }
 0x84a   : >> { %v977_v54 = vmul.f32 %v975_v36, %v972_v13 }
 0x84b   : >> { %v1916_v21 = vmul.f32 -1.442695, %v999_v50 }
 0x84c   : >> { %979 = vrot.lane.b32.xlu0 %v977_v54, %s2153_s14 }
 0x84d   : >> { %2042 = vpow2.f32 %v1916_v21 }
 0x853   : >> { %v2043_v27 = vpop.eup %2042 }
 0x854   : >> { %v1003_v45 = vadd.f32 1.0, %v2043_v27 }
 0x856   : >> { %2044 = vrcp.f32 %v1003_v45  ;;  %v1015_v33 = vand.u32 2147483648, %v1003_v45  ;;  %v1013_v40 = vand.u32 2147483647, %v1003_v45  ;;  %vm1009_vm3 = vweird.f32 %v1003_v45 }
 0x858   : >> { %v1016_v0 = vor.u32 1.1754944e-38, %v1015_v33  ;;  %vm1014_vm5 = vcmp.eq.f32.partialorder %v1013_v40, 8.507059e+37  ;;  %v1061_v33 = vrot.slane %v2476_v55, 2 }
 0x85c   : >> { %v2045_v56 = vpop.eup %2044 }
 0x85d   : >> { %v1005_v57 = vmul.f32 %v2045_v56, %v1003_v45  ;;  %vm1010_vm0 = vweird.f32 %v2045_v56 }
 0x85e   : >> { %vm1011_vm4 = vmor %vm1009_vm3, %vm1010_vm0 }
 0x85f   : >> { %v1006_v58 = vsub.f32 1.0, %v1005_v57 }
 0x861   : >> { %v1007_v59 = vmul.f32 %v2045_v56, %v1006_v58 }
 0x863   : >> { %v1008_v63 = vadd.f32 %v2045_v56, %v1007_v59 }
 0x865   : >> { %v1012_v42 = vsel %vm1011_vm4, %v2045_v56, %v1008_v63 }
 0x866   : >> { %v1017_v22 = vsel %vm1014_vm5, %v1016_v0, %v1012_v42 }
 0x867   : >> { %v1047_v24 = vmul.f32 %v1045_v20, %v1017_v22 }
 0x869   : >> { %1049 = vrot.lane.b32.xlu1 %v1047_v24, %s2153_s14 }
 0x8be   : >> { %v980_v15 = vpop.permute.xlu0 %979 }
 0x8bf   : >> { %v982_v16 = vadd.f32 %v980_v15, %v909_v18  ;;  %v990_v18 = vrot.slane %v2464_v39, 6 }
 0x8c1   : >> { %2046 = vtanh.f32 %v982_v16  ;;  %v992_v48 = vmul.f32 %v990_v18, %v972_v13 }
 0x8c7   : >> { %v2047_v25 = vpop.eup %2046 }
 0x8c8   : >> { %986 = vrot.lane.b32.xlu0 %v2047_v25, %s2151_s11 }
 0x8db   : >> { %v1050_v52 = vpop.permute.xlu1 %1049 }
 0x8dc   : >> { %v1052_v26 = vadd.f32 %v1050_v52, %v910_v35 }
 0x8de   : >> { %2048 = vtanh.f32 %v1052_v26 }
 0x8df   : >> { %2050 = vpow2.f32 %v1917_v61 }
 0x8e4   : >> { %v2049_v29 = vpop.eup %2048 }
 0x8e5   : >> { %1056 = vrot.lane.b32.xlu1 %v2049_v29, %s2151_s11  ;;  %v2051_v19 = vpop.eup %2050 }
 0x8e6   : >> { %v1028_v14 = vadd.f32 1.0, %v2051_v19  ;;  %v2531_v19 = vunpack.c.h.bf16 %v2365_v34 }
 0x8e8   : >> { %2052 = vrcp.f32 %v1028_v14  ;;  %v1040_v45 = vand.u32 2147483648, %v1028_v14  ;;  %vm1034_vm9 = vweird.f32 %v1028_v14  ;;  %v1038_v39 = vand.u32 2147483647, %v1028_v14 }
 0x8ea   : >> { %v1041_v56 = vor.u32 1.1754944e-38, %v1040_v45  ;;  %vm1039_vm11 = vcmp.eq.f32.partialorder %v1038_v39, 8.507059e+37 }
 0x8ee   : >> { %v2053_v49 = vpop.eup %2052 }
 0x8ef   : >> { %v1030_v35 = vmul.f32 %v2053_v49, %v1028_v14  ;;  %vm1035_vm8 = vweird.f32 %v2053_v49  ;;  %v1065_v14 = vadd.f32 %v2531_v19, %v2230_v1 }
 0x8f0   : >> { %vm1036_vm10 = vmor %vm1034_vm9, %vm1035_vm8 }
 0x8f1   : >> { %v1031_v54 = vsub.f32 1.0, %v1030_v35 }
 0x8f3   : >> { %v1032_v21 = vmul.f32 %v2053_v49, %v1031_v54 }
 0x8f5   : >> { %v1033_v27 = vadd.f32 %v2053_v49, %v1032_v21 }
 0x8f7   : >> { %v1037_v13 = vsel %vm1036_vm10, %v2053_v49, %v1033_v27 }
 0x8f8   : >> { %v1042_v57 = vsel %vm1039_vm11, %v1041_v56, %v1037_v13 }
 0x8f9   : >> { %v1054_v58 = vsub.f32 1.0, %v1042_v57  ;;  %v1063_v40 = vmul.f32 %v1061_v33, %v1042_v57 }
 0x93a   : >> { %v987_v47 = vpop.permute.xlu0 %986 }
 0x93b   : >> { %v989_v28 = vmul.f32 %v987_v47, %v984_v46 }
 0x93d   : >> { %v2505_v50 = vadd.f32 %v992_v48, %v989_v28 }
 0x93f   : >> { %v2510_v36 = vsel %vm1688_vm6, %v2471_v43, %v2505_v50  ;;  %v1068_v0 = vrot.slane %v2505_v50, 6 }
 0x957   : >> { %v1057_v59 = vpop.permute.xlu1 %1056 }
 0x958   : >> { %v1059_v43 = vmul.f32 %v1057_v59, %v1054_v58  ;;  %v2540_v58 = vunpack.c.l.bf16 %v2376_v38 }
 0x95a   : >> { %v2513_v63 = vadd.f32 %v1063_v40, %v1059_v43  ;;  %v1066_v33 = vadd.f32 %v2540_v58, %v403_v41 }
 0x95c   : >> { %v1071_v42 = vrot.slane %v2513_v63, 6 }
 0x95e   : >> { %v1073_v20 = vsel %vm409_vm1, %v1068_v0, %v1071_v42 }
 0x95f   : >> { %v1074_v22 = vpack.c.bf16 %v1073_v20, %v1073_v20 }
 0x961   : >> { %1076 = vrot.lane.b32.xlu2 %v1074_v22, %s2151_s11 }
 0x9bb   : >> { %v1077_v24 = vpop.permute.xlu2 %1076 }
 0x9bc   : >> { %1918 = vmatmul.msk.bf16.vlgmr.msra.gmra.mxu0 %vm432_vm2, %v1077_v24  ;;  %1919 = vmatmul.msk.bf16.vlgmr.msra.gmra.mxu1 %vm432_vm2, %v1077_v24 }
 0xa39   : >> { %v1090_v15 = vpop.f32.mrf.mxu0  ;;  %v1103_v16 = vpop.f32.mrf.mxu1 }
 0xa3a   : >> { %v1107_v25 = vadd.f32 %v1090_v15, %v2352_v30  ;;  %v1108_v52 = vadd.f32 %v1090_v15, %v2345_v23  ;;  %v1109_v26 = vadd.f32 %v1103_v16, %v2345_v23 }
 0xa3c   : >> { %v1150_v29 = vrot.slane %v1108_v52, 4  ;;  %v1175_v32 = vrot.slane %v1109_v26, 4  ;;  %1131 = vrot.lane.b32.xlu2 %v1107_v25, %s2153_s14  ;;  %v1110_v46 = vadd.f32 %v1107_v25, %v1065_v14 }
 0xa3e   : >> { %1199 = vrot.lane.b32.xlu1 %v1175_v32, %s2151_s11  ;;  %1151 = vrot.lane.b32.xlu0 %v1150_v29, %s2152_s12  ;;  %v1920_v18 = vmul.f32 -1.442695, %v1110_v46 }
 0xa40   : >> { %2054 = vpow2.f32 %v1920_v18 }
 0xa41   : >> { %v1092_v37 = vpop.f32.mrf.mxu0  ;;  %v1105_v61 = vpop.f32.mrf.mxu1 }
 0xa44   : >> { %1176 = vrot.lane.b32.xlu2 %v1175_v32, %s2152_s12 }
 0xa46   : >> { %v2055_v47 = vpop.eup %2054 }
 0xa47   : >> { %v1114_v48 = vadd.f32 1.0, %v2055_v47 }
 0xa49   : >> { %2056 = vrcp.f32 %v1114_v48  ;;  %v1126_v27 = vand.u32 2147483648, %v1114_v48  ;;  %vm1120_vm13 = vweird.f32 %v1114_v48  ;;  %v1124_v45 = vand.u32 2147483647, %v1114_v48 }
 0xa4b   : >> { %v1127_v39 = vor.u32 1.1754944e-38, %v1126_v27  ;;  %vm1125_vm15 = vcmp.eq.f32.partialorder %v1124_v45, 8.507059e+37 }
 0xa4f   : >> { %v2057_v28 = vpop.eup %2056 }
 0xa50   : >> { %v1116_v49 = vmul.f32 %v2057_v28, %v1114_v48  ;;  %vm1121_vm12 = vweird.f32 %v2057_v28 }
 0xa51   : >> { %vm1122_vm14 = vmor %vm1120_vm13, %vm1121_vm12 }
 0xa52   : >> { %v1117_v35 = vsub.f32 1.0, %v1116_v49 }
 0xa54   : >> { %v1118_v54 = vmul.f32 %v2057_v28, %v1117_v35 }
 0xa56   : >> { %v1119_v21 = vadd.f32 %v2057_v28, %v1118_v54 }
 0xa58   : >> { %v1123_v34 = vsel %vm1122_vm14, %v2057_v28, %v1119_v21 }
 0xa59   : >> { %v2535_v56 = vsel %vm1125_vm15, %v1127_v39, %v1123_v34 }
 0xa96   : >> { %v1132_v13 = vpop.permute.xlu2 %1131 }
 0xa97   : >> { %v1134_v57 = vmul.f32 %v1132_v13, %v2535_v56 }
 0xa99   : >> { %1136 = vrot.lane.b32.xlu1 %v1134_v57, %s2153_s14 }
 0xa9e   : >> { %v1177_v49 = vpop.permute.xlu2 %1176 }
 0xa9f   : >> { %v1179_v35 = vadd.f32 %v1177_v49, %v1066_v33 }
 0xaa1   : >> { %v1922_v54 = vmul.f32 -1.442695, %v1179_v35 }
 0xab0   : >> { %v1152_v59 = vpop.permute.xlu0 %1151  ;;  %v1200_v41 = vpop.permute.xlu1 %1199 }
 0xab1   : >> { %v1154_v40 = vadd.f32 %v1152_v59, %v1066_v33 }
 0xab3   : >> { %v1921_v43 = vmul.f32 -1.442695, %v1154_v40 }
 0xab5   : >> { %2058 = vpow2.f32 %v1921_v43 }
 0xabb   : >> { %v2059_v42 = vpop.eup %2058 }
 0xabc   : >> { %v1158_v20 = vadd.f32 1.0, %v2059_v42 }
 0xabe   : >> { %2060 = vrcp.f32 %v1158_v20  ;;  %v1170_v16 = vand.u32 2147483648, %v1158_v20  ;;  %v1168_v52 = vand.u32 2147483647, %v1158_v20  ;;  %vm1164_vm3 = vweird.f32 %v1158_v20 }
 0xac0   : >> { %v1171_v26 = vor.u32 1.1754944e-38, %v1170_v16  ;;  %vm1169_vm5 = vcmp.eq.f32.partialorder %v1168_v52, 8.507059e+37 }
 0xac4   : >> { %v2061_v22 = vpop.eup %2060 }
 0xac5   : >> { %v1160_v24 = vmul.f32 %v2061_v22, %v1158_v20  ;;  %vm1165_vm0 = vweird.f32 %v2061_v22  ;;  %v1141_v20 = vsub.f32 1.0, %v2535_v56 }
 0xac6   : >> { %vm1166_vm4 = vmor %vm1164_vm3, %vm1165_vm0 }
 0xac7   : >> { %v1161_v15 = vsub.f32 1.0, %v1160_v24 }
 0xac9   : >> { %v1162_v25 = vmul.f32 %v2061_v22, %v1161_v15 }
 0xacb   : >> { %v1163_v38 = vadd.f32 %v2061_v22, %v1162_v25 }
 0xacd   : >> { %v1167_v29 = vsel %vm1166_vm4, %v2061_v22, %v1163_v38  ;;  %v1215_v22 = vrot.slane %v2513_v63, 2  ;;  %v1147_v38 = vmul.f32 %v2535_v56, %v1068_v0 }
 0xace   : >> { %v1172_v32 = vsel %vm1169_vm5, %v1171_v26, %v1167_v29 }
 0xacf   : >> { %v1202_v37 = vmul.f32 %v1200_v41, %v1172_v32 }
 0xad1   : >> { %1204 = vrot.lane.b32.xlu0 %v1202_v37, %s2153_s14 }
 0xb0b   : >> { %v1137_v61 = vpop.permute.xlu1 %1136 }
 0xb0c   : >> { %v1139_v46 = vadd.f32 %v1137_v61, %v1065_v14 }
 0xb0e   : >> { %2062 = vtanh.f32 %v1139_v46 }
 0xb14   : >> { %v2063_v18 = vpop.eup %2062 }
 0xb15   : >> { %1143 = vrot.lane.b32.xlu1 %v2063_v18, %s2151_s11 }
 0xb43   : >> { %v1205_v47 = vpop.permute.xlu0 %1204 }
 0xb44   : >> { %v1207_v48 = vadd.f32 %v1205_v47, %v1066_v33 }
 0xb46   : >> { %2064 = vtanh.f32 %v1207_v48 }
 0xb47   : >> { %2066 = vpow2.f32 %v1922_v54  ;;  %v1219_v54 = vadd.f32 %v2531_v19, %v589_v44  ;;  %v1220_v44 = vadd.f32 %v2540_v58, %v592_v53 }
 0xb4c   : >> { %v2065_v28 = vpop.eup %2064 }
 0xb4d   : >> { %1211 = vrot.lane.b32.xlu0 %v2065_v28, %s2151_s11  ;;  %v2067_v21 = vpop.eup %2066 }
 0xb4e   : >> { %v1183_v27 = vadd.f32 1.0, %v2067_v21 }
 0xb50   : >> { %2068 = vrcp.f32 %v1183_v27  ;;  %v1195_v57 = vand.u32 2147483648, %v1183_v27  ;;  %vm1189_vm9 = vweird.f32 %v1183_v27  ;;  %v1193_v59 = vand.u32 2147483647, %v1183_v27 }
 0xb52   : >> { %v1196_v43 = vor.u32 1.1754944e-38, %v1195_v57  ;;  %vm1194_vm11 = vcmp.eq.f32.partialorder %v1193_v59, 8.507059e+37 }
 0xb56   : >> { %v2069_v45 = vpop.eup %2068 }
 0xb57   : >> { %v1185_v34 = vmul.f32 %v2069_v45, %v1183_v27  ;;  %vm1190_vm8 = vweird.f32 %v2069_v45 }
 0xb58   : >> { %vm1191_vm10 = vmor %vm1189_vm9, %vm1190_vm8 }
 0xb59   : >> { %v1186_v14 = vsub.f32 1.0, %v1185_v34 }
 0xb5b   : >> { %v1187_v39 = vmul.f32 %v2069_v45, %v1186_v14 }
 0xb5d   : >> { %v1188_v13 = vadd.f32 %v2069_v45, %v1187_v39 }
 0xb5f   : >> { %v1192_v40 = vsel %vm1191_vm10, %v2069_v45, %v1188_v13 }
 0xb60   : >> { %v1197_v42 = vsel %vm1194_vm11, %v1196_v43, %v1192_v40 }
 0xb61   : >> { %v1209_v24 = vsub.f32 1.0, %v1197_v42  ;;  %v1217_v52 = vmul.f32 %v1215_v22, %v1197_v42 }
 0xb87   : >> { %v1144_v33 = vpop.permute.xlu1 %1143 }
 0xb88   : >> { %v1146_v16 = vmul.f32 %v1144_v33, %v1141_v20 }
 0xb8a   : >> { %v2555_v29 = vadd.f32 %v1147_v38, %v1146_v16 }
 0xbbf   : >> { %v1212_v15 = vpop.permute.xlu0 %1211 }
 0xbc0   : >> { %v1214_v25 = vmul.f32 %v1212_v15, %v1209_v24 }
 0xbc2   : >> { %v2553_v26 = vadd.f32 %v1217_v52, %v1214_v25 }
 0xbc4   : >> { %v1222_v41 = vrot.slane %v2553_v26, 4 }
 0xbc6   : >> { %v1224_v32 = vsel %vm409_vm1, %v2555_v29, %v1222_v41 }
 0xbc7   : >> { %v1225_v37 = vpack.c.bf16 %v1224_v32, %v1224_v32 }
 0xbc9   : >> { %1227 = vrot.lane.b32.xlu2 %v1225_v37, %s2151_s11 }
 0xc23   : >> { %v1228_v61 = vpop.permute.xlu2 %1227 }
 0xc24   : >> { %1923 = vmatmul.msk.bf16.vlgmr.msra.gmra.mxu2 %vm432_vm2, %v1228_v61  ;;  %1924 = vmatmul.msk.bf16.vlgmr.msra.gmra.mxu3 %vm432_vm2, %v1228_v61 }
 0xca7   : >> { %v1241_v50 = vpop.f32.mrf.mxu2  ;;  %v1254_v46 = vpop.f32.mrf.mxu3 }
 0xca8   : >> { %v1258_v0 = vadd.f32 %v1241_v50, %v2352_v30  ;;  %v1259_v56 = vadd.f32 %v1241_v50, %v2345_v23  ;;  %v1260_v18 = vadd.f32 %v1254_v46, %v2345_v23 }
 0xcaa   : >> { %v1262_v47 = vrot.slane %v1258_v0, 6  ;;  %v1306_v48 = vrot.slane %v1259_v56, 6  ;;  %v1331_v28 = vrot.slane %v1260_v18, 6 }
 0xcac   : >> { %1355 = vrot.lane.b32.xlu2 %v1331_v28, %s2151_s11  ;;  %1307 = vrot.lane.b32.xlu0 %v1306_v48, %s2152_s12  ;;  %v1264_v21 = vadd.f32 %v1262_v47, %v1219_v54 }
 0xcad   : >> { %1284 = vrot.lane.b32.xlu1 %v1262_v47, %s2153_s14 }
 0xcae   : >> { %v1925_v27 = vmul.f32 -1.442695, %v1264_v21 }
 0xcaf   : >> { %v1243_v49 = vpop.f32.mrf.mxu2  ;;  %v1256_v35 = vpop.f32.mrf.mxu3 }
 0xcb0   : >> { %2070 = vpow2.f32 %v1925_v27 }
 0xcb4   : >> { %1332 = vrot.lane.b32.xlu2 %v1331_v28, %s2152_s12 }
 0xcb6   : >> { %v2071_v45 = vpop.eup %2070 }
 0xcb7   : >> { %v1268_v34 = vadd.f32 1.0, %v2071_v45 }
 0xcb9   : >> { %2072 = vrcp.f32 %v1268_v34  ;;  %v1280_v40 = vand.u32 2147483648, %v1268_v34  ;;  %vm1274_vm13 = vweird.f32 %v1268_v34  ;;  %v1278_v43 = vand.u32 2147483647, %v1268_v34 }
 0xcbb   : >> { %v1281_v33 = vor.u32 1.1754944e-38, %v1280_v40  ;;  %vm1279_vm15 = vcmp.eq.f32.partialorder %v1278_v43, 8.507059e+37 }
 0xcbf   : >> { %v2073_v14 = vpop.eup %2072 }
 0xcc0   : >> { %v1270_v39 = vmul.f32 %v2073_v14, %v1268_v34  ;;  %vm1275_vm12 = vweird.f32 %v2073_v14 }
 0xcc1   : >> { %vm1276_vm14 = vmor %vm1274_vm13, %vm1275_vm12 }
 0xcc2   : >> { %v1271_v13 = vsub.f32 1.0, %v1270_v39 }
 0xcc4   : >> { %v1272_v57 = vmul.f32 %v2073_v14, %v1271_v13 }
 0xcc6   : >> { %v1273_v59 = vadd.f32 %v2073_v14, %v1272_v57 }
 0xcc8   : >> { %v1277_v42 = vsel %vm1276_vm14, %v2073_v14, %v1273_v59 }
 0xcc9   : >> { %v1282_v15 = vsel %vm1279_vm15, %v1281_v33, %v1277_v42 }
 0xd06   : >> { %v1356_v18 = vpop.permute.xlu2 %1355 }
 0xd0e   : >> { %v1333_v34 = vpop.permute.xlu2 %1332 }
 0xd0f   : >> { %v1335_v14 = vadd.f32 %v1333_v34, %v1220_v44 }
 0xd11   : >> { %v1927_v39 = vmul.f32 -1.442695, %v1335_v14 }
 0xd1e   : >> { %v1308_v20 = vpop.permute.xlu0 %1307 }
 0xd1f   : >> { %v1310_v22 = vadd.f32 %v1308_v20, %v1220_v44  ;;  %v1285_v24 = vpop.permute.xlu1 %1284 }
 0xd20   : >> { %v1287_v16 = vmul.f32 %v1285_v24, %v1282_v15 }
 0xd21   : >> { %v1926_v25 = vmul.f32 -1.442695, %v1310_v22 }
 0xd22   : >> { %1289 = vrot.lane.b32.xlu0 %v1287_v16, %s2153_s14 }
 0xd23   : >> { %2074 = vpow2.f32 %v1926_v25  ;;  %v1294_v25 = vsub.f32 1.0, %v1282_v15 }
 0xd29   : >> { %v2075_v52 = vpop.eup %2074 }
 0xd2a   : >> { %v1314_v38 = vadd.f32 1.0, %v2075_v52  ;;  %v1301_v52 = vrot.slane %v2555_v29, 6 }
 0xd2c   : >> { %2076 = vrcp.f32 %v1314_v38  ;;  %v1326_v61 = vand.u32 2147483648, %v1314_v38  ;;  %v1324_v53 = vand.u32 2147483647, %v1314_v38  ;;  %vm1320_vm3 = vweird.f32 %v1314_v38 }
 0xd2e   : >> { %v1327_v0 = vor.u32 1.1754944e-38, %v1326_v61  ;;  %vm1325_vm5 = vcmp.eq.f32.partialorder %v1324_v53, 8.507059e+37 }
 0xd32   : >> { %v2077_v41 = vpop.eup %2076 }
 0xd33   : >> { %v1316_v32 = vmul.f32 %v2077_v41, %v1314_v38  ;;  %vm1321_vm0 = vweird.f32 %v2077_v41 }
 0xd34   : >> { %vm1322_vm4 = vmor %vm1320_vm3, %vm1321_vm0 }
 0xd35   : >> { %v1317_v37 = vsub.f32 1.0, %v1316_v32 }
 0xd37   : >> { %v1318_v50 = vmul.f32 %v2077_v41, %v1317_v37  ;;  %v1371_v37 = vrot.slane %v2553_v26, 2 }
 0xd39   : >> { %v1319_v46 = vadd.f32 %v2077_v41, %v1318_v50 }
 0xd3b   : >> { %v1323_v56 = vsel %vm1322_vm4, %v2077_v41, %v1319_v46  ;;  %v1303_v41 = vmul.f32 %v1301_v52, %v1282_v15 }
 0xd3c   : >> { %v1328_v47 = vsel %vm1325_vm5, %v1327_v0, %v1323_v56 }
 0xd3d   : >> { %v1358_v48 = vmul.f32 %v1356_v18, %v1328_v47 }
 0xd3f   : >> { %1360 = vrot.lane.b32.xlu1 %v1358_v48, %s2153_s14 }
 0xd94   : >> { %v1290_v28 = vpop.permute.xlu0 %1289 }
 0xd95   : >> { %v1292_v49 = vadd.f32 %v1290_v28, %v1219_v54 }
 0xd97   : >> { %2078 = vtanh.f32 %v1292_v49 }
 0xd9d   : >> { %v2079_v35 = vpop.eup %2078 }
 0xd9e   : >> { %1296 = vrot.lane.b32.xlu0 %v2079_v35, %s2151_s11 }
 0xdb1   : >> { %v1361_v21 = vpop.permute.xlu1 %1360 }
 0xdb2   : >> { %v1363_v27 = vadd.f32 %v1361_v21, %v1220_v44 }
 0xdb4   : >> { %2080 = vtanh.f32 %v1363_v27 }
 0xdb5   : >> { %2082 = vpow2.f32 %v1927_v39  ;;  %v1375_v39 = vadd.f32 %v2531_v19, %v749_v51  ;;  %v1376_v51 = vadd.f32 %v2540_v58, %v752_v62 }
 0xdba   : >> { %v2081_v45 = vpop.eup %2080 }
 0xdbb   : >> { %1367 = vrot.lane.b32.xlu1 %v2081_v45, %s2151_s11  ;;  %v2083_v13 = vpop.eup %2082 }
 0xdbc   : >> { %v1339_v57 = vadd.f32 1.0, %v2083_v13 }
 0xdbe   : >> { %2084 = vrcp.f32 %v1339_v57  ;;  %v1351_v33 = vand.u32 2147483648, %v1339_v57  ;;  %vm1345_vm9 = vweird.f32 %v1339_v57  ;;  %v1349_v20 = vand.u32 2147483647, %v1339_v57 }
 0xdc0   : >> { %v1352_v16 = vor.u32 1.1754944e-38, %v1351_v33  ;;  %vm1350_vm11 = vcmp.eq.f32.partialorder %v1349_v20, 8.507059e+37 }
 0xdc4   : >> { %v2085_v59 = vpop.eup %2084 }
 0xdc5   : >> { %v1341_v40 = vmul.f32 %v2085_v59, %v1339_v57  ;;  %vm1346_vm8 = vweird.f32 %v2085_v59 }
 0xdc6   : >> { %vm1347_vm10 = vmor %vm1345_vm9, %vm1346_vm8 }
 0xdc7   : >> { %v1342_v54 = vsub.f32 1.0, %v1341_v40 }
 0xdc9   : >> { %v1343_v43 = vmul.f32 %v2085_v59, %v1342_v54 }
 0xdcb   : >> { %v1344_v42 = vadd.f32 %v2085_v59, %v1343_v43 }
 0xdcd   : >> { %v1348_v22 = vsel %vm1347_vm10, %v2085_v59, %v1344_v42 }
 0xdce   : >> { %v1353_v44 = vsel %vm1350_vm11, %v1352_v16, %v1348_v22 }
 0xdcf   : >> { %v1365_v32 = vsub.f32 1.0, %v1353_v44  ;;  %v1373_v53 = vmul.f32 %v1371_v37, %v1353_v44 }
 0xe10   : >> { %v1297_v24 = vpop.permute.xlu0 %1296 }
 0xe11   : >> { %v1299_v38 = vmul.f32 %v1297_v24, %v1294_v25 }
 0xe13   : >> { %v2582_v50 = vadd.f32 %v1303_v41, %v1299_v38 }
 0xe15   : >> { %v1378_v56 = vrot.slane %v2582_v50, 2 }
 0xe2d   : >> { %v1368_v61 = vpop.permute.xlu1 %1367 }
 0xe2e   : >> { %v1370_v46 = vmul.f32 %v1368_v61, %v1365_v32 }
 0xe30   : >> { %v2584_v0 = vadd.f32 %v1373_v53, %v1370_v46 }
 0xe32   : >> { %v1381_v18 = vrot.slane %v2584_v0, 2 }
 0xe34   : >> { %v1383_v47 = vsel %vm409_vm1, %v1378_v56, %v1381_v18 }
 0xe35   : >> { %v1384_v48 = vpack.c.bf16 %v1383_v47, %v1383_v47 }
 0xe37   : >> { %1386 = vrot.lane.b32.xlu2 %v1384_v48, %s2151_s11 }
 0xe91   : >> { %v1387_v15 = vpop.permute.xlu2 %1386 }
 0xe92   : >> { %1928 = vmatmul.msk.bf16.vlgmr.msrb.gmra.mxu0 %vm432_vm2, %v1387_v15  ;;  %1929 = vmatmul.msk.bf16.vlgmr.msrb.gmra.mxu1 %vm432_vm2, %v1387_v15 }
 0xf0f   : >> { %v1400_v28 = vpop.f32.mrf.mxu0  ;;  %v1413_v49 = vpop.f32.mrf.mxu1 }
 0xf10   : >> { %v1417_v35 = vadd.f32 %v1400_v28, %v2352_v30  ;;  %v1418_v21 = vadd.f32 %v1400_v28, %v2345_v23  ;;  %v1419_v27 = vadd.f32 %v1413_v49, %v2345_v23 }
 0xf12   : >> { %v1421_v45 = vrot.slane %v1417_v35, 4  ;;  %1511 = vrot.lane.b32.xlu2 %v1419_v27, %s2151_s11  ;;  %1464 = vrot.lane.b32.xlu0 %v1418_v21, %s2152_s12 }
 0xf14   : >> { %1443 = vrot.lane.b32.xlu1 %v1421_v45, %s2153_s14  ;;  %v1423_v13 = vadd.f32 %v1421_v45, %v1375_v39 }
 0xf16   : >> { %v1930_v57 = vmul.f32 -1.442695, %v1423_v13 }
 0xf17   : >> { %v1402_v34 = vpop.f32.mrf.mxu0  ;;  %v1415_v14 = vpop.f32.mrf.mxu1 }
 0xf18   : >> { %2086 = vpow2.f32 %v1930_v57 }
 0xf1a   : >> { %1488 = vrot.lane.b32.xlu2 %v1419_v27, %s2152_s12 }
 0xf1e   : >> { %v2087_v59 = vpop.eup %2086 }
 0xf1f   : >> { %v1427_v40 = vadd.f32 1.0, %v2087_v59 }
 0xf21   : >> { %2088 = vrcp.f32 %v1427_v40  ;;  %v1439_v22 = vand.u32 2147483648, %v1427_v40  ;;  %vm1433_vm13 = vweird.f32 %v1427_v40  ;;  %v1437_v24 = vand.u32 2147483647, %v1427_v40 }
 0xf23   : >> { %v1440_v44 = vor.u32 1.1754944e-38, %v1439_v22  ;;  %vm1438_vm15 = vcmp.eq.f32.partialorder %v1437_v24, 8.507059e+37 }
 0xf27   : >> { %v2089_v54 = vpop.eup %2088 }
 0xf28   : >> { %v1429_v43 = vmul.f32 %v2089_v54, %v1427_v40  ;;  %vm1434_vm12 = vweird.f32 %v2089_v54 }
 0xf29   : >> { %vm1435_vm14 = vmor %vm1433_vm13, %vm1434_vm12 }
 0xf2a   : >> { %v1430_v42 = vsub.f32 1.0, %v1429_v43 }
 0xf2c   : >> { %v1431_v33 = vmul.f32 %v2089_v54, %v1430_v42 }
 0xf2e   : >> { %v1432_v20 = vadd.f32 %v2089_v54, %v1431_v33 }
 0xf30   : >> { %v1436_v16 = vsel %vm1435_vm14, %v2089_v54, %v1432_v20 }
 0xf31   : >> { %v1441_v41 = vsel %vm1438_vm15, %v1440_v44, %v1436_v16  ;;  %vm1705_vm15 = vcmask 257024  }
 0xf32   : >> { %v1453_v22 = vsub.f32 1.0, %v1441_v41 }
 0xf6c   : >> { %v1512_v21 = vpop.permute.xlu2 %1511 }
 0xf74   : >> { %v1489_v54 = vpop.permute.xlu2 %1488 }
 0xf75   : >> { %v1491_v43 = vadd.f32 %v1489_v54, %v1376_v51 }
 0xf77   : >> { %v1932_v42 = vmul.f32 -1.442695, %v1491_v43 }
 0xf84   : >> { %v1465_v25 = vpop.permute.xlu0 %1464 }
 0xf85   : >> { %v1467_v52 = vadd.f32 %v1465_v25, %v1376_v51 }
 0xf86   : >> { %v1444_v38 = vpop.permute.xlu1 %1443 }
 0xf87   : >> { %v1931_v32 = vmul.f32 -1.442695, %v1467_v52  ;;  %v1446_v37 = vmul.f32 %v1444_v38, %v1441_v41  ;;  %v1690_v38 = vsel %vm409_vm1, %v2555_v29, %v2582_v50 }
 0xf89   : >> { %2090 = vpow2.f32 %v1931_v32  ;;  %1448 = vrot.lane.b32.xlu0 %v1446_v37, %s2153_s14 }
 0xf8f   : >> { %v2091_v61 = vpop.eup %2090 }
 0xf90   : >> { %v1471_v53 = vadd.f32 1.0, %v2091_v61 }
 0xf92   : >> { %2092 = vrcp.f32 %v1471_v53  ;;  %v1483_v48 = vand.u32 2147483648, %v1471_v53  ;;  %v1481_v15 = vand.u32 2147483647, %v1471_v53  ;;  %vm1477_vm3 = vweird.f32 %v1471_v53 }
 0xf94   : >> { %v1484_v49 = vor.u32 1.1754944e-38, %v1483_v48  ;;  %vm1482_vm5 = vcmp.eq.f32.partialorder %v1481_v15, 8.507059e+37 }
 0xf98   : >> { %v2093_v46 = vpop.eup %2092 }
 0xf99   : >> { %v1473_v56 = vmul.f32 %v2093_v46, %v1471_v53  ;;  %vm1478_vm0 = vweird.f32 %v2093_v46 }
 0xf9a   : >> { %vm1479_vm4 = vmor %vm1477_vm3, %vm1478_vm0 }
 0xf9b   : >> { %v1474_v47 = vsub.f32 1.0, %v1473_v56 }
 0xf9d   : >> { %v1475_v62 = vmul.f32 %v2093_v46, %v1474_v47 }
 0xf9f   : >> { %v1476_v28 = vadd.f32 %v2093_v46, %v1475_v62 }
 0xfa1   : >> { %v1480_v35 = vsel %vm1479_vm4, %v2093_v46, %v1476_v28 }
 0xfa2   : >> { %v1485_v27 = vsel %vm1482_vm5, %v1484_v49, %v1480_v35 }
 0xfa3   : >> { %v1514_v45 = vmul.f32 %v1512_v21, %v1485_v27 }
 0xfa5   : >> { %1516 = vrot.lane.b32.xlu1 %v1514_v45, %s2153_s14 }
 0xffb   : >> { %v1449_v34 = vpop.permute.xlu0 %1448 }
 0xffc   : >> { %v1451_v14 = vadd.f32 %v1449_v34, %v1375_v39  ;;  %v1459_v39 = vrot.slane %v2582_v50, 6 }
 0xffe   : >> { %2094 = vtanh.f32 %v1451_v14  ;;  %v1461_v16 = vmul.f32 %v1459_v39, %v1441_v41 }
0x1004   : >> { %v2095_v13 = vpop.eup %2094 }
0x1005   : >> { %1455 = vrot.lane.b32.xlu0 %v2095_v13, %s2151_s11 }
0x1017   : >> { %v1517_v57 = vpop.permute.xlu1 %1516 }
0x1018   : >> { %v1519_v59 = vadd.f32 %v1517_v57, %v1376_v51 }
0x101a   : >> { %2096 = vtanh.f32 %v1519_v59 }
0x101b   : >> { %2098 = vpow2.f32 %v1932_v42 }
0x1020   : >> { %v2097_v40 = vpop.eup %2096 }
0x1021   : >> { %1523 = vrot.lane.b32.xlu1 %v2097_v40, %s2151_s11  ;;  %v2099_v33 = vpop.eup %2098 }
0x1022   : >> { %v1495_v20 = vadd.f32 1.0, %v2099_v33 }
0x1024   : >> { %2100 = vrcp.f32 %v1495_v20  ;;  %v1507_v46 = vand.u32 2147483648, %v1495_v20  ;;  %vm1501_vm9 = vweird.f32 %v1495_v20  ;;  %v1505_v41 = vand.u32 2147483647, %v1495_v20 }
0x1026   : >> { %v1508_v47 = vor.u32 1.1754944e-38, %v1507_v46  ;;  %vm1506_vm11 = vcmp.eq.f32.partialorder %v1505_v41, 8.507059e+37 }
0x102a   : >> { %v2101_v44 = vpop.eup %2100 }
0x102b   : >> { %v1497_v32 = vmul.f32 %v2101_v44, %v1495_v20  ;;  %vm1502_vm8 = vweird.f32 %v2101_v44  ;;  %v1693_v20 = vpack.c.bf16 %v2510_v36, %v2510_v36 }
0x102c   : >> { %vm1503_vm10 = vmor %vm1501_vm9, %vm1502_vm8 }
0x102d   : >> { %v1498_v37 = vsub.f32 1.0, %v1497_v32 }
0x102f   : >> { %v1499_v61 = vmul.f32 %v2101_v44, %v1498_v37 }
0x1031   : >> { %v1500_v53 = vadd.f32 %v2101_v44, %v1499_v61 }
0x1033   : >> { %v1504_v56 = vsel %vm1503_vm10, %v2101_v44, %v1500_v53 }
0x1034   : >> { %v1509_v48 = vsel %vm1506_vm11, %v1508_v47, %v1504_v56  ;;  %v1530_v47 = vadd.f32 %v2540_v58, %v2235_v2 }
0x1035   : >> { %v1521_v62 = vsub.f32 1.0, %v1509_v48  ;;  %v1527_v29 = vmul.f32 %v1509_v48, %v1381_v18  ;;  %v2634_v18 = vadd.f32 %v2531_v19, %v907_v17 }
0x1077   : >> { %v1456_v24 = vpop.permute.xlu0 %1455 }
0x1078   : >> { %v1458_v25 = vmul.f32 %v1456_v24, %v1453_v22 }
0x107a   : >> { %v2612_v52 = vadd.f32 %v1461_v16, %v1458_v25 }
0x107c   : >> { %v2619_v51 = vsel %vm1686_vm7, %v1690_v38, %v2612_v52  ;;  %v1532_v28 = vrot.slane %v2612_v52, 4 }
0x1093   : >> { %v1524_v15 = vpop.permute.xlu1 %1523 }
0x1094   : >> { %v1526_v50 = vmul.f32 %v1524_v15, %v1521_v62 }
0x1096   : >> { %v2624_v49 = vadd.f32 %v1527_v29, %v1526_v50 }
0x1098   : >> { %v1534_v35 = vsel %vm409_vm1, %v1532_v28, %v2624_v49 }
0x1099   : >> { %v1535_v21 = vpack.c.bf16 %v1534_v35, %v1534_v35 }
0x109b   : >> { %1537 = vrot.lane.b32.xlu2 %v1535_v21, %s2151_s11 }
0x10f5   : >> { %v1538_v27 = vpop.permute.xlu2 %1537 }
0x10f6   : >> { %1933 = vmatmul.msk.bf16.vlgmr.msrb.gmra.mxu2 %vm432_vm2, %v1538_v27  ;;  %1934 = vmatmul.msk.bf16.vlgmr.msrb.gmra.mxu3 %vm432_vm2, %v1538_v27 }
0x1179   : >> { %v1551_v45 = vpop.f32.mrf.mxu2  ;;  %v1564_v34 = vpop.f32.mrf.mxu3 }
0x117a   : >> { %v1568_v14 = vadd.f32 %v1551_v45, %v2352_v30  ;;  %v1569_v13 = vadd.f32 %v1551_v45, %v2345_v23  ;;  %v1570_v57 = vadd.f32 %v1564_v34, %v2345_v23  ;;  %v1711_v23 = vsel %vm409_vm1, %v2513_v63, %v2476_v55 }
0x117b   : >> { %v1712_v22 = vsel %vm1686_vm7, %v1711_v23, %v2430_v31 }
0x117c   : >> { %v1572_v59 = vrot.slane %v1568_v14, 2  ;;  %v1615_v40 = vrot.slane %v1569_v13, 2  ;;  %v1640_v54 = vrot.slane %v1570_v57, 2  ;;  %v1713_v24 = vsel %vm1688_vm6, %v1712_v22, %v2393_v60 }
0x117d   : >> { %v1715_v44 = vpack.c.bf16 %v1713_v24, %v1713_v24  ;;  %v1610_v60 = vrot.slane %v2612_v52, 6 }
0x117e   : >> { %v1574_v43 = vadd.f32 %v1572_v59, %v2634_v18  ;;  %1664 = vrot.lane.b32.xlu1 %v1640_v54, %s2151_s11  ;;  %1616 = vrot.lane.b32.xlu0 %v1615_v40, %s2152_s12 }
0x117f   : >> { %1594 = vrot.lane.b32.xlu2 %v1572_v59, %s2153_s14 }
0x1180   : >> { %v1935_v42 = vmul.f32 -1.442695, %v1574_v43 }
0x1181   : >> { %v1553_v17 = vpop.f32.mrf.mxu2  ;;  %v1566_v19 = vpop.f32.mrf.mxu3 }
0x1182   : >> { %2102 = vpow2.f32 %v1935_v42 }
0x1187   : >> { %1641 = vrot.lane.b32.xlu2 %v1640_v54, %s2152_s12 }
0x1188   : >> { %v2103_v30 = vpop.eup %2102 }
0x1189   : >> { %v1578_v33 = vadd.f32 1.0, %v2103_v30 }
0x118b   : >> { %2104 = vrcp.f32 %v1578_v33  ;;  %v1590_v38 = vand.u32 2147483648, %v1578_v33  ;;  %v1588_v55 = vand.u32 2147483647, %v1578_v33  ;;  %vm1584_vm12 = vweird.f32 %v1578_v33 }
0x118d   : >> { %v1591_v31 = vor.u32 1.1754944e-38, %v1590_v38  ;;  %vm1589_vm14 = vcmp.eq.f32.partialorder %v1588_v55, 8.507059e+37 }
0x118f   : >> { %1697 = vrot.lane.b32.xlu2 %v1693_v20, %s2151_s11 }
0x1191   : >> { %v2105_v39 = vpop.eup %2104 }
0x1192   : >> { %v1580_v16 = vmul.f32 %v2105_v39, %v1578_v33  ;;  %vm1585_vm2 = vweird.f32 %v2105_v39 }
0x1193   : >> { %vm1586_vm13 = vmor %vm1584_vm12, %vm1585_vm2 }
0x1194   : >> { %v1581_v25 = vsub.f32 1.0, %v1580_v16 }
0x1196   : >> { %v1582_v32 = vmul.f32 %v2105_v39, %v1581_v25 }
0x1197   : >> { %1720 = vrot.lane.b32.xlu2 %v1715_v44, %s2151_s11 }
0x1198   : >> { %v1583_v36 = vadd.f32 %v2105_v39, %v1582_v32 }
0x119a   : >> { %v1587_v63 = vsel %vm1586_vm13, %v2105_v39, %v1583_v36 }
0x119b   : >> { %v1592_v37 = vsel %vm1589_vm14, %v1591_v31, %v1587_v63 }
0x119c   : >> { %v1612_v61 = vmul.f32 %v1610_v60, %v1592_v37  ;;  %v1604_v33 = vsub.f32 1.0, %v1592_v37 }
0x11d9   : >> { %v1595_v53 = vpop.permute.xlu2 %1594 }
0x11da   : >> { %v1597_v46 = vmul.f32 %v1595_v53, %v1592_v37 }
0x11dc   : >> { %1599 = vrot.lane.b32.xlu1 %v1597_v46, %s2153_s14  ;;  %v1681_v46 = vrot.slane %v2624_v49, 2 }
0x11e1   : >> { %v1642_v41 = vpop.permute.xlu2 %1641 }
0x11e2   : >> { %v1644_v23 = vadd.f32 %v1642_v41, %v1530_v47 }
0x11e4   : >> { %v1937_v24 = vmul.f32 -1.442695, %v1644_v23 }
0x11e9   : >> { %v1698_v56 = vpop.permute.xlu2 %1697 }
0x11ea   : >> { %1706 = vst.msk [vmem:[%s2660_s29] sm:$0xf] %vm1705_vm15, %v1698_v56 }
0x11f0   : >> { %v1617_v52 = vpop.permute.xlu0 %1616  ;;  %v1665_v57 = vpop.permute.xlu1 %1664 }
0x11f1   : >> { %v1619_v48 = vadd.f32 %v1617_v52, %v1530_v47  ;;  %v1721_v62 = vpop.permute.xlu2 %1720 }
0x11f2   : >> { %1727 = vst.msk [vmem:[%s2668_s30 + $0x4] sm:$0xf] %vm1705_vm15, %v1721_v62 }
0x11f3   : >> { %v1936_v15 = vmul.f32 -1.442695, %v1619_v48 }
0x11f5   : >> { %2106 = vpow2.f32 %v1936_v15 }
0x11fb   : >> { %v2107_v29 = vpop.eup %2106 }
0x11fc   : >> { %v1623_v50 = vadd.f32 1.0, %v2107_v29 }
0x11fe   : >> { %2108 = vrcp.f32 %v1623_v50  ;;  %v1635_v27 = vand.u32 2147483648, %v1623_v50  ;;  %v1633_v58 = vand.u32 2147483647, %v1623_v50  ;;  %vm1629_vm3 = vweird.f32 %v1623_v50 }
0x1200   : >> { %v1636_v14 = vor.u32 1.1754944e-38, %v1635_v27  ;;  %vm1634_vm5 = vcmp.eq.f32.partialorder %v1633_v58, 8.507059e+37 }
0x1204   : >> { %v2109_v28 = vpop.eup %2108 }
0x1205   : >> { %v1625_v35 = vmul.f32 %v2109_v28, %v1623_v50  ;;  %vm1630_vm0 = vweird.f32 %v2109_v28 }
0x1206   : >> { %vm1631_vm4 = vmor %vm1629_vm3, %vm1630_vm0 }
0x1207   : >> { %v1626_v21 = vsub.f32 1.0, %v1625_v35 }
0x1209   : >> { %v1627_v45 = vmul.f32 %v2109_v28, %v1626_v21 }
0x120b   : >> { %v1628_v34 = vadd.f32 %v2109_v28, %v1627_v45 }
0x120d   : >> { %v1632_v13 = vsel %vm1631_vm4, %v2109_v28, %v1628_v34 }
0x120e   : >> { %v1637_v59 = vsel %vm1634_vm5, %v1636_v14, %v1632_v13 }
0x120f   : >> { %v1667_v40 = vmul.f32 %v1665_v57, %v1637_v59 }
0x1211   : >> { %1669 = vrot.lane.b32.xlu0 %v1667_v40, %s2153_s14 }
0x124e   : >> { %v1600_v54 = vpop.permute.xlu1 %1599 }
0x124f   : >> { %v1602_v43 = vadd.f32 %v1600_v54, %v2634_v18 }
0x1251   : >> { %2110 = vtanh.f32 %v1602_v43 }
0x1257   : >> { %v2111_v42 = vpop.eup %2110 }
0x1258   : >> { %1606 = vrot.lane.b32.xlu1 %v2111_v42, %s2151_s11 }
0x1283   : >> { %v1670_v17 = vpop.permute.xlu0 %1669 }
0x1284   : >> { %v1672_v19 = vadd.f32 %v1670_v17, %v1530_v47 }
0x1286   : >> { %2112 = vtanh.f32 %v1672_v19 }
0x1287   : >> { %2114 = vpow2.f32 %v1937_v24 }
0x128c   : >> { %v2113_v30 = vpop.eup %2112 }
0x128d   : >> { %1676 = vrot.lane.b32.xlu0 %v2113_v30, %s2151_s11  ;;  %v2115_v25 = vpop.eup %2114 }
0x128e   : >> { %v1648_v38 = vadd.f32 1.0, %v2115_v25 }
0x1290   : >> { %2116 = vrcp.f32 %v1648_v38  ;;  %v1660_v60 = vand.u32 2147483648, %v1648_v38  ;;  %vm1654_vm9 = vweird.f32 %v1648_v38  ;;  %v1658_v37 = vand.u32 2147483647, %v1648_v38 }
0x1292   : >> { %vm1659_vm11 = vcmp.eq.f32.partialorder %v1658_v37, 8.507059e+37 }
0x1296   : >> { %v2117_v32 = vpop.eup %2116 }
0x1297   : >> { %v1650_v55 = vmul.f32 %v2117_v32, %v1648_v38  ;;  %vm1655_vm8 = vweird.f32 %v2117_v32 }
0x1298   : >> { %vm1656_vm10 = vmor %vm1654_vm9, %vm1655_vm8 }
0x1299   : >> { %v1651_v36 = vsub.f32 1.0, %v1650_v55 }
0x129b   : >> { %v1652_v31 = vmul.f32 %v2117_v32, %v1651_v36 }
0x129d   : >> { %v1653_v63 = vadd.f32 %v2117_v32, %v1652_v31 }
0x12ca   : >> { %v1607_v20 = vpop.permute.xlu1 %1606 }
0x12cb   : >> { %v1609_v22 = vmul.f32 %v1607_v20, %v1604_v33 }
0x12cd   : >> { %v1613_v39 = vadd.f32 %v1612_v61, %v1609_v22  ;;  %v1661_v61 = vor.u32 1.1754944e-38, %v1660_v60 }
0x12cf   : >> { %v1692_v16 = vsel %vm1688_vm6, %v2619_v51, %v1613_v39  ;;  %v1729_v44 = vrot.slane %v1613_v39, 6  ;;  %v1657_v51 = vsel %vm1656_vm10, %v2117_v32, %v1653_v63 }
0x12d0   : >> { %v1694_v18 = vpack.c.bf16 %v1692_v16, %v1692_v16  ;;  %v1662_v53 = vsel %vm1659_vm11, %v1661_v61, %v1657_v51 }
0x12d1   : >> { %v1674_v41 = vsub.f32 1.0, %v1662_v53  ;;  %v1683_v52 = vmul.f32 %v1681_v46, %v1662_v53 }
0x12d2   : >> { %1699 = vrot.lane.b32.xlu0 %v1694_v18, %s2151_s11 }
0x12da   : >> { %1730 = vrot.lane.b32.xlu0 %v1729_v44, %s2151_s11 }
0x12ff   : >> { %v1677_v56 = vpop.permute.xlu0 %1676 }
0x1300   : >> { %v1679_v47 = vmul.f32 %v1677_v56, %v1674_v41 }
0x1302   : >> { %v1684_v48 = vadd.f32 %v1683_v52, %v1679_v47 }
0x1304   : >> { %v1708_v62 = vsel %vm409_vm1, %v1684_v48, %v2624_v49  ;;  %vm1737_vm1 = vcmask (%p376_p6), 254976  }
0x1305   : >> { %v1709_v15 = vsel %vm1686_vm7, %v1708_v62, %v2584_v0 }
0x1306   : >> { %v1710_v29 = vsel %vm1688_vm6, %v1709_v15, %v2553_v26 }
0x1307   : >> { %v1714_v50 = vpack.c.bf16 %v1710_v29, %v1710_v29 }
0x1309   : >> { %1718 = vrot.lane.b32.xlu1 %v1714_v50, %s2151_s11 }
0x1311   : >> { %1734 = vrot.lane.b32.xlu1 %v1684_v48, %s2151_s11 }
0x1344   : >> { %v1700_v28 = vpop.permute.xlu0 %1699 }
0x1345   : >> { %1707 = vst.msk [vmem:[%s2660_s29 + $0x4] sm:$0xf] %vm1705_vm15, %v1700_v28 }
0x134c   : >> { %v1731_v35 = vpop.permute.xlu0 %1730  }
0x134d   : >> { %v2713_v13 = vmov %v1731_v35  ;;  %1738 = vst.msk [vmem:[#allocation2] sm:$0x3] (%p376_p6), %vm1737_vm1, %v1731_v35 }
0x137b   : >> { %v1719_v21 = vpop.permute.xlu1 %1718 }
0x137c   : >> { %1726 = vst.msk [vmem:[%s2668_s30] sm:$0xf] %vm1705_vm15, %v1719_v21 }
0x1380   : > { %378 = sbr.rel (!%p376_p6) target bundleno = 29 (0x1d), region = 108 }
0x1383   : >> { %v1735_v27 = vpop.permute.xlu1 %1734  }
0x1384   : >> { %v2712_v14 = vmov %v1735_v27  ;;  %1739 = vst.msk [vmem:[#allocation2 + $0x2] sm:$0x3] (%p376_p6), %vm1737_vm1, %v1735_v27 }
0x1385 PF: > { %s19_s27 = sadd.s32 1, %s2136_s27  }
0x1386   : > { %p16_p7 = scmp.ge.s32.totalorder %s19_s27, 4  }
0x1388   :  { %18 = sbr.rel (!%p16_p7) target bundleno = 1 (0x1), region = 119 }

</bundles_post_ra>
